<compile_context>
chip_gen: v7x
topology: tpu7x:2x2x1
jax: 0.10.0
libtpu: 0.0.40
codegen_flags: <defaults>
</compile_context>

<pallas_src>
import functools

import jax
import jax.numpy as jnp
from jax import lax
from jax.experimental import pallas as pl
from jax.experimental.pallas import tpu as pltpu

EPS = 1e-5
LANE = 128


def _round_up(n, m):
    return ((n + m - 1) // m) * m


def _pad_axis(a, axis, target):
    if a.shape[axis] == target:
        return a
    widths = [(0, 0)] * a.ndim
    widths[axis] = (0, target - a.shape[axis])
    return jnp.pad(a, widths)


# -----------------------------------------------------------------------------
# Pallas kernel: Bblk images per grid step, everything resident in VMEM.
# -----------------------------------------------------------------------------
def bottleneck_kernel(H, W,
                      x_ref, w1_ref, b1_ref, w2_ref, b2_ref, w3_ref, b3_ref,
                      wsc_ref, bsc_ref, wcf_ref, bcf_ref, wcm_ref, scal_ref,
                      out_ref, pad_ref):
    f32, bf16 = jnp.float32, jnp.bfloat16
    Bblk, HW, Cin = x_ref.shape
    Cmid = w1_ref.shape[1]                       # lane-padded mid channels
    C4 = w3_ref.shape[1]                         # lane-padded output channels
    M = Bblk * HW
    Lp = pad_ref.shape[2] - (W + 1)              # sublane-aligned left pad (=8)

    x2 = x_ref[...].reshape(M, Cin).astype(bf16)

    # ---- conv1x1 + folded BN + ReLU ------------------------------------------------
    h1 = jnp.dot(x2, w1_ref[...], preferred_element_type=f32) + b1_ref[...]
    h1 = jnp.maximum(h1, 0.0)                                     # (M, Cmid) f32

    # ---- conv3x3 (stride=1, pad=1) + BN + ReLU -------------------------------------
    # h1 is written once into a zero-filled VMEM scratch; the 9 taps are shifted
    # window loads from the scratch Ref (bf16-cast) feeding the MXU directly.
    pad_ref[...] = jnp.zeros_like(pad_ref)
    pad_ref[:, 1:H + 1, Lp:Lp + W, :] = h1.reshape(Bblk, H, W, Cmid)
    acc = jnp.zeros((M, Cmid), f32)
    for k in range(9):                                            # unrolled taps
        di, dj = k // 3, k % 3
        tap = pad_ref[:, di:di + H, Lp + dj - 1:Lp + dj - 1 + W, :]
        acc = acc + jnp.dot(tap.reshape(M, Cmid).astype(bf16), w2_ref[k],
                            preferred_element_type=f32)
    h2 = jnp.maximum(acc + b2_ref[...], 0.0)                      # (M, Cmid)

    # ---- conv1x1 + BN (no relu) ----------------------------------------------------
    h3 = jnp.dot(h2.astype(bf16), w3_ref[...],
                 preferred_element_type=f32) + b3_ref[...]        # (M, C4)
    h3 = h3.reshape(Bblk, HW, C4)

    # ---- ChannelAtt: (avg+max) pool over HW, Conv1d(k=5) over channels -------------
    # conv(avg) + conv(max) == conv(avg + max); the 5-tap conv is 5 shift-FMA steps.
    pooled = jnp.mean(h3, axis=1) + jnp.max(h3, axis=1)           # (Bblk, C4)
    ca_log = jnp.zeros_like(pooled)
    for t in range(5):
        s = t - 2
        if s < 0:
            sh = jnp.concatenate(
                [jnp.zeros((Bblk, -s), f32), pooled[:, :C4 + s]], axis=1)
        elif s > 0:
            sh = jnp.concatenate(
                [pooled[:, s:], jnp.zeros((Bblk, s), f32)], axis=1)
        else:
            sh = pooled
        ca_log = ca_log + scal_ref[t] * sh
    y = h3 * jax.nn.sigmoid(ca_log)[:, None, :]                   # (Bblk, HW, C4)

    # ---- SpaceAtt, reassociated: ctx = f @ (y^T @ m); no (HW, HW) intermediate -----
    fx = jnp.dot(y.reshape(M, C4).astype(bf16), wcf_ref[...],
                 preferred_element_type=f32) + bcf_ref[...]       # conv_first
    fx = fx.reshape(Bblk, HW, C4)
    mlog = jnp.sum(y * wcm_ref[...], axis=2, keepdims=True) + scal_ref[5]
    m = jax.nn.softmax(mlog, axis=1)                              # (Bblk, HW, 1)
    wv = jnp.sum(y * m, axis=1)                                   # (Bblk, C4)
    ctx = jnp.sum(fx * wv[:, None, :], axis=2, keepdims=True)     # (Bblk, HW, 1)
    ctx = ctx * scal_ref[6] + scal_ref[7]                         # BatchNorm2d(1), eval
    z = y * jax.nn.sigmoid(ctx)

    # ---- shortcut conv1x1 + BN (folded), final ReLU --------------------------------
    sc = jnp.dot(x2, wsc_ref[...], preferred_element_type=f32) + bsc_ref[...]
    out_ref[...] = jnp.maximum(z + sc.reshape(Bblk, HW, C4), 0.0)


# -----------------------------------------------------------------------------
# Wrapper: NCHW <-> channels-last glue + pallas_call.
# -----------------------------------------------------------------------------
def bottleneck_pallas(x_nchw, kp, *, bblk=None):
    B, Cin, H, W = x_nchw.shape
    HW = H * W
    Cmid_p = kp["w1t"].shape[1]
    C4p = kp["w3t"].shape[1]
    C4 = kp["c4"]
    if bblk is None:
        bblk = 2 if B % 2 == 0 else 1
    assert B % bblk == 0, "batch must be divisible by the per-step batch block"

    x_flat = jnp.transpose(x_nchw.reshape(B, Cin, HW), (0, 2, 1))   # (B, HW, Cin)
    kernel = functools.partial(bottleneck_kernel, H, W)

    def full(shp):
        n = len(shp)
        return pl.BlockSpec(shp, lambda b, _n=n: (0,) * _n)

    out = pl.pallas_call(
        kernel,
        out_shape=jax.ShapeDtypeStruct((B, HW, C4p), jnp.float32),
        grid=(B // bblk,),
        in_specs=[
            pl.BlockSpec((bblk, HW, Cin), lambda b: (b, 0, 0)),     # x
            full((Cin, Cmid_p)), full((1, Cmid_p)),                 # conv1 (+BN1)
            full((9, Cmid_p, Cmid_p)), full((1, Cmid_p)),           # conv2 (+BN2)
            full((Cmid_p, C4p)), full((1, C4p)),                    # conv3 (+BN3)
            full((Cin, C4p)), full((1, C4p)),                       # shortcut (+BN)
            full((C4p, C4p)), full((1, C4p)),                       # conv_first
            full((1, C4p)),                                         # conv_mask weight
            pl.BlockSpec(memory_space=pltpu.MemorySpace.SMEM),      # scalars (SMEM)
        ],
        out_specs=pl.BlockSpec((bblk, HW, C4p), lambda b: (b, 0, 0)),
        scratch_shapes=[
            # zero-padded conv3x3 buffer: 1 row pad top/bottom, 8-left/1-right col pad
            pltpu.VMEM((bblk, H + 2, 8 + W + 1, Cmid_p), jnp.float32),
        ],
        compiler_params=pltpu.CompilerParams(dimension_semantics=("parallel",)),
    )(x_flat, kp["w1t"], kp["b1"], kp["w2t"], kp["b2"], kp["w3t"], kp["b3"],
      kp["wsct"], kp["bsc"], kp["wcft"], kp["bcf"], kp["wcm_row"], kp["scalars"])

    out = out[:, :, :C4]                                            # drop lane padding
    return jnp.transpose(out, (0, 2, 1)).reshape(B, C4, H, W)


# -----------------------------------------------------------------------------
# Deterministic parameter init (mirrors the PyTorch module's shapes).
# -----------------------------------------------------------------------------
def bn_init(key, C):
    k1, k2, k3, k4 = jax.random.split(key, 4)
    gamma = 1.0 + 0.1 * jax.random.normal(k1, (C,), jnp.float32)
    beta = 0.1 * jax.random.normal(k2, (C,), jnp.float32)
    mean = 0.1 * jax.random.normal(k3, (C,), jnp.float32)
    var = jax.random.uniform(k4, (C,), jnp.float32, 0.5, 1.5)
    return gamma, beta, mean, var


def init_params(key, Cin, Cout):
    Cmid, C4 = Cout, Cout * 4
    ks = jax.random.split(key, 16)
    n = lambda k, shape, s: s * jax.random.normal(k, shape, jnp.float32)
    return {
        "W1": n(ks[0], (Cmid, Cin), 0.3), "bn1": bn_init(ks[1], Cmid),
        "W2": n(ks[2], (Cmid, Cmid, 3, 3), 0.2), "bn2": bn_init(ks[3], Cmid),
        "W3": n(ks[4], (C4, Cmid), 0.2), "bn3": bn_init(ks[5], C4),
        "Wsc": n(ks[6], (C4, Cin), 0.2), "bnsc": bn_init(ks[7], C4),
        "w5": n(ks[8], (5,), 0.5),                       # ChannelAtt Conv1d(1,1,5)
        "Wcf": n(ks[9], (C4, C4), 0.2), "bcf": n(ks[10], (C4,), 0.1),
        "wcm": n(ks[11], (C4,), 0.2), "bcm": n(ks[12], (), 0.1),
        "bn_sp": bn_init(ks[13], 1),                     # BatchNorm2d(1)
    }


def fold_params(P, C4):
    """Fold BN into scale/bias, lane-pad channel dims to 128, cast MXU weights bf16."""
    def fold_bn(g, b, m, v):
        s = g / jnp.sqrt(v + EPS)
        return s, b - m * s

    s1, o1 = fold_bn(*P["bn1"])
    s2, o2 = fold_bn(*P["bn2"])
    s3, o3 = fold_bn(*P["bn3"])
    ssc, osc = fold_bn(*P["bnsc"])

    Cmid = P["W1"].shape[0]
    Cmid_p = _round_up(Cmid, LANE)
    C4p = _round_up(C4, LANE)
    bf16 = jnp.bfloat16

    w2t = jnp.stack(
        [(P["W2"][:, :, k // 3, k % 3] * s2[:, None]).T for k in range(9)])

    g0, b0, m0, v0 = (x[0] for x in P["bn_sp"])
    ssp = g0 / jnp.sqrt(v0 + EPS)
    osp = b0 - m0 * ssp

    return {
        "w1t": _pad_axis((P["W1"] * s1[:, None]).T, 1, Cmid_p).astype(bf16),
        "b1": _pad_axis(o1[None, :], 1, Cmid_p),
        "w2t": _pad_axis(_pad_axis(w2t, 1, Cmid_p), 2, Cmid_p).astype(bf16),
        "b2": _pad_axis(o2[None, :], 1, Cmid_p),
        "w3t": _pad_axis(_pad_axis((P["W3"] * s3[:, None]).T, 0, Cmid_p),
                         1, C4p).astype(bf16),
        "b3": _pad_axis(o3[None, :], 1, C4p),
        "wsct": _pad_axis((P["Wsc"] * ssc[:, None]).T, 1, C4p).astype(bf16),
        "bsc": _pad_axis(osc[None, :], 1, C4p),
        "wcft": _pad_axis(_pad_axis(P["Wcf"].T, 0, C4p), 1, C4p).astype(bf16),
        "bcf": _pad_axis(P["bcf"][None, :], 1, C4p),
        "wcm_row": _pad_axis(P["wcm"][None, :], 1, C4p),
        "scalars": jnp.concatenate(
            [P["w5"], jnp.stack([P["bcm"], ssp, osp])]).astype(jnp.float32),
        "c4": int(C4),
    }


# -----------------------------------------------------------------------------
# Pure-JAX reference (mirrors the PyTorch forward, NCHW, eval-mode BN, f32).
# -----------------------------------------------------------------------------
def reference_forward(x, P):
    def bn(y, g, b, m, v):
        return ((y - m[None, :, None, None]) / jnp.sqrt(v + EPS)[None, :, None, None]
                * g[None, :, None, None] + b[None, :, None, None])

    h = jnp.einsum("oi,bihw->bohw", P["W1"], x)
    h = jax.nn.relu(bn(h, *P["bn1"]))
    h = lax.conv_general_dilated(h, P["W2"], (1, 1), ((1, 1), (1, 1)),
                                 dimension_numbers=("NCHW", "OIHW", "NCHW"))
    h = jax.nn.relu(bn(h, *P["bn2"]))
    h = jnp.einsum("oi,bihw->bohw", P["W3"], h)
    r = bn(h, *P["bn3"])

    B, C, H, W = r.shape
    HW = H * W
    # ChannelAtt
    avg = r.mean(axis=(2, 3))
    mx = r.max(axis=(2, 3))

    def conv1d(v):
        p = jnp.pad(v, ((0, 0), (2, 2)))
        return sum(P["w5"][k] * p[:, k:k + C] for k in range(5))

    ca = jax.nn.sigmoid(conv1d(avg) + conv1d(mx))
    y = r * ca[:, :, None, None]

    # SpaceAtt
    first = jnp.einsum("oi,bihw->bohw", P["Wcf"], y) + P["bcf"][None, :, None, None]
    first = first.reshape(B, C, HW)[:, None].transpose(0, 1, 3, 2)   # (B,1,HW,C)
    inp = y.reshape(B, C, HW)[:, None]                               # (B,1,C,HW)
    second = jnp.matmul(first, inp)                                  # (B,1,HW,HW)
    cm = jnp.einsum("i,bihw->bhw", P["wcm"], y) + P["bcm"]
    cm = jax.nn.softmax(cm.reshape(B, 1, HW), axis=2)[..., None]     # (B,1,HW,1)
    ctx = jnp.matmul(second, cm).reshape(B, 1, H, W)
    g0, b0, m0, v0 = (t[0] for t in P["bn_sp"])
    ctx = (ctx - m0) / jnp.sqrt(v0 + EPS) * g0 + b0
    z = jax.nn.sigmoid(ctx) * y

    # shortcut
    s = jnp.einsum("oi,bihw->bohw", P["Wsc"], x)
    s = bn(s, *P["bnsc"])
    return jax.nn.relu(z + s)


if __name__ == "__main__":
    # stride=1, Cin != 4*Cout -> conv shortcut path; B=4 with bblk=2 keeps grid >= 2.
    B, Cin, Cout, H, W = 4, 16, 8, 16, 16
    C4 = Cout * 4

    key = jax.random.PRNGKey(0)
    kx, kp = jax.random.split(key)
    x = jax.random.normal(kx, (B, Cin, H, W), jnp.float32)

    P = init_params(kp, Cin, Cout)
    KP = fold_params(P, C4)

    out = bottleneck_pallas(x, KP, bblk=2)
    out = jax.block_until_ready(out)

    ref = reference_forward(x, P)
    assert out.shape == (B, C4, H, W)
    # Kernel uses bf16 MXU operands (f32 accumulation); reference is pure f32.
    err = jnp.max(jnp.abs(out - ref))
    assert jnp.allclose(out, ref, atol=5e-2, rtol=2e-2), f"max abs diff = {err}"

    print("KERNEL_OK")
</pallas_src>

<mosaic_0001>
module attributes {stable_mosaic.version = 11 : i64} {
  func.func @bottleneck_kernel(%arg0: i32, %arg1: memref<2x256x16xf32, #tpu.memory_space<vmem>>, %arg2: memref<16x128xbf16, #tpu.memory_space<vmem>>, %arg3: memref<1x128xf32, #tpu.memory_space<vmem>>, %arg4: memref<9x128x128xbf16, #tpu.memory_space<vmem>>, %arg5: memref<1x128xf32, #tpu.memory_space<vmem>>, %arg6: memref<128x128xbf16, #tpu.memory_space<vmem>>, %arg7: memref<1x128xf32, #tpu.memory_space<vmem>>, %arg8: memref<16x128xbf16, #tpu.memory_space<vmem>>, %arg9: memref<1x128xf32, #tpu.memory_space<vmem>>, %arg10: memref<128x128xbf16, #tpu.memory_space<vmem>>, %arg11: memref<1x128xf32, #tpu.memory_space<vmem>>, %arg12: memref<1x128xf32, #tpu.memory_space<vmem>>, %arg13: memref<8xf32, #tpu.memory_space<smem>>, %arg14: memref<2x256x128xf32, #tpu.memory_space<vmem>>, %arg15: memref<2x18x25x128xf32, #tpu.memory_space<vmem>>) attributes {dimension_semantics = [#tpu.dimension_semantics<parallel>], iteration_bounds = array<i64: 2>, scalar_prefetch = 0 : i64, scratch_operands = 1 : i64, tpu.core_type = #tpu.core_type<tc>, window_params = [{transform_indices = @transform_0, window_bounds = array<i64: 2, 256, 16>}, {pipeline_mode = #tpu.pipeline_mode<synchronous>, transform_indices = @transform_1, window_bounds = array<i64: 16, 128>}, {pipeline_mode = #tpu.pipeline_mode<synchronous>, transform_indices = @transform_2, window_bounds = array<i64: 1, 128>}, {pipeline_mode = #tpu.pipeline_mode<synchronous>, transform_indices = @transform_3, window_bounds = array<i64: 9, 128, 128>}, {pipeline_mode = #tpu.pipeline_mode<synchronous>, transform_indices = @transform_4, window_bounds = array<i64: 1, 128>}, {pipeline_mode = #tpu.pipeline_mode<synchronous>, transform_indices = @transform_5, window_bounds = array<i64: 128, 128>}, {pipeline_mode = #tpu.pipeline_mode<synchronous>, transform_indices = @transform_6, window_bounds = array<i64: 1, 128>}, {pipeline_mode = #tpu.pipeline_mode<synchronous>, transform_indices = @transform_7, window_bounds = array<i64: 16, 128>}, {pipeline_mode = #tpu.pipeline_mode<synchronous>, transform_indices = @transform_8, window_bounds = array<i64: 1, 128>}, {pipeline_mode = #tpu.pipeline_mode<synchronous>, transform_indices = @transform_9, window_bounds = array<i64: 128, 128>}, {pipeline_mode = #tpu.pipeline_mode<synchronous>, transform_indices = @transform_10, window_bounds = array<i64: 1, 128>}, {pipeline_mode = #tpu.pipeline_mode<synchronous>, transform_indices = @transform_11, window_bounds = array<i64: 1, 128>}, {transform_indices = @transform_12, window_bounds = array<i64: 8>}, {transform_indices = @transform_13, window_bounds = array<i64: 2, 256, 128>}]} {
    %c0 = arith.constant 0 : index
    %c0_0 = arith.constant 0 : index
    %c0_1 = arith.constant 0 : index
    %0 = vector.load %arg1[%c0, %c0_0, %c0_1] : memref<2x256x16xf32, #tpu.memory_space<vmem>>, vector<2x256x16xf32>
    %1 = vector.shape_cast %0 : vector<2x256x16xf32> to vector<512x16xf32>
    %2 = arith.truncf %1 : vector<512x16xf32> to vector<512x16xbf16>
    %c0_2 = arith.constant 0 : index
    %c0_3 = arith.constant 0 : index
    %3 = vector.load %arg2[%c0_2, %c0_3] : memref<16x128xbf16, #tpu.memory_space<vmem>>, vector<16x128xbf16>
    %cst = arith.constant dense<0.000000e+00> : vector<512x128xf32>
    %4 = tpu.matmul %2, %3, %cst {dimension_numbers = #tpu.dot_dimension_numbers<[1], [0], [0], [1], [0, 0, 1, 1], [], []>} : vector<512x16xbf16>, vector<16x128xbf16>, vector<512x128xf32> -> vector<512x128xf32>
    %c0_4 = arith.constant 0 : index
    %c0_5 = arith.constant 0 : index
    %5 = vector.load %arg3[%c0_4, %c0_5] : memref<1x128xf32, #tpu.memory_space<vmem>>, vector<1x128xf32>
    %6 = vector.broadcast %5 : vector<1x128xf32> to vector<512x128xf32>
    %7 = arith.addf %4, %6 : vector<512x128xf32>
    %cst_6 = arith.constant 0.000000e+00 : f32
    %8 = vector.broadcast %cst_6 : f32 to vector<512x128xf32>
    %9 = arith.maximumf %7, %8 : vector<512x128xf32>
    %cst_7 = arith.constant 0.000000e+00 : f32
    %10 = vector.broadcast %cst_7 : f32 to vector<2x18x25x128xf32>
    %c0_8 = arith.constant 0 : index
    %c0_9 = arith.constant 0 : index
    %c0_10 = arith.constant 0 : index
    %c0_11 = arith.constant 0 : index
    %11 = vector.load %arg15[%c0_8, %c0_9, %c0_10, %c0_11] : memref<2x18x25x128xf32, #tpu.memory_space<vmem>>, vector<2x18x25x128xf32>
    tpu.vector_store %arg15[%c0_8, %c0_9, %c0_10, %c0_11], %10 {strides = array<i32>} : memref<2x18x25x128xf32, #tpu.memory_space<vmem>>, vector<2x18x25x128xf32>,
    %12 = vector.shape_cast %9 : vector<512x128xf32> to vector<2x16x16x128xf32>
    %c0_12 = arith.constant 0 : index
    %c1 = arith.constant 1 : index
    %c8 = arith.constant 8 : index
    %c0_13 = arith.constant 0 : index
    %13 = vector.load %arg15[%c0_12, %c1, %c8, %c0_13] : memref<2x18x25x128xf32, #tpu.memory_space<vmem>>, vector<2x16x16x128xf32>
    tpu.vector_store %arg15[%c0_12, %c1, %c8, %c0_13], %12 {strides = array<i32>} : memref<2x18x25x128xf32, #tpu.memory_space<vmem>>, vector<2x16x16x128xf32>,
    %cst_14 = arith.constant 0.000000e+00 : f32
    %14 = vector.broadcast %cst_14 : f32 to vector<512x128xf32>
    %c0_15 = arith.constant 0 : index
    %c0_16 = arith.constant 0 : index
    %c7 = arith.constant 7 : index
    %c0_17 = arith.constant 0 : index
    %15 = vector.load %arg15[%c0_15, %c0_16, %c7, %c0_17] : memref<2x18x25x128xf32, #tpu.memory_space<vmem>>, vector<2x16x16x128xf32>
    %16 = vector.shape_cast %15 : vector<2x16x16x128xf32> to vector<512x128xf32>
    %17 = arith.truncf %16 : vector<512x128xf32> to vector<512x128xbf16>
    %c0_18 = arith.constant 0 : index
    %c0_19 = arith.constant 0 : index
    %c0_20 = arith.constant 0 : index
    %18 = vector.load %arg4[%c0_18, %c0_19, %c0_20] : memref<9x128x128xbf16, #tpu.memory_space<vmem>>, vector<1x128x128xbf16>
    %19 = vector.shape_cast %18 : vector<1x128x128xbf16> to vector<128x128xbf16>
    %cst_21 = arith.constant dense<0.000000e+00> : vector<512x128xf32>
    %20 = tpu.matmul %17, %19, %cst_21 {dimension_numbers = #tpu.dot_dimension_numbers<[1], [0], [0], [1], [0, 0, 1, 1], [], []>} : vector<512x128xbf16>, vector<128x128xbf16>, vector<512x128xf32> -> vector<512x128xf32>
    %21 = arith.addf %14, %20 : vector<512x128xf32>
    %c0_22 = arith.constant 0 : index
    %c0_23 = arith.constant 0 : index
    %c8_24 = arith.constant 8 : index
    %c0_25 = arith.constant 0 : index
    %22 = vector.load %arg15[%c0_22, %c0_23, %c8_24, %c0_25] : memref<2x18x25x128xf32, #tpu.memory_space<vmem>>, vector<2x16x16x128xf32>
    %23 = vector.shape_cast %22 : vector<2x16x16x128xf32> to vector<512x128xf32>
    %24 = arith.truncf %23 : vector<512x128xf32> to vector<512x128xbf16>
    %c1_26 = arith.constant 1 : index
    %c0_27 = arith.constant 0 : index
    %c0_28 = arith.constant 0 : index
    %25 = vector.load %arg4[%c1_26, %c0_27, %c0_28] : memref<9x128x128xbf16, #tpu.memory_space<vmem>>, vector<1x128x128xbf16>
    %26 = vector.shape_cast %25 : vector<1x128x128xbf16> to vector<128x128xbf16>
    %cst_29 = arith.constant dense<0.000000e+00> : vector<512x128xf32>
    %27 = tpu.matmul %24, %26, %cst_29 {dimension_numbers = #tpu.dot_dimension_numbers<[1], [0], [0], [1], [0, 0, 1, 1], [], []>} : vector<512x128xbf16>, vector<128x128xbf16>, vector<512x128xf32> -> vector<512x128xf32>
    %28 = arith.addf %21, %27 : vector<512x128xf32>
    %c0_30 = arith.constant 0 : index
    %c0_31 = arith.constant 0 : index
    %c9 = arith.constant 9 : index
    %c0_32 = arith.constant 0 : index
    %29 = vector.load %arg15[%c0_30, %c0_31, %c9, %c0_32] : memref<2x18x25x128xf32, #tpu.memory_space<vmem>>, vector<2x16x16x128xf32>
    %30 = vector.shape_cast %29 : vector<2x16x16x128xf32> to vector<512x128xf32>
    %31 = arith.truncf %30 : vector<512x128xf32> to vector<512x128xbf16>
    %c2 = arith.constant 2 : index
    %c0_33 = arith.constant 0 : index
    %c0_34 = arith.constant 0 : index
    %32 = vector.load %arg4[%c2, %c0_33, %c0_34] : memref<9x128x128xbf16, #tpu.memory_space<vmem>>, vector<1x128x128xbf16>
    %33 = vector.shape_cast %32 : vector<1x128x128xbf16> to vector<128x128xbf16>
    %cst_35 = arith.constant dense<0.000000e+00> : vector<512x128xf32>
    %34 = tpu.matmul %31, %33, %cst_35 {dimension_numbers = #tpu.dot_dimension_numbers<[1], [0], [0], [1], [0, 0, 1, 1], [], []>} : vector<512x128xbf16>, vector<128x128xbf16>, vector<512x128xf32> -> vector<512x128xf32>
    %35 = arith.addf %28, %34 : vector<512x128xf32>
    %c0_36 = arith.constant 0 : index
    %c1_37 = arith.constant 1 : index
    %c7_38 = arith.constant 7 : index
    %c0_39 = arith.constant 0 : index
    %36 = vector.load %arg15[%c0_36, %c1_37, %c7_38, %c0_39] : memref<2x18x25x128xf32, #tpu.memory_space<vmem>>, vector<2x16x16x128xf32>
    %37 = vector.shape_cast %36 : vector<2x16x16x128xf32> to vector<512x128xf32>
    %38 = arith.truncf %37 : vector<512x128xf32> to vector<512x128xbf16>
    %c3 = arith.constant 3 : index
    %c0_40 = arith.constant 0 : index
    %c0_41 = arith.constant 0 : index
    %39 = vector.load %arg4[%c3, %c0_40, %c0_41] : memref<9x128x128xbf16, #tpu.memory_space<vmem>>, vector<1x128x128xbf16>
    %40 = vector.shape_cast %39 : vector<1x128x128xbf16> to vector<128x128xbf16>
    %cst_42 = arith.constant dense<0.000000e+00> : vector<512x128xf32>
    %41 = tpu.matmul %38, %40, %cst_42 {dimension_numbers = #tpu.dot_dimension_numbers<[1], [0], [0], [1], [0, 0, 1, 1], [], []>} : vector<512x128xbf16>, vector<128x128xbf16>, vector<512x128xf32> -> vector<512x128xf32>
    %42 = arith.addf %35, %41 : vector<512x128xf32>
    %c0_43 = arith.constant 0 : index
    %c1_44 = arith.constant 1 : index
    %c8_45 = arith.constant 8 : index
    %c0_46 = arith.constant 0 : index
    %43 = vector.load %arg15[%c0_43, %c1_44, %c8_45, %c0_46] : memref<2x18x25x128xf32, #tpu.memory_space<vmem>>, vector<2x16x16x128xf32>
    %44 = vector.shape_cast %43 : vector<2x16x16x128xf32> to vector<512x128xf32>
    %45 = arith.truncf %44 : vector<512x128xf32> to vector<512x128xbf16>
    %c4 = arith.constant 4 : index
    %c0_47 = arith.constant 0 : index
    %c0_48 = arith.constant 0 : index
    %46 = vector.load %arg4[%c4, %c0_47, %c0_48] : memref<9x128x128xbf16, #tpu.memory_space<vmem>>, vector<1x128x128xbf16>
    %47 = vector.shape_cast %46 : vector<1x128x128xbf16> to vector<128x128xbf16>
    %cst_49 = arith.constant dense<0.000000e+00> : vector<512x128xf32>
    %48 = tpu.matmul %45, %47, %cst_49 {dimension_numbers = #tpu.dot_dimension_numbers<[1], [0], [0], [1], [0, 0, 1, 1], [], []>} : vector<512x128xbf16>, vector<128x128xbf16>, vector<512x128xf32> -> vector<512x128xf32>
    %49 = arith.addf %42, %48 : vector<512x128xf32>
    %c0_50 = arith.constant 0 : index
    %c1_51 = arith.constant 1 : index
    %c9_52 = arith.constant 9 : index
    %c0_53 = arith.constant 0 : index
    %50 = vector.load %arg15[%c0_50, %c1_51, %c9_52, %c0_53] : memref<2x18x25x128xf32, #tpu.memory_space<vmem>>, vector<2x16x16x128xf32>
    %51 = vector.shape_cast %50 : vector<2x16x16x128xf32> to vector<512x128xf32>
    %52 = arith.truncf %51 : vector<512x128xf32> to vector<512x128xbf16>
    %c5 = arith.constant 5 : index
    %c0_54 = arith.constant 0 : index
    %c0_55 = arith.constant 0 : index
    %53 = vector.load %arg4[%c5, %c0_54, %c0_55] : memref<9x128x128xbf16, #tpu.memory_space<vmem>>, vector<1x128x128xbf16>
    %54 = vector.shape_cast %53 : vector<1x128x128xbf16> to vector<128x128xbf16>
    %cst_56 = arith.constant dense<0.000000e+00> : vector<512x128xf32>
    %55 = tpu.matmul %52, %54, %cst_56 {dimension_numbers = #tpu.dot_dimension_numbers<[1], [0], [0], [1], [0, 0, 1, 1], [], []>} : vector<512x128xbf16>, vector<128x128xbf16>, vector<512x128xf32> -> vector<512x128xf32>
    %56 = arith.addf %49, %55 : vector<512x128xf32>
    %c0_57 = arith.constant 0 : index
    %c2_58 = arith.constant 2 : index
    %c7_59 = arith.constant 7 : index
    %c0_60 = arith.constant 0 : index
    %57 = vector.load %arg15[%c0_57, %c2_58, %c7_59, %c0_60] : memref<2x18x25x128xf32, #tpu.memory_space<vmem>>, vector<2x16x16x128xf32>
    %58 = vector.shape_cast %57 : vector<2x16x16x128xf32> to vector<512x128xf32>
    %59 = arith.truncf %58 : vector<512x128xf32> to vector<512x128xbf16>
    %c6 = arith.constant 6 : index
    %c0_61 = arith.constant 0 : index
    %c0_62 = arith.constant 0 : index
    %60 = vector.load %arg4[%c6, %c0_61, %c0_62] : memref<9x128x128xbf16, #tpu.memory_space<vmem>>, vector<1x128x128xbf16>
    %61 = vector.shape_cast %60 : vector<1x128x128xbf16> to vector<128x128xbf16>
    %cst_63 = arith.constant dense<0.000000e+00> : vector<512x128xf32>
    %62 = tpu.matmul %59, %61, %cst_63 {dimension_numbers = #tpu.dot_dimension_numbers<[1], [0], [0], [1], [0, 0, 1, 1], [], []>} : vector<512x128xbf16>, vector<128x128xbf16>, vector<512x128xf32> -> vector<512x128xf32>
    %63 = arith.addf %56, %62 : vector<512x128xf32>
    %c0_64 = arith.constant 0 : index
    %c2_65 = arith.constant 2 : index
    %c8_66 = arith.constant 8 : index
    %c0_67 = arith.constant 0 : index
    %64 = vector.load %arg15[%c0_64, %c2_65, %c8_66, %c0_67] : memref<2x18x25x128xf32, #tpu.memory_space<vmem>>, vector<2x16x16x128xf32>
    %65 = vector.shape_cast %64 : vector<2x16x16x128xf32> to vector<512x128xf32>
    %66 = arith.truncf %65 : vector<512x128xf32> to vector<512x128xbf16>
    %c7_68 = arith.constant 7 : index
    %c0_69 = arith.constant 0 : index
    %c0_70 = arith.constant 0 : index
    %67 = vector.load %arg4[%c7_68, %c0_69, %c0_70] : memref<9x128x128xbf16, #tpu.memory_space<vmem>>, vector<1x128x128xbf16>
    %68 = vector.shape_cast %67 : vector<1x128x128xbf16> to vector<128x128xbf16>
    %cst_71 = arith.constant dense<0.000000e+00> : vector<512x128xf32>
    %69 = tpu.matmul %66, %68, %cst_71 {dimension_numbers = #tpu.dot_dimension_numbers<[1], [0], [0], [1], [0, 0, 1, 1], [], []>} : vector<512x128xbf16>, vector<128x128xbf16>, vector<512x128xf32> -> vector<512x128xf32>
    %70 = arith.addf %63, %69 : vector<512x128xf32>
    %c0_72 = arith.constant 0 : index
    %c2_73 = arith.constant 2 : index
    %c9_74 = arith.constant 9 : index
    %c0_75 = arith.constant 0 : index
    %71 = vector.load %arg15[%c0_72, %c2_73, %c9_74, %c0_75] : memref<2x18x25x128xf32, #tpu.memory_space<vmem>>, vector<2x16x16x128xf32>
    %72 = vector.shape_cast %71 : vector<2x16x16x128xf32> to vector<512x128xf32>
    %73 = arith.truncf %72 : vector<512x128xf32> to vector<512x128xbf16>
    %c8_76 = arith.constant 8 : index
    %c0_77 = arith.constant 0 : index
    %c0_78 = arith.constant 0 : index
    %74 = vector.load %arg4[%c8_76, %c0_77, %c0_78] : memref<9x128x128xbf16, #tpu.memory_space<vmem>>, vector<1x128x128xbf16>
    %75 = vector.shape_cast %74 : vector<1x128x128xbf16> to vector<128x128xbf16>
    %cst_79 = arith.constant dense<0.000000e+00> : vector<512x128xf32>
    %76 = tpu.matmul %73, %75, %cst_79 {dimension_numbers = #tpu.dot_dimension_numbers<[1], [0], [0], [1], [0, 0, 1, 1], [], []>} : vector<512x128xbf16>, vector<128x128xbf16>, vector<512x128xf32> -> vector<512x128xf32>
    %77 = arith.addf %70, %76 : vector<512x128xf32>
    %c0_80 = arith.constant 0 : index
    %c0_81 = arith.constant 0 : index
    %78 = vector.load %arg5[%c0_80, %c0_81] : memref<1x128xf32, #tpu.memory_space<vmem>>, vector<1x128xf32>
    %79 = vector.broadcast %78 : vector<1x128xf32> to vector<512x128xf32>
    %80 = arith.addf %77, %79 : vector<512x128xf32>
    %cst_82 = arith.constant 0.000000e+00 : f32
    %81 = vector.broadcast %cst_82 : f32 to vector<512x128xf32>
    %82 = arith.maximumf %80, %81 : vector<512x128xf32>
    %83 = arith.truncf %82 : vector<512x128xf32> to vector<512x128xbf16>
    %c0_83 = arith.constant 0 : index
    %c0_84 = arith.constant 0 : index
    %84 = vector.load %arg6[%c0_83, %c0_84] : memref<128x128xbf16, #tpu.memory_space<vmem>>, vector<128x128xbf16>
    %cst_85 = arith.constant dense<0.000000e+00> : vector<512x128xf32>
    %85 = tpu.matmul %83, %84, %cst_85 {dimension_numbers = #tpu.dot_dimension_numbers<[1], [0], [0], [1], [0, 0, 1, 1], [], []>} : vector<512x128xbf16>, vector<128x128xbf16>, vector<512x128xf32> -> vector<512x128xf32>
    %c0_86 = arith.constant 0 : index
    %c0_87 = arith.constant 0 : index
    %86 = vector.load %arg7[%c0_86, %c0_87] : memref<1x128xf32, #tpu.memory_space<vmem>>, vector<1x128xf32>
    %87 = vector.broadcast %86 : vector<1x128xf32> to vector<512x128xf32>
    %88 = arith.addf %85, %87 : vector<512x128xf32>
    %89 = vector.shape_cast %88 : vector<512x128xf32> to vector<2x256x128xf32>
    %cst_88 = arith.constant dense<0.000000e+00> : vector<2x128xf32>
    %90 = vector.multi_reduction <add>, %89, %cst_88 [1] : vector<2x256x128xf32> to vector<2x128xf32>
    %cst_89 = arith.constant 2.560000e+02 : f32
    %91 = vector.broadcast %cst_89 : f32 to vector<2x128xf32>
    %92 = arith.divf %90, %91 : vector<2x128xf32>
    %cst_90 = arith.constant dense<0xFF800000> : vector<2x128xf32>
    %93 = vector.multi_reduction <maximumf>, %89, %cst_90 [1] : vector<2x256x128xf32> to vector<2x128xf32>
    %94 = arith.addf %92, %93 : vector<2x128xf32>
    %cst_91 = arith.constant 0.000000e+00 : f32
    %95 = vector.broadcast %cst_91 : f32 to vector<2x128xf32>
    %cst_92 = arith.constant 0.000000e+00 : f32
    %96 = vector.broadcast %cst_92 : f32 to vector<2x2xf32>
    %97 = vector.extract_strided_slice %94 {offsets = [0, 0], sizes = [2, 126], strides = [1, 1]} : vector<2x128xf32> to vector<2x126xf32>
    %98 = tpu.concatenate %96, %97 in 1 : vector<2x2xf32>, vector<2x126xf32> -> vector<2x128xf32>
    %c0_93 = arith.constant 0 : index
    %99 = memref.load %arg13[%c0_93] : memref<8xf32, #tpu.memory_space<smem>>
    %100 = vector.broadcast %99 : f32 to vector<2x128xf32>
    %101 = arith.mulf %100, %98 : vector<2x128xf32>
    %102 = arith.addf %95, %101 : vector<2x128xf32>
    %cst_94 = arith.constant 0.000000e+00 : f32
    %103 = vector.broadcast %cst_94 : f32 to vector<2x1xf32>
    %104 = vector.extract_strided_slice %94 {offsets = [0, 0], sizes = [2, 127], strides = [1, 1]} : vector<2x128xf32> to vector<2x127xf32>
    %105 = tpu.concatenate %103, %104 in 1 : vector<2x1xf32>, vector<2x127xf32> -> vector<2x128xf32>
    %c1_95 = arith.constant 1 : index
    %106 = memref.load %arg13[%c1_95] : memref<8xf32, #tpu.memory_space<smem>>
    %107 = vector.broadcast %106 : f32 to vector<2x128xf32>
    %108 = arith.mulf %107, %105 : vector<2x128xf32>
    %109 = arith.addf %102, %108 : vector<2x128xf32>
    %c2_96 = arith.constant 2 : index
    %110 = memref.load %arg13[%c2_96] : memref<8xf32, #tpu.memory_space<smem>>
    %111 = vector.broadcast %110 : f32 to vector<2x128xf32>
    %112 = arith.mulf %111, %94 : vector<2x128xf32>
    %113 = arith.addf %109, %112 : vector<2x128xf32>
    %114 = vector.extract_strided_slice %94 {offsets = [0, 1], sizes = [2, 127], strides = [1, 1]} : vector<2x128xf32> to vector<2x127xf32>
    %cst_97 = arith.constant 0.000000e+00 : f32
    %115 = vector.broadcast %cst_97 : f32 to vector<2x1xf32>
    %116 = tpu.concatenate %114, %115 in 1 : vector<2x127xf32>, vector<2x1xf32> -> vector<2x128xf32>
    %c3_98 = arith.constant 3 : index
    %117 = memref.load %arg13[%c3_98] : memref<8xf32, #tpu.memory_space<smem>>
    %118 = vector.broadcast %117 : f32 to vector<2x128xf32>
    %119 = arith.mulf %118, %116 : vector<2x128xf32>
    %120 = arith.addf %113, %119 : vector<2x128xf32>
    %121 = vector.extract_strided_slice %94 {offsets = [0, 2], sizes = [2, 126], strides = [1, 1]} : vector<2x128xf32> to vector<2x126xf32>
    %cst_99 = arith.constant 0.000000e+00 : f32
    %122 = vector.broadcast %cst_99 : f32 to vector<2x2xf32>
    %123 = tpu.concatenate %121, %122 in 1 : vector<2x126xf32>, vector<2x2xf32> -> vector<2x128xf32>
    %c4_100 = arith.constant 4 : index
    %124 = memref.load %arg13[%c4_100] : memref<8xf32, #tpu.memory_space<smem>>
    %125 = vector.broadcast %124 : f32 to vector<2x128xf32>
    %126 = arith.mulf %125, %123 : vector<2x128xf32>
    %127 = arith.addf %120, %126 : vector<2x128xf32>
    %128 = arith.negf %127 : vector<2x128xf32>
    %129 = math.exp %128 : vector<2x128xf32>
    %cst_101 = arith.constant 1.000000e+00 : f32
    %130 = vector.broadcast %cst_101 : f32 to vector<2x128xf32>
    %131 = arith.addf %130, %129 : vector<2x128xf32>
    %132 = arith.divf %130, %131 : vector<2x128xf32>
    %133 = vector.shape_cast %132 : vector<2x128xf32> to vector<2x1x128xf32>
    %134 = vector.broadcast %133 : vector<2x1x128xf32> to vector<2x256x128xf32>
    %135 = arith.mulf %89, %134 : vector<2x256x128xf32>
    %136 = vector.shape_cast %135 : vector<2x256x128xf32> to vector<512x128xf32>
    %137 = arith.truncf %136 : vector<512x128xf32> to vector<512x128xbf16>
    %c0_102 = arith.constant 0 : index
    %c0_103 = arith.constant 0 : index
    %138 = vector.load %arg10[%c0_102, %c0_103] : memref<128x128xbf16, #tpu.memory_space<vmem>>, vector<128x128xbf16>
    %cst_104 = arith.constant dense<0.000000e+00> : vector<512x128xf32>
    %139 = tpu.matmul %137, %138, %cst_104 {dimension_numbers = #tpu.dot_dimension_numbers<[1], [0], [0], [1], [0, 0, 1, 1], [], []>} : vector<512x128xbf16>, vector<128x128xbf16>, vector<512x128xf32> -> vector<512x128xf32>
    %c0_105 = arith.constant 0 : index
    %c0_106 = arith.constant 0 : index
    %140 = vector.load %arg11[%c0_105, %c0_106] : memref<1x128xf32, #tpu.memory_space<vmem>>, vector<1x128xf32>
    %141 = vector.broadcast %140 : vector<1x128xf32> to vector<512x128xf32>
    %142 = arith.addf %139, %141 : vector<512x128xf32>
    %143 = vector.shape_cast %142 : vector<512x128xf32> to vector<2x256x128xf32>
    %c0_107 = arith.constant 0 : index
    %c0_108 = arith.constant 0 : index
    %144 = vector.load %arg12[%c0_107, %c0_108] : memref<1x128xf32, #tpu.memory_space<vmem>>, vector<1x128xf32>
    %145 = vector.shape_cast %144 : vector<1x128xf32> to vector<1x1x128xf32>
    %146 = vector.broadcast %145 : vector<1x1x128xf32> to vector<2x256x128xf32>
    %147 = arith.mulf %135, %146 : vector<2x256x128xf32>
    %cst_109 = arith.constant dense<0.000000e+00> : vector<2x256xf32>
    %148 = vector.multi_reduction <add>, %147, %cst_109 [2] : vector<2x256x128xf32> to vector<2x256xf32>
    %149 = vector.shape_cast %148 : vector<2x256xf32> to vector<2x256x1xf32>
    %c5_110 = arith.constant 5 : index
    %150 = memref.load %arg13[%c5_110] : memref<8xf32, #tpu.memory_space<smem>>
    %151 = vector.broadcast %150 : f32 to vector<2x256x1xf32>
    %152 = arith.addf %149, %151 : vector<2x256x1xf32>
    %cst_111 = arith.constant dense<0xFF800000> : vector<2x1xf32>
    %153 = vector.multi_reduction <maximumf>, %152, %cst_111 [1] : vector<2x256x1xf32> to vector<2x1xf32>
    %cst_112 = arith.constant 0xFF800000 : f32
    %154 = vector.broadcast %cst_112 : f32 to vector<2x1xf32>
    %155 = arith.maximumf %154, %153 : vector<2x1xf32>
    %156 = vector.shape_cast %155 : vector<2x1xf32> to vector<2x1x1xf32>
    %157 = vector.broadcast %156 : vector<2x1x1xf32> to vector<2x256x1xf32>
    %158 = arith.subf %152, %157 : vector<2x256x1xf32>
    %159 = math.exp %158 : vector<2x256x1xf32>
    %cst_113 = arith.constant dense<0.000000e+00> : vector<2x1xf32>
    %160 = vector.multi_reduction <add>, %159, %cst_113 [1] : vector<2x256x1xf32> to vector<2x1xf32>
    %161 = vector.shape_cast %160 : vector<2x1xf32> to vector<2x1x1xf32>
    %162 = vector.broadcast %161 : vector<2x1x1xf32> to vector<2x256x1xf32>
    %163 = arith.divf %159, %162 : vector<2x256x1xf32>
    %164 = vector.broadcast %163 : vector<2x256x1xf32> to vector<2x256x128xf32>
    %165 = arith.mulf %135, %164 : vector<2x256x128xf32>
    %cst_114 = arith.constant dense<0.000000e+00> : vector<2x128xf32>
    %166 = vector.multi_reduction <add>, %165, %cst_114 [1] : vector<2x256x128xf32> to vector<2x128xf32>
    %167 = vector.shape_cast %166 : vector<2x128xf32> to vector<2x1x128xf32>
    %168 = vector.broadcast %167 : vector<2x1x128xf32> to vector<2x256x128xf32>
    %169 = arith.mulf %143, %168 : vector<2x256x128xf32>
    %cst_115 = arith.constant dense<0.000000e+00> : vector<2x256xf32>
    %170 = vector.multi_reduction <add>, %169, %cst_115 [2] : vector<2x256x128xf32> to vector<2x256xf32>
    %171 = vector.shape_cast %170 : vector<2x256xf32> to vector<2x256x1xf32>
    %c6_116 = arith.constant 6 : index
    %172 = memref.load %arg13[%c6_116] : memref<8xf32, #tpu.memory_space<smem>>
    %173 = vector.broadcast %172 : f32 to vector<2x256x1xf32>
    %174 = arith.mulf %171, %173 : vector<2x256x1xf32>
    %c7_117 = arith.constant 7 : index
    %175 = memref.load %arg13[%c7_117] : memref<8xf32, #tpu.memory_space<smem>>
    %176 = vector.broadcast %175 : f32 to vector<2x256x1xf32>
    %177 = arith.addf %174, %176 : vector<2x256x1xf32>
    %178 = arith.negf %177 : vector<2x256x1xf32>
    %179 = math.exp %178 : vector<2x256x1xf32>
    %cst_118 = arith.constant 1.000000e+00 : f32
    %180 = vector.broadcast %cst_118 : f32 to vector<2x256x1xf32>
    %181 = arith.addf %180, %179 : vector<2x256x1xf32>
    %182 = arith.divf %180, %181 : vector<2x256x1xf32>
    %183 = vector.broadcast %182 : vector<2x256x1xf32> to vector<2x256x128xf32>
    %184 = arith.mulf %135, %183 : vector<2x256x128xf32>
    %c0_119 = arith.constant 0 : index
    %c0_120 = arith.constant 0 : index
    %185 = vector.load %arg8[%c0_119, %c0_120] : memref<16x128xbf16, #tpu.memory_space<vmem>>, vector<16x128xbf16>
    %cst_121 = arith.constant dense<0.000000e+00> : vector<512x128xf32>
    %186 = tpu.matmul %2, %185, %cst_121 {dimension_numbers = #tpu.dot_dimension_numbers<[1], [0], [0], [1], [0, 0, 1, 1], [], []>} : vector<512x16xbf16>, vector<16x128xbf16>, vector<512x128xf32> -> vector<512x128xf32>
    %c0_122 = arith.constant 0 : index
    %c0_123 = arith.constant 0 : index
    %187 = vector.load %arg9[%c0_122, %c0_123] : memref<1x128xf32, #tpu.memory_space<vmem>>, vector<1x128xf32>
    %188 = vector.broadcast %187 : vector<1x128xf32> to vector<512x128xf32>
    %189 = arith.addf %186, %188 : vector<512x128xf32>
    %190 = vector.shape_cast %189 : vector<512x128xf32> to vector<2x256x128xf32>
    %191 = arith.addf %184, %190 : vector<2x256x128xf32>
    %cst_124 = arith.constant 0.000000e+00 : f32
    %192 = vector.broadcast %cst_124 : f32 to vector<2x256x128xf32>
    %193 = arith.maximumf %191, %192 : vector<2x256x128xf32>
    %c0_125 = arith.constant 0 : index
    %c0_126 = arith.constant 0 : index
    %c0_127 = arith.constant 0 : index
    %194 = vector.load %arg14[%c0_125, %c0_126, %c0_127] : memref<2x256x128xf32, #tpu.memory_space<vmem>>, vector<2x256x128xf32>
    tpu.vector_store %arg14[%c0_125, %c0_126, %c0_127], %193 {strides = array<i32>} : memref<2x256x128xf32, #tpu.memory_space<vmem>>, vector<2x256x128xf32>,
    return
  }
  func.func @transform_0(%arg0: i32) -> (i32, i32, i32) {
    %c0_i32 = arith.constant 0 : i32
    %c0_i32_0 = arith.constant 0 : i32
    %c0_i32_1 = arith.constant 0 : i32
    return %arg0, %c0_i32, %c0_i32_0 : i32, i32, i32
  }
  func.func @transform_1(%arg0: i32) -> (i32, i32) {
    %c0_i32 = arith.constant 0 : i32
    %c0_i32_0 = arith.constant 0 : i32
    %c0_i32_1 = arith.constant 0 : i32
    return %c0_i32, %c0_i32_0 : i32, i32
  }
  func.func @transform_2(%arg0: i32) -> (i32, i32) {
    %c0_i32 = arith.constant 0 : i32
    %c0_i32_0 = arith.constant 0 : i32
    %c0_i32_1 = arith.constant 0 : i32
    return %c0_i32, %c0_i32_0 : i32, i32
  }
  func.func @transform_3(%arg0: i32) -> (i32, i32, i32) {
    %c0_i32 = arith.constant 0 : i32
    %c0_i32_0 = arith.constant 0 : i32
    %c0_i32_1 = arith.constant 0 : i32
    %c0_i32_2 = arith.constant 0 : i32
    return %c0_i32, %c0_i32_0, %c0_i32_1 : i32, i32, i32
  }
  func.func @transform_4(%arg0: i32) -> (i32, i32) {
    %c0_i32 = arith.constant 0 : i32
    %c0_i32_0 = arith.constant 0 : i32
    %c0_i32_1 = arith.constant 0 : i32
    return %c0_i32, %c0_i32_0 : i32, i32
  }
  func.func @transform_5(%arg0: i32) -> (i32, i32) {
    %c0_i32 = arith.constant 0 : i32
    %c0_i32_0 = arith.constant 0 : i32
    %c0_i32_1 = arith.constant 0 : i32
    return %c0_i32, %c0_i32_0 : i32, i32
  }
  func.func @transform_6(%arg0: i32) -> (i32, i32) {
    %c0_i32 = arith.constant 0 : i32
    %c0_i32_0 = arith.constant 0 : i32
    %c0_i32_1 = arith.constant 0 : i32
    return %c0_i32, %c0_i32_0 : i32, i32
  }
  func.func @transform_7(%arg0: i32) -> (i32, i32) {
    %c0_i32 = arith.constant 0 : i32
    %c0_i32_0 = arith.constant 0 : i32
    %c0_i32_1 = arith.constant 0 : i32
    return %c0_i32, %c0_i32_0 : i32, i32
  }
  func.func @transform_8(%arg0: i32) -> (i32, i32) {
    %c0_i32 = arith.constant 0 : i32
    %c0_i32_0 = arith.constant 0 : i32
    %c0_i32_1 = arith.constant 0 : i32
    return %c0_i32, %c0_i32_0 : i32, i32
  }
  func.func @transform_9(%arg0: i32) -> (i32, i32) {
    %c0_i32 = arith.constant 0 : i32
    %c0_i32_0 = arith.constant 0 : i32
    %c0_i32_1 = arith.constant 0 : i32
    return %c0_i32, %c0_i32_0 : i32, i32
  }
  func.func @transform_10(%arg0: i32) -> (i32, i32) {
    %c0_i32 = arith.constant 0 : i32
    %c0_i32_0 = arith.constant 0 : i32
    %c0_i32_1 = arith.constant 0 : i32
    return %c0_i32, %c0_i32_0 : i32, i32
  }
  func.func @transform_11(%arg0: i32) -> (i32, i32) {
    %c0_i32 = arith.constant 0 : i32
    %c0_i32_0 = arith.constant 0 : i32
    %c0_i32_1 = arith.constant 0 : i32
    return %c0_i32, %c0_i32_0 : i32, i32
  }
  func.func @transform_12(%arg0: i32) -> i32 {
    %c0_i32 = arith.constant 0 : i32
    %c0_i32_0 = arith.constant 0 : i32
    return %c0_i32 : i32
  }
  func.func @transform_13(%arg0: i32) -> (i32, i32, i32) {
    %c0_i32 = arith.constant 0 : i32
    %c0_i32_0 = arith.constant 0 : i32
    %c0_i32_1 = arith.constant 0 : i32
    return %arg0, %c0_i32, %c0_i32_0 : i32, i32, i32
  }
}

</mosaic_0001>

<bundles_post_ra>
// kernel: tpu_custom_call.1
= control target key start
LH: loop header
LB: loop body
LE: loop exit
PB: predicated region body
PF: predicated region fallthrough
CT: control target
= control target key end

     0   :  { %s16282_s0 = inlined_call_operand.vmem [shape: f32[4,256,16], index: 0, kind: input, shape index: {}]   ;;  %s16283_s1 = inlined_call_operand.vmem [shape: bf16[16,128], index: 1, kind: input, shape index: {}]   ;;  %s16284_s2 = inlined_call_operand.vmem [shape: f32[1,128], index: 2, kind: input, shape index: {}]   ;;  %s16285_s3 = inlined_call_operand.vmem [shape: bf16[9,128,128], index: 3, kind: input, shape index: {}]   ;;  %s16286_s4 = inlined_call_operand.vmem [shape: f32[1,128], index: 4, kind: input, shape index: {}]   ;;  %s16287_s5 = inlined_call_operand.vmem [shape: bf16[128,128], index: 5, kind: input, shape index: {}]   ;;  %s16288_s6 = inlined_call_operand.vmem [shape: f32[1,128], index: 6, kind: input, shape index: {}]   ;;  %s16289_s7 = inlined_call_operand.vmem [shape: bf16[16,128], index: 7, kind: input, shape index: {}]   ;;  %s16290_s8 = inlined_call_operand.vmem [shape: f32[1,128], index: 8, kind: input, shape index: {}]   ;;  %s16291_s9 = inlined_call_operand.vmem [shape: bf16[128,128], index: 9, kind: input, shape index: {}]   ;;  %s16292_s10 = inlined_call_operand.vmem [shape: f32[1,128], index: 10, kind: input, shape index: {}]   ;;  %s16293_s11 = inlined_call_operand.vmem [shape: f32[1,128], index: 11, kind: input, shape index: {}]   ;;  %s16294_s12 = inlined_call_operand.vmem [shape: f32[8], index: 12, kind: input, shape index: {}]   ;;  %s16295_s13 = inlined_call_operand.hbm [shape: f32[4,256,128], index: 13, kind: output, shape index: {}]  }
   0x1   :  { %16497 = sst [smem:[#allocation168_spill]] %s16282_s0 }
   0x2   :  { %16498 = sst [smem:[#allocation169_spill]] %s16294_s12 }
   0x3   :  { %18 = vsyncpa [#allocation5], 0 }
   0x4   :  { %19 = vsyncpa [#allocation4], 0 }
   0x5   :  { %21 = vsyncpa [#allocation4 + $0x1], 0  ;;  %s12249_s25 = smov 0   ;;  %s12251_s26 = smov 0  }
   0x6   :  { %s12253_s27 = smov 0   ;;  %s12255_s28 = smov 0  }
   0x7 LB: > { %s12270_s29 = sadd.s32 4294967295, %s12166_s28   ;;  %s9118_s30 = sadd.s32 4294967294, %s12166_s28   ;;  %s12166_s28 = sphi %s12255_s28, %s17105_s28   ;;  %s12162_s27 = sphi %s12253_s27, %s17104_s27   ;;  %s12158_s26 = sphi %s12251_s26, %s17103_s26   ;;  %s12154_s25 = sphi %s12249_s25, %s17102_s25  }
   0x8   : > { %s12274_s14 = sadd.s32 1, %s12166_s28   ;;  %s312_s15 = sadd.s32 1, %s12162_s27 }
   0x9   : > { %s309_s16 = ssub.s32 %s12166_s28, %s12274_s14  ;;  %p322_p0 = scmp.ne.s32.totalorder %s12162_s27, %s12158_s26 }
   0xa   : > { %p310_p1 = scmp.eq.s32.totalorder %s309_s16, 0  ;;  %p323_p2 = scmp.eq.s32.totalorder %s12270_s29, 1 }
   0xb   : > { %p328_p3 = scmp.ne.s32.totalorder %s12158_s26, %s12154_s25  ;;  %p329_p4 = scmp.eq.s32.totalorder %s9118_s30, 1 }
   0xc   : > { %s12285_s17 = scalar_select %p310_p1, %s12162_s27, %s312_s15  }
   0xd   : > { %p12287_p5 = por %p323_p2, %p322_p0  ;;  %p12291_p6 = por %p329_p4, %p328_p3 }
   0xe   : > { %p9119_p7 = scmp.ge.s32.totalorder %s12166_s28, 1  ;;  %p336_p8 = scmp.lt.s32.totalorder %s12166_s28, 3 }
   0xf   : > { %p11557_p9 = scmp.eq.s32.totalorder %s12270_s29, 0  ;;  %s16502_s12 = sld [smem:[#allocation169_spill]] }
  0x10   : > { %p12298_p10 = pnand %p9119_p7, %p336_p8 }
  0x12   : > { %p11549_p11 = pneg %p12298_p10 }
  0x14   : > { %p11550_p12 = pnand %p11557_p9, %p11549_p11 }
  0x15   : > { %s382_s23 = sshll.u32 %s16502_s12, 4  ;;  %s383_s23 = int_to_ptr.vmem [resolvable:$true] %s382_s23 }
  0x16   : > { %s12085_s24 = scalar_lea.vmem %s383_s23, 16  ;;  %p12087_p0 = pneg %p11550_p12 }
  0x17   : > { %p12086_p13 = scmp.ne.s32.totalorder %s383_s23, %s12085_s24  ;;  %p12093_p3 = scmp.lt.s32.totalorder %s383_s23, %s383_s23 }
  0x18   : > { %p12094_p4 = scmp.lt.s32.totalorder %s12085_s24, %s12085_s24 }
  0x19   : > { %p12088_p1 = pnand %p12087_p0, %p12086_p13 }
  0x1a   : > { %p12095_p7 = por %p12094_p4, %p12093_p3 }
  0x1b   : > { %p12089_p2 = pneg %p12088_p1 }
  0x1d   : > { %p12096_p8 = pnand %p12095_p7, %p12089_p2 }
  0x1f   : > { %12099 = shalt.err (!%p12096_p8)
}
  0x20   : > { %s12168_s30 = smov [#allocation3]   ;;  %405 = sbr.rel (%p12298_p10) target bundleno = 2558 (0x9fe), region = 72 }
  0x21   : > { %11552 = dma.vmem_to_smem (!%p11550_p12), %s383_s23, 16, %s12168_s30, [#allocation5]  }
  0x27   : > { %12145 = dma.done.wait (%p11557_p9), [#allocation5], 16  }
  0x28   : > { %12147 = vsyncadd (%p11557_p9), [#allocation5], 4294967280 }
  0x29   : > { %411 = sfence }
  0x2a   : > { %v11601_v0 = vld [vmem:[%s16283_s1] sm:$0xff]   ;;  %s9125_s21 = sshll.u32 %s12270_s29, 1  ;;  %s16503_s0 = sld [smem:[#allocation168_spill]]  ;;  %vm571_vm0 = vcmask 130048   ;;  %v11603_v11 = vld [vmem:[%s16285_s3 + $0x48] sm:$0xff]   ;;  %v11604_v16 = vld [vmem:[%s16285_s3 + $0x50] sm:$0xff]  }
  0x2b   : > { %p452_p11 = scmp.lt.s32.totalorder %s9125_s21, 3  ;;  %10003 = vmatprep.subr.bf16.mxu0 %v11601_v0  ;;  %v11602_v1 = vld [vmem:[%s16285_s3 + $0x40] sm:$0xff]   ;;  %v11605_v19 = vld [vmem:[%s16285_s3 + $0x58] sm:$0xff]   ;;  %s9373_s22 = sld [smem:[#allocation3 + $0x2]]  ;;  %vm6410_vm1 = vcmask 1041409   ;;  %vm6415_vm2 = vcmask 15360  }
  0x2c   : > { %10004 = vmatpush3.bf16.msra.mxu0 %v11601_v0  ;;  %s12171_s20 = smov 127   ;;  %s12173_s24 = smov 126   ;;  %vm6424_vm3 = vcmask 7168   ;;  %vm6442_vm4 = vcmask 1039360   ;;  %vm6451_vm5 = vcmask 1031168  }
  0x2d   : > { %s17107_s21 = smov (!%p452_p11, %s9125_s21), 3  ;;  %10069 = vmatprep.subr.bf16.mxu0 %v11602_v1  ;;  %s12174_s30 = smov 1  }
  0x2e   : > { %s9494_s23 = sshll.u32 %s17107_s21, 8  ;;  %s9374_s15 = sld [smem:[#allocation3 + $0x3]] }
  0x2f   : > { %s9375_s16 = sld [smem:[#allocation3 + $0x4]] }
  0x30   : > { %s12325_s12 = scalar_lea.vmem %s16503_s0, %s9494_s23  ;;  %s12172_s23 = smov 2  }
  0x31   : > { %v460_v2 = vld [vmem:[%s12325_s12] sm:$0xff]  ;;  %v461_v3 = vld [vmem:[%s12325_s12 + $0x8] sm:$0xff]  ;;  %v462_v4 = vld [vmem:[%s12325_s12 + $0x10] sm:$0xff] }
  0x32   : > { %v12330_v5 = vpack.c.bf16 %v461_v3, %v460_v2  ;;  %v463_v6 = vld [vmem:[%s12325_s12 + $0x18] sm:$0xff]  ;;  %v464_v7 = vld [vmem:[%s12325_s12 + $0x20] sm:$0xff]  ;;  %v465_v8 = vld [vmem:[%s12325_s12 + $0x28] sm:$0xff] }
  0x33   : > { %v12335_v9 = vpack.c.bf16 %v463_v6, %v462_v4  ;;  %v12337_v10 = vpack.c.bf16 %v465_v8, %v464_v7  ;;  %v466_v12 = vld [vmem:[%s12325_s12 + $0x30] sm:$0xff]  ;;  %v467_v13 = vld [vmem:[%s12325_s12 + $0x38] sm:$0xff]  ;;  %v468_v14 = vld [vmem:[%s12325_s12 + $0x40] sm:$0xff] }
  0x34   : > { %16504 = vst [vmem:[#allocation9_spill] sm:$0xff] %v12330_v5  ;;  %10005 = vmatprep.mubr.msk.bf16.mxu0 %vm571_vm0, %v12330_v5  ;;  %v469_v15 = vld [vmem:[%s12325_s12 + $0x48] sm:$0xff]  ;;  %v12355_v17 = vpack.c.bf16 %v467_v13, %v466_v12  ;;  %v470_v20 = vld [vmem:[%s12325_s12 + $0x50] sm:$0xff]  ;;  %v471_v21 = vld [vmem:[%s12325_s12 + $0x58] sm:$0xff] }
  0x35   : > { %16505 = vst [vmem:[#allocation10_spill] sm:$0xff] %v12335_v9  ;;  %16506 = vst [vmem:[#allocation11_spill] sm:$0xff] %v12337_v10  ;;  %10006 = vmatmul.mubr.msk.bf16.vlgmr.msra.gmra.mrb[0].mxu0 %vm571_vm0, %v12335_v9  ;;  %v12357_v18 = vpack.c.bf16 %v469_v15, %v468_v14  ;;  %v472_v22 = vld [vmem:[%s12325_s12 + $0x60] sm:$0xff]  ;;  %v473_v23 = vld [vmem:[%s12325_s12 + $0x68] sm:$0xff]  ;;  %v12370_v24 = vpack.c.bf16 %v471_v21, %v470_v20 }
  0x36   : > { %10009 = vmatprep.mubr.msk.bf16.mxu0 %vm571_vm0, %v12337_v10  ;;  %10070 = vmatpush3.bf16.msra.mxu0 %v11602_v1  ;;  %16507 = vst [vmem:[#allocation12_spill] sm:$0xff] %v12355_v17  ;;  %v12372_v25 = vpack.c.bf16 %v473_v23, %v472_v22  ;;  %v474_v26 = vld [vmem:[%s12325_s12 + $0x70] sm:$0xff]  ;;  %v475_v27 = vld [vmem:[%s12325_s12 + $0x78] sm:$0xff]  ;;  %v476_v28 = vld [vmem:[%s12325_s12 + $0x80] sm:$0xff] }
  0x37   : > { %10071 = vmatprep.subr.bf16.mxu0 %v11603_v11  ;;  %16508 = vst [vmem:[#allocation13_spill] sm:$0xff] %v12357_v18  ;;  %16509 = vst [vmem:[#allocation14_spill] sm:$0xff] %v12370_v24  ;;  %v477_v29 = vld [vmem:[%s12325_s12 + $0x88] sm:$0xff]  ;;  %v12382_v30 = vpack.c.bf16 %v475_v27, %v474_v26  ;;  %v478_v32 = vld [vmem:[%s12325_s12 + $0x90] sm:$0xff]  ;;  %v12169_v26 = vmov 0.0  }
  0x38   : > { %16510 = vst [vmem:[#allocation15_spill] sm:$0xff] %v12372_v25  ;;  %v12384_v31 = vpack.c.bf16 %v477_v29, %v476_v28  ;;  %v479_v33 = vld [vmem:[%s12325_s12 + $0x98] sm:$0xff]  ;;  %v480_v34 = vld [vmem:[%s12325_s12 + $0xa0] sm:$0xff]  ;;  %v481_v35 = vld [vmem:[%s12325_s12 + $0xa8] sm:$0xff] }
  0x39   : > { %16511 = vst [vmem:[#allocation16_spill] sm:$0xff] %v12382_v30  ;;  %v12394_v36 = vpack.c.bf16 %v479_v33, %v478_v32  ;;  %v12396_v37 = vpack.c.bf16 %v481_v35, %v480_v34  ;;  %v482_v38 = vld [vmem:[%s12325_s12 + $0xb0] sm:$0xff]  ;;  %v483_v39 = vld [vmem:[%s12325_s12 + $0xb8] sm:$0xff]  ;;  %v484_v40 = vld [vmem:[%s12325_s12 + $0xc0] sm:$0xff] }
  0x3a   : > { %10072 = vmatpush3.bf16.msra.mxu0 %v11603_v11  ;;  %16512 = vst [vmem:[#allocation17_spill] sm:$0xff] %v12384_v31  ;;  %v485_v41 = vld [vmem:[%s12325_s12 + $0xc8] sm:$0xff]  ;;  %v12406_v42 = vpack.c.bf16 %v483_v39, %v482_v38  ;;  %v486_v44 = vld [vmem:[%s12325_s12 + $0xd0] sm:$0xff]  ;;  %v487_v45 = vld [vmem:[%s12325_s12 + $0xd8] sm:$0xff] }
  0x3b   : > { %10073 = vmatprep.subr.bf16.mxu0 %v11604_v16  ;;  %16513 = vst [vmem:[#allocation18_spill] sm:$0xff] %v12394_v36  ;;  %16514 = vst [vmem:[#allocation19_spill] sm:$0xff] %v12396_v37  ;;  %v12408_v43 = vpack.c.bf16 %v485_v41, %v484_v40  ;;  %v488_v46 = vld [vmem:[%s12325_s12 + $0xe0] sm:$0xff]  ;;  %v489_v47 = vld [vmem:[%s12325_s12 + $0xe8] sm:$0xff]  ;;  %v12418_v48 = vpack.c.bf16 %v487_v45, %v486_v44 }
  0x3c   : > { %16515 = vst [vmem:[#allocation20_spill] sm:$0xff] %v12406_v42  ;;  %v12420_v49 = vpack.c.bf16 %v489_v47, %v488_v46  ;;  %v490_v50 = vld [vmem:[%s12325_s12 + $0xf0] sm:$0xff]  ;;  %v491_v51 = vld [vmem:[%s12325_s12 + $0xf8] sm:$0xff]  ;;  %v492_v52 = vld [vmem:[%s12325_s12 + $0x100] sm:$0xff] }
  0x3d   : > { %10010 = vmatmul.mubr.msk.bf16.gmra.mrb[4].mxu0 %vm571_vm0, %v12355_v17  ;;  %16516 = vst [vmem:[#allocation21_spill] sm:$0xff] %v12408_v43  ;;  %16517 = vst [vmem:[#allocation22_spill] sm:$0xff] %v12418_v48  ;;  %v493_v53 = vld [vmem:[%s12325_s12 + $0x108] sm:$0xff]  ;;  %v12430_v54 = vpack.c.bf16 %v491_v51, %v490_v50  ;;  %v494_v56 = vld [vmem:[%s12325_s12 + $0x110] sm:$0xff] }
  0x3e   : > { %10013 = vmatprep.mubr.msk.bf16.mxu0 %vm571_vm0, %v12357_v18  ;;  %10074 = vmatpush3.bf16.msra.mxu0 %v11604_v16  ;;  %16518 = vst [vmem:[#allocation23_spill] sm:$0xff] %v12420_v49  ;;  %v12432_v55 = vpack.c.bf16 %v493_v53, %v492_v52  ;;  %v495_v57 = vld [vmem:[%s12325_s12 + $0x118] sm:$0xff]  ;;  %v496_v58 = vld [vmem:[%s12325_s12 + $0x120] sm:$0xff]  ;;  %v497_v59 = vld [vmem:[%s12325_s12 + $0x128] sm:$0xff] }
  0x3f   : > { %10075 = vmatprep.subr.bf16.mxu0 %v11605_v19  ;;  %16519 = vst [vmem:[#allocation24_spill] sm:$0xff] %v12430_v54  ;;  %v12442_v60 = vpack.c.bf16 %v495_v57, %v494_v56  ;;  %v12444_v61 = vpack.c.bf16 %v497_v59, %v496_v58  ;;  %v498_v62 = vld [vmem:[%s12325_s12 + $0x130] sm:$0xff]  ;;  %v499_v63 = vld [vmem:[%s12325_s12 + $0x138] sm:$0xff]  ;;  %v500_v0 = vld [vmem:[%s12325_s12 + $0x140] sm:$0xff]  ;;  %v12170_v59 = vmov 0.0|0.0  }
  0x40   : > { %16520 = vst [vmem:[#allocation25_spill] sm:$0xff] %v12432_v55  ;;  %v501_v1 = vld [vmem:[%s12325_s12 + $0x148] sm:$0xff]  ;;  %v12454_v2 = vpack.c.bf16 %v499_v63, %v498_v62  ;;  %v502_v4 = vld [vmem:[%s12325_s12 + $0x150] sm:$0xff]  ;;  %v503_v6 = vld [vmem:[%s12325_s12 + $0x158] sm:$0xff] }
  0x41   : > { %16521 = vst [vmem:[#allocation26_spill] sm:$0xff] %v12442_v60  ;;  %16522 = vst [vmem:[#allocation27_spill] sm:$0xff] %v12444_v61  ;;  %v12456_v3 = vpack.c.bf16 %v501_v1, %v500_v0  ;;  %v504_v7 = vld [vmem:[%s12325_s12 + $0x160] sm:$0xff]  ;;  %v505_v8 = vld [vmem:[%s12325_s12 + $0x168] sm:$0xff]  ;;  %v12469_v12 = vpack.c.bf16 %v503_v6, %v502_v4 }
  0x42   : > { %10076 = vmatpush3.bf16.msra.mxu0 %v11605_v19  ;;  %16523 = vst [vmem:[#allocation28_spill] sm:$0xff] %v12454_v2  ;;  %v11606_v11 = vld [vmem:[%s16285_s3 + $0x60] sm:$0xff]   ;;  %v12471_v13 = vpack.c.bf16 %v505_v8, %v504_v7  ;;  %v11607_v14 = vld [vmem:[%s16285_s3 + $0x68] sm:$0xff]   ;;  %v506_v15 = vld [vmem:[%s12325_s12 + $0x170] sm:$0xff] }
  0x43   : > { %16524 = vst [vmem:[#allocation29_spill] sm:$0xff] %v12456_v3  ;;  %16525 = vst [vmem:[#allocation30_spill] sm:$0xff] %v12469_v12  ;;  %10077 = vmatprep.subr.bf16.mxu0 %v11606_v11  ;;  %v507_v16 = vld [vmem:[%s12325_s12 + $0x178] sm:$0xff]  ;;  %v508_v19 = vld [vmem:[%s12325_s12 + $0x180] sm:$0xff] }
  0x44   : > { %16526 = vst [vmem:[#allocation31_spill] sm:$0xff] %v12471_v13  ;;  %v509_v20 = vld [vmem:[%s12325_s12 + $0x188] sm:$0xff]  ;;  %v11608_v21 = vld [vmem:[%s16285_s3 + $0x70] sm:$0xff]   ;;  %v12487_v22 = vpack.c.bf16 %v507_v16, %v506_v15  ;;  %1021 = vst [vmem:[#allocation2] sm:$0xff] %v12169_v26 }
  0x45   : > { %10014 = vmatmul.mubr.msk.bf16.gmra.mrb[8].mxu0 %vm571_vm0, %v12370_v24  ;;  %v12489_v23 = vpack.c.bf16 %v509_v20, %v508_v19  ;;  %1022 = vst [vmem:[#allocation2 + $0x8] sm:$0xff] %v12169_v26  ;;  %1023 = vst [vmem:[#allocation2 + $0x10] sm:$0xff] %v12169_v26  ;;  %v11609_v27 = vld [vmem:[%s16285_s3 + $0x78] sm:$0xff]   ;;  %v510_v28 = vld [vmem:[%s12325_s12 + $0x190] sm:$0xff] }
  0x46   : > { %10017 = vmatprep.mubr.msk.bf16.mxu0 %vm571_vm0, %v12372_v25  ;;  %10078 = vmatpush3.bf16.msra.mxu0 %v11606_v11  ;;  %16527 = vst [vmem:[#allocation32_spill] sm:$0xff] %v12487_v22  ;;  %1024 = vst [vmem:[#allocation2 + $0x18] sm:$0x1] %v12169_v26  ;;  %v511_v29 = vld [vmem:[%s12325_s12 + $0x198] sm:$0xff]  ;;  %v512_v32 = vld [vmem:[%s12325_s12 + $0x1a0] sm:$0xff] }
  0x47   : > { %10079 = vmatprep.subr.bf16.mxu0 %v11607_v14  ;;  %16528 = vst [vmem:[#allocation33_spill] sm:$0xff] %v12489_v23  ;;  %1025 = vst [vmem:[#allocation2 + $0x20] sm:$0xff] %v12169_v26  ;;  %v513_v33 = vld [vmem:[%s12325_s12 + $0x1a8] sm:$0xff]  ;;  %v12582_v34 = vpack.c.bf16 %v511_v29, %v510_v28  ;;  %v514_v38 = vld [vmem:[%s12325_s12 + $0x1b0] sm:$0xff] }
  0x48   : > { %1028 = vst [vmem:[#allocation2 + $0x38] sm:$0x1] %v12169_v26  ;;  %1029 = vst [vmem:[#allocation2 + $0x40] sm:$0xff] %v12169_v26  ;;  %v12584_v35 = vpack.c.bf16 %v513_v33, %v512_v32  ;;  %v515_v39 = vld [vmem:[%s12325_s12 + $0x1b8] sm:$0xff]  ;;  %v516_v40 = vld [vmem:[%s12325_s12 + $0x1c0] sm:$0xff] }
  0x49   : > { %1032 = vst [vmem:[#allocation2 + $0x58] sm:$0x1] %v12169_v26  ;;  %1033 = vst [vmem:[#allocation2 + $0x60] sm:$0xff] %v12169_v26  ;;  %v517_v41 = vld [vmem:[%s12325_s12 + $0x1c8] sm:$0xff]  ;;  %v12594_v44 = vpack.c.bf16 %v515_v39, %v514_v38  ;;  %v518_v46 = vld [vmem:[%s12325_s12 + $0x1d0] sm:$0xff] }
  0x4a   : > { %10080 = vmatpush3.bf16.msra.mxu0 %v11607_v14  ;;  %1036 = vst [vmem:[#allocation2 + $0x78] sm:$0x1] %v12169_v26  ;;  %1037 = vst [vmem:[#allocation2 + $0x80] sm:$0xff] %v12169_v26  ;;  %v12596_v45 = vpack.c.bf16 %v517_v41, %v516_v40  ;;  %v519_v47 = vld [vmem:[%s12325_s12 + $0x1d8] sm:$0xff]  ;;  %v520_v50 = vld [vmem:[%s12325_s12 + $0x1e0] sm:$0xff] }
  0x4b   : > { %10081 = vmatprep.subr.bf16.mxu0 %v11608_v21  ;;  %1040 = vst [vmem:[#allocation2 + $0x98] sm:$0x1] %v12169_v26  ;;  %1041 = vst [vmem:[#allocation2 + $0xa0] sm:$0xff] %v12169_v26  ;;  %v521_v51 = vld [vmem:[%s12325_s12 + $0x1e8] sm:$0xff]  ;;  %v12606_v52 = vpack.c.bf16 %v519_v47, %v518_v46  ;;  %v522_v56 = vld [vmem:[%s12325_s12 + $0x1f0] sm:$0xff] }
  0x4c   : > { %1044 = vst [vmem:[#allocation2 + $0xb8] sm:$0x1] %v12169_v26  ;;  %1045 = vst [vmem:[#allocation2 + $0xc0] sm:$0xff] %v12169_v26  ;;  %v12608_v53 = vpack.c.bf16 %v521_v51, %v520_v50  ;;  %v523_v57 = vld [vmem:[%s12325_s12 + $0x1f8] sm:$0xff]  ;;  %v12624_v62 = vld [vmem:[%s16285_s3 + $0x80] sm:$0xff]  }
  0x4d   : > { %10018 = vmatmul.mubr.msk.bf16.gmra.mrb[12].mxu0 %vm571_vm0, %v12382_v30  ;;  %1048 = vst [vmem:[#allocation2 + $0xd8] sm:$0x1] %v12169_v26  ;;  %1049 = vst [vmem:[#allocation2 + $0xe0] sm:$0xff] %v12169_v26  ;;  %v12616_v58 = vpack.c.bf16 %v523_v57, %v522_v56  ;;  %11015 = vmatprep.subr.bf16.mxu1 %v12624_v62  ;;  %v12631_v63 = vld [vmem:[%s16285_s3 + $0x88] sm:$0xff]   ;;  %v12638_v0 = vld [vmem:[%s16285_s3 + $0x90] sm:$0xff]  }
  0x4e   : > { %10021 = vmatprep.mubr.msk.bf16.mxu0 %vm571_vm0, %v12384_v31  ;;  %10082 = vmatpush3.bf16.msra.mxu0 %v11608_v21  ;;  %1052 = vst [vmem:[#allocation2 + $0xf8] sm:$0x1] %v12169_v26  ;;  %1053 = vst [vmem:[#allocation2 + $0x100] sm:$0xff] %v12169_v26  ;;  %v12645_v1 = vld [vmem:[%s16285_s3 + $0x98] sm:$0xff]   ;;  %v12652_v4 = vld [vmem:[%s16285_s3 + $0xa0] sm:$0xff]  }
  0x4f   : > { %1056 = vst [vmem:[#allocation2 + $0x118] sm:$0x1] %v12169_v26  ;;  %1057 = vst [vmem:[#allocation2 + $0x120] sm:$0xff] %v12169_v26  ;;  %10083 = vmatprep.subr.bf16.mxu0 %v11609_v27  ;;  %11023 = vmatpush3.bf16.msra.mxu1 %v12624_v62  ;;  %v12659_v6 = vld [vmem:[%s16285_s3 + $0xa8] sm:$0xff]   ;;  %v12666_v7 = vld [vmem:[%s16285_s3 + $0xb0] sm:$0xff]  }
  0x50   : > { %1060 = vst [vmem:[#allocation2 + $0x138] sm:$0x1] %v12169_v26  ;;  %1061 = vst [vmem:[#allocation2 + $0x140] sm:$0xff] %v12169_v26  ;;  %11016 = vmatprep.subr.bf16.mxu1 %v12631_v63  ;;  %v12673_v8 = vld [vmem:[%s16285_s3 + $0xb8] sm:$0xff]   ;;  %v12680_v11 = vld [vmem:[%s16285_s3 + $0xc0] sm:$0xff]  }
  0x51   : > { %1064 = vst [vmem:[#allocation2 + $0x158] sm:$0x1] %v12169_v26  ;;  %1065 = vst [vmem:[#allocation2 + $0x160] sm:$0xff] %v12169_v26  ;;  %v11622_v14 = vld [vmem:[%s16285_s3] sm:$0xff]   ;;  %v11624_v47 = vld [vmem:[%s16285_s3 + $0x8] sm:$0xff]  }
  0x52   : > { %1068 = vst [vmem:[#allocation2 + $0x178] sm:$0x1] %v12169_v26  ;;  %1069 = vst [vmem:[#allocation2 + $0x180] sm:$0xff] %v12169_v26  ;;  %10084 = vmatpush3.bf16.msra.mxu0 %v11609_v27  ;;  %v12689_v15 = vld [vmem:[%s16284_s2] ss:$0 sm:$0xff] }
  0x53   : > { %1072 = vst [vmem:[#allocation2 + $0x198] sm:$0x1] %v12169_v26  ;;  %1073 = vst [vmem:[#allocation2 + $0x1a0] sm:$0xff] %v12169_v26  ;;  %11024 = vmatpush3.bf16.msra.mxu1 %v12631_v63  ;;  %10149 = vmatprep.subr.bf16.mxu0 %v11622_v14 }
  0x54   : > { %1076 = vst [vmem:[#allocation2 + $0x1b8] sm:$0x1] %v12169_v26  ;;  %1077 = vst [vmem:[#allocation2 + $0x1c0] sm:$0xff] %v12169_v26  ;;  %11017 = vmatprep.subr.bf16.mxu1 %v12638_v0 }
  0x55   : > { %10022 = vmatmul.mubr.msk.bf16.gmra.mrb[16].mxu0 %vm571_vm0, %v12394_v36  ;;  %1080 = vst [vmem:[#allocation2 + $0x1d8] sm:$0x1] %v12169_v26  ;;  %1081 = vst [vmem:[#allocation2 + $0x1e0] sm:$0xff] %v12169_v26 }
  0x56   : > { %10025 = vmatprep.mubr.msk.bf16.mxu0 %vm571_vm0, %v12396_v37  ;;  %1084 = vst [vmem:[#allocation2 + $0x1f8] sm:$0x1] %v12169_v26  ;;  %1085 = vst [vmem:[#allocation2 + $0x200] sm:$0xff] %v12169_v26 }
  0x57   : > { %1088 = vst [vmem:[#allocation2 + $0x218] sm:$0x1] %v12169_v26  ;;  %1089 = vst [vmem:[#allocation2 + $0x220] sm:$0xff] %v12169_v26  ;;  %11025 = vmatpush3.bf16.msra.mxu1 %v12638_v0 }
  0x58   : > { %1090 = vst [vmem:[#allocation2 + $0x228] sm:$0xff] %v12169_v26  ;;  %1091 = vst [vmem:[#allocation2 + $0x230] sm:$0xff] %v12169_v26  ;;  %11018 = vmatprep.subr.bf16.mxu1 %v12645_v1 }
  0x59   : > { %1092 = vst [vmem:[#allocation2 + $0x238] sm:$0x1] %v12169_v26  ;;  %1093 = vst [vmem:[#allocation2 + $0x240] sm:$0xff] %v12169_v26 }
  0x5a   : > { %1094 = vst [vmem:[#allocation2 + $0x248] sm:$0xff] %v12169_v26  ;;  %1095 = vst [vmem:[#allocation2 + $0x250] sm:$0xff] %v12169_v26 }
  0x5b   : > { %1096 = vst [vmem:[#allocation2 + $0x258] sm:$0x1] %v12169_v26  ;;  %1097 = vst [vmem:[#allocation2 + $0x260] sm:$0xff] %v12169_v26  ;;  %11026 = vmatpush3.bf16.msra.mxu1 %v12645_v1 }
  0x5c   : > { %1100 = vst [vmem:[#allocation2 + $0x278] sm:$0x1] %v12169_v26  ;;  %1101 = vst [vmem:[#allocation2 + $0x280] sm:$0xff] %v12169_v26  ;;  %11019 = vmatprep.subr.bf16.mxu1 %v12652_v4 }
  0x5d   : > { %10026 = vmatmul.mubr.msk.bf16.gmra.mrb[20].mxu0 %vm571_vm0, %v12406_v42  ;;  %1104 = vst [vmem:[#allocation2 + $0x298] sm:$0x1] %v12169_v26  ;;  %1105 = vst [vmem:[#allocation2 + $0x2a0] sm:$0xff] %v12169_v26 }
  0x5e   : > { %10029 = vmatprep.mubr.msk.bf16.mxu0 %vm571_vm0, %v12408_v43  ;;  %1108 = vst [vmem:[#allocation2 + $0x2b8] sm:$0x1] %v12169_v26  ;;  %1109 = vst [vmem:[#allocation2 + $0x2c0] sm:$0xff] %v12169_v26 }
  0x5f   : > { %1112 = vst [vmem:[#allocation2 + $0x2d8] sm:$0x1] %v12169_v26  ;;  %1113 = vst [vmem:[#allocation2 + $0x2e0] sm:$0xff] %v12169_v26  ;;  %11027 = vmatpush3.bf16.msra.mxu1 %v12652_v4 }
  0x60   : > { %1116 = vst [vmem:[#allocation2 + $0x2f8] sm:$0x1] %v12169_v26  ;;  %1117 = vst [vmem:[#allocation2 + $0x300] sm:$0xff] %v12169_v26  ;;  %11020 = vmatprep.subr.bf16.mxu1 %v12659_v6 }
  0x61   : > { %1120 = vst [vmem:[#allocation2 + $0x318] sm:$0x1] %v12169_v26  ;;  %1121 = vst [vmem:[#allocation2 + $0x320] sm:$0xff] %v12169_v26 }
  0x62   : > { %1124 = vst [vmem:[#allocation2 + $0x338] sm:$0x1] %v12169_v26  ;;  %1125 = vst [vmem:[#allocation2 + $0x340] sm:$0xff] %v12169_v26 }
  0x63   : > { %1128 = vst [vmem:[#allocation2 + $0x358] sm:$0x1] %v12169_v26  ;;  %1129 = vst [vmem:[#allocation2 + $0x360] sm:$0xff] %v12169_v26  ;;  %11028 = vmatpush3.bf16.msra.mxu1 %v12659_v6 }
  0x64   : > { %1132 = vst [vmem:[#allocation2 + $0x378] sm:$0x1] %v12169_v26  ;;  %1133 = vst [vmem:[#allocation2 + $0x380] sm:$0xff] %v12169_v26  ;;  %11021 = vmatprep.subr.bf16.mxu1 %v12666_v7 }
  0x65   : > { %10030 = vmatmul.mubr.msk.bf16.gmra.mrb[24].mxu0 %vm571_vm0, %v12418_v48  ;;  %1136 = vst [vmem:[#allocation2 + $0x398] sm:$0x1] %v12169_v26  ;;  %1137 = vst [vmem:[#allocation2 + $0x3a0] sm:$0xff] %v12169_v26 }
  0x66   : > { %10033 = vmatprep.mubr.msk.bf16.mxu0 %vm571_vm0, %v12420_v49  ;;  %1140 = vst [vmem:[#allocation2 + $0x3b8] sm:$0x1] %v12169_v26  ;;  %1141 = vst [vmem:[#allocation2 + $0x3c0] sm:$0xff] %v12169_v26 }
  0x67   : > { %1144 = vst [vmem:[#allocation2 + $0x3d8] sm:$0x1] %v12169_v26  ;;  %1145 = vst [vmem:[#allocation2 + $0x3e0] sm:$0xff] %v12169_v26  ;;  %11029 = vmatpush3.bf16.msra.mxu1 %v12666_v7 }
  0x68   : > { %1148 = vst [vmem:[#allocation2 + $0x3f8] sm:$0x1] %v12169_v26  ;;  %1149 = vst [vmem:[#allocation2 + $0x400] sm:$0xff] %v12169_v26  ;;  %11022 = vmatprep.subr.bf16.mxu1 %v12673_v8 }
  0x69   : > { %1152 = vst [vmem:[#allocation2 + $0x418] sm:$0x1] %v12169_v26  ;;  %1153 = vst [vmem:[#allocation2 + $0x420] sm:$0xff] %v12169_v26 }
  0x6a   : > { %1156 = vst [vmem:[#allocation2 + $0x438] sm:$0x1] %v12169_v26  ;;  %1157 = vst [vmem:[#allocation2 + $0x440] sm:$0xff] %v12169_v26 }
  0x6b   : > { %1160 = vst [vmem:[#allocation2 + $0x458] sm:$0x1] %v12169_v26  ;;  %1161 = vst [vmem:[#allocation2 + $0x460] sm:$0xff] %v12169_v26  ;;  %11030 = vmatpush3.bf16.msra.mxu1 %v12673_v8 }
  0x6c   : > { %1162 = vst [vmem:[#allocation2 + $0x468] sm:$0xff] %v12169_v26  ;;  %1163 = vst [vmem:[#allocation2 + $0x470] sm:$0xff] %v12169_v26  ;;  %10309 = vmatprep.subr.bf16.mxu1 %v12680_v11 }
  0x6d   : > { %10034 = vmatmul.mubr.msk.bf16.gmra.mrb[28].mxu0 %vm571_vm0, %v12430_v54  ;;  %1164 = vst [vmem:[#allocation2 + $0x478] sm:$0x1] %v12169_v26  ;;  %16529 = vst [vmem:[#allocation34_spill] sm:$0xff] %v12582_v34 }
  0x6e   : > { %10037 = vmatprep.mubr.msk.bf16.mxu0 %vm571_vm0, %v12432_v55  ;;  %16530 = vst [vmem:[#allocation35_spill] sm:$0xff] %v12584_v35  ;;  %16531 = vst [vmem:[#allocation36_spill] sm:$0xff] %v12594_v44 }
  0x6f   : > { %16532 = vst [vmem:[#allocation37_spill] sm:$0xff] %v12596_v45  ;;  %16533 = vst [vmem:[#allocation38_spill] sm:$0xff] %v12606_v52 }
  0x70   : > { %16534 = vst [vmem:[#allocation39_spill] sm:$0xff] %v12608_v53  ;;  %16535 = vst [vmem:[#allocation40_spill] sm:$0xff] %v12616_v58 }
  0x75   : > { %10038 = vmatmul.mubr.msk.bf16.gmra.mrb[32].mxu0 %vm571_vm0, %v12442_v60 }
  0x76   : > { %10041 = vmatprep.mubr.msk.bf16.mxu0 %vm571_vm0, %v12444_v61 }
  0x7d   : > { %10042 = vmatmul.mubr.msk.bf16.gmra.mrb[36].mxu0 %vm571_vm0, %v12454_v2 }
  0x7e   : > { %10045 = vmatprep.mubr.msk.bf16.mxu0 %vm571_vm0, %v12456_v3 }
  0x85   : > { %10046 = vmatmul.mubr.msk.bf16.gmra.mrb[40].mxu0 %vm571_vm0, %v12469_v12 }
  0x86   : > { %10049 = vmatprep.mubr.msk.bf16.mxu0 %vm571_vm0, %v12471_v13 }
  0x8d   : > { %10050 = vmatmul.mubr.msk.bf16.gmra.mrb[44].mxu0 %vm571_vm0, %v12487_v22 }
  0x8e   : > { %10053 = vmatprep.mubr.msk.bf16.mxu0 %vm571_vm0, %v12489_v23 }
  0x95   : > { %10054 = vmatmul.mubr.msk.bf16.gmra.mrb[48].mxu0 %vm571_vm0, %v12582_v34 }
  0x96   : > { %10057 = vmatprep.mubr.msk.bf16.mxu0 %vm571_vm0, %v12584_v35 }
  0x9d   : > { %10058 = vmatmul.mubr.msk.bf16.gmra.mrb[52].mxu0 %vm571_vm0, %v12594_v44 }
  0x9e   : > { %10061 = vmatprep.mubr.msk.bf16.mxu0 %vm571_vm0, %v12596_v45 }
  0xa5   : > { %10062 = vmatmul.mubr.msk.bf16.gmra.mrb[56].mxu0 %vm571_vm0, %v12606_v52 }
  0xa6   : > { %10065 = vmatprep.mubr.msk.bf16.mxu0 %vm571_vm0, %v12608_v53 }
  0xad   : > { %10066 = vmatmul.mubr.msk.bf16.gmra.mrb[60].mxu0 %vm571_vm0, %v12616_v58 }
  0xae   : > { %10085 = vmatprep.mubr.bf16.mxu0 %v12170_v59 }
 0x108   : > { %v10007_v16 = vpop.f32.mrb[0].mxu0 }
 0x109   : > { %v711_v19 = vadd.f32 %v10007_v16, %v12689_v15  ;;  %v702_v20 = vpop.f32.mrb[1].mxu0 }
 0x10a   : > { %v703_v21 = vadd.f32 %v12689_v15, %v702_v20  ;;  %v10008_v26 = vpop.f32.mrb[2].mxu0 }
 0x10b   : > { %v959_v27 = vmax.f32 %v711_v19, 0.0  ;;  %v714_v28 = vadd.f32 %v10008_v26, %v12689_v15  ;;  %v705_v29 = vpop.f32.mrb[3].mxu0 }
 0x10c   : > { %v957_v32 = vmax.f32 %v703_v21, 0.0  ;;  %v706_v33 = vadd.f32 %v12689_v15, %v705_v29 }
 0x10d   : > { %1168 = vst [vmem:[#allocation2 + $0x48] sm:$0xff] %v959_v27  ;;  %v960_v38 = vmax.f32 %v714_v28, 0.0 }
 0x10e   : > { %1166 = vst [vmem:[#allocation2 + $0x28] sm:$0xff] %v957_v32  ;;  %v958_v39 = vmax.f32 %v706_v33, 0.0 }
 0x10f   : > { %1169 = vst [vmem:[#allocation2 + $0x50] sm:$0xff] %v960_v38  ;;  %v1408_v40 = vpack.c.bf16 %v960_v38, %v959_v27  ;;  %v11625_v27 = vld [vmem:[%s16285_s3 + $0x10] sm:$0xff]  }
 0x110   : > { %1167 = vst [vmem:[#allocation2 + $0x30] sm:$0xff] %v958_v39  ;;  %v10011_v41 = vpop.f32.mrb[4].mxu0  ;;  %v1407_v46 = vpack.c.bf16 %v958_v39, %v957_v32 }
 0x111   : > { %v727_v50 = vadd.f32 %v10011_v41, %v12689_v15  ;;  %v718_v51 = vpop.f32.mrb[5].mxu0 }
 0x112   : > { %v719_v56 = vadd.f32 %v12689_v15, %v718_v51  ;;  %v10012_v57 = vpop.f32.mrb[6].mxu0  ;;  %10086 = vmatmul.mubr.bf16.vlgmr.msra.gmra.mrb[64].mxu0 %v1407_v46 }
 0x113   : > { %v963_v16 = vmax.f32 %v727_v50, 0.0  ;;  %v730_v19 = vadd.f32 %v10012_v57, %v12689_v15  ;;  %v721_v20 = vpop.f32.mrb[7].mxu0  ;;  %10089 = vmatprep.mubr.bf16.mxu0 %v1408_v40  ;;  %10150 = vmatpush3.bf16.msra.mxu0 %v11622_v14  ;;  %v11627_v14 = vld [vmem:[%s16285_s3 + $0x18] sm:$0xff]  }
 0x114   : > { %v961_v21 = vmax.f32 %v719_v56, 0.0  ;;  %v722_v26 = vadd.f32 %v12689_v15, %v721_v20  ;;  %10151 = vmatprep.subr.bf16.mxu0 %v11624_v47 }
 0x115   : > { %1172 = vst [vmem:[#allocation2 + $0x88] sm:$0xff] %v963_v16  ;;  %v964_v28 = vmax.f32 %v730_v19, 0.0 }
 0x116   : > { %1170 = vst [vmem:[#allocation2 + $0x68] sm:$0xff] %v961_v21  ;;  %v962_v29 = vmax.f32 %v722_v26, 0.0 }
 0x117   : > { %1173 = vst [vmem:[#allocation2 + $0x90] sm:$0xff] %v964_v28  ;;  %v1410_v32 = vpack.c.bf16 %v964_v28, %v963_v16  ;;  %10152 = vmatpush3.bf16.msra.mxu0 %v11624_v47  ;;  %v11628_v16 = vld [vmem:[%s16285_s3 + $0x20] sm:$0xff]  }
 0x118   : > { %1171 = vst [vmem:[#allocation2 + $0x70] sm:$0xff] %v962_v29  ;;  %v10015_v33 = vpop.f32.mrb[8].mxu0  ;;  %v1409_v38 = vpack.c.bf16 %v962_v29, %v961_v21  ;;  %10153 = vmatprep.subr.bf16.mxu0 %v11625_v27 }
 0x119   : > { %v743_v39 = vadd.f32 %v10015_v33, %v12689_v15  ;;  %v734_v40 = vpop.f32.mrb[9].mxu0 }
 0x11a   : > { %v735_v41 = vadd.f32 %v12689_v15, %v734_v40  ;;  %v10016_v46 = vpop.f32.mrb[10].mxu0  ;;  %10090 = vmatmul.mubr.bf16.gmra.mrb[68].mxu0 %v1409_v38 }
 0x11b   : > { %v967_v50 = vmax.f32 %v743_v39, 0.0  ;;  %v746_v51 = vadd.f32 %v10016_v46, %v12689_v15  ;;  %v737_v56 = vpop.f32.mrb[11].mxu0  ;;  %10093 = vmatprep.mubr.bf16.mxu0 %v1410_v32  ;;  %10154 = vmatpush3.bf16.msra.mxu0 %v11625_v27  ;;  %v11630_v27 = vld [vmem:[%s16285_s3 + $0x28] sm:$0xff]  }
 0x11c   : > { %v965_v47 = vmax.f32 %v735_v41, 0.0  ;;  %v738_v57 = vadd.f32 %v12689_v15, %v737_v56  ;;  %10155 = vmatprep.subr.bf16.mxu0 %v11627_v14 }
 0x11d   : > { %1176 = vst [vmem:[#allocation2 + $0xc8] sm:$0xff] %v967_v50  ;;  %v968_v19 = vmax.f32 %v746_v51, 0.0 }
 0x11e   : > { %1174 = vst [vmem:[#allocation2 + $0xa8] sm:$0xff] %v965_v47  ;;  %v966_v20 = vmax.f32 %v738_v57, 0.0 }
 0x11f   : > { %1177 = vst [vmem:[#allocation2 + $0xd0] sm:$0xff] %v968_v19  ;;  %v1412_v21 = vpack.c.bf16 %v968_v19, %v967_v50  ;;  %10156 = vmatpush3.bf16.msra.mxu0 %v11627_v14  ;;  %v11631_v50 = vld [vmem:[%s16285_s3 + $0x30] sm:$0xff]  }
 0x120   : > { %1175 = vst [vmem:[#allocation2 + $0xb0] sm:$0xff] %v966_v20  ;;  %v10019_v26 = vpop.f32.mrb[12].mxu0  ;;  %v1411_v28 = vpack.c.bf16 %v966_v20, %v965_v47  ;;  %10157 = vmatprep.subr.bf16.mxu0 %v11628_v16 }
 0x121   : > { %v759_v29 = vadd.f32 %v10019_v26, %v12689_v15  ;;  %v750_v32 = vpop.f32.mrb[13].mxu0 }
 0x122   : > { %v751_v33 = vadd.f32 %v12689_v15, %v750_v32  ;;  %v10020_v38 = vpop.f32.mrb[14].mxu0  ;;  %10094 = vmatmul.mubr.bf16.gmra.mrb[72].mxu0 %v1411_v28 }
 0x123   : > { %v971_v39 = vmax.f32 %v759_v29, 0.0  ;;  %v762_v40 = vadd.f32 %v10020_v38, %v12689_v15  ;;  %v753_v41 = vpop.f32.mrb[15].mxu0  ;;  %10097 = vmatprep.mubr.bf16.mxu0 %v1412_v21  ;;  %10158 = vmatpush3.bf16.msra.mxu0 %v11628_v16  ;;  %v11633_v16 = vld [vmem:[%s16285_s3 + $0x38] sm:$0xff]  }
 0x124   : > { %v969_v14 = vmax.f32 %v751_v33, 0.0  ;;  %v754_v46 = vadd.f32 %v12689_v15, %v753_v41  ;;  %10159 = vmatprep.subr.bf16.mxu0 %v11630_v27 }
 0x125   : > { %1180 = vst [vmem:[#allocation2 + $0x108] sm:$0xff] %v971_v39  ;;  %v972_v51 = vmax.f32 %v762_v40, 0.0 }
 0x126   : > { %1178 = vst [vmem:[#allocation2 + $0xe8] sm:$0xff] %v969_v14  ;;  %v970_v56 = vmax.f32 %v754_v46, 0.0 }
 0x127   : > { %1181 = vst [vmem:[#allocation2 + $0x110] sm:$0xff] %v972_v51  ;;  %v1414_v47 = vpack.c.bf16 %v972_v51, %v971_v39  ;;  %10160 = vmatpush3.bf16.msra.mxu0 %v11630_v27 }
 0x128   : > { %1179 = vst [vmem:[#allocation2 + $0xf0] sm:$0xff] %v970_v56  ;;  %v10023_v57 = vpop.f32.mrb[16].mxu0  ;;  %v1413_v19 = vpack.c.bf16 %v970_v56, %v969_v14  ;;  %10161 = vmatprep.subr.bf16.mxu0 %v11631_v50 }
 0x129   : > { %v775_v20 = vadd.f32 %v10023_v57, %v12689_v15  ;;  %v766_v21 = vpop.f32.mrb[17].mxu0 }
 0x12a   : > { %v767_v26 = vadd.f32 %v12689_v15, %v766_v21  ;;  %v10024_v28 = vpop.f32.mrb[18].mxu0  ;;  %10098 = vmatmul.mubr.bf16.gmra.mrb[76].mxu0 %v1413_v19 }
 0x12b   : > { %v975_v29 = vmax.f32 %v775_v20, 0.0  ;;  %v778_v32 = vadd.f32 %v10024_v28, %v12689_v15  ;;  %v769_v33 = vpop.f32.mrb[19].mxu0  ;;  %10101 = vmatprep.mubr.bf16.mxu0 %v1414_v47  ;;  %10162 = vmatpush3.bf16.msra.mxu0 %v11631_v50 }
 0x12c   : > { %v973_v27 = vmax.f32 %v767_v26, 0.0  ;;  %v770_v38 = vadd.f32 %v12689_v15, %v769_v33  ;;  %10163 = vmatprep.subr.bf16.mxu0 %v11633_v16 }
 0x12d   : > { %1184 = vst [vmem:[#allocation2 + $0x148] sm:$0xff] %v975_v29  ;;  %v976_v39 = vmax.f32 %v778_v32, 0.0 }
 0x12e   : > { %1182 = vst [vmem:[#allocation2 + $0x128] sm:$0xff] %v973_v27  ;;  %v974_v40 = vmax.f32 %v770_v38, 0.0 }
 0x12f   : > { %1185 = vst [vmem:[#allocation2 + $0x150] sm:$0xff] %v976_v39  ;;  %v1416_v41 = vpack.c.bf16 %v976_v39, %v975_v29  ;;  %10164 = vmatpush3.bf16.msra.mxu0 %v11633_v16 }
 0x130   : > { %1183 = vst [vmem:[#allocation2 + $0x130] sm:$0xff] %v974_v40  ;;  %v10027_v14 = vpop.f32.mrb[20].mxu0  ;;  %v1415_v46 = vpack.c.bf16 %v974_v40, %v973_v27  ;;  %10229 = vmatprep.subr.bf16.mxu0 %v12624_v62 }
 0x131   : > { %v791_v51 = vadd.f32 %v10027_v14, %v12689_v15  ;;  %v782_v56 = vpop.f32.mrb[21].mxu0 }
 0x132   : > { %v783_v50 = vadd.f32 %v12689_v15, %v782_v56  ;;  %v10028_v47 = vpop.f32.mrb[22].mxu0  ;;  %10102 = vmatmul.mubr.bf16.gmra.mrb[80].mxu0 %v1415_v46 }
 0x133   : > { %v979_v57 = vmax.f32 %v791_v51, 0.0  ;;  %v794_v19 = vadd.f32 %v10028_v47, %v12689_v15  ;;  %v785_v20 = vpop.f32.mrb[23].mxu0  ;;  %10105 = vmatprep.mubr.bf16.mxu0 %v1416_v41 }
 0x134   : > { %v977_v21 = vmax.f32 %v783_v50, 0.0  ;;  %v786_v16 = vadd.f32 %v12689_v15, %v785_v20 }
 0x135   : > { %1188 = vst [vmem:[#allocation2 + $0x188] sm:$0xff] %v979_v57  ;;  %v980_v26 = vmax.f32 %v794_v19, 0.0 }
 0x136   : > { %1186 = vst [vmem:[#allocation2 + $0x168] sm:$0xff] %v977_v21  ;;  %v978_v28 = vmax.f32 %v786_v16, 0.0 }
 0x137   : > { %1189 = vst [vmem:[#allocation2 + $0x190] sm:$0xff] %v980_v26  ;;  %v1418_v29 = vpack.c.bf16 %v980_v26, %v979_v57 }
 0x138   : > { %1187 = vst [vmem:[#allocation2 + $0x170] sm:$0xff] %v978_v28  ;;  %v10031_v32 = vpop.f32.mrb[24].mxu0  ;;  %v1417_v33 = vpack.c.bf16 %v978_v28, %v977_v21 }
 0x139   : > { %v807_v27 = vadd.f32 %v10031_v32, %v12689_v15  ;;  %v798_v38 = vpop.f32.mrb[25].mxu0 }
 0x13a   : > { %v799_v39 = vadd.f32 %v12689_v15, %v798_v38  ;;  %v10032_v40 = vpop.f32.mrb[26].mxu0  ;;  %10106 = vmatmul.mubr.bf16.gmra.mrb[84].mxu0 %v1417_v33 }
 0x13b   : > { %v983_v41 = vmax.f32 %v807_v27, 0.0  ;;  %v810_v14 = vadd.f32 %v10032_v40, %v12689_v15  ;;  %v801_v46 = vpop.f32.mrb[27].mxu0  ;;  %10109 = vmatprep.mubr.bf16.mxu0 %v1418_v29 }
 0x13c   : > { %v981_v51 = vmax.f32 %v799_v39, 0.0  ;;  %v802_v56 = vadd.f32 %v12689_v15, %v801_v46 }
 0x13d   : > { %1192 = vst [vmem:[#allocation2 + $0x1c8] sm:$0xff] %v983_v41  ;;  %v984_v50 = vmax.f32 %v810_v14, 0.0 }
 0x13e   : > { %1190 = vst [vmem:[#allocation2 + $0x1a8] sm:$0xff] %v981_v51  ;;  %v982_v47 = vmax.f32 %v802_v56, 0.0 }
 0x13f   : > { %1193 = vst [vmem:[#allocation2 + $0x1d0] sm:$0xff] %v984_v50  ;;  %v1420_v57 = vpack.c.bf16 %v984_v50, %v983_v41 }
 0x140   : > { %1191 = vst [vmem:[#allocation2 + $0x1b0] sm:$0xff] %v982_v47  ;;  %v10035_v19 = vpop.f32.mrb[28].mxu0  ;;  %v1419_v20 = vpack.c.bf16 %v982_v47, %v981_v51 }
 0x141   : > { %v823_v21 = vadd.f32 %v10035_v19, %v12689_v15  ;;  %v814_v16 = vpop.f32.mrb[29].mxu0 }
 0x142   : > { %v815_v26 = vadd.f32 %v12689_v15, %v814_v16  ;;  %v10036_v28 = vpop.f32.mrb[30].mxu0  ;;  %10110 = vmatmul.mubr.bf16.gmra.mrb[88].mxu0 %v1419_v20 }
 0x143   : > { %v987_v29 = vmax.f32 %v823_v21, 0.0  ;;  %v826_v32 = vadd.f32 %v10036_v28, %v12689_v15  ;;  %v817_v33 = vpop.f32.mrb[31].mxu0  ;;  %10113 = vmatprep.mubr.bf16.mxu0 %v1420_v57 }
 0x144   : > { %v985_v27 = vmax.f32 %v815_v26, 0.0  ;;  %v818_v38 = vadd.f32 %v12689_v15, %v817_v33 }
 0x145   : > { %1196 = vst [vmem:[#allocation2 + $0x208] sm:$0xff] %v987_v29  ;;  %v988_v39 = vmax.f32 %v826_v32, 0.0 }
 0x146   : > { %1194 = vst [vmem:[#allocation2 + $0x1e8] sm:$0xff] %v985_v27  ;;  %v986_v40 = vmax.f32 %v818_v38, 0.0 }
 0x147   : > { %1197 = vst [vmem:[#allocation2 + $0x210] sm:$0xff] %v988_v39 }
 0x148   : > { %1195 = vst [vmem:[#allocation2 + $0x1f0] sm:$0xff] %v986_v40  ;;  %v10039_v41 = vpop.f32.mrb[32].mxu0  ;;  %v1421_v14 = vpack.c.bf16 %v986_v40, %v985_v27 }
 0x149   : > { %v839_v46 = vadd.f32 %v10039_v41, %v12689_v15  ;;  %v830_v51 = vpop.f32.mrb[33].mxu0 }
 0x14a   : > { %v831_v56 = vadd.f32 %v12689_v15, %v830_v51  ;;  %v10040_v50 = vpop.f32.mrb[34].mxu0  ;;  %10114 = vmatmul.mubr.bf16.gmra.mrb[92].mxu0 %v1421_v14 }
 0x14b   : > { %v991_v47 = vmax.f32 %v839_v46, 0.0  ;;  %v842_v57 = vadd.f32 %v10040_v50, %v12689_v15  ;;  %v833_v19 = vpop.f32.mrb[35].mxu0  ;;  %10117 = vmatprep.mubr.bf16.mxu0 %v12170_v59 }
 0x14c   : > { %v989_v20 = vmax.f32 %v831_v56, 0.0  ;;  %v834_v21 = vadd.f32 %v12689_v15, %v833_v19 }
 0x14d   : > { %1200 = vst [vmem:[#allocation2 + $0x288] sm:$0xff] %v991_v47  ;;  %v992_v16 = vmax.f32 %v842_v57, 0.0 }
 0x14e   : > { %1198 = vst [vmem:[#allocation2 + $0x268] sm:$0xff] %v989_v20  ;;  %v990_v26 = vmax.f32 %v834_v21, 0.0 }
 0x14f   : > { %1201 = vst [vmem:[#allocation2 + $0x290] sm:$0xff] %v992_v16  ;;  %v1424_v28 = vpack.c.bf16 %v992_v16, %v991_v47 }
 0x150   : > { %1199 = vst [vmem:[#allocation2 + $0x270] sm:$0xff] %v990_v26  ;;  %v10043_v29 = vpop.f32.mrb[36].mxu0  ;;  %v1423_v32 = vpack.c.bf16 %v990_v26, %v989_v20 }
 0x151   : > { %v855_v33 = vadd.f32 %v10043_v29, %v12689_v15  ;;  %v846_v27 = vpop.f32.mrb[37].mxu0 }
 0x152   : > { %v847_v38 = vadd.f32 %v12689_v15, %v846_v27  ;;  %v10044_v39 = vpop.f32.mrb[38].mxu0  ;;  %10118 = vmatmul.mubr.bf16.gmra.mrb[96].mxu0 %v1423_v32 }
 0x153   : > { %v995_v59 = vmax.f32 %v855_v33, 0.0  ;;  %v858_v40 = vadd.f32 %v10044_v39, %v12689_v15  ;;  %v849_v41 = vpop.f32.mrb[39].mxu0  ;;  %10121 = vmatprep.mubr.bf16.mxu0 %v1424_v28 }
 0x154   : > { %v993_v14 = vmax.f32 %v847_v38, 0.0  ;;  %v850_v46 = vadd.f32 %v12689_v15, %v849_v41 }
 0x155   : > { %1204 = vst [vmem:[#allocation2 + $0x2c8] sm:$0xff] %v995_v59  ;;  %v996_v51 = vmax.f32 %v858_v40, 0.0  ;;  %v3189_v53 = vld [vmem:[#allocation2 + $0x268] sm:$0xff] }
 0x156   : > { %1202 = vst [vmem:[#allocation2 + $0x2a8] sm:$0xff] %v993_v14  ;;  %v994_v56 = vmax.f32 %v850_v46, 0.0  ;;  %v2165_v50 = vld [vmem:[#allocation2 + $0x289] sm:$0xff]  ;;  %v2166_v47 = vld [vmem:[#allocation2 + $0x291] sm:$0xff] }
 0x157   : > { %1205 = vst [vmem:[#allocation2 + $0x2d0] sm:$0xff] %v996_v51  ;;  %v2211_v57 = vpack.c.bf16 %v2166_v47, %v2165_v50  ;;  %v1426_v19 = vpack.c.bf16 %v996_v51, %v995_v59 }
 0x158   : > { %1203 = vst [vmem:[#allocation2 + $0x2b0] sm:$0xff] %v994_v56  ;;  %v10047_v20 = vpop.f32.mrb[40].mxu0  ;;  %v1425_v21 = vpack.c.bf16 %v994_v56, %v993_v14 }
 0x159   : > { %v871_v16 = vadd.f32 %v10047_v20, %v12689_v15  ;;  %v862_v26 = vpop.f32.mrb[41].mxu0  ;;  %10281 = vmatprep.mubr.bf16.mxu1 %v2211_v57  ;;  %v11619_v57 = vld [vmem:[%s16285_s3 + $0xc8] sm:$0xff]  }
 0x15a   : > { %v863_v28 = vadd.f32 %v12689_v15, %v862_v26  ;;  %v10048_v29 = vpop.f32.mrb[42].mxu0  ;;  %10122 = vmatmul.mubr.bf16.gmra.mrb[100].mxu0 %v1425_v21 }
 0x15b   : > { %v999_v32 = vmax.f32 %v871_v16, 0.0  ;;  %v874_v33 = vadd.f32 %v10048_v29, %v12689_v15  ;;  %v865_v27 = vpop.f32.mrb[43].mxu0  ;;  %10125 = vmatprep.mubr.bf16.mxu0 %v1426_v19 }
 0x15c   : > { %v997_v38 = vmax.f32 %v863_v28, 0.0  ;;  %v866_v39 = vadd.f32 %v12689_v15, %v865_v27 }
 0x15d   : > { %1208 = vst [vmem:[#allocation2 + $0x308] sm:$0xff] %v999_v32  ;;  %v1000_v59 = vmax.f32 %v874_v33, 0.0 }
 0x15e   : > { %1206 = vst [vmem:[#allocation2 + $0x2e8] sm:$0xff] %v997_v38  ;;  %v998_v40 = vmax.f32 %v866_v39, 0.0  ;;  %v2169_v41 = vld [vmem:[#allocation2 + $0x2c9] sm:$0xff]  ;;  %v2170_v14 = vld [vmem:[#allocation2 + $0x2d1] sm:$0xff] }
 0x15f   : > { %1209 = vst [vmem:[#allocation2 + $0x310] sm:$0xff] %v1000_v59  ;;  %v2167_v46 = vld [vmem:[#allocation2 + $0x2a9] sm:$0xff]  ;;  %v2168_v51 = vld [vmem:[#allocation2 + $0x2b1] sm:$0xff]  ;;  %v1428_v56 = vpack.c.bf16 %v1000_v59, %v999_v32  ;;  %v2213_v16 = vpack.c.bf16 %v2170_v14, %v2169_v41 }
 0x160   : > { %1207 = vst [vmem:[#allocation2 + $0x2f0] sm:$0xff] %v998_v40  ;;  %v10051_v50 = vpop.f32.mrb[44].mxu0  ;;  %v2212_v47 = vpack.c.bf16 %v2168_v51, %v2167_v46  ;;  %v1427_v19 = vpack.c.bf16 %v998_v40, %v997_v38  ;;  %v11620_v38 = vld [vmem:[%s16285_s3 + $0xd0] sm:$0xff]  }
 0x161   : > { %v887_v20 = vadd.f32 %v10051_v50, %v12689_v15  ;;  %v878_v21 = vpop.f32.mrb[45].mxu0 }
 0x162   : > { %v879_v26 = vadd.f32 %v12689_v15, %v878_v21  ;;  %v10052_v28 = vpop.f32.mrb[46].mxu0  ;;  %10282 = vmatmul.mubr.bf16.vlgmr.msra.gmra.mrb[0].mxu1 %v2212_v47  ;;  %10126 = vmatmul.mubr.bf16.gmra.mrb[104].mxu0 %v1427_v19  ;;  %v11621_v19 = vld [vmem:[%s16285_s3 + $0xd8] sm:$0xff]  }
 0x163   : > { %v1003_v29 = vmax.f32 %v887_v20, 0.0  ;;  %v890_v32 = vadd.f32 %v10052_v28, %v12689_v15  ;;  %10310 = vmatpush3.bf16.msra.mxu1 %v12680_v11  ;;  %v881_v33 = vpop.f32.mrb[47].mxu0  ;;  %10285 = vmatprep.mubr.bf16.mxu1 %v2213_v16 }
 0x164   : > { %v1001_v27 = vmax.f32 %v879_v26, 0.0  ;;  %v882_v39 = vadd.f32 %v12689_v15, %v881_v33  ;;  %10311 = vmatprep.subr.bf16.mxu1 %v11619_v57  ;;  %10129 = vmatprep.mubr.bf16.mxu0 %v1428_v56 }
 0x165   : > { %1212 = vst [vmem:[#allocation2 + $0x348] sm:$0xff] %v1003_v29  ;;  %v1004_v59 = vmax.f32 %v890_v32, 0.0 }
 0x166   : > { %1210 = vst [vmem:[#allocation2 + $0x328] sm:$0xff] %v1001_v27  ;;  %v1002_v40 = vmax.f32 %v882_v39, 0.0  ;;  %v2173_v41 = vld [vmem:[#allocation2 + $0x309] sm:$0xff]  ;;  %v2174_v14 = vld [vmem:[#allocation2 + $0x311] sm:$0xff]  ;;  %v11623_v39 = vld [vmem:[%s16285_s3 + $0xe0] sm:$0xff]  }
 0x167   : > { %1213 = vst [vmem:[#allocation2 + $0x350] sm:$0xff] %v1004_v59  ;;  %10312 = vmatpush3.bf16.msra.mxu1 %v11619_v57  ;;  %v2171_v11 = vld [vmem:[#allocation2 + $0x2e9] sm:$0xff]  ;;  %v2172_v46 = vld [vmem:[#allocation2 + $0x2f1] sm:$0xff]  ;;  %v1430_v51 = vpack.c.bf16 %v1004_v59, %v1003_v29  ;;  %v2215_v16 = vpack.c.bf16 %v2174_v14, %v2173_v41 }
 0x168   : > { %1211 = vst [vmem:[#allocation2 + $0x330] sm:$0xff] %v1002_v40  ;;  %v10055_v50 = vpop.f32.mrb[48].mxu0  ;;  %v2214_v47 = vpack.c.bf16 %v2172_v46, %v2171_v11  ;;  %10313 = vmatprep.subr.bf16.mxu1 %v11620_v38  ;;  %v1429_v56 = vpack.c.bf16 %v1002_v40, %v1001_v27  ;;  %v3712_v45 = vld [vmem:[#allocation2 + $0x2f1] sm:$0xff] }
 0x169   : > { %v903_v20 = vadd.f32 %v10055_v50, %v12689_v15  ;;  %v894_v21 = vpop.f32.mrb[49].mxu0 }
 0x16a   : > { %v895_v26 = vadd.f32 %v12689_v15, %v894_v21  ;;  %v10056_v28 = vpop.f32.mrb[50].mxu0  ;;  %10286 = vmatmul.mubr.bf16.gmra.mrb[4].mxu1 %v2214_v47  ;;  %10130 = vmatmul.mubr.bf16.gmra.mrb[108].mxu0 %v1429_v56 }
 0x16b   : > { %v1007_v57 = vmax.f32 %v903_v20, 0.0  ;;  %v906_v29 = vadd.f32 %v10056_v28, %v12689_v15  ;;  %v897_v32 = vpop.f32.mrb[51].mxu0  ;;  %10289 = vmatprep.mubr.bf16.mxu1 %v2215_v16  ;;  %10314 = vmatpush3.bf16.msra.mxu1 %v11620_v38  ;;  %v11626_v16 = vld [vmem:[%s16285_s3 + $0xe8] sm:$0xff]  }
 0x16c   : > { %v1005_v33 = vmax.f32 %v895_v26, 0.0  ;;  %v898_v27 = vadd.f32 %v12689_v15, %v897_v32  ;;  %10133 = vmatprep.mubr.bf16.mxu0 %v1430_v51  ;;  %10315 = vmatprep.subr.bf16.mxu1 %v11621_v19 }
 0x16d   : > { %1216 = vst [vmem:[#allocation2 + $0x388] sm:$0xff] %v1007_v57  ;;  %v1008_v59 = vmax.f32 %v906_v29, 0.0 }
 0x16e   : > { %1214 = vst [vmem:[#allocation2 + $0x368] sm:$0xff] %v1005_v33  ;;  %v1006_v40 = vmax.f32 %v898_v27, 0.0  ;;  %v2177_v41 = vld [vmem:[#allocation2 + $0x349] sm:$0xff]  ;;  %v2178_v14 = vld [vmem:[#allocation2 + $0x351] sm:$0xff] }
 0x16f   : > { %1217 = vst [vmem:[#allocation2 + $0x390] sm:$0xff] %v1008_v59  ;;  %v2175_v11 = vld [vmem:[#allocation2 + $0x329] sm:$0xff]  ;;  %v2176_v46 = vld [vmem:[#allocation2 + $0x331] sm:$0xff]  ;;  %10316 = vmatpush3.bf16.msra.mxu1 %v11621_v19  ;;  %v1432_v38 = vpack.c.bf16 %v1008_v59, %v1007_v57  ;;  %v2217_v21 = vpack.c.bf16 %v2178_v14, %v2177_v41 }
 0x170   : > { %1215 = vst [vmem:[#allocation2 + $0x370] sm:$0xff] %v1006_v40  ;;  %v10059_v50 = vpop.f32.mrb[52].mxu0  ;;  %v2216_v47 = vpack.c.bf16 %v2176_v46, %v2175_v11  ;;  %v1431_v51 = vpack.c.bf16 %v1006_v40, %v1005_v33  ;;  %10317 = vmatprep.subr.bf16.mxu1 %v11623_v39  ;;  %v11629_v59 = vld [vmem:[%s16285_s3 + $0xf0] sm:$0xff]  }
 0x171   : > { %v919_v56 = vadd.f32 %v10059_v50, %v12689_v15  ;;  %v910_v20 = vpop.f32.mrb[53].mxu0 }
 0x172   : > { %v911_v26 = vadd.f32 %v12689_v15, %v910_v20  ;;  %v10060_v28 = vpop.f32.mrb[54].mxu0  ;;  %10290 = vmatmul.mubr.bf16.gmra.mrb[8].mxu1 %v2216_v47  ;;  %10134 = vmatmul.mubr.bf16.gmra.mrb[112].mxu0 %v1431_v51 }
 0x173   : > { %v1011_v19 = vmax.f32 %v919_v56, 0.0  ;;  %v922_v57 = vadd.f32 %v10060_v28, %v12689_v15  ;;  %v913_v29 = vpop.f32.mrb[55].mxu0  ;;  %10293 = vmatprep.mubr.bf16.mxu1 %v2217_v21  ;;  %10137 = vmatprep.mubr.bf16.mxu0 %v1432_v38  ;;  %v11632_v21 = vld [vmem:[%s16285_s3 + $0xf8] sm:$0xff]  }
 0x174   : > { %v1009_v32 = vmax.f32 %v911_v26, 0.0  ;;  %v914_v33 = vadd.f32 %v12689_v15, %v913_v29  ;;  %10318 = vmatpush3.bf16.msra.mxu1 %v11623_v39 }
 0x175   : > { %1220 = vst [vmem:[#allocation2 + $0x3c8] sm:$0xff] %v1011_v19  ;;  %v1012_v27 = vmax.f32 %v922_v57, 0.0  ;;  %10319 = vmatprep.subr.bf16.mxu1 %v11626_v16 }
 0x176   : > { %1218 = vst [vmem:[#allocation2 + $0x3a8] sm:$0xff] %v1009_v32  ;;  %v1010_v40 = vmax.f32 %v914_v33, 0.0  ;;  %v2181_v41 = vld [vmem:[#allocation2 + $0x389] sm:$0xff]  ;;  %v2182_v14 = vld [vmem:[#allocation2 + $0x391] sm:$0xff] }
 0x177   : > { %1221 = vst [vmem:[#allocation2 + $0x3d0] sm:$0xff] %v1012_v27  ;;  %v2179_v11 = vld [vmem:[#allocation2 + $0x369] sm:$0xff]  ;;  %v2180_v46 = vld [vmem:[#allocation2 + $0x371] sm:$0xff]  ;;  %v1434_v50 = vpack.c.bf16 %v1012_v27, %v1011_v19  ;;  %v2219_v20 = vpack.c.bf16 %v2182_v14, %v2181_v41  ;;  %v12799_v27 = vld [vmem:[%s16285_s3 + $0x100] sm:$0xff]  }
 0x178   : > { %1219 = vst [vmem:[#allocation2 + $0x3b0] sm:$0xff] %v1010_v40  ;;  %v10063_v38 = vpop.f32.mrb[56].mxu0  ;;  %v2218_v47 = vpack.c.bf16 %v2180_v46, %v2179_v11  ;;  %v1433_v51 = vpack.c.bf16 %v1010_v40, %v1009_v32  ;;  %10320 = vmatpush3.bf16.msra.mxu1 %v11626_v16  ;;  %v3722_v60 = vld [vmem:[#allocation2 + $0x391] sm:$0xff] }
 0x179   : > { %v935_v39 = vadd.f32 %v10063_v38, %v12689_v15  ;;  %v926_v56 = vpop.f32.mrb[57].mxu0  ;;  %10321 = vmatprep.subr.bf16.mxu1 %v11629_v59 }
 0x17a   : > { %v927_v26 = vadd.f32 %v12689_v15, %v926_v56  ;;  %v10064_v28 = vpop.f32.mrb[58].mxu0  ;;  %10294 = vmatmul.mubr.bf16.gmra.mrb[12].mxu1 %v2218_v47  ;;  %10138 = vmatmul.mubr.bf16.gmra.mrb[116].mxu0 %v1433_v51 }
 0x17b   : > { %v1015_v19 = vmax.f32 %v935_v39, 0.0  ;;  %v938_v57 = vadd.f32 %v10064_v28, %v12689_v15  ;;  %v929_v29 = vpop.f32.mrb[59].mxu0  ;;  %10297 = vmatprep.mubr.bf16.mxu1 %v2219_v20  ;;  %10141 = vmatprep.mubr.bf16.mxu0 %v1434_v50 }
 0x17c   : > { %v1013_v16 = vmax.f32 %v927_v26, 0.0  ;;  %v930_v32 = vadd.f32 %v12689_v15, %v929_v29  ;;  %10322 = vmatpush3.bf16.msra.mxu1 %v11629_v59 }
 0x17d   : > { %1224 = vst [vmem:[#allocation2 + $0x408] sm:$0xff] %v1015_v19  ;;  %v1016_v33 = vmax.f32 %v938_v57, 0.0  ;;  %10323 = vmatprep.subr.bf16.mxu1 %v11632_v21 }
 0x17e   : > { %1222 = vst [vmem:[#allocation2 + $0x3e8] sm:$0xff] %v1013_v16  ;;  %v1014_v40 = vmax.f32 %v930_v32, 0.0  ;;  %v2185_v41 = vld [vmem:[#allocation2 + $0x3c9] sm:$0xff]  ;;  %v2186_v14 = vld [vmem:[#allocation2 + $0x3d1] sm:$0xff] }
 0x17f   : > { %1225 = vst [vmem:[#allocation2 + $0x410] sm:$0xff] %v1016_v33  ;;  %v2183_v11 = vld [vmem:[#allocation2 + $0x3a9] sm:$0xff]  ;;  %v2184_v46 = vld [vmem:[#allocation2 + $0x3b1] sm:$0xff]  ;;  %v1436_v50 = vpack.c.bf16 %v1016_v33, %v1015_v19  ;;  %v2221_v56 = vpack.c.bf16 %v2186_v14, %v2185_v41 }
 0x180   : > { %1223 = vst [vmem:[#allocation2 + $0x3f0] sm:$0xff] %v1014_v40  ;;  %v10067_v38 = vpop.f32.mrb[60].mxu0  ;;  %v2220_v47 = vpack.c.bf16 %v2184_v46, %v2183_v11  ;;  %v1435_v59 = vpack.c.bf16 %v1014_v40, %v1013_v16  ;;  %10324 = vmatpush3.bf16.msra.mxu1 %v11632_v21  ;;  %v1230_v16 = vld [vmem:[#allocation2 + $0x7] sm:$0xff]  ;;  %v1231_v32 = vld [vmem:[#allocation2 + $0xf] sm:$0xff] }
 0x181   : > { %v951_v51 = vadd.f32 %v10067_v38, %v12689_v15  ;;  %v942_v39 = vpop.f32.mrb[61].mxu0  ;;  %10389 = vmatprep.subr.bf16.mxu1 %v12799_v27  ;;  %v1294_v38 = vpack.c.bf16 %v1231_v32, %v1230_v16  ;;  %v2650_v16 = vld [vmem:[#allocation2 + $0x8f] sm:$0xff] }
 0x182   : > { %v943_v20 = vadd.f32 %v12689_v15, %v942_v39  ;;  %v10068_v26 = vpop.f32.mrb[62].mxu0  ;;  %10298 = vmatmul.mubr.bf16.gmra.mrb[16].mxu1 %v2220_v47  ;;  %10142 = vmatmul.mubr.bf16.gmra.mrb[120].mxu0 %v1435_v59  ;;  %v3723_v54 = vld [vmem:[#allocation2 + $0x3a9] sm:$0xff]  ;;  %v3724_v49 = vld [vmem:[#allocation2 + $0x3b1] sm:$0xff] }
 0x183   : > { %v1019_v28 = vmax.f32 %v951_v51, 0.0  ;;  %v954_v57 = vadd.f32 %v10068_v26, %v12689_v15  ;;  %v945_v19 = vpop.f32.mrb[63].mxu0  ;;  %10301 = vmatprep.mubr.bf16.mxu1 %v2221_v56  ;;  %10145 = vmatprep.mubr.bf16.mxu0 %v1436_v50  ;;  %v2646_v50 = vld [vmem:[#allocation2 + $0x4f] sm:$0xff] }
 0x184   : > { %v1017_v29 = vmax.f32 %v943_v20, 0.0  ;;  %v946_v21 = vadd.f32 %v12689_v15, %v945_v19  ;;  %v2644_v15 = vld [vmem:[#allocation2 + $0x2f] sm:$0xff]  ;;  %v2643_v20 = vld [vmem:[#allocation2 + $0x27] sm:$0xff] }
 0x185   : > { %1228 = vst [vmem:[#allocation2 + $0x448] sm:$0xff] %v1019_v28  ;;  %v1020_v33 = vmax.f32 %v954_v57, 0.0  ;;  %v2707_v28 = vpack.c.bf16 %v2644_v15, %v2643_v20  ;;  %v2645_v57 = vld [vmem:[#allocation2 + $0x47] sm:$0xff]  ;;  %v11640_v20 = vld [vmem:[%s16285_s3 + $0x130] sm:$0xff]  }
 0x186   : > { %1226 = vst [vmem:[#allocation2 + $0x428] sm:$0xff] %v1017_v29  ;;  %v1018_v40 = vmax.f32 %v946_v21, 0.0  ;;  %v2189_v41 = vld [vmem:[#allocation2 + $0x409] sm:$0xff]  ;;  %v2190_v14 = vld [vmem:[#allocation2 + $0x411] sm:$0xff]  ;;  %v2708_v19 = vpack.c.bf16 %v2646_v50, %v2645_v57 }
 0x187   : > { %1229 = vst [vmem:[#allocation2 + $0x450] sm:$0xff] %v1020_v33  ;;  %v2187_v11 = vld [vmem:[#allocation2 + $0x3e9] sm:$0xff]  ;;  %v2188_v46 = vld [vmem:[#allocation2 + $0x3f1] sm:$0xff]  ;;  %v2223_v51 = vpack.c.bf16 %v2190_v14, %v2189_v41 }
 0x188   : > { %1227 = vst [vmem:[#allocation2 + $0x430] sm:$0xff] %v1018_v40  ;;  %v2222_v47 = vpack.c.bf16 %v2188_v46, %v2187_v11  ;;  %v1437_v59 = vpack.c.bf16 %v1018_v40, %v1017_v29  ;;  %v2648_v29 = vld [vmem:[#allocation2 + $0x6f] sm:$0xff]  ;;  %v2647_v21 = vld [vmem:[#allocation2 + $0x67] sm:$0xff] }
 0x189   : > { %v2709_v32 = vpack.c.bf16 %v2648_v29, %v2647_v21  ;;  %v11635_v33 = vld [vmem:[%s16285_s3 + $0x108] sm:$0xff]   ;;  %v11641_v29 = vld [vmem:[%s16285_s3 + $0x138] sm:$0xff]   ;;  %v12846_v21 = vld [vmem:[%s16285_s3 + $0x140] sm:$0xff]  }
 0x18a   : > { %10302 = vmatmul.mubr.bf16.gmra.mrb[20].mxu1 %v2222_v47  ;;  %10146 = vmatmul.mubr.bf16.gmra.mrb[124].mxu0 %v1437_v59  ;;  %v2649_v40 = vld [vmem:[#allocation2 + $0x87] sm:$0xff]  ;;  %v2652_v14 = vld [vmem:[#allocation2 + $0xaf] sm:$0xff] }
 0x18b   : > { %10305 = vmatprep.mubr.bf16.mxu1 %v2223_v51  ;;  %10165 = vmatprep.mubr.bf16.mxu0 %v1294_v38  ;;  %v2710_v41 = vpack.c.bf16 %v2650_v16, %v2649_v40  ;;  %v2654_v11 = vld [vmem:[#allocation2 + $0xcf] sm:$0xff]  ;;  %v2653_v38 = vld [vmem:[#allocation2 + $0xc7] sm:$0xff] }
 0x18c   : > { %v2712_v47 = vpack.c.bf16 %v2654_v11, %v2653_v38  ;;  %v11638_v59 = vld [vmem:[%s16285_s3 + $0x120] sm:$0xff]   ;;  %v2658_v51 = vld [vmem:[#allocation2 + $0x10f] sm:$0xff] }
 0x18d   : > { %v2655_v15 = vld [vmem:[#allocation2 + $0xe7] sm:$0xff]  ;;  %v2666_v16 = vld [vmem:[#allocation2 + $0x18f] sm:$0xff] }
 0x18e   : > { %v2657_v50 = vld [vmem:[#allocation2 + $0x107] sm:$0xff]  ;;  %v3726_v42 = vld [vmem:[#allocation2 + $0x3d1] sm:$0xff] }
 0x18f   : > { %v2191_v39 = vld [vmem:[#allocation2 + $0x429] sm:$0xff]  ;;  %v2192_v56 = vld [vmem:[#allocation2 + $0x431] sm:$0xff] }
 0x190   : > { %v2224_v26 = vpack.c.bf16 %v2192_v56, %v2191_v39  ;;  %v2714_v39 = vpack.c.bf16 %v2658_v51, %v2657_v50  ;;  %v11639_v56 = vld [vmem:[%s16285_s3 + $0x128] sm:$0xff]   ;;  %v3728_v31 = vld [vmem:[#allocation2 + $0x3f1] sm:$0xff] }
 0x191   : > { %v2661_v57 = vld [vmem:[#allocation2 + $0x147] sm:$0xff]  ;;  %v2678_v50 = vld [vmem:[#allocation2 + $0x28f] sm:$0xff] }
 0x192   : > { %10306 = vmatmul.mubr.bf16.gmra.mrb[24].mxu1 %v2224_v26  ;;  %10166 = vmatmul.mubr.bf16.vlgmr.msra.gmra.mrb[64].mxu0 %v2707_v28  ;;  %v2662_v26 = vld [vmem:[#allocation2 + $0x14f] sm:$0xff]  ;;  %v2665_v40 = vld [vmem:[#allocation2 + $0x187] sm:$0xff] }
 0x193   : > { %10325 = vmatprep.mubr.bf16.mxu1 %v2707_v28  ;;  %10169 = vmatprep.mubr.bf16.mxu0 %v2708_v19  ;;  %v2659_v28 = vld [vmem:[#allocation2 + $0x127] sm:$0xff]  ;;  %v3730_v24 = vld [vmem:[#allocation2 + $0x411] sm:$0xff] }
 0x194   : > { %10230 = vmatpush3.bf16.msra.mxu0 %v12624_v62  ;;  %v11636_v62 = vld [vmem:[%s16285_s3 + $0x110] sm:$0xff]   ;;  %v1262_v38 = vld [vmem:[#allocation2 + $0x247] sm:$0xff] }
 0x195   : > { %10231 = vmatprep.subr.bf16.mxu0 %v12631_v63  ;;  %v3727_v36 = vld [vmem:[#allocation2 + $0x3e9] sm:$0xff]  ;;  %v3732_v10 = vld [vmem:[#allocation2 + $0x431] sm:$0xff] }
 0x196   : > { %v3731_v17 = vld [vmem:[#allocation2 + $0x429] sm:$0xff] }
 0x198   : > { %10232 = vmatpush3.bf16.msra.mxu0 %v12631_v63  ;;  %v2651_v63 = vld [vmem:[#allocation2 + $0xa7] sm:$0xff] }
 0x199   : > { %10233 = vmatprep.subr.bf16.mxu0 %v12638_v0  ;;  %v2711_v46 = vpack.c.bf16 %v2652_v14, %v2651_v63  ;;  %v2667_v14 = vld [vmem:[#allocation2 + $0x1a7] sm:$0xff] }
 0x19a   : > { %10326 = vmatmul.mubr.bf16.vlgmr.msra.gmra.mrb[28].mxu1 %v2708_v19  ;;  %10170 = vmatmul.mubr.bf16.gmra.mrb[68].mxu0 %v2709_v32  ;;  %v2716_v19 = vpack.c.bf16 %v2662_v26, %v2661_v57  ;;  %v2669_v63 = vld [vmem:[#allocation2 + $0x1c7] sm:$0xff]  ;;  %v2682_v57 = vld [vmem:[#allocation2 + $0x2cf] sm:$0xff] }
 0x19b   : > { %10390 = vmatpush3.bf16.msra.mxu1 %v12799_v27  ;;  %10329 = vmatprep.mubr.bf16.mxu1 %v2709_v32  ;;  %v11637_v27 = vld [vmem:[%s16285_s3 + $0x118] sm:$0xff]   ;;  %v2663_v32 = vld [vmem:[#allocation2 + $0x167] sm:$0xff] }
 0x19c   : > { %10173 = vmatprep.mubr.bf16.mxu0 %v2710_v41  ;;  %10391 = vmatprep.subr.bf16.mxu1 %v11635_v33  ;;  %v2677_v26 = vld [vmem:[#allocation2 + $0x287] sm:$0xff] }
 0x19d   : > { %10234 = vmatpush3.bf16.msra.mxu0 %v12638_v0  ;;  %v2656_v0 = vld [vmem:[#allocation2 + $0xef] sm:$0xff] }
 0x19e   : > { %10235 = vmatprep.subr.bf16.mxu0 %v12645_v1 }
 0x19f   : > { %10392 = vmatpush3.bf16.msra.mxu1 %v11635_v33 }
 0x1a0   : > { %10393 = vmatprep.subr.bf16.mxu1 %v11636_v62 }
 0x1a1   : > { %10236 = vmatpush3.bf16.msra.mxu0 %v12645_v1  ;;  %v2713_v1 = vpack.c.bf16 %v2656_v0, %v2655_v15  ;;  %v2671_v0 = vld [vmem:[#allocation2 + $0x1e7] sm:$0xff]  ;;  %v2674_v15 = vld [vmem:[#allocation2 + $0x20f] sm:$0xff] }
 0x1a2   : > { %10330 = vmatmul.mubr.bf16.gmra.mrb[32].mxu1 %v2710_v41  ;;  %10174 = vmatmul.mubr.bf16.gmra.mrb[72].mxu0 %v2711_v46  ;;  %v2718_v41 = vpack.c.bf16 %v2666_v16, %v2665_v40  ;;  %v2683_v40 = vld [vmem:[#allocation2 + $0x2e7] sm:$0xff] }
 0x1a3   : > { %10333 = vmatprep.mubr.bf16.mxu1 %v2711_v46  ;;  %10177 = vmatprep.mubr.bf16.mxu0 %v2712_v47 }
 0x1a4   : > { %10394 = vmatpush3.bf16.msra.mxu1 %v11636_v62  ;;  %10237 = vmatprep.subr.bf16.mxu0 %v12652_v4  ;;  %v2670_v62 = vld [vmem:[#allocation2 + $0x1cf] sm:$0xff] }
 0x1a5   : > { %10395 = vmatprep.subr.bf16.mxu1 %v11637_v27  ;;  %10238 = vmatpush3.bf16.msra.mxu0 %v12652_v4  ;;  %v2660_v4 = vld [vmem:[#allocation2 + $0x12f] sm:$0xff]  ;;  %v2720_v46 = vpack.c.bf16 %v2670_v62, %v2669_v63  ;;  %v2687_v63 = vld [vmem:[#allocation2 + $0x327] sm:$0xff] }
 0x1a6   : > { %10239 = vmatprep.subr.bf16.mxu0 %v12659_v6 }
 0x1a8   : > { %10396 = vmatpush3.bf16.msra.mxu1 %v11637_v27  ;;  %v2672_v27 = vld [vmem:[#allocation2 + $0x1ef] sm:$0xff] }
 0x1a9   : > { %10397 = vmatprep.subr.bf16.mxu1 %v11638_v59  ;;  %10240 = vmatpush3.bf16.msra.mxu0 %v12659_v6  ;;  %v2715_v6 = vpack.c.bf16 %v2660_v4, %v2659_v28  ;;  %v2721_v51 = vpack.c.bf16 %v2672_v27, %v2671_v0  ;;  %v2724_v28 = vpack.c.bf16 %v2678_v50, %v2677_v26  ;;  %v2692_v27 = vld [vmem:[#allocation2 + $0x36f] sm:$0xff] }
 0x1aa   : > { %10334 = vmatmul.mubr.bf16.gmra.mrb[36].mxu1 %v2712_v47  ;;  %10178 = vmatmul.mubr.bf16.gmra.mrb[76].mxu0 %v2713_v1  ;;  %v1263_v47 = vld [vmem:[#allocation2 + $0x24f] sm:$0xff] }
 0x1ab   : > { %10337 = vmatprep.mubr.bf16.mxu1 %v2713_v1  ;;  %10181 = vmatprep.mubr.bf16.mxu0 %v2714_v39  ;;  %v2676_v1 = vld [vmem:[#allocation2 + $0x26f] sm:$0xff] }
 0x1ac   : > { %10398 = vmatpush3.bf16.msra.mxu1 %v11638_v59  ;;  %10241 = vmatprep.subr.bf16.mxu0 %v12666_v7  ;;  %v1310_v59 = vpack.c.bf16 %v1263_v47, %v1262_v38  ;;  %v2689_v38 = vld [vmem:[#allocation2 + $0x347] sm:$0xff]  ;;  %v2694_v0 = vld [vmem:[#allocation2 + $0x38f] sm:$0xff] }
 0x1ad   : > { %10399 = vmatprep.subr.bf16.mxu1 %v11639_v56  ;;  %10242 = vmatpush3.bf16.msra.mxu0 %v12666_v7  ;;  %v2664_v7 = vld [vmem:[#allocation2 + $0x16f] sm:$0xff] }
 0x1ae   : > { %10243 = vmatprep.subr.bf16.mxu0 %v12673_v8  ;;  %v2717_v33 = vpack.c.bf16 %v2664_v7, %v2663_v32  ;;  %v2681_v7 = vld [vmem:[#allocation2 + $0x2c7] sm:$0xff]  ;;  %v2684_v32 = vld [vmem:[#allocation2 + $0x2ef] sm:$0xff] }
 0x1af   : > { %v2726_v16 = vpack.c.bf16 %v2682_v57, %v2681_v7  ;;  %v2696_v50 = vld [vmem:[#allocation2 + $0x3af] sm:$0xff]  ;;  %v2699_v57 = vld [vmem:[#allocation2 + $0x3e7] sm:$0xff] }
 0x1b0   : > { %10400 = vmatpush3.bf16.msra.mxu1 %v11639_v56  ;;  %v2675_v56 = vld [vmem:[#allocation2 + $0x267] sm:$0xff] }
 0x1b1   : > { %10401 = vmatprep.subr.bf16.mxu1 %v11640_v20  ;;  %10244 = vmatpush3.bf16.msra.mxu0 %v12673_v8  ;;  %v2668_v8 = vld [vmem:[#allocation2 + $0x1af] sm:$0xff] }
 0x1b2   : > { %10338 = vmatmul.mubr.bf16.gmra.mrb[40].mxu1 %v2714_v39  ;;  %10182 = vmatmul.mubr.bf16.gmra.mrb[80].mxu0 %v2715_v6  ;;  %v2719_v11 = vpack.c.bf16 %v2668_v8, %v2667_v14  ;;  %v2673_v39 = vld [vmem:[#allocation2 + $0x207] sm:$0xff]  ;;  %v2688_v14 = vld [vmem:[#allocation2 + $0x32f] sm:$0xff] }
 0x1b3   : > { %10341 = vmatprep.mubr.bf16.mxu1 %v2715_v6  ;;  %10185 = vmatprep.mubr.bf16.mxu0 %v2716_v19  ;;  %v2722_v4 = vpack.c.bf16 %v2674_v15, %v2673_v39  ;;  %v2680_v6 = vld [vmem:[#allocation2 + $0x2af] sm:$0xff]  ;;  %v2685_v8 = vld [vmem:[#allocation2 + $0x307] sm:$0xff] }
 0x1b4   : > { %10402 = vmatpush3.bf16.msra.mxu1 %v11640_v20  ;;  %v2723_v20 = vpack.c.bf16 %v2676_v1, %v2675_v56  ;;  %v2693_v15 = vld [vmem:[#allocation2 + $0x387] sm:$0xff]  ;;  %v2698_v39 = vld [vmem:[#allocation2 + $0x3cf] sm:$0xff] }
 0x1b5   : > { %10403 = vmatprep.subr.bf16.mxu1 %v11641_v29  ;;  %v2732_v1 = vpack.c.bf16 %v2694_v0, %v2693_v15  ;;  %v2695_v56 = vld [vmem:[#allocation2 + $0x3a7] sm:$0xff] }
 0x1b6   : > { %v3157_v0 = vld [vmem:[#allocation2 + $0x28] sm:$0xff] }
 0x1b8   : > { %10404 = vmatpush3.bf16.msra.mxu1 %v11641_v29 }
 0x1b9   : > { %10469 = vmatprep.subr.bf16.mxu1 %v12846_v21 }
 0x1ba   : > { %10342 = vmatmul.mubr.bf16.gmra.mrb[44].mxu1 %v2716_v19  ;;  %10186 = vmatmul.mubr.bf16.gmra.mrb[84].mxu0 %v2717_v33  ;;  %v2679_v19 = vld [vmem:[#allocation2 + $0x2a7] sm:$0xff] }
 0x1bb   : > { %10345 = vmatprep.mubr.bf16.mxu1 %v2717_v33  ;;  %10189 = vmatprep.mubr.bf16.mxu0 %v2718_v41  ;;  %v2725_v29 = vpack.c.bf16 %v2680_v6, %v2679_v19  ;;  %v2686_v33 = vld [vmem:[#allocation2 + $0x30f] sm:$0xff] }
 0x1bc   : > { %v2728_v62 = vpack.c.bf16 %v2686_v33, %v2685_v8  ;;  %v2702_v6 = vld [vmem:[#allocation2 + $0x40f] sm:$0xff] }
 0x1bd   : > { %v2704_v33 = vld [vmem:[#allocation2 + $0x42f] sm:$0xff] }
 0x1c2   : > { %10346 = vmatmul.mubr.bf16.gmra.mrb[48].mxu1 %v2718_v41  ;;  %10190 = vmatmul.mubr.bf16.gmra.mrb[88].mxu0 %v2719_v11  ;;  %v2727_v41 = vpack.c.bf16 %v2684_v32, %v2683_v40  ;;  %v2130_v32 = vld [vmem:[#allocation2 + $0x11] sm:$0xff]  ;;  %v2703_v40 = vld [vmem:[#allocation2 + $0x427] sm:$0xff] }
 0x1c3   : > { %10349 = vmatprep.mubr.bf16.mxu1 %v2719_v11  ;;  %10193 = vmatprep.mubr.bf16.mxu0 %v2720_v46  ;;  %v2690_v11 = vld [vmem:[#allocation2 + $0x34f] sm:$0xff]  ;;  %v2737_v8 = vpack.c.bf16 %v2704_v33, %v2703_v40 }
 0x1c4   : > { %v2730_v47 = vpack.c.bf16 %v2690_v11, %v2689_v38  ;;  %v2132_v11 = vld [vmem:[#allocation2 + $0x31] sm:$0xff]  ;;  %v2139_v33 = vld [vmem:[#allocation2 + $0xa9] sm:$0xff] }
 0x1c5   : > { %v2134_v38 = vld [vmem:[#allocation2 + $0x51] sm:$0xff] }
 0x1c6   : > { %v2140_v40 = vld [vmem:[#allocation2 + $0xb1] sm:$0xff] }
 0x1ca   : > { %10350 = vmatmul.mubr.bf16.gmra.mrb[52].mxu1 %v2720_v46  ;;  %10194 = vmatmul.mubr.bf16.gmra.mrb[92].mxu0 %v2721_v51  ;;  %v2729_v46 = vpack.c.bf16 %v2688_v14, %v2687_v63  ;;  %v2131_v14 = vld [vmem:[#allocation2 + $0x29] sm:$0xff] }
 0x1cb   : > { %10353 = vmatprep.mubr.bf16.mxu1 %v2721_v51  ;;  %10197 = vmatprep.mubr.bf16.mxu0 %v1310_v59  ;;  %v2691_v59 = vld [vmem:[#allocation2 + $0x367] sm:$0xff]  ;;  %v3158_v63 = vld [vmem:[#allocation2 + $0x30] sm:$0xff] }
 0x1cc   : > { %v2731_v51 = vpack.c.bf16 %v2692_v27, %v2691_v59  ;;  %v12849_v59 = vpack.c.bf16 %v2132_v11, %v2131_v14  ;;  %v3163_v14 = vld [vmem:[#allocation2 + $0x88] sm:$0xff] }
 0x1d2   : > { %10354 = vmatmul.mubr.bf16.gmra.mrb[56].mxu1 %v2722_v4  ;;  %10198 = vmatmul.mubr.bf16.gmra.mrb[96].mxu0 %v2723_v20  ;;  %v2733_v4 = vpack.c.bf16 %v2696_v50, %v2695_v56  ;;  %v2135_v50 = vld [vmem:[#allocation2 + $0x69] sm:$0xff] }
 0x1d3   : > { %10357 = vmatprep.mubr.bf16.mxu1 %v2723_v20  ;;  %10201 = vmatprep.mubr.bf16.mxu0 %v2724_v28  ;;  %v2697_v20 = vld [vmem:[#allocation2 + $0x3c7] sm:$0xff]  ;;  %v3162_v56 = vld [vmem:[#allocation2 + $0x70] sm:$0xff] }
 0x1d4   : > { %v2734_v26 = vpack.c.bf16 %v2698_v39, %v2697_v20  ;;  %v2136_v39 = vld [vmem:[#allocation2 + $0x71] sm:$0xff]  ;;  %v2137_v20 = vld [vmem:[#allocation2 + $0x89] sm:$0xff] }
 0x1da   : > { %10358 = vmatmul.mubr.bf16.gmra.mrb[60].mxu1 %v2724_v28  ;;  %10202 = vmatmul.mubr.bf16.gmra.mrb[100].mxu0 %v2725_v29  ;;  %v2700_v28 = vld [vmem:[#allocation2 + $0x3ef] sm:$0xff] }
 0x1db   : > { %10361 = vmatprep.mubr.bf16.mxu1 %v2725_v29  ;;  %10205 = vmatprep.mubr.bf16.mxu0 %v2726_v16  ;;  %v2735_v19 = vpack.c.bf16 %v2700_v28, %v2699_v57  ;;  %v2701_v29 = vld [vmem:[#allocation2 + $0x407] sm:$0xff]  ;;  %v12855_v57 = vpack.c.bf16 %v2136_v39, %v2135_v50  ;;  %v3170_v50 = vld [vmem:[#allocation2 + $0xf0] sm:$0xff] }
 0x1dc   : > { %v2736_v7 = vpack.c.bf16 %v2702_v6, %v2701_v29  ;;  %v3161_v6 = vld [vmem:[#allocation2 + $0x68] sm:$0xff] }
 0x1dd   : > { %v3223_v29 = vpack.c.bf16 %v3162_v56, %v3161_v6  ;;  %v2145_v39 = vld [vmem:[#allocation2 + $0x109] sm:$0xff]  ;;  %v2146_v56 = vld [vmem:[#allocation2 + $0x111] sm:$0xff] }
 0x1e2   : > { %10362 = vmatmul.mubr.bf16.gmra.mrb[0].mxu1 %v2726_v16  ;;  %10206 = vmatmul.mubr.bf16.gmra.mrb[104].mxu0 %v2727_v41  ;;  %v2129_v16 = vld [vmem:[#allocation2 + $0x9] sm:$0xff] }
 0x1e3   : > { %10365 = vmatprep.mubr.bf16.mxu1 %v2727_v41  ;;  %10209 = vmatprep.mubr.bf16.mxu0 %v2728_v62  ;;  %v2193_v41 = vpack.c.bf16 %v2130_v32, %v2129_v16  ;;  %v11644_v16 = vld [vmem:[%s16285_s3 + $0x150] sm:$0xff]  }
 0x1e4   : > { %v3164_v32 = vld [vmem:[#allocation2 + $0x90] sm:$0xff] }
 0x1e5   : > { %v3224_v11 = vpack.c.bf16 %v3164_v32, %v3163_v14  ;;  %v2147_v32 = vld [vmem:[#allocation2 + $0x129] sm:$0xff] }
 0x1e6   : > { %v3171_v14 = vld [vmem:[#allocation2 + $0x108] sm:$0xff] }
 0x1ea   : > { %10366 = vmatmul.mubr.bf16.gmra.mrb[4].mxu1 %v2728_v62  ;;  %10210 = vmatmul.mubr.bf16.gmra.mrb[108].mxu0 %v2729_v46  ;;  %v2706_v62 = vld [vmem:[#allocation2 + $0x44f] sm:$0xff] }
 0x1eb   : > { %10369 = vmatprep.mubr.bf16.mxu1 %v2729_v46  ;;  %10213 = vmatprep.mubr.bf16.mxu0 %v2730_v47  ;;  %v2133_v46 = vld [vmem:[#allocation2 + $0x49] sm:$0xff] }
 0x1ec   : > { %v12851_v15 = vpack.c.bf16 %v2134_v38, %v2133_v46  ;;  %v12868_v46 = vpack.c.bf16 %v2140_v40, %v2139_v33  ;;  %v2148_v33 = vld [vmem:[#allocation2 + $0x131] sm:$0xff] }
 0x1ed   : > { %v11648_v40 = vld [vmem:[%s16285_s3 + $0x170] sm:$0xff]  }
 0x1f2   : > { %10370 = vmatmul.mubr.bf16.gmra.mrb[8].mxu1 %v2730_v47  ;;  %10214 = vmatmul.mubr.bf16.gmra.mrb[112].mxu0 %v2731_v51  ;;  %v2705_v47 = vld [vmem:[#allocation2 + $0x447] sm:$0xff] }
 0x1f3   : > { %10373 = vmatprep.mubr.bf16.mxu1 %v2731_v51  ;;  %10217 = vmatprep.mubr.bf16.mxu0 %v2732_v1  ;;  %v2738_v27 = vpack.c.bf16 %v2706_v62, %v2705_v47  ;;  %v3221_v51 = vpack.c.bf16 %v3158_v63, %v3157_v0  ;;  %v2142_v62 = vld [vmem:[#allocation2 + $0xd1] sm:$0xff]  ;;  %v3165_v63 = vld [vmem:[#allocation2 + $0xa8] sm:$0xff] }
 0x1f4   : > { %v11645_v47 = vld [vmem:[%s16285_s3 + $0x158] sm:$0xff]   ;;  %v2143_v0 = vld [vmem:[#allocation2 + $0xe9] sm:$0xff] }
 0x1fa   : > { %10374 = vmatmul.mubr.bf16.gmra.mrb[12].mxu1 %v2732_v1  ;;  %10218 = vmatmul.mubr.bf16.gmra.mrb[116].mxu0 %v2733_v4  ;;  %v3160_v1 = vld [vmem:[#allocation2 + $0x50] sm:$0xff] }
 0x1fb   : > { %10377 = vmatprep.mubr.bf16.mxu1 %v2733_v4  ;;  %10221 = vmatprep.mubr.bf16.mxu0 %v2734_v26  ;;  %v3159_v4 = vld [vmem:[#allocation2 + $0x48] sm:$0xff] }
 0x1fc   : > { %v3222_v28 = vpack.c.bf16 %v3160_v1, %v3159_v4  ;;  %v11646_v1 = vld [vmem:[%s16285_s3 + $0x160] sm:$0xff]   ;;  %v3167_v4 = vld [vmem:[#allocation2 + $0xc8] sm:$0xff] }
 0x202   : > { %10378 = vmatmul.mubr.bf16.gmra.mrb[16].mxu1 %v2734_v26  ;;  %10222 = vmatmul.mubr.bf16.gmra.mrb[120].mxu0 %v2735_v19  ;;  %v2138_v26 = vld [vmem:[#allocation2 + $0x91] sm:$0xff] }
 0x203   : > { %10381 = vmatprep.mubr.bf16.mxu1 %v2735_v19  ;;  %10225 = vmatprep.mubr.bf16.mxu0 %v2736_v7  ;;  %v11643_v19 = vld [vmem:[%s16285_s3 + $0x148] sm:$0xff]  }
 0x20a   : > { %10382 = vmatmul.mubr.bf16.gmra.mrb[20].mxu1 %v2736_v7  ;;  %10226 = vmatmul.mubr.bf16.gmra.mrb[124].mxu0 %v2737_v8  ;;  %v12861_v7 = vpack.c.bf16 %v2138_v26, %v2137_v20  ;;  %v3169_v26 = vld [vmem:[#allocation2 + $0xe8] sm:$0xff] }
 0x20b   : > { %10385 = vmatprep.mubr.bf16.mxu1 %v2737_v8  ;;  %10245 = vmatprep.mubr.bf16.mxu0 %v2193_v41  ;;  %v3166_v41 = vld [vmem:[#allocation2 + $0xb0] sm:$0xff]  ;;  %v3227_v6 = vpack.c.bf16 %v3170_v50, %v3169_v26  ;;  %v3175_v26 = vld [vmem:[#allocation2 + $0x148] sm:$0xff] }
 0x20c   : > { %v2141_v8 = vld [vmem:[#allocation2 + $0xc9] sm:$0xff]  ;;  %v2152_v50 = vld [vmem:[#allocation2 + $0x171] sm:$0xff] }
 0x20d   : > { %v12870_v38 = vpack.c.bf16 %v2142_v62, %v2141_v8  ;;  %v2149_v8 = vld [vmem:[#allocation2 + $0x149] sm:$0xff]  ;;  %v2150_v62 = vld [vmem:[#allocation2 + $0x151] sm:$0xff] }
 0x212   : > { %10386 = vmatmul.mubr.bf16.gmra.mrb[24].mxu1 %v2738_v27  ;;  %10246 = vmatmul.mubr.bf16.vlgmr.msra.gmra.mrb[64].mxu0 %v12849_v59  ;;  %v3168_v27 = vld [vmem:[#allocation2 + $0xd0] sm:$0xff] }
 0x213   : > { %10405 = vmatprep.mubr.bf16.mxu1 %v3221_v51  ;;  %10249 = vmatprep.mubr.bf16.mxu0 %v12851_v15  ;;  %v2144_v51 = vld [vmem:[#allocation2 + $0xf1] sm:$0xff]  ;;  %v3226_v20 = vpack.c.bf16 %v3168_v27, %v3167_v4  ;;  %v12894_v27 = vpack.c.bf16 %v2150_v62, %v2149_v8  ;;  %v2153_v4 = vld [vmem:[#allocation2 + $0x189] sm:$0xff] }
 0x214   : > { %v2156_v8 = vld [vmem:[#allocation2 + $0x1b1] sm:$0xff] }
 0x215   : > { %v3182_v62 = vld [vmem:[#allocation2 + $0x1b0] sm:$0xff] }
 0x21a   : > { %10406 = vmatmul.mubr.bf16.vlgmr.msra.gmra.mrb[28].mxu1 %v3222_v28  ;;  %10250 = vmatmul.mubr.bf16.gmra.mrb[68].mxu0 %v12855_v57  ;;  %v12880_v28 = vpack.c.bf16 %v2144_v51, %v2143_v0  ;;  %v11649_v0 = vld [vmem:[%s16285_s3 + $0x178] sm:$0xff]   ;;  %v3176_v51 = vld [vmem:[#allocation2 + $0x150] sm:$0xff] }
 0x21b   : > { %10470 = vmatpush3.bf16.msra.mxu1 %v12846_v21  ;;  %10409 = vmatprep.mubr.bf16.mxu1 %v3223_v29  ;;  %v3225_v21 = vpack.c.bf16 %v3166_v41, %v3165_v63  ;;  %v11647_v29 = vld [vmem:[%s16285_s3 + $0x168] sm:$0xff]   ;;  %v3174_v41 = vld [vmem:[#allocation2 + $0x130] sm:$0xff] }
 0x21c   : > { %10253 = vmatprep.mubr.bf16.mxu0 %v12861_v7  ;;  %10471 = vmatprep.subr.bf16.mxu1 %v11643_v19  ;;  %v3173_v63 = vld [vmem:[#allocation2 + $0x128] sm:$0xff] }
 0x21f   : > { %10472 = vmatpush3.bf16.msra.mxu1 %v11643_v19  ;;  %v12882_v19 = vpack.c.bf16 %v2146_v56, %v2145_v39  ;;  %v12904_v39 = vld [vmem:[%s16285_s3 + $0x180] sm:$0xff]   ;;  %v3178_v56 = vld [vmem:[#allocation2 + $0x170] sm:$0xff] }
 0x220   : > { %10473 = vmatprep.subr.bf16.mxu1 %v11644_v16 }
 0x222   : > { %10410 = vmatmul.mubr.bf16.gmra.mrb[32].mxu1 %v3224_v11  ;;  %10254 = vmatmul.mubr.bf16.gmra.mrb[72].mxu0 %v12868_v46 }
 0x223   : > { %10413 = vmatprep.mubr.bf16.mxu1 %v3225_v21  ;;  %10257 = vmatprep.mubr.bf16.mxu0 %v12870_v38  ;;  %v12892_v21 = vpack.c.bf16 %v2148_v33, %v2147_v32 }
 0x224   : > { %10474 = vmatpush3.bf16.msra.mxu1 %v11644_v16  ;;  %v3172_v16 = vld [vmem:[#allocation2 + $0x110] sm:$0xff] }
 0x225   : > { %10475 = vmatprep.subr.bf16.mxu1 %v11645_v47  ;;  %v3228_v11 = vpack.c.bf16 %v3172_v16, %v3171_v14  ;;  %v2157_v14 = vld [vmem:[#allocation2 + $0x1c9] sm:$0xff] }
 0x228   : > { %10476 = vmatpush3.bf16.msra.mxu1 %v11645_v47  ;;  %v3229_v47 = vpack.c.bf16 %v3174_v41, %v3173_v63  ;;  %v2155_v41 = vld [vmem:[#allocation2 + $0x1a9] sm:$0xff] }
 0x229   : > { %10477 = vmatprep.subr.bf16.mxu1 %v11646_v1  ;;  %v3179_v63 = vld [vmem:[#allocation2 + $0x188] sm:$0xff] }
 0x22a   : > { %10414 = vmatmul.mubr.bf16.gmra.mrb[36].mxu1 %v3226_v20  ;;  %10258 = vmatmul.mubr.bf16.gmra.mrb[76].mxu0 %v12880_v28  ;;  %v2154_v20 = vld [vmem:[#allocation2 + $0x191] sm:$0xff] }
 0x22b   : > { %10417 = vmatprep.mubr.bf16.mxu1 %v3227_v6  ;;  %10261 = vmatprep.mubr.bf16.mxu0 %v12882_v19  ;;  %v3230_v6 = vpack.c.bf16 %v3176_v51, %v3175_v26  ;;  %v12908_v33 = vpack.c.bf16 %v2154_v20, %v2153_v4  ;;  %v12913_v51 = vpack.c.bf16 %v2156_v8, %v2155_v41  ;;  %v2162_v4 = vld [vmem:[#allocation2 + $0x251] sm:$0xff]  ;;  %v2159_v26 = vld [vmem:[#allocation2 + $0x1e9] sm:$0xff] }
 0x22c   : > { %10478 = vmatpush3.bf16.msra.mxu1 %v11646_v1  ;;  %v2151_v1 = vld [vmem:[#allocation2 + $0x169] sm:$0xff] }
 0x22d   : > { %10479 = vmatprep.subr.bf16.mxu1 %v11647_v29  ;;  %v12906_v16 = vpack.c.bf16 %v2152_v50, %v2151_v1  ;;  %v3184_v20 = vld [vmem:[#allocation2 + $0x1d0] sm:$0xff]  ;;  %v3185_v41 = vld [vmem:[#allocation2 + $0x1e8] sm:$0xff] }
 0x230   : > { %10480 = vmatpush3.bf16.msra.mxu1 %v11647_v29  ;;  %v3177_v29 = vld [vmem:[#allocation2 + $0x168] sm:$0xff] }
 0x231   : > { %10481 = vmatprep.subr.bf16.mxu1 %v11648_v40  ;;  %v3231_v32 = vpack.c.bf16 %v3178_v56, %v3177_v29  ;;  %v2161_v56 = vld [vmem:[#allocation2 + $0x249] sm:$0xff] }
 0x232   : > { %10418 = vmatmul.mubr.bf16.gmra.mrb[40].mxu1 %v3228_v11  ;;  %10262 = vmatmul.mubr.bf16.gmra.mrb[80].mxu0 %v12892_v21  ;;  %v2158_v11 = vld [vmem:[#allocation2 + $0x1d1] sm:$0xff] }
 0x233   : > { %10421 = vmatprep.mubr.bf16.mxu1 %v3229_v47  ;;  %10265 = vmatprep.mubr.bf16.mxu0 %v12894_v27  ;;  %v12915_v50 = vpack.c.bf16 %v2158_v11, %v2157_v14  ;;  %v3186_v29 = vld [vmem:[#allocation2 + $0x1f0] sm:$0xff] }
 0x234   : > { %10482 = vmatpush3.bf16.msra.mxu1 %v11648_v40  ;;  %v3180_v40 = vld [vmem:[#allocation2 + $0x190] sm:$0xff] }
 0x235   : > { %10483 = vmatprep.subr.bf16.mxu1 %v11649_v0  ;;  %v3232_v47 = vpack.c.bf16 %v3180_v40, %v3179_v63  ;;  %v2209_v40 = vpack.c.bf16 %v2162_v4, %v2161_v56  ;;  %v3188_v14 = vld [vmem:[#allocation2 + $0x210] sm:$0xff] }
 0x236   : > { %v2163_v11 = vld [vmem:[#allocation2 + $0x269] sm:$0xff] }
 0x237   : > { %v3192_v4 = vld [vmem:[#allocation2 + $0x290] sm:$0xff] }
 0x238   : > { %10484 = vmatpush3.bf16.msra.mxu1 %v11649_v0  ;;  %v3181_v0 = vld [vmem:[#allocation2 + $0x1a8] sm:$0xff] }
 0x239   : > { %10549 = vmatprep.subr.bf16.mxu1 %v12904_v39  ;;  %v3233_v1 = vpack.c.bf16 %v3182_v62, %v3181_v0  ;;  %v3235_v62 = vpack.c.bf16 %v3186_v29, %v3185_v41  ;;  %v3190_v0 = vld [vmem:[#allocation2 + $0x270] sm:$0xff]  ;;  %v3193_v29 = vld [vmem:[#allocation2 + $0x2a8] sm:$0xff] }
 0x23a   : > { %10422 = vmatmul.mubr.bf16.gmra.mrb[44].mxu1 %v3230_v6  ;;  %10266 = vmatmul.mubr.bf16.gmra.mrb[84].mxu0 %v12906_v16  ;;  %v2160_v6 = vld [vmem:[#allocation2 + $0x1f1] sm:$0xff]  ;;  %v3237_v56 = vpack.c.bf16 %v3190_v0, %v3189_v53  ;;  %v3195_v41 = vld [vmem:[#allocation2 + $0x2c8] sm:$0xff] }
 0x23b   : > { %10425 = vmatprep.mubr.bf16.mxu1 %v3231_v32  ;;  %10269 = vmatprep.mubr.bf16.mxu0 %v12908_v33  ;;  %v3183_v32 = vld [vmem:[#allocation2 + $0x1c8] sm:$0xff]  ;;  %v12919_v8 = vpack.c.bf16 %v2160_v6, %v2159_v26  ;;  %v3200_v53 = vld [vmem:[#allocation2 + $0x310] sm:$0xff] }
 0x23c   : > { %v3234_v63 = vpack.c.bf16 %v3184_v20, %v3183_v32  ;;  %v3194_v20 = vld [vmem:[#allocation2 + $0x2b0] sm:$0xff]  ;;  %v3191_v26 = vld [vmem:[#allocation2 + $0x288] sm:$0xff] }
 0x23d   : > { %v3238_v6 = vpack.c.bf16 %v3192_v4, %v3191_v26  ;;  %v3239_v32 = vpack.c.bf16 %v3194_v20, %v3193_v29  ;;  %v3204_v4 = vld [vmem:[#allocation2 + $0x350] sm:$0xff]  ;;  %v3203_v26 = vld [vmem:[#allocation2 + $0x348] sm:$0xff] }
 0x23e   : > { %v3206_v20 = vld [vmem:[#allocation2 + $0x370] sm:$0xff]  ;;  %v3205_v29 = vld [vmem:[#allocation2 + $0x368] sm:$0xff] }
 0x242   : > { %10426 = vmatmul.mubr.bf16.gmra.mrb[48].mxu1 %v3232_v47  ;;  %10270 = vmatmul.mubr.bf16.gmra.mrb[88].mxu0 %v12913_v51  ;;  %v2164_v47 = vld [vmem:[#allocation2 + $0x271] sm:$0xff] }
 0x243   : > { %10429 = vmatprep.mubr.bf16.mxu1 %v3233_v1  ;;  %10273 = vmatprep.mubr.bf16.mxu0 %v12915_v50  ;;  %v3187_v1 = vld [vmem:[#allocation2 + $0x208] sm:$0xff]  ;;  %v12922_v52 = vpack.c.bf16 %v2164_v47, %v2163_v11 }
 0x244   : > { %v3236_v58 = vpack.c.bf16 %v3188_v14, %v3187_v1  ;;  %v3197_v14 = vld [vmem:[#allocation2 + $0x2e8] sm:$0xff] }
 0x245   : > { %v3199_v47 = vld [vmem:[#allocation2 + $0x308] sm:$0xff] }
 0x246   : > { %v3242_v0 = vpack.c.bf16 %v3200_v53, %v3199_v47  ;;  %v3201_v1 = vld [vmem:[#allocation2 + $0x328] sm:$0xff]  ;;  %v3212_v53 = vld [vmem:[#allocation2 + $0x3d0] sm:$0xff] }
 0x247   : > { %v3211_v47 = vld [vmem:[#allocation2 + $0x3c8] sm:$0xff] }
 0x24a   : > { %10430 = vmatmul.mubr.bf16.gmra.mrb[52].mxu1 %v3234_v63  ;;  %10274 = vmatmul.mubr.bf16.gmra.mrb[92].mxu0 %v12919_v8  ;;  %v3198_v63 = vld [vmem:[#allocation2 + $0x2f0] sm:$0xff] }
 0x24b   : > { %10433 = vmatprep.mubr.bf16.mxu1 %v3235_v62  ;;  %10277 = vmatprep.mubr.bf16.mxu0 %v2209_v40  ;;  %v3196_v40 = vld [vmem:[#allocation2 + $0x2d0] sm:$0xff]  ;;  %v3241_v11 = vpack.c.bf16 %v3198_v63, %v3197_v14  ;;  %v3209_v14 = vld [vmem:[#allocation2 + $0x3a8] sm:$0xff] }
 0x24c   : > { %v3240_v62 = vpack.c.bf16 %v3196_v40, %v3195_v41  ;;  %v3208_v40 = vld [vmem:[#allocation2 + $0x390] sm:$0xff]  ;;  %v3207_v41 = vld [vmem:[#allocation2 + $0x388] sm:$0xff] }
 0x24d   : > { %v3210_v63 = vld [vmem:[#allocation2 + $0x3b0] sm:$0xff] }
 0x252   : > { %10434 = vmatmul.mubr.bf16.gmra.mrb[56].mxu1 %v3236_v58  ;;  %10278 = vmatmul.mubr.bf16.gmra.mrb[96].mxu0 %v12922_v52  ;;  %v3202_v58 = vld [vmem:[#allocation2 + $0x330] sm:$0xff] }
 0x253   : > { %10437 = vmatprep.mubr.bf16.mxu1 %v3237_v56  ;;  %v3243_v56 = vpack.c.bf16 %v3202_v58, %v3201_v1  ;;  %v3214_v58 = vld [vmem:[#allocation2 + $0x3f0] sm:$0xff]  ;;  %v3213_v1 = vld [vmem:[#allocation2 + $0x3e8] sm:$0xff] }
 0x25a   : > { %10438 = vmatmul.mubr.bf16.gmra.mrb[60].mxu1 %v3238_v6  ;;  %v3244_v6 = vpack.c.bf16 %v3204_v4, %v3203_v26  ;;  %v3216_v4 = vld [vmem:[#allocation2 + $0x410] sm:$0xff]  ;;  %v3215_v26 = vld [vmem:[#allocation2 + $0x408] sm:$0xff] }
 0x25b   : > { %10441 = vmatprep.mubr.bf16.mxu1 %v3239_v32  ;;  %v3245_v32 = vpack.c.bf16 %v3206_v20, %v3205_v29  ;;  %v3218_v20 = vld [vmem:[#allocation2 + $0x430] sm:$0xff]  ;;  %v3217_v29 = vld [vmem:[#allocation2 + $0x428] sm:$0xff] }
 0x262   : > { %10442 = vmatmul.mubr.bf16.gmra.mrb[0].mxu1 %v3240_v62  ;;  %v3246_v62 = vpack.c.bf16 %v3208_v40, %v3207_v41  ;;  %v3220_v40 = vld [vmem:[#allocation2 + $0x450] sm:$0xff] }
 0x263   : > { %10445 = vmatprep.mubr.bf16.mxu1 %v3241_v11  ;;  %v3247_v11 = vpack.c.bf16 %v3210_v63, %v3209_v14  ;;  %v3219_v63 = vld [vmem:[#allocation2 + $0x448] sm:$0xff]  ;;  %v11652_v14 = vld [vmem:[%s16285_s3 + $0x190] sm:$0xff]  }
 0x264   : > { %v3252_v41 = vpack.c.bf16 %v3220_v40, %v3219_v63 }
 0x26a   : > { %10446 = vmatmul.mubr.bf16.gmra.mrb[4].mxu1 %v3242_v0  ;;  %v3248_v0 = vpack.c.bf16 %v3212_v53, %v3211_v47 }
 0x26b   : > { %10449 = vmatprep.mubr.bf16.mxu1 %v3243_v56  ;;  %v3249_v56 = vpack.c.bf16 %v3214_v58, %v3213_v1 }
 0x272   : > { %10450 = vmatmul.mubr.bf16.gmra.mrb[8].mxu1 %v3244_v6  ;;  %v3250_v6 = vpack.c.bf16 %v3216_v4, %v3215_v26 }
 0x273   : > { %10453 = vmatprep.mubr.bf16.mxu1 %v3245_v32  ;;  %v3251_v32 = vpack.c.bf16 %v3218_v20, %v3217_v29  ;;  %v3702_v29 = vld [vmem:[#allocation2 + $0x211] sm:$0xff] }
 0x27a   : > { %10454 = vmatmul.mubr.bf16.gmra.mrb[12].mxu1 %v3246_v62  ;;  %v11651_v62 = vld [vmem:[%s16285_s3 + $0x188] sm:$0xff]  }
 0x27b   : > { %10457 = vmatprep.mubr.bf16.mxu1 %v3247_v11 }
 0x282   : > { %10458 = vmatmul.mubr.bf16.gmra.mrb[16].mxu1 %v3248_v0 }
 0x283   : > { %10461 = vmatprep.mubr.bf16.mxu1 %v3249_v56 }
 0x28a   : > { %10462 = vmatmul.mubr.bf16.gmra.mrb[20].mxu1 %v3250_v6 }
 0x28b   : > { %10465 = vmatprep.mubr.bf16.mxu1 %v3251_v32 }
 0x292   : > { %10466 = vmatmul.mubr.bf16.gmra.mrb[24].mxu1 %v3252_v41  ;;  %v3705_v41 = vld [vmem:[#allocation2 + $0x289] sm:$0xff] }
 0x293   : > { %10485 = vmatprep.mubr.bf16.mxu1 %v12849_v59  ;;  %v11653_v59 = vld [vmem:[%s16285_s3 + $0x198] sm:$0xff]  }
 0x29a   : > { %10486 = vmatmul.mubr.bf16.vlgmr.msra.gmra.mrb[28].mxu1 %v12851_v15  ;;  %v11654_v15 = vld [vmem:[%s16285_s3 + $0x1a0] sm:$0xff]  }
 0x29b   : > { %10550 = vmatpush3.bf16.msra.mxu1 %v12904_v39  ;;  %10489 = vmatprep.mubr.bf16.mxu1 %v12855_v57  ;;  %v11655_v57 = vld [vmem:[%s16285_s3 + $0x1a8] sm:$0xff]  }
 0x29c   : > { %10551 = vmatprep.subr.bf16.mxu1 %v11651_v62 }
 0x29f   : > { %10552 = vmatpush3.bf16.msra.mxu1 %v11651_v62  ;;  %v3706_v62 = vld [vmem:[#allocation2 + $0x291] sm:$0xff] }
 0x2a0   : > { %10553 = vmatprep.subr.bf16.mxu1 %v11652_v14 }
 0x2a2   : > { %10490 = vmatmul.mubr.bf16.gmra.mrb[32].mxu1 %v12861_v7  ;;  %v11656_v7 = vld [vmem:[%s16285_s3 + $0x1b0] sm:$0xff]  }
 0x2a3   : > { %10493 = vmatprep.mubr.bf16.mxu1 %v12868_v46  ;;  %10554 = vmatpush3.bf16.msra.mxu1 %v11652_v14 }
 0x2a4   : > { %10555 = vmatprep.subr.bf16.mxu1 %v11653_v59 }
 0x2a7   : > { %10556 = vmatpush3.bf16.msra.mxu1 %v11653_v59 }
 0x2a8   : > { %10557 = vmatprep.subr.bf16.mxu1 %v11654_v15 }
 0x2aa   : > { %10494 = vmatmul.mubr.bf16.gmra.mrb[36].mxu1 %v12870_v38  ;;  %v11657_v38 = vld [vmem:[%s16285_s3 + $0x1b8] sm:$0xff]  }
 0x2ab   : > { %10497 = vmatprep.mubr.bf16.mxu1 %v12880_v28  ;;  %10558 = vmatpush3.bf16.msra.mxu1 %v11654_v15  ;;  %v12967_v28 = vld [vmem:[%s16285_s3 + $0x1c0] sm:$0xff]  }
 0x2ac   : > { %10559 = vmatprep.subr.bf16.mxu1 %v11655_v57 }
 0x2ad   : > { %v12951_v46 = vpop.f32.mrb[100].mxu0 }
 0x2ae   : > { %16536 = vst [vmem:[#allocation41_spill] sm:$0xff] %v12951_v46  ;;  %v12953_v39 = vpop.f32.mrb[101].mxu0  ;;  %v4212_v46 = vld [vmem:[#allocation2 + $0x1e7] sm:$0xff] }
 0x2af   : > { %16537 = vst [vmem:[#allocation42_spill] sm:$0xff] %v12953_v39  ;;  %v12955_v11 = vpop.f32.mrb[102].mxu0  ;;  %10560 = vmatpush3.bf16.msra.mxu1 %v11655_v57  ;;  %v3752_v57 = vpack.c.bf16 %v3706_v62, %v3705_v41  ;;  %v3713_v41 = vld [vmem:[#allocation2 + $0x309] sm:$0xff]  ;;  %v3714_v62 = vld [vmem:[#allocation2 + $0x311] sm:$0xff] }
 0x2b0   : > { %16538 = vst [vmem:[#allocation43_spill] sm:$0xff] %v12955_v11  ;;  %v12957_v53 = vpop.f32.mrb[103].mxu0  ;;  %10561 = vmatprep.subr.bf16.mxu1 %v11656_v7  ;;  %v13031_v12 = vpack.c.bf16 %v3714_v62, %v3713_v41  ;;  %v4213_v11 = vld [vmem:[#allocation2 + $0x1ef] sm:$0xff] }
 0x2b1   : > { %16539 = vst [vmem:[#allocation44_spill] sm:$0xff] %v12957_v53  ;;  %v4215_v39 = vld [vmem:[#allocation2 + $0x20f] sm:$0xff] }
 0x2b2   : > { %10498 = vmatmul.mubr.bf16.gmra.mrb[40].mxu1 %v12882_v19 }
 0x2b3   : > { %10501 = vmatprep.mubr.bf16.mxu1 %v12892_v21  ;;  %10562 = vmatpush3.bf16.msra.mxu1 %v11656_v7 }
 0x2b4   : > { %10563 = vmatprep.subr.bf16.mxu1 %v11657_v38 }
 0x2b5   : > { %v12969_v58 = vpop.f32.mrb[104].mxu0 }
 0x2b6   : > { %16540 = vst [vmem:[#allocation45_spill] sm:$0xff] %v12969_v58  ;;  %v12971_v47 = vpop.f32.mrb[105].mxu0  ;;  %v11665_v58 = vld [vmem:[%s16285_s3 + $0x1f8] sm:$0xff]  }
 0x2b7   : > { %16541 = vst [vmem:[#allocation46_spill] sm:$0xff] %v12971_v47  ;;  %v12973_v0 = vpop.f32.mrb[106].mxu0  ;;  %10564 = vmatpush3.bf16.msra.mxu1 %v11657_v38  ;;  %v4202_v47 = vld [vmem:[#allocation2 + $0x147] sm:$0xff] }
 0x2b8   : > { %16542 = vst [vmem:[#allocation47_spill] sm:$0xff] %v12973_v0  ;;  %v12975_v1 = vpop.f32.mrb[107].mxu0  ;;  %10629 = vmatprep.subr.bf16.mxu1 %v12967_v28  ;;  %v4201_v0 = vld [vmem:[#allocation2 + $0x12f] sm:$0xff] }
 0x2b9   : > { %16543 = vst [vmem:[#allocation48_spill] sm:$0xff] %v12975_v1 }
 0x2ba   : > { %10502 = vmatmul.mubr.bf16.gmra.mrb[44].mxu1 %v12894_v27 }
 0x2bb   : > { %10505 = vmatprep.mubr.bf16.mxu1 %v12906_v16  ;;  %v3701_v16 = vld [vmem:[#allocation2 + $0x209] sm:$0xff] }
 0x2bd   : > { %v12980_v19 = vpop.f32.mrb[108].mxu0 }
 0x2be   : > { %16544 = vst [vmem:[#allocation49_spill] sm:$0xff] %v12980_v19  ;;  %v12982_v21 = vpop.f32.mrb[109].mxu0 }
 0x2bf   : > { %16545 = vst [vmem:[#allocation50_spill] sm:$0xff] %v12982_v21  ;;  %v12984_v56 = vpop.f32.mrb[110].mxu0  ;;  %v4196_v21 = vld [vmem:[#allocation2 + $0xe7] sm:$0xff] }
 0x2c0   : > { %16546 = vst [vmem:[#allocation51_spill] sm:$0xff] %v12984_v56  ;;  %v12986_v4 = vpop.f32.mrb[111].mxu0  ;;  %v4197_v56 = vld [vmem:[#allocation2 + $0xef] sm:$0xff] }
 0x2c1   : > { %16547 = vst [vmem:[#allocation52_spill] sm:$0xff] %v12986_v4  ;;  %v11662_v4 = vld [vmem:[%s16285_s3 + $0x1e0] sm:$0xff]   ;;  %v4255_v1 = vpack.c.bf16 %v4197_v56, %v4196_v21 }
 0x2c2   : > { %10506 = vmatmul.mubr.bf16.gmra.mrb[48].mxu1 %v12908_v33  ;;  %v4200_v21 = vld [vmem:[#allocation2 + $0x127] sm:$0xff] }
 0x2c3   : > { %10509 = vmatprep.mubr.bf16.mxu1 %v12913_v51  ;;  %v3750_v51 = vpack.c.bf16 %v3702_v29, %v3701_v16  ;;  %v3709_v16 = vld [vmem:[#allocation2 + $0x2c9] sm:$0xff]  ;;  %v3710_v29 = vld [vmem:[#allocation2 + $0x2d1] sm:$0xff]  ;;  %v4257_v56 = vpack.c.bf16 %v4201_v0, %v4200_v21 }
 0x2c4   : > { %v3754_v34 = vpack.c.bf16 %v3710_v29, %v3709_v16  ;;  %v3719_v29 = vld [vmem:[#allocation2 + $0x369] sm:$0xff] }
 0x2c5   : > { %v12990_v20 = vpop.f32.mrb[112].mxu0 }
 0x2c6   : > { %16548 = vst [vmem:[#allocation53_spill] sm:$0xff] %v12990_v20  ;;  %v12992_v26 = vpop.f32.mrb[113].mxu0 }
 0x2c7   : > { %16549 = vst [vmem:[#allocation54_spill] sm:$0xff] %v12992_v26  ;;  %v12994_v6 = vpop.f32.mrb[114].mxu0  ;;  %v4192_v26 = vld [vmem:[#allocation2 + $0xa7] sm:$0xff] }
 0x2c8   : > { %16550 = vst [vmem:[#allocation55_spill] sm:$0xff] %v12994_v6  ;;  %v12996_v27 = vpop.f32.mrb[115].mxu0 }
 0x2c9   : > { %16551 = vst [vmem:[#allocation56_spill] sm:$0xff] %v12996_v27  ;;  %v4190_v27 = vld [vmem:[#allocation2 + $0x87] sm:$0xff] }
 0x2ca   : > { %10510 = vmatmul.mubr.bf16.gmra.mrb[52].mxu1 %v12915_v50  ;;  %v3707_v50 = vld [vmem:[#allocation2 + $0x2a9] sm:$0xff] }
 0x2cb   : > { %10513 = vmatprep.mubr.bf16.mxu1 %v12919_v8  ;;  %v3708_v8 = vld [vmem:[#allocation2 + $0x2b1] sm:$0xff] }
 0x2cc   : > { %v3753_v38 = vpack.c.bf16 %v3708_v8, %v3707_v50  ;;  %v3715_v8 = vld [vmem:[#allocation2 + $0x329] sm:$0xff] }
 0x2cd   : > { %v13000_v32 = vpop.f32.mrb[116].mxu0 }
 0x2ce   : > { %16552 = vst [vmem:[#allocation57_spill] sm:$0xff] %v13000_v32  ;;  %v13002_v40 = vpop.f32.mrb[117].mxu0 }
 0x2cf   : > { %16553 = vst [vmem:[#allocation58_spill] sm:$0xff] %v13002_v40  ;;  %v13004_v33 = vpop.f32.mrb[118].mxu0 }
 0x2d0   : > { %16554 = vst [vmem:[#allocation59_spill] sm:$0xff] %v13004_v33  ;;  %v13006_v63 = vpop.f32.mrb[119].mxu0  ;;  %v4188_v33 = vld [vmem:[#allocation2 + $0x67] sm:$0xff] }
 0x2d1   : > { %16555 = vst [vmem:[#allocation60_spill] sm:$0xff] %v13006_v63 }
 0x2d2   : > { %10514 = vmatmul.mubr.bf16.gmra.mrb[56].mxu1 %v3750_v51 }
 0x2d3   : > { %10517 = vmatprep.mubr.bf16.mxu1 %v12922_v52  ;;  %v3711_v52 = vld [vmem:[#allocation2 + $0x2e9] sm:$0xff] }
 0x2d4   : > { %v3755_v22 = vpack.c.bf16 %v3712_v45, %v3711_v52  ;;  %v3720_v52 = vld [vmem:[#allocation2 + $0x371] sm:$0xff] }
 0x2d5   : > { %v13009_v14 = vpop.f32.mrb[120].mxu0 }
 0x2d6   : > { %16556 = vst [vmem:[#allocation61_spill] sm:$0xff] %v13009_v14  ;;  %v13011_v59 = vpop.f32.mrb[121].mxu0  ;;  %v4191_v14 = vld [vmem:[#allocation2 + $0x8f] sm:$0xff] }
 0x2d7   : > { %16557 = vst [vmem:[#allocation62_spill] sm:$0xff] %v13011_v59  ;;  %v13013_v15 = vpop.f32.mrb[122].mxu0 }
 0x2d8   : > { %16558 = vst [vmem:[#allocation63_spill] sm:$0xff] %v13013_v15  ;;  %v13015_v7 = vpop.f32.mrb[123].mxu0 }
 0x2d9   : > { %16559 = vst [vmem:[#allocation64_spill] sm:$0xff] %v13015_v7 }
 0x2da   : > { %10518 = vmatmul.mubr.bf16.gmra.mrb[60].mxu1 %v3752_v57  ;;  %v3716_v57 = vld [vmem:[#allocation2 + $0x331] sm:$0xff] }
 0x2db   : > { %10521 = vmatprep.mubr.bf16.mxu1 %v3753_v38  ;;  %v13035_v16 = vpack.c.bf16 %v3716_v57, %v3715_v8  ;;  %v13049_v8 = vpack.c.bf16 %v3720_v52, %v3719_v29  ;;  %v3721_v57 = vld [vmem:[#allocation2 + $0x389] sm:$0xff]  ;;  %v13063_v29 = vpack.c.bf16 %v3724_v49, %v3723_v54  ;;  %v13077_v49 = vpack.c.bf16 %v3728_v31, %v3727_v36 }
 0x2dc   : > { %v3725_v52 = vld [vmem:[#allocation2 + $0x3c9] sm:$0xff]  ;;  %v13091_v31 = vpack.c.bf16 %v3732_v10, %v3731_v17 }
 0x2dd   : > { %v13017_v51 = vpop.f32.mrb[124].mxu0  ;;  %v3729_v54 = vld [vmem:[#allocation2 + $0x409] sm:$0xff] }
 0x2de   : > { %16560 = vst [vmem:[#allocation65_spill] sm:$0xff] %v13017_v51  ;;  %v13019_v44 = vpop.f32.mrb[125].mxu0  ;;  %v3733_v36 = vld [vmem:[#allocation2 + $0x449] sm:$0xff] }
 0x2df   : > { %16561 = vst [vmem:[#allocation66_spill] sm:$0xff] %v13019_v44  ;;  %v13021_v35 = vpop.f32.mrb[126].mxu0  ;;  %v4187_v44 = vld [vmem:[#allocation2 + $0x4f] sm:$0xff] }
 0x2e0   : > { %16562 = vst [vmem:[#allocation67_spill] sm:$0xff] %v13021_v35  ;;  %v13023_v23 = vpop.f32.mrb[127].mxu0  ;;  %v4189_v17 = vld [vmem:[#allocation2 + $0x6f] sm:$0xff] }
 0x2e1   : > { %16563 = vst [vmem:[#allocation68_spill] sm:$0xff] %v13023_v23  ;;  %v3734_v23 = vld [vmem:[#allocation2 + $0x451] sm:$0xff]  ;;  %v4251_v32 = vpack.c.bf16 %v4189_v17, %v4188_v33 }
 0x2e2   : > { %10522 = vmatmul.mubr.bf16.gmra.mrb[0].mxu1 %v3754_v34  ;;  %v3718_v34 = vld [vmem:[#allocation2 + $0x351] sm:$0xff]  ;;  %v13101_v15 = vpack.c.bf16 %v3734_v23, %v3733_v36  ;;  %v4252_v36 = vpack.c.bf16 %v4191_v14, %v4190_v27 }
 0x2e3   : > { %10525 = vmatprep.mubr.bf16.mxu1 %v3755_v22  ;;  %v3717_v22 = vld [vmem:[#allocation2 + $0x349] sm:$0xff] }
 0x2e4   : > { %v13045_v41 = vpack.c.bf16 %v3718_v34, %v3717_v22  ;;  %v13059_v22 = vpack.c.bf16 %v3722_v60, %v3721_v57  ;;  %v13073_v60 = vpack.c.bf16 %v3726_v42, %v3725_v52  ;;  %v13087_v42 = vpack.c.bf16 %v3730_v24, %v3729_v54  ;;  %v4186_v24 = vld [vmem:[#allocation2 + $0x47] sm:$0xff]  ;;  %v4195_v33 = vld [vmem:[#allocation2 + $0xcf] sm:$0xff] }
 0x2e5   : > { %v13025_v50 = vpop.f32.mrb[64].mxu0  ;;  %v4250_v10 = vpack.c.bf16 %v4187_v44, %v4186_v24  ;;  %v11659_v44 = vld [vmem:[%s16285_s3 + $0x1c8] sm:$0xff]   ;;  %v11660_v24 = vld [vmem:[%s16285_s3 + $0x1d0] sm:$0xff]  }
 0x2e6   : > { %v13027_v38 = vpop.f32.mrb[65].mxu0 }
 0x2e7   : > { %v13029_v13 = vpop.f32.mrb[66].mxu0 }
 0x2e8   : > { %v13033_v3 = vpop.f32.mrb[67].mxu0 }
 0x2ea   : > { %10526 = vmatmul.mubr.bf16.gmra.mrb[4].mxu1 %v13031_v12 }
 0x2eb   : > { %10529 = vmatprep.mubr.bf16.mxu1 %v13035_v16 }
 0x2ed   : > { %v13039_v45 = vpop.f32.mrb[68].mxu0 }
 0x2ee   : > { %v13041_v2 = vpop.f32.mrb[69].mxu0 }
 0x2ef   : > { %v13043_v61 = vpop.f32.mrb[70].mxu0 }
 0x2f0   : > { %v13047_v62 = vpop.f32.mrb[71].mxu0 }
 0x2f2   : > { %10530 = vmatmul.mubr.bf16.gmra.mrb[8].mxu1 %v13045_v41 }
 0x2f3   : > { %10533 = vmatprep.mubr.bf16.mxu1 %v13049_v8 }
 0x2f5   : > { %v13053_v55 = vpop.f32.mrb[72].mxu0 }
 0x2f6   : > { %v13055_v48 = vpop.f32.mrb[73].mxu0 }
 0x2f7   : > { %v13057_v43 = vpop.f32.mrb[74].mxu0 }
 0x2f8   : > { %v13061_v34 = vpop.f32.mrb[75].mxu0 }
 0x2fa   : > { %10534 = vmatmul.mubr.bf16.gmra.mrb[12].mxu1 %v13059_v22 }
 0x2fb   : > { %10537 = vmatprep.mubr.bf16.mxu1 %v13063_v29 }
 0x2fd   : > { %v13067_v37 = vpop.f32.mrb[76].mxu0 }
 0x2fe   : > { %v13069_v30 = vpop.f32.mrb[77].mxu0 }
 0x2ff   : > { %v13071_v25 = vpop.f32.mrb[78].mxu0 }
 0x300   : > { %v13075_v57 = vpop.f32.mrb[79].mxu0 }
 0x302   : > { %10538 = vmatmul.mubr.bf16.gmra.mrb[16].mxu1 %v13073_v60 }
 0x303   : > { %10541 = vmatprep.mubr.bf16.mxu1 %v13077_v49 }
 0x305   : > { %v13081_v18 = vpop.f32.mrb[80].mxu0 }
 0x306   : > { %v13083_v9 = vpop.f32.mrb[81].mxu0 }
 0x307   : > { %v13085_v5 = vpop.f32.mrb[82].mxu0 }
 0x308   : > { %v13089_v52 = vpop.f32.mrb[83].mxu0 }
 0x30a   : > { %10542 = vmatmul.mubr.bf16.gmra.mrb[20].mxu1 %v13087_v42 }
 0x30b   : > { %10545 = vmatprep.mubr.bf16.mxu1 %v13091_v31 }
 0x30d   : > { %v13095_v35 = vpop.f32.mrb[84].mxu0 }
 0x30e   : > { %v13097_v51 = vpop.f32.mrb[85].mxu0 }
 0x30f   : > { %v13099_v7 = vpop.f32.mrb[86].mxu0 }
 0x310   : > { %v13103_v54 = vpop.f32.mrb[87].mxu0 }
 0x312   : > { %10546 = vmatmul.mubr.bf16.gmra.mrb[24].mxu1 %v13101_v15 }
 0x313   : > { %10565 = vmatprep.mubr.bf16.mxu1 %v4250_v10  ;;  %v4193_v10 = vld [vmem:[#allocation2 + $0xaf] sm:$0xff] }
 0x314   : > { %v4253_v27 = vpack.c.bf16 %v4193_v10, %v4192_v26  ;;  %v4199_v26 = vld [vmem:[#allocation2 + $0x10f] sm:$0xff] }
 0x315   : > { %v13106_v59 = vpop.f32.mrb[88].mxu0 }
 0x316   : > { %v13108_v63 = vpop.f32.mrb[89].mxu0 }
 0x317   : > { %v13110_v40 = vpop.f32.mrb[90].mxu0 }
 0x318   : > { %v13112_v23 = vpop.f32.mrb[91].mxu0 }
 0x31a   : > { %10566 = vmatmul.mubr.bf16.vlgmr.msra.gmra.mrb[28].mxu1 %v4251_v32  ;;  %v4194_v32 = vld [vmem:[#allocation2 + $0xc7] sm:$0xff] }
 0x31b   : > { %10630 = vmatpush3.bf16.msra.mxu1 %v12967_v28  ;;  %10569 = vmatprep.mubr.bf16.mxu1 %v4252_v36  ;;  %v11661_v28 = vld [vmem:[%s16285_s3 + $0x1d8] sm:$0xff]   ;;  %v4254_v36 = vpack.c.bf16 %v4195_v33, %v4194_v32  ;;  %v4198_v33 = vld [vmem:[#allocation2 + $0x107] sm:$0xff] }
 0x31c   : > { %10631 = vmatprep.subr.bf16.mxu1 %v11659_v44  ;;  %v4256_v32 = vpack.c.bf16 %v4199_v26, %v4198_v33  ;;  %v4207_v33 = vld [vmem:[#allocation2 + $0x18f] sm:$0xff] }
 0x31d   : > { %v13121_v6 = vpop.f32.mrb[92].mxu0 }
 0x31e   : > { %v13123_v17 = vpop.f32.mrb[93].mxu0 }
 0x31f   : > { %v13125_v20 = vpop.f32.mrb[94].mxu0  ;;  %10632 = vmatpush3.bf16.msra.mxu1 %v11659_v44 }
 0x320   : > { %v13127_v14 = vpop.f32.mrb[95].mxu0  ;;  %10633 = vmatprep.subr.bf16.mxu1 %v11660_v24 }
 0x322   : > { %10570 = vmatmul.mubr.bf16.gmra.mrb[32].mxu1 %v4253_v27 }
 0x323   : > { %10573 = vmatprep.mubr.bf16.mxu1 %v4254_v36  ;;  %10634 = vmatpush3.bf16.msra.mxu1 %v11660_v24  ;;  %v11663_v24 = vld [vmem:[%s16285_s3 + $0x1e8] sm:$0xff]   ;;  %v11664_v36 = vld [vmem:[%s16285_s3 + $0x1f0] sm:$0xff]  }
 0x324   : > { %10635 = vmatprep.subr.bf16.mxu1 %v11661_v28 }
 0x325   : > { %v13135_v44 = vpop.f32.mrb[96].mxu0 }
 0x326   : > { %v13137_v10 = vpop.f32.mrb[97].mxu0 }
 0x327   : > { %v13139_v19 = vpop.f32.mrb[98].mxu0  ;;  %10636 = vmatpush3.bf16.msra.mxu1 %v11661_v28  ;;  %v4203_v28 = vld [vmem:[#allocation2 + $0x14f] sm:$0xff] }
 0x328   : > { %16564 = vst [vmem:[#allocation69_spill] sm:$0xff] %v13139_v19  ;;  %v13141_v27 = vpop.f32.mrb[99].mxu0  ;;  %10637 = vmatprep.subr.bf16.mxu1 %v11662_v4  ;;  %v4258_v26 = vpack.c.bf16 %v4203_v28, %v4202_v47  ;;  %v4209_v47 = vld [vmem:[#allocation2 + $0x1af] sm:$0xff] }
 0x329   : > { %16565 = vst [vmem:[#allocation70_spill] sm:$0xff] %v13141_v27  ;;  %v4211_v28 = vld [vmem:[#allocation2 + $0x1cf] sm:$0xff]  ;;  %v4263_v27 = vpack.c.bf16 %v4213_v11, %v4212_v46  ;;  %v4224_v11 = vld [vmem:[#allocation2 + $0x2e7] sm:$0xff] }
 0x32a   : > { %10574 = vmatmul.mubr.bf16.gmra.mrb[36].mxu1 %v4255_v1  ;;  %v13155_v1 = vld [vmem:[%s16285_s3 + $0x200] sm:$0xff]   ;;  %v4225_v46 = vld [vmem:[#allocation2 + $0x2ef] sm:$0xff] }
 0x32b   : > { %10577 = vmatprep.mubr.bf16.mxu1 %v4256_v32  ;;  %10638 = vmatpush3.bf16.msra.mxu1 %v11662_v4  ;;  %v4205_v4 = vld [vmem:[#allocation2 + $0x16f] sm:$0xff]  ;;  %v4206_v32 = vld [vmem:[#allocation2 + $0x187] sm:$0xff] }
 0x32c   : > { %10639 = vmatprep.subr.bf16.mxu1 %v11663_v24  ;;  %v4260_v21 = vpack.c.bf16 %v4207_v33, %v4206_v32  ;;  %v4217_v33 = vld [vmem:[#allocation2 + $0x22f] sm:$0xff] }
 0x32d   : > { %v4219_v32 = vld [vmem:[#allocation2 + $0x28f] sm:$0xff] }
 0x32f   : > { %10640 = vmatpush3.bf16.msra.mxu1 %v11663_v24  ;;  %v4204_v24 = vld [vmem:[#allocation2 + $0x167] sm:$0xff] }
 0x330   : > { %10641 = vmatprep.subr.bf16.mxu1 %v11664_v36  ;;  %v4259_v0 = vpack.c.bf16 %v4205_v4, %v4204_v24  ;;  %v4216_v24 = vld [vmem:[#allocation2 + $0x227] sm:$0xff] }
 0x332   : > { %10578 = vmatmul.mubr.bf16.gmra.mrb[40].mxu1 %v4257_v56 }
 0x333   : > { %10581 = vmatprep.mubr.bf16.mxu1 %v4258_v26  ;;  %10642 = vmatpush3.bf16.msra.mxu1 %v11664_v36  ;;  %v4208_v36 = vld [vmem:[#allocation2 + $0x1a7] sm:$0xff] }
 0x334   : > { %10643 = vmatprep.subr.bf16.mxu1 %v11665_v58  ;;  %v4261_v56 = vpack.c.bf16 %v4209_v47, %v4208_v36  ;;  %v4210_v26 = vld [vmem:[#allocation2 + $0x1c7] sm:$0xff]  ;;  %v4221_v47 = vld [vmem:[#allocation2 + $0x2af] sm:$0xff] }
 0x335   : > { %v4262_v53 = vpack.c.bf16 %v4211_v28, %v4210_v26  ;;  %v4223_v28 = vld [vmem:[#allocation2 + $0x2cf] sm:$0xff]  ;;  %v4220_v36 = vld [vmem:[#allocation2 + $0x2a7] sm:$0xff] }
 0x337   : > { %10644 = vmatpush3.bf16.msra.mxu1 %v11665_v58  ;;  %v4214_v58 = vld [vmem:[#allocation2 + $0x207] sm:$0xff] }
 0x338   : > { %10709 = vmatprep.subr.bf16.mxu1 %v13155_v1  ;;  %v4264_v4 = vpack.c.bf16 %v4215_v39, %v4214_v58  ;;  %v4227_v39 = vld [vmem:[#allocation2 + $0x30f] sm:$0xff]  ;;  %v4226_v58 = vld [vmem:[#allocation2 + $0x307] sm:$0xff] }
 0x33a   : > { %10582 = vmatmul.mubr.bf16.gmra.mrb[44].mxu1 %v4259_v0  ;;  %v4265_v0 = vpack.c.bf16 %v4217_v33, %v4216_v24  ;;  %v4229_v24 = vld [vmem:[#allocation2 + $0x32f] sm:$0xff] }
 0x33b   : > { %10585 = vmatprep.mubr.bf16.mxu1 %v4260_v21  ;;  %v4218_v21 = vld [vmem:[#allocation2 + $0x287] sm:$0xff]  ;;  %v4231_v33 = vld [vmem:[#allocation2 + $0x34f] sm:$0xff] }
 0x33c   : > { %v4266_v19 = vpack.c.bf16 %v4219_v32, %v4218_v21  ;;  %v4230_v32 = vld [vmem:[#allocation2 + $0x347] sm:$0xff] }
 0x33d   : > { %v4272_v21 = vpack.c.bf16 %v4231_v33, %v4230_v32  ;;  %v4243_v33 = vld [vmem:[#allocation2 + $0x40f] sm:$0xff]  ;;  %v4242_v32 = vld [vmem:[#allocation2 + $0x407] sm:$0xff] }
 0x342   : > { %10586 = vmatmul.mubr.bf16.gmra.mrb[48].mxu1 %v4261_v56  ;;  %v4222_v56 = vld [vmem:[#allocation2 + $0x2c7] sm:$0xff] }
 0x343   : > { %10589 = vmatprep.mubr.bf16.mxu1 %v4262_v53  ;;  %v4267_v53 = vpack.c.bf16 %v4221_v47, %v4220_v36  ;;  %v4268_v26 = vpack.c.bf16 %v4223_v28, %v4222_v56  ;;  %v4233_v47 = vld [vmem:[#allocation2 + $0x36f] sm:$0xff]  ;;  %v4232_v36 = vld [vmem:[#allocation2 + $0x367] sm:$0xff] }
 0x344   : > { %v4235_v28 = vld [vmem:[#allocation2 + $0x38f] sm:$0xff]  ;;  %v4234_v56 = vld [vmem:[#allocation2 + $0x387] sm:$0xff] }
 0x34a   : > { %10590 = vmatmul.mubr.bf16.gmra.mrb[52].mxu1 %v4263_v27  ;;  %v4269_v27 = vpack.c.bf16 %v4225_v46, %v4224_v11  ;;  %v4237_v46 = vld [vmem:[#allocation2 + $0x3af] sm:$0xff]  ;;  %v4236_v11 = vld [vmem:[#allocation2 + $0x3a7] sm:$0xff] }
 0x34b   : > { %10593 = vmatprep.mubr.bf16.mxu1 %v4264_v4  ;;  %v4270_v4 = vpack.c.bf16 %v4227_v39, %v4226_v58  ;;  %v4239_v39 = vld [vmem:[#allocation2 + $0x3cf] sm:$0xff]  ;;  %v4238_v58 = vld [vmem:[#allocation2 + $0x3c7] sm:$0xff] }
 0x352   : > { %10594 = vmatmul.mubr.bf16.gmra.mrb[56].mxu1 %v4265_v0  ;;  %v4228_v0 = vld [vmem:[#allocation2 + $0x327] sm:$0xff] }
 0x353   : > { %10597 = vmatprep.mubr.bf16.mxu1 %v4266_v19  ;;  %v4271_v19 = vpack.c.bf16 %v4229_v24, %v4228_v0  ;;  %v4241_v24 = vld [vmem:[#allocation2 + $0x3ef] sm:$0xff]  ;;  %v4240_v0 = vld [vmem:[#allocation2 + $0x3e7] sm:$0xff] }
 0x35a   : > { %10598 = vmatmul.mubr.bf16.gmra.mrb[60].mxu1 %v4267_v53  ;;  %v4273_v53 = vpack.c.bf16 %v4233_v47, %v4232_v36  ;;  %v4245_v47 = vld [vmem:[#allocation2 + $0x42f] sm:$0xff]  ;;  %v4244_v36 = vld [vmem:[#allocation2 + $0x427] sm:$0xff] }
 0x35b   : > { %10601 = vmatprep.mubr.bf16.mxu1 %v4268_v26  ;;  %v4274_v26 = vpack.c.bf16 %v4235_v28, %v4234_v56  ;;  %v4247_v28 = vld [vmem:[#allocation2 + $0x44f] sm:$0xff]  ;;  %v4246_v56 = vld [vmem:[#allocation2 + $0x447] sm:$0xff] }
 0x362   : > { %10602 = vmatmul.mubr.bf16.gmra.mrb[0].mxu1 %v4269_v27  ;;  %v4275_v27 = vpack.c.bf16 %v4237_v46, %v4236_v11  ;;  %v4248_v46 = vld [vmem:[#allocation2 + $0x467] sm:$0xff] }
 0x363   : > { %10605 = vmatprep.mubr.bf16.mxu1 %v4270_v4  ;;  %v4276_v4 = vpack.c.bf16 %v4239_v39, %v4238_v58  ;;  %v4249_v39 = vld [vmem:[#allocation2 + $0x46f] sm:$0xff] }
 0x364   : > { %v4281_v11 = vpack.c.bf16 %v4249_v39, %v4248_v46  ;;  %v4700_v58 = vld [vmem:[#allocation2 + $0x48] sm:$0xff]  ;;  %v11669_v39 = vld [vmem:[%s16285_s3 + $0x218] sm:$0xff]  }
 0x365   : > { %v4708_v46 = vld [vmem:[#allocation2 + $0xc8] sm:$0xff] }
 0x36a   : > { %10606 = vmatmul.mubr.bf16.gmra.mrb[4].mxu1 %v4271_v19  ;;  %v4277_v19 = vpack.c.bf16 %v4241_v24, %v4240_v0  ;;  %v4703_v24 = vld [vmem:[#allocation2 + $0x70] sm:$0xff]  ;;  %v4702_v0 = vld [vmem:[#allocation2 + $0x68] sm:$0xff] }
 0x36b   : > { %10609 = vmatprep.mubr.bf16.mxu1 %v4272_v21  ;;  %v4278_v21 = vpack.c.bf16 %v4243_v33, %v4242_v32  ;;  %v4705_v33 = vld [vmem:[#allocation2 + $0x90] sm:$0xff]  ;;  %v4704_v32 = vld [vmem:[#allocation2 + $0x88] sm:$0xff] }
 0x372   : > { %10610 = vmatmul.mubr.bf16.gmra.mrb[8].mxu1 %v4273_v53  ;;  %v4279_v53 = vpack.c.bf16 %v4245_v47, %v4244_v36  ;;  %v4766_v47 = vpack.c.bf16 %v4705_v33, %v4704_v32  ;;  %v4707_v36 = vld [vmem:[#allocation2 + $0xb0] sm:$0xff]  ;;  %v4712_v33 = vld [vmem:[#allocation2 + $0x108] sm:$0xff] }
 0x373   : > { %10613 = vmatprep.mubr.bf16.mxu1 %v4274_v26  ;;  %v4280_v26 = vpack.c.bf16 %v4247_v28, %v4246_v56  ;;  %v11668_v28 = vld [vmem:[%s16285_s3 + $0x210] sm:$0xff]   ;;  %v4706_v56 = vld [vmem:[#allocation2 + $0xa8] sm:$0xff] }
 0x374   : > { %v11672_v32 = vld [vmem:[%s16285_s3 + $0x230] sm:$0xff]  }
 0x37a   : > { %10614 = vmatmul.mubr.bf16.gmra.mrb[12].mxu1 %v4275_v27  ;;  %v4701_v27 = vld [vmem:[#allocation2 + $0x50] sm:$0xff] }
 0x37b   : > { %10617 = vmatprep.mubr.bf16.mxu1 %v4276_v4  ;;  %v4764_v4 = vpack.c.bf16 %v4701_v27, %v4700_v58  ;;  %v4711_v27 = vld [vmem:[#allocation2 + $0xf0] sm:$0xff] }
 0x37c   : > { %v4713_v58 = vld [vmem:[#allocation2 + $0x110] sm:$0xff] }
 0x382   : > { %10618 = vmatmul.mubr.bf16.gmra.mrb[16].mxu1 %v4277_v19  ;;  %v4765_v19 = vpack.c.bf16 %v4703_v24, %v4702_v0  ;;  %v11671_v0 = vld [vmem:[%s16285_s3 + $0x228] sm:$0xff]  }
 0x383   : > { %10621 = vmatprep.mubr.bf16.mxu1 %v4278_v21  ;;  %v11667_v21 = vld [vmem:[%s16285_s3 + $0x208] sm:$0xff]  }
 0x38a   : > { %10622 = vmatmul.mubr.bf16.gmra.mrb[20].mxu1 %v4279_v53  ;;  %v4709_v53 = vld [vmem:[#allocation2 + $0xd0] sm:$0xff] }
 0x38b   : > { %10625 = vmatprep.mubr.bf16.mxu1 %v4280_v26  ;;  %v4767_v26 = vpack.c.bf16 %v4707_v36, %v4706_v56  ;;  %v11673_v56 = vld [vmem:[%s16285_s3 + $0x238] sm:$0xff]  }
 0x392   : > { %10626 = vmatmul.mubr.bf16.gmra.mrb[24].mxu1 %v4281_v11  ;;  %v4768_v11 = vpack.c.bf16 %v4709_v53, %v4708_v46  ;;  %v4716_v53 = vld [vmem:[#allocation2 + $0x148] sm:$0xff]  ;;  %v4719_v46 = vld [vmem:[#allocation2 + $0x170] sm:$0xff] }
 0x393   : > { %10645 = vmatprep.mubr.bf16.mxu1 %v4764_v4  ;;  %v4710_v4 = vld [vmem:[#allocation2 + $0xe8] sm:$0xff] }
 0x394   : > { %v4769_v24 = vpack.c.bf16 %v4711_v27, %v4710_v4  ;;  %v4720_v27 = vld [vmem:[#allocation2 + $0x188] sm:$0xff]  ;;  %v4723_v4 = vld [vmem:[#allocation2 + $0x1b0] sm:$0xff] }
 0x39a   : > { %10646 = vmatmul.mubr.bf16.vlgmr.msra.gmra.mrb[28].mxu1 %v4765_v19  ;;  %v4770_v19 = vpack.c.bf16 %v4713_v58, %v4712_v33  ;;  %v4722_v33 = vld [vmem:[#allocation2 + $0x1a8] sm:$0xff] }
 0x39b   : > { %10710 = vmatpush3.bf16.msra.mxu1 %v13155_v1  ;;  %10649 = vmatprep.mubr.bf16.mxu1 %v4766_v47  ;;  %v11670_v1 = vld [vmem:[%s16285_s3 + $0x220] sm:$0xff]   ;;  %v4717_v47 = vld [vmem:[#allocation2 + $0x150] sm:$0xff] }
 0x39c   : > { %10711 = vmatprep.subr.bf16.mxu1 %v11667_v21 }
 0x39f   : > { %10712 = vmatpush3.bf16.msra.mxu1 %v11667_v21  ;;  %v4715_v21 = vld [vmem:[#allocation2 + $0x130] sm:$0xff] }
 0x3a0   : > { %10713 = vmatprep.subr.bf16.mxu1 %v11668_v28 }
 0x3a2   : > { %10650 = vmatmul.mubr.bf16.gmra.mrb[32].mxu1 %v4767_v26  ;;  %v4772_v26 = vpack.c.bf16 %v4717_v47, %v4716_v53  ;;  %v4727_v47 = vld [vmem:[#allocation2 + $0x1f0] sm:$0xff]  ;;  %v4728_v53 = vld [vmem:[#allocation2 + $0x208] sm:$0xff] }
 0x3a3   : > { %10653 = vmatprep.mubr.bf16.mxu1 %v4768_v11  ;;  %10714 = vmatpush3.bf16.msra.mxu1 %v11668_v28  ;;  %v4714_v28 = vld [vmem:[#allocation2 + $0x128] sm:$0xff] }
 0x3a4   : > { %10715 = vmatprep.subr.bf16.mxu1 %v11669_v39  ;;  %v4771_v36 = vpack.c.bf16 %v4715_v21, %v4714_v28  ;;  %v4718_v11 = vld [vmem:[#allocation2 + $0x168] sm:$0xff] }
 0x3a5   : > { %v4726_v28 = vld [vmem:[#allocation2 + $0x1e8] sm:$0xff] }
 0x3a7   : > { %10716 = vmatpush3.bf16.msra.mxu1 %v11669_v39  ;;  %v4721_v39 = vld [vmem:[#allocation2 + $0x190] sm:$0xff] }
 0x3a8   : > { %10717 = vmatprep.subr.bf16.mxu1 %v11670_v1  ;;  %v4774_v58 = vpack.c.bf16 %v4721_v39, %v4720_v27  ;;  %v4733_v39 = vld [vmem:[#allocation2 + $0x290] sm:$0xff] }
 0x3a9   : > { %v4735_v27 = vld [vmem:[#allocation2 + $0x2b0] sm:$0xff] }
 0x3aa   : > { %10654 = vmatmul.mubr.bf16.gmra.mrb[36].mxu1 %v4769_v24  ;;  %v4725_v24 = vld [vmem:[#allocation2 + $0x1d0] sm:$0xff] }
 0x3ab   : > { %10657 = vmatprep.mubr.bf16.mxu1 %v4770_v19  ;;  %10718 = vmatpush3.bf16.msra.mxu1 %v11670_v1  ;;  %v4773_v1 = vpack.c.bf16 %v4719_v46, %v4718_v11  ;;  %v4724_v19 = vld [vmem:[#allocation2 + $0x1c8] sm:$0xff] }
 0x3ac   : > { %10719 = vmatprep.subr.bf16.mxu1 %v11671_v0  ;;  %v4776_v21 = vpack.c.bf16 %v4725_v24, %v4724_v19  ;;  %v4732_v11 = vld [vmem:[#allocation2 + $0x288] sm:$0xff]  ;;  %v4739_v19 = vld [vmem:[#allocation2 + $0x2f0] sm:$0xff] }
 0x3af   : > { %10720 = vmatpush3.bf16.msra.mxu1 %v11671_v0  ;;  %v4775_v0 = vpack.c.bf16 %v4723_v4, %v4722_v33  ;;  %v4734_v4 = vld [vmem:[#allocation2 + $0x2a8] sm:$0xff] }
 0x3b0   : > { %10721 = vmatprep.subr.bf16.mxu1 %v11672_v32  ;;  %v4781_v24 = vpack.c.bf16 %v4735_v27, %v4734_v4  ;;  %v4736_v33 = vld [vmem:[#allocation2 + $0x2c8] sm:$0xff]  ;;  %v4747_v27 = vld [vmem:[#allocation2 + $0x370] sm:$0xff] }
 0x3b1   : > { %v4746_v4 = vld [vmem:[#allocation2 + $0x368] sm:$0xff] }
 0x3b2   : > { %10658 = vmatmul.mubr.bf16.gmra.mrb[40].mxu1 %v4771_v36  ;;  %v4777_v36 = vpack.c.bf16 %v4727_v47, %v4726_v28  ;;  %v4738_v47 = vld [vmem:[#allocation2 + $0x2e8] sm:$0xff] }
 0x3b3   : > { %10661 = vmatprep.mubr.bf16.mxu1 %v4772_v26  ;;  %10722 = vmatpush3.bf16.msra.mxu1 %v11672_v32  ;;  %v4729_v32 = vld [vmem:[#allocation2 + $0x210] sm:$0xff]  ;;  %v4740_v28 = vld [vmem:[#allocation2 + $0x308] sm:$0xff] }
 0x3b4   : > { %10723 = vmatprep.subr.bf16.mxu1 %v11673_v56  ;;  %v4778_v26 = vpack.c.bf16 %v4729_v32, %v4728_v53  ;;  %v4783_v32 = vpack.c.bf16 %v4739_v19, %v4738_v47  ;;  %v4743_v53 = vld [vmem:[#allocation2 + $0x330] sm:$0xff]  ;;  %v4750_v47 = vld [vmem:[#allocation2 + $0x3a8] sm:$0xff] }
 0x3b5   : > { %v4751_v19 = vld [vmem:[#allocation2 + $0x3b0] sm:$0xff] }
 0x3b7   : > { %10724 = vmatpush3.bf16.msra.mxu1 %v11673_v56  ;;  %v12083_v56 = vld [vmem:[#allocation2] sm:$0xff] }
 0x3b8   : > { %v13180_v46 = vpack.c.bf16 %v12083_v56, %v12083_v56  ;;  %v4742_v56 = vld [vmem:[#allocation2 + $0x328] sm:$0xff] }
 0x3ba   : > { %10662 = vmatmul.mubr.bf16.gmra.mrb[44].mxu1 %v4773_v1  ;;  %v4780_v1 = vpack.c.bf16 %v4733_v39, %v4732_v11  ;;  %v4785_v39 = vpack.c.bf16 %v4743_v53, %v4742_v56  ;;  %v4744_v11 = vld [vmem:[#allocation2 + $0x348] sm:$0xff]  ;;  %v4755_v53 = vld [vmem:[#allocation2 + $0x3f0] sm:$0xff] }
 0x3bb   : > { %10665 = vmatprep.mubr.bf16.mxu1 %v4774_v58  ;;  %v4737_v58 = vld [vmem:[#allocation2 + $0x2d0] sm:$0xff]  ;;  %v4754_v56 = vld [vmem:[#allocation2 + $0x3e8] sm:$0xff] }
 0x3c2   : > { %10666 = vmatmul.mubr.bf16.gmra.mrb[48].mxu1 %v4775_v0  ;;  %v4782_v0 = vpack.c.bf16 %v4737_v58, %v4736_v33  ;;  %v4749_v58 = vld [vmem:[#allocation2 + $0x390] sm:$0xff]  ;;  %v4748_v33 = vld [vmem:[#allocation2 + $0x388] sm:$0xff] }
 0x3c3   : > { %10669 = vmatprep.mubr.bf16.mxu1 %v4776_v21  ;;  %v4741_v21 = vld [vmem:[#allocation2 + $0x310] sm:$0xff] }
 0x3ca   : > { %10670 = vmatmul.mubr.bf16.gmra.mrb[52].mxu1 %v4777_v36  ;;  %v4784_v36 = vpack.c.bf16 %v4741_v21, %v4740_v28  ;;  %v4753_v21 = vld [vmem:[#allocation2 + $0x3d0] sm:$0xff]  ;;  %v4752_v28 = vld [vmem:[#allocation2 + $0x3c8] sm:$0xff] }
 0x3cb   : > { %10673 = vmatprep.mubr.bf16.mxu1 %v4778_v26  ;;  %v4745_v26 = vld [vmem:[#allocation2 + $0x350] sm:$0xff] }
 0x3d2   : > { %10674 = vmatmul.mubr.bf16.gmra.mrb[56].mxu1 %v13180_v46 }
 0x3d3   : > { %10677 = vmatprep.mubr.bf16.mxu1 %v4780_v1  ;;  %v4786_v1 = vpack.c.bf16 %v4745_v26, %v4744_v11  ;;  %v4757_v26 = vld [vmem:[#allocation2 + $0x410] sm:$0xff]  ;;  %v4756_v11 = vld [vmem:[#allocation2 + $0x408] sm:$0xff] }
 0x3da   : > { %10678 = vmatmul.mubr.bf16.gmra.mrb[60].mxu1 %v4781_v24  ;;  %v4787_v24 = vpack.c.bf16 %v4747_v27, %v4746_v4  ;;  %v4759_v27 = vld [vmem:[#allocation2 + $0x430] sm:$0xff]  ;;  %v4758_v4 = vld [vmem:[#allocation2 + $0x428] sm:$0xff] }
 0x3db   : > { %10681 = vmatprep.mubr.bf16.mxu1 %v4782_v0  ;;  %v4788_v0 = vpack.c.bf16 %v4749_v58, %v4748_v33  ;;  %v4761_v58 = vld [vmem:[#allocation2 + $0x450] sm:$0xff]  ;;  %v4760_v33 = vld [vmem:[#allocation2 + $0x448] sm:$0xff] }
 0x3e2   : > { %10682 = vmatmul.mubr.bf16.gmra.mrb[0].mxu1 %v4783_v32  ;;  %v4789_v32 = vpack.c.bf16 %v4751_v19, %v4750_v47  ;;  %v5214_v19 = vld [vmem:[#allocation2 + $0x49] sm:$0xff] }
 0x3e3   : > { %10685 = vmatprep.mubr.bf16.mxu1 %v4784_v36  ;;  %v4790_v36 = vpack.c.bf16 %v4753_v21, %v4752_v28  ;;  %v5215_v21 = vld [vmem:[#allocation2 + $0x51] sm:$0xff]  ;;  %v11675_v28 = vld [vmem:[%s16287_s5 + $0x8] sm:$0xff]  }
 0x3e4   : > { %v5278_v47 = vpack.c.bf16 %v5215_v21, %v5214_v19  ;;  %v11679_v21 = vld [vmem:[%s16287_s5 + $0x28] sm:$0xff]  }
 0x3ea   : > { %10686 = vmatmul.mubr.bf16.gmra.mrb[4].mxu1 %v4785_v39  ;;  %v4791_v39 = vpack.c.bf16 %v4755_v53, %v4754_v56  ;;  %v5217_v53 = vld [vmem:[#allocation2 + $0x71] sm:$0xff] }
 0x3eb   : > { %10689 = vmatprep.mubr.bf16.mxu1 %v4786_v1  ;;  %v4792_v1 = vpack.c.bf16 %v4757_v26, %v4756_v11  ;;  %v5218_v26 = vld [vmem:[#allocation2 + $0x89] sm:$0xff]  ;;  %v5219_v56 = vld [vmem:[#allocation2 + $0x91] sm:$0xff] }
 0x3ec   : > { %v5280_v11 = vpack.c.bf16 %v5219_v56, %v5218_v26 }
 0x3f2   : > { %10690 = vmatmul.mubr.bf16.gmra.mrb[8].mxu1 %v4787_v24  ;;  %v4793_v24 = vpack.c.bf16 %v4759_v27, %v4758_v4  ;;  %v5220_v27 = vld [vmem:[#allocation2 + $0xa9] sm:$0xff] }
 0x3f3   : > { %10693 = vmatprep.mubr.bf16.mxu1 %v4788_v0  ;;  %v4794_v0 = vpack.c.bf16 %v4761_v58, %v4760_v33  ;;  %v5221_v58 = vld [vmem:[#allocation2 + $0xb1] sm:$0xff]  ;;  %v5222_v4 = vld [vmem:[#allocation2 + $0xc9] sm:$0xff]  ;;  %v11678_v33 = vld [vmem:[%s16287_s5 + $0x20] sm:$0xff]  }
 0x3fa   : > { %10694 = vmatmul.mubr.bf16.gmra.mrb[12].mxu1 %v4789_v32  ;;  %v11674_v32 = vld [vmem:[%s16287_s5] sm:$0xff]  }
 0x3fb   : > { %10697 = vmatprep.mubr.bf16.mxu1 %v4790_v36  ;;  %10789 = vmatprep.subr.bf16.mxu0 %v11674_v32  ;;  %v5216_v36 = vld [vmem:[#allocation2 + $0x69] sm:$0xff] }
 0x3fc   : > { %10790 = vmatpush3.bf16.msra.mxu0 %v11674_v32  ;;  %v5225_v32 = vld [vmem:[#allocation2 + $0xf1] sm:$0xff] }
 0x3fd   : > { %10791 = vmatprep.subr.bf16.mxu0 %v11675_v28 }
 0x400   : > { %10792 = vmatpush3.bf16.msra.mxu0 %v11675_v28  ;;  %v5226_v28 = vld [vmem:[#allocation2 + $0x109] sm:$0xff] }
 0x402   : > { %10698 = vmatmul.mubr.bf16.gmra.mrb[16].mxu1 %v4791_v39  ;;  %v5279_v39 = vpack.c.bf16 %v5217_v53, %v5216_v36  ;;  %v5227_v36 = vld [vmem:[#allocation2 + $0x111] sm:$0xff] }
 0x403   : > { %10701 = vmatprep.mubr.bf16.mxu1 %v4792_v1  ;;  %v11677_v1 = vld [vmem:[%s16287_s5 + $0x18] sm:$0xff]   ;;  %v11680_v53 = vld [vmem:[%s16287_s5 + $0x30] sm:$0xff]   ;;  %v5284_v56 = vpack.c.bf16 %v5227_v36, %v5226_v28 }
 0x404   : > { %v5238_v28 = vld [vmem:[#allocation2 + $0x1c9] sm:$0xff]  ;;  %v5239_v36 = vld [vmem:[#allocation2 + $0x1d1] sm:$0xff] }
 0x40a   : > { %10702 = vmatmul.mubr.bf16.gmra.mrb[20].mxu1 %v4793_v24  ;;  %v5223_v24 = vld [vmem:[#allocation2 + $0xd1] sm:$0xff] }
 0x40b   : > { %10705 = vmatprep.mubr.bf16.mxu1 %v4794_v0  ;;  %v5281_v0 = vpack.c.bf16 %v5221_v58, %v5220_v27  ;;  %v5282_v19 = vpack.c.bf16 %v5223_v24, %v5222_v4  ;;  %v5232_v4 = vld [vmem:[#allocation2 + $0x169] sm:$0xff]  ;;  %v5233_v24 = vld [vmem:[#allocation2 + $0x171] sm:$0xff] }
 0x412   : > { %10706 = vmatmul.mubr.bf16.gmra.mrb[24].mxu1 %v13180_v46  ;;  %v11676_v46 = vld [vmem:[%s16287_s5 + $0x10] sm:$0xff]  }
 0x413   : > { %10725 = vmatprep.mubr.bf16.mxu1 %v5278_v47  ;;  %10793 = vmatprep.subr.bf16.mxu0 %v11676_v46  ;;  %v5224_v47 = vld [vmem:[#allocation2 + $0xe9] sm:$0xff] }
 0x414   : > { %10794 = vmatpush3.bf16.msra.mxu0 %v11676_v46  ;;  %v5283_v26 = vpack.c.bf16 %v5225_v32, %v5224_v47  ;;  %v5228_v46 = vld [vmem:[#allocation2 + $0x129] sm:$0xff]  ;;  %v5237_v32 = vld [vmem:[#allocation2 + $0x1b1] sm:$0xff] }
 0x415   : > { %10795 = vmatprep.subr.bf16.mxu0 %v11677_v1 }
 0x418   : > { %10796 = vmatpush3.bf16.msra.mxu0 %v11677_v1  ;;  %v5231_v1 = vld [vmem:[#allocation2 + $0x151] sm:$0xff] }
 0x419   : > { %10797 = vmatprep.subr.bf16.mxu0 %v11678_v33 }
 0x41a   : > { %10726 = vmatmul.mubr.bf16.vlgmr.msra.gmra.mrb[28].mxu1 %v5279_v39  ;;  %v5229_v39 = vld [vmem:[#allocation2 + $0x131] sm:$0xff] }
 0x41b   : > { %10729 = vmatprep.mubr.bf16.mxu1 %v5280_v11  ;;  %v5230_v11 = vld [vmem:[#allocation2 + $0x149] sm:$0xff]  ;;  %v5285_v27 = vpack.c.bf16 %v5229_v39, %v5228_v46  ;;  %v5241_v46 = vld [vmem:[#allocation2 + $0x1f1] sm:$0xff] }
 0x41c   : > { %10798 = vmatpush3.bf16.msra.mxu0 %v11678_v33  ;;  %v5286_v58 = vpack.c.bf16 %v5231_v1, %v5230_v11  ;;  %v5234_v33 = vld [vmem:[#allocation2 + $0x189] sm:$0xff]  ;;  %v5243_v11 = vld [vmem:[#allocation2 + $0x211] sm:$0xff] }
 0x41d   : > { %10799 = vmatprep.subr.bf16.mxu0 %v11679_v21  ;;  %v5242_v39 = vld [vmem:[#allocation2 + $0x209] sm:$0xff] }
 0x420   : > { %10800 = vmatpush3.bf16.msra.mxu0 %v11679_v21  ;;  %v5236_v21 = vld [vmem:[#allocation2 + $0x1a9] sm:$0xff] }
 0x421   : > { %10801 = vmatprep.subr.bf16.mxu0 %v11680_v53 }
 0x422   : > { %10730 = vmatmul.mubr.bf16.gmra.mrb[32].mxu1 %v5281_v0  ;;  %v5235_v0 = vld [vmem:[#allocation2 + $0x191] sm:$0xff] }
 0x423   : > { %10733 = vmatprep.mubr.bf16.mxu1 %v5282_v19  ;;  %v5287_v19 = vpack.c.bf16 %v5233_v24, %v5232_v4  ;;  %v5288_v47 = vpack.c.bf16 %v5235_v0, %v5234_v33  ;;  %v5245_v4 = vld [vmem:[#allocation2 + $0x231] sm:$0xff]  ;;  %v5246_v33 = vld [vmem:[#allocation2 + $0x289] sm:$0xff] }
 0x424   : > { %10802 = vmatpush3.bf16.msra.mxu0 %v11680_v53  ;;  %v5290_v53 = vpack.c.bf16 %v5239_v36, %v5238_v28  ;;  %v5247_v0 = vld [vmem:[#allocation2 + $0x291] sm:$0xff] }
 0x425   : > { %v5251_v28 = vld [vmem:[#allocation2 + $0x2d1] sm:$0xff] }
 0x42a   : > { %10734 = vmatmul.mubr.bf16.gmra.mrb[36].mxu1 %v5283_v26  ;;  %v5289_v26 = vpack.c.bf16 %v5237_v32, %v5236_v21  ;;  %v5249_v21 = vld [vmem:[#allocation2 + $0x2b1] sm:$0xff]  ;;  %v5250_v32 = vld [vmem:[#allocation2 + $0x2c9] sm:$0xff] }
 0x42b   : > { %10737 = vmatprep.mubr.bf16.mxu1 %v5284_v56  ;;  %v5240_v56 = vld [vmem:[#allocation2 + $0x1e9] sm:$0xff] }
 0x42c   : > { %v5291_v1 = vpack.c.bf16 %v5241_v46, %v5240_v56  ;;  %v5253_v56 = vld [vmem:[#allocation2 + $0x2f1] sm:$0xff] }
 0x432   : > { %10738 = vmatmul.mubr.bf16.gmra.mrb[40].mxu1 %v5285_v27  ;;  %v5292_v27 = vpack.c.bf16 %v5243_v11, %v5242_v39  ;;  %v11681_v39 = vld [vmem:[%s16287_s5 + $0x38] sm:$0xff]  }
 0x433   : > { %10741 = vmatprep.mubr.bf16.mxu1 %v5286_v58  ;;  %v5244_v58 = vld [vmem:[#allocation2 + $0x229] sm:$0xff]  ;;  %10803 = vmatprep.subr.bf16.mxu0 %v11681_v39 }
 0x434   : > { %v5293_v24 = vpack.c.bf16 %v5245_v4, %v5244_v58  ;;  %10804 = vmatpush3.bf16.msra.mxu0 %v11681_v39 }
 0x43a   : > { %10742 = vmatmul.mubr.bf16.gmra.mrb[44].mxu1 %v5287_v19  ;;  %v5294_v19 = vpack.c.bf16 %v5247_v0, %v5246_v33 }
 0x43b   : > { %10745 = vmatprep.mubr.bf16.mxu1 %v5288_v47  ;;  %v5248_v47 = vld [vmem:[#allocation2 + $0x2a9] sm:$0xff] }
 0x43c   : > { %v5295_v36 = vpack.c.bf16 %v5249_v21, %v5248_v47 }
 0x442   : > { %10746 = vmatmul.mubr.bf16.gmra.mrb[48].mxu1 %v5289_v26  ;;  %v5296_v26 = vpack.c.bf16 %v5251_v28, %v5250_v32 }
 0x443   : > { %10749 = vmatprep.mubr.bf16.mxu1 %v5290_v53  ;;  %v5252_v53 = vld [vmem:[#allocation2 + $0x2e9] sm:$0xff] }
 0x444   : > { %v5297_v46 = vpack.c.bf16 %v5253_v56, %v5252_v53 }
 0x44a   : > { %10750 = vmatmul.mubr.bf16.gmra.mrb[52].mxu1 %v5291_v1 }
 0x44b   : > { %10753 = vmatprep.mubr.bf16.mxu1 %v5292_v27 }
 0x452   : > { %10754 = vmatmul.mubr.bf16.gmra.mrb[56].mxu1 %v5293_v24 }
 0x453   : > { %10757 = vmatprep.mubr.bf16.mxu1 %v5294_v19 }
 0x45a   : > { %10758 = vmatmul.mubr.bf16.gmra.mrb[60].mxu1 %v5295_v36 }
 0x45b   : > { %10761 = vmatprep.mubr.bf16.mxu1 %v5296_v26 }
 0x462   : > { %10762 = vmatmul.mubr.bf16.gmra.mrb[0].mxu1 %v5297_v46 }
 0x463   : > { %10765 = vmatprep.mubr.bf16.mxu1 %v13031_v12  ;;  %v5276_v12 = vld [vmem:[#allocation2 + $0x469] sm:$0xff] }
 0x46a   : > { %10766 = vmatmul.mubr.bf16.gmra.mrb[4].mxu1 %v13035_v16  ;;  %v5277_v16 = vld [vmem:[#allocation2 + $0x471] sm:$0xff] }
 0x46b   : > { %10769 = vmatprep.mubr.bf16.mxu1 %v13045_v41  ;;  %v5309_v41 = vpack.c.bf16 %v5277_v16, %v5276_v12 }
 0x472   : > { %10770 = vmatmul.mubr.bf16.gmra.mrb[8].mxu1 %v13049_v8 }
 0x473   : > { %10773 = vmatprep.mubr.bf16.mxu1 %v13059_v22  ;;  %v13222_v22 = vld [vmem:[%s16286_s4] ss:$0 sm:$0xff] }
 0x47a   : > { %10774 = vmatmul.mubr.bf16.gmra.mrb[12].mxu1 %v13063_v29 }
 0x47b   : > { %10777 = vmatprep.mubr.bf16.mxu1 %v13073_v60 }
 0x482   : > { %10778 = vmatmul.mubr.bf16.gmra.mrb[16].mxu1 %v13077_v49 }
 0x483   : > { %10781 = vmatprep.mubr.bf16.mxu1 %v13087_v42 }
 0x48a   : > { %10782 = vmatmul.mubr.bf16.gmra.mrb[20].mxu1 %v13091_v31 }
 0x48b   : > { %10785 = vmatprep.mubr.bf16.mxu1 %v13101_v15 }
 0x492   : > { %10786 = vmatmul.mubr.bf16.gmra.mrb[24].mxu1 %v5309_v41 }
 0x4ed   : > { %v10727_v8 = vpop.f32.mrb[28].mxu1 }
 0x4ee   : > { %v11031_v29 = vadd.f32 %v10727_v8, %v13025_v50  ;;  %v5409_v60 = vpop.f32.mrb[29].mxu1 }
 0x4ef   : > { %v11032_v49 = vadd.f32 %v5409_v60, %v13027_v38  ;;  %v10728_v42 = vpop.f32.mrb[30].mxu1 }
 0x4f0   : > { %v5737_v31 = vadd.f32 %v11031_v29, %v13222_v22  ;;  %v11033_v15 = vadd.f32 %v10728_v42, %v13029_v13  ;;  %v5412_v11 = vpop.f32.mrb[31].mxu1 }
 0x4f1   : > { %v5735_v1 = vadd.f32 %v11032_v49, %v13222_v22  ;;  %v11034_v27 = vadd.f32 %v5412_v11, %v13033_v3 }
 0x4f2   : > { %v5738_v58 = vadd.f32 %v11033_v15, %v13222_v22  ;;  %v5801_v24 = vmax.f32 %v5737_v31, 0.0 }
 0x4f3   : > { %v5736_v4 = vadd.f32 %v11034_v27, %v13222_v22  ;;  %v5799_v50 = vmax.f32 %v5735_v1, 0.0 }
 0x4f4   : > { %v5802_v33 = vmax.f32 %v5738_v58, 0.0 }
 0x4f5   : > { %v5800_v0 = vmax.f32 %v5736_v4, 0.0  ;;  %v10731_v19 = vpop.f32.mrb[32].mxu1 }
 0x4f6   : > { %v5864_v38 = vpack.c.bf16 %v5802_v33, %v5801_v24  ;;  %v11035_v47 = vadd.f32 %v10731_v19, %v13039_v45  ;;  %v5425_v21 = vpop.f32.mrb[33].mxu1 }
 0x4f7   : > { %v11036_v13 = vadd.f32 %v5425_v21, %v13041_v2  ;;  %v10732_v32 = vpop.f32.mrb[34].mxu1  ;;  %v5863_v28 = vpack.c.bf16 %v5800_v0, %v5799_v50 }
 0x4f8   : > { %v5741_v36 = vadd.f32 %v11035_v47, %v13222_v22  ;;  %v11037_v3 = vadd.f32 %v10732_v32, %v13043_v61  ;;  %v5428_v26 = vpop.f32.mrb[35].mxu1 }
 0x4f9   : > { %v5739_v53 = vadd.f32 %v11036_v13, %v13222_v22  ;;  %v11038_v56 = vadd.f32 %v5428_v26, %v13047_v62  ;;  %10805 = vmatprep.mubr.bf16.mxu0 %v5863_v28 }
 0x4fa   : > { %v5742_v46 = vadd.f32 %v11037_v3, %v13222_v22  ;;  %10806 = vmatmul.mubr.bf16.vlgmr.msra.gmra.mrb[128].mxu0 %v5864_v38  ;;  %v5805_v39 = vmax.f32 %v5741_v36, 0.0 }
 0x4fb   : > { %v5740_v45 = vadd.f32 %v11038_v56, %v13222_v22  ;;  %v5803_v2 = vmax.f32 %v5739_v53, 0.0 }
 0x4fc   : > { %v5806_v12 = vmax.f32 %v5742_v46, 0.0 }
 0x4fd   : > { %v5804_v16 = vmax.f32 %v5740_v45, 0.0  ;;  %v10735_v41 = vpop.f32.mrb[36].mxu1 }
 0x4fe   : > { %v11039_v8 = vadd.f32 %v10735_v41, %v13053_v55  ;;  %v5441_v29 = vpop.f32.mrb[37].mxu1  ;;  %v5866_v61 = vpack.c.bf16 %v5806_v12, %v5805_v39 }
 0x4ff   : > { %v11040_v60 = vadd.f32 %v5441_v29, %v13055_v48  ;;  %v10736_v49 = vpop.f32.mrb[38].mxu1  ;;  %v5865_v42 = vpack.c.bf16 %v5804_v16, %v5803_v2 }
 0x500   : > { %v5745_v62 = vadd.f32 %v11039_v8, %v13222_v22  ;;  %v11041_v31 = vadd.f32 %v10736_v49, %v13057_v43  ;;  %v5444_v15 = vpop.f32.mrb[39].mxu1 }
 0x501   : > { %v5743_v11 = vadd.f32 %v11040_v60, %v13222_v22  ;;  %v11042_v1 = vadd.f32 %v5444_v15, %v13061_v34  ;;  %10809 = vmatprep.mubr.bf16.mxu0 %v5865_v42 }
 0x502   : > { %v5746_v27 = vadd.f32 %v11041_v31, %v13222_v22  ;;  %10810 = vmatmul.mubr.bf16.gmra.mrb[132].mxu0 %v5866_v61  ;;  %v5809_v58 = vmax.f32 %v5745_v62, 0.0 }
 0x503   : > { %v5744_v55 = vadd.f32 %v11042_v1, %v13222_v22  ;;  %v5807_v48 = vmax.f32 %v5743_v11, 0.0 }
 0x504   : > { %v5810_v4 = vmax.f32 %v5746_v27, 0.0 }
 0x505   : > { %v5808_v24 = vmax.f32 %v5744_v55, 0.0  ;;  %v10739_v33 = vpop.f32.mrb[40].mxu1 }
 0x506   : > { %v11043_v50 = vadd.f32 %v10739_v33, %v13067_v37  ;;  %v5457_v0 = vpop.f32.mrb[41].mxu1  ;;  %v5868_v43 = vpack.c.bf16 %v5810_v4, %v5809_v58 }
 0x507   : > { %v11044_v19 = vadd.f32 %v5457_v0, %v13069_v30  ;;  %v10740_v38 = vpop.f32.mrb[42].mxu1  ;;  %v5867_v47 = vpack.c.bf16 %v5808_v24, %v5807_v48 }
 0x508   : > { %v5749_v34 = vadd.f32 %v11043_v50, %v13222_v22  ;;  %v11045_v21 = vadd.f32 %v10740_v38, %v13071_v25  ;;  %v5460_v13 = vpop.f32.mrb[43].mxu1 }
 0x509   : > { %v5747_v32 = vadd.f32 %v11044_v19, %v13222_v22  ;;  %v11046_v28 = vadd.f32 %v5460_v13, %v13075_v57  ;;  %10813 = vmatprep.mubr.bf16.mxu0 %v5867_v47 }
 0x50a   : > { %v5750_v36 = vadd.f32 %v11045_v21, %v13222_v22  ;;  %10814 = vmatmul.mubr.bf16.gmra.mrb[136].mxu0 %v5868_v43  ;;  %v5813_v3 = vmax.f32 %v5749_v34, 0.0 }
 0x50b   : > { %v5748_v37 = vadd.f32 %v11046_v28, %v13222_v22  ;;  %v5811_v30 = vmax.f32 %v5747_v32, 0.0 }
 0x50c   : > { %v5814_v26 = vmax.f32 %v5750_v36, 0.0 }
 0x50d   : > { %v5812_v53 = vmax.f32 %v5748_v37, 0.0  ;;  %v10743_v56 = vpop.f32.mrb[44].mxu1 }
 0x50e   : > { %v11047_v46 = vadd.f32 %v10743_v56, %v13081_v18  ;;  %v5473_v45 = vpop.f32.mrb[45].mxu1  ;;  %v5870_v25 = vpack.c.bf16 %v5814_v26, %v5813_v3 }
 0x50f   : > { %v11048_v39 = vadd.f32 %v5473_v45, %v13083_v9  ;;  %v10744_v12 = vpop.f32.mrb[46].mxu1  ;;  %v5869_v2 = vpack.c.bf16 %v5812_v53, %v5811_v30 }
 0x510   : > { %v5753_v57 = vadd.f32 %v11047_v46, %v13222_v22  ;;  %v11049_v16 = vadd.f32 %v10744_v12, %v13085_v5  ;;  %v5476_v41 = vpop.f32.mrb[47].mxu1 }
 0x511   : > { %v5751_v8 = vadd.f32 %v11048_v39, %v13222_v22  ;;  %v11050_v29 = vadd.f32 %v5476_v41, %v13089_v52  ;;  %10817 = vmatprep.mubr.bf16.mxu0 %v5869_v2 }
 0x512   : > { %v5754_v61 = vadd.f32 %v11049_v16, %v13222_v22  ;;  %10818 = vmatmul.mubr.bf16.gmra.mrb[140].mxu0 %v5870_v25  ;;  %v5817_v60 = vmax.f32 %v5753_v57, 0.0 }
 0x513   : > { %v5752_v18 = vadd.f32 %v11050_v29, %v13222_v22  ;;  %v5815_v9 = vmax.f32 %v5751_v8, 0.0 }
 0x514   : > { %v5818_v49 = vmax.f32 %v5754_v61, 0.0 }
 0x515   : > { %v5816_v42 = vmax.f32 %v5752_v18, 0.0  ;;  %v10747_v62 = vpop.f32.mrb[48].mxu1 }
 0x516   : > { %v11051_v31 = vadd.f32 %v10747_v62, %v13095_v35  ;;  %v5489_v15 = vpop.f32.mrb[49].mxu1  ;;  %v5872_v5 = vpack.c.bf16 %v5818_v49, %v5817_v60 }
 0x517   : > { %v11052_v11 = vadd.f32 %v5489_v15, %v13097_v51  ;;  %v10748_v1 = vpop.f32.mrb[50].mxu1  ;;  %v5871_v27 = vpack.c.bf16 %v5816_v42, %v5815_v9 }
 0x518   : > { %v5757_v52 = vadd.f32 %v11051_v31, %v13222_v22  ;;  %v11053_v55 = vadd.f32 %v10748_v1, %v13099_v7  ;;  %v5492_v58 = vpop.f32.mrb[51].mxu1  ;;  %v16566_v31 = vld [vmem:[#allocation69_spill] sm:$0xff]  ;;  %v16567_v1 = vld [vmem:[#allocation70_spill] sm:$0xff] }
 0x519   : > { %v5755_v4 = vadd.f32 %v11052_v11, %v13222_v22  ;;  %v11054_v48 = vadd.f32 %v5492_v58, %v13103_v54  ;;  %10821 = vmatprep.mubr.bf16.mxu0 %v5871_v27 }
 0x51a   : > { %v5758_v24 = vadd.f32 %v11053_v55, %v13222_v22  ;;  %10822 = vmatmul.mubr.bf16.gmra.mrb[144].mxu0 %v5872_v5  ;;  %v5821_v33 = vmax.f32 %v5757_v52, 0.0 }
 0x51b   : > { %v5756_v35 = vadd.f32 %v11054_v48, %v13222_v22  ;;  %v5819_v51 = vmax.f32 %v5755_v4, 0.0 }
 0x51c   : > { %v5822_v50 = vmax.f32 %v5758_v24, 0.0  ;;  %v16568_v24 = vld [vmem:[#allocation41_spill] sm:$0xff] }
 0x51d   : > { %v5820_v0 = vmax.f32 %v5756_v35, 0.0  ;;  %v10751_v43 = vpop.f32.mrb[52].mxu1 }
 0x51e   : > { %v11055_v19 = vadd.f32 %v10751_v43, %v13106_v59  ;;  %v5505_v38 = vpop.f32.mrb[53].mxu1  ;;  %v5874_v7 = vpack.c.bf16 %v5822_v50, %v5821_v33 }
 0x51f   : > { %v11056_v47 = vadd.f32 %v5505_v38, %v13108_v63  ;;  %v10752_v34 = vpop.f32.mrb[54].mxu1  ;;  %v5873_v21 = vpack.c.bf16 %v5820_v0, %v5819_v51  ;;  %v16569_v51 = vld [vmem:[#allocation42_spill] sm:$0xff] }
 0x520   : > { %v5761_v54 = vadd.f32 %v11055_v19, %v13222_v22  ;;  %v11057_v13 = vadd.f32 %v10752_v34, %v13110_v40  ;;  %v5508_v32 = vpop.f32.mrb[55].mxu1 }
 0x521   : > { %v5759_v28 = vadd.f32 %v11056_v47, %v13222_v22  ;;  %v11058_v36 = vadd.f32 %v5508_v32, %v13112_v23  ;;  %10825 = vmatprep.mubr.bf16.mxu0 %v5873_v21 }
 0x522   : > { %v5762_v37 = vadd.f32 %v11057_v13, %v13222_v22  ;;  %10826 = vmatmul.mubr.bf16.gmra.mrb[148].mxu0 %v5874_v7  ;;  %v5825_v3 = vmax.f32 %v5761_v54, 0.0  ;;  %v16570_v7 = vld [vmem:[#allocation43_spill] sm:$0xff]  ;;  %v16571_v54 = vld [vmem:[#allocation44_spill] sm:$0xff] }
 0x523   : > { %v5760_v59 = vadd.f32 %v11058_v36, %v13222_v22  ;;  %v5823_v63 = vmax.f32 %v5759_v28, 0.0 }
 0x524   : > { %v5826_v26 = vmax.f32 %v5762_v37, 0.0 }
 0x525   : > { %v5824_v30 = vmax.f32 %v5760_v59, 0.0  ;;  %v10755_v53 = vpop.f32.mrb[56].mxu1 }
 0x526   : > { %v11059_v56 = vadd.f32 %v10755_v53, %v13121_v6  ;;  %v5521_v46 = vpop.f32.mrb[57].mxu1  ;;  %v5876_v40 = vpack.c.bf16 %v5826_v26, %v5825_v3 }
 0x527   : > { %v11060_v45 = vadd.f32 %v5521_v46, %v13123_v17  ;;  %v10756_v25 = vpop.f32.mrb[58].mxu1  ;;  %v5875_v39 = vpack.c.bf16 %v5824_v30, %v5823_v63  ;;  %v16572_v63 = vld [vmem:[#allocation45_spill] sm:$0xff]  ;;  %v16573_v46 = vld [vmem:[#allocation46_spill] sm:$0xff] }
 0x528   : > { %v5765_v23 = vadd.f32 %v11059_v56, %v13222_v22  ;;  %v11061_v12 = vadd.f32 %v10756_v25, %v13125_v20  ;;  %v5524_v2 = vpop.f32.mrb[59].mxu1 }
 0x529   : > { %v5763_v57 = vadd.f32 %v11060_v45, %v13222_v22  ;;  %v11062_v16 = vadd.f32 %v5524_v2, %v13127_v14  ;;  %10829 = vmatprep.mubr.bf16.mxu0 %v5875_v39 }
 0x52a   : > { %v5766_v41 = vadd.f32 %v11061_v12, %v13222_v22  ;;  %10830 = vmatmul.mubr.bf16.gmra.mrb[152].mxu0 %v5876_v40  ;;  %v5829_v8 = vmax.f32 %v5765_v23, 0.0  ;;  %v16574_v23 = vld [vmem:[#allocation47_spill] sm:$0xff] }
 0x52b   : > { %v5764_v6 = vadd.f32 %v11062_v16, %v13222_v22  ;;  %v5827_v17 = vmax.f32 %v5763_v57, 0.0  ;;  %v16575_v16 = vld [vmem:[#allocation48_spill] sm:$0xff] }
 0x52c   : > { %v5830_v29 = vmax.f32 %v5766_v41, 0.0 }
 0x52d   : > { %v5828_v61 = vmax.f32 %v5764_v6, 0.0  ;;  %v10759_v18 = vpop.f32.mrb[60].mxu1 }
 0x52e   : > { %v11063_v60 = vadd.f32 %v10759_v18, %v13135_v44  ;;  %v5537_v49 = vpop.f32.mrb[61].mxu1  ;;  %v5878_v20 = vpack.c.bf16 %v5830_v29, %v5829_v8 }
 0x52f   : > { %v11064_v9 = vadd.f32 %v5537_v49, %v13137_v10  ;;  %v10760_v42 = vpop.f32.mrb[62].mxu1  ;;  %v5877_v62 = vpack.c.bf16 %v5828_v61, %v5827_v17  ;;  %v16576_v49 = vld [vmem:[#allocation49_spill] sm:$0xff] }
 0x530   : > { %v5769_v14 = vadd.f32 %v11063_v60, %v13222_v22  ;;  %v11065_v15 = vadd.f32 %v10760_v42, %v16566_v31  ;;  %v5540_v5 = vpop.f32.mrb[63].mxu1 }
 0x531   : > { %v5767_v11 = vadd.f32 %v11064_v9, %v13222_v22  ;;  %v11066_v27 = vadd.f32 %v5540_v5, %v16567_v1  ;;  %10833 = vmatprep.mubr.bf16.mxu0 %v5877_v62  ;;  %v16577_v62 = vld [vmem:[#allocation50_spill] sm:$0xff] }
 0x532   : > { %v5770_v52 = vadd.f32 %v11065_v15, %v13222_v22  ;;  %10834 = vmatmul.mubr.bf16.gmra.mrb[156].mxu0 %v5878_v20  ;;  %v5833_v55 = vmax.f32 %v5769_v14, 0.0 }
 0x533   : > { %v5768_v44 = vadd.f32 %v11066_v27, %v13222_v22  ;;  %v5831_v10 = vmax.f32 %v5767_v11, 0.0  ;;  %v16578_v11 = vld [vmem:[#allocation51_spill] sm:$0xff] }
 0x534   : > { %v5834_v58 = vmax.f32 %v5770_v52, 0.0 }
 0x535   : > { %v5832_v4 = vmax.f32 %v5768_v44, 0.0  ;;  %v10763_v48 = vpop.f32.mrb[0].mxu1  ;;  %v16579_v44 = vld [vmem:[#allocation52_spill] sm:$0xff] }
 0x536   : > { %v11067_v35 = vadd.f32 %v10763_v48, %v16568_v24  ;;  %v5553_v33 = vpop.f32.mrb[1].mxu1  ;;  %v5880_v50 = vpack.c.bf16 %v5834_v58, %v5833_v55 }
 0x537   : > { %v11068_v0 = vadd.f32 %v5553_v33, %v16569_v51  ;;  %v10764_v43 = vpop.f32.mrb[2].mxu1  ;;  %v5879_v19 = vpack.c.bf16 %v5832_v4, %v5831_v10 }
 0x538   : > { %v5773_v38 = vadd.f32 %v11067_v35, %v13222_v22  ;;  %v11069_v47 = vadd.f32 %v10764_v43, %v16570_v7  ;;  %v5556_v34 = vpop.f32.mrb[3].mxu1 }
 0x539   : > { %v5771_v21 = vadd.f32 %v11068_v0, %v13222_v22  ;;  %v11070_v13 = vadd.f32 %v5556_v34, %v16571_v54  ;;  %10837 = vmatprep.mubr.bf16.mxu0 %v5879_v19  ;;  %v16581_v19 = vld [vmem:[#allocation54_spill] sm:$0xff] }
 0x53a   : > { %v5774_v32 = vadd.f32 %v11069_v47, %v13222_v22  ;;  %10838 = vmatmul.mubr.bf16.gmra.mrb[160].mxu0 %v5880_v50  ;;  %v5837_v36 = vmax.f32 %v5773_v38, 0.0  ;;  %v16580_v50 = vld [vmem:[#allocation53_spill] sm:$0xff] }
 0x53b   : > { %v5772_v28 = vadd.f32 %v11070_v13, %v13222_v22  ;;  %v5835_v59 = vmax.f32 %v5771_v21, 0.0  ;;  %v16582_v21 = vld [vmem:[#allocation55_spill] sm:$0xff] }
 0x53c   : > { %v5838_v37 = vmax.f32 %v5774_v32, 0.0 }
 0x53d   : > { %v5836_v3 = vmax.f32 %v5772_v28, 0.0  ;;  %v10767_v26 = vpop.f32.mrb[4].mxu1  ;;  %v16583_v28 = vld [vmem:[#allocation56_spill] sm:$0xff] }
 0x53e   : > { %v11071_v30 = vadd.f32 %v10767_v26, %v16572_v63  ;;  %v5569_v53 = vpop.f32.mrb[5].mxu1  ;;  %v5882_v56 = vpack.c.bf16 %v5838_v37, %v5837_v36 }
 0x53f   : > { %v11072_v40 = vadd.f32 %v5569_v53, %v16573_v46  ;;  %v10768_v45 = vpop.f32.mrb[6].mxu1  ;;  %v5881_v25 = vpack.c.bf16 %v5836_v3, %v5835_v59 }
 0x540   : > { %v5777_v39 = vadd.f32 %v11071_v30, %v13222_v22  ;;  %v11073_v12 = vadd.f32 %v10768_v45, %v16574_v23  ;;  %v5572_v2 = vpop.f32.mrb[7].mxu1 }
 0x541   : > { %v5775_v57 = vadd.f32 %v11072_v40, %v13222_v22  ;;  %v11074_v41 = vadd.f32 %v5572_v2, %v16575_v16  ;;  %10841 = vmatprep.mubr.bf16.mxu0 %v5881_v25  ;;  %v16585_v25 = vld [vmem:[#allocation58_spill] sm:$0xff] }
 0x542   : > { %v5778_v6 = vadd.f32 %v11073_v12, %v13222_v22  ;;  %10842 = vmatmul.mubr.bf16.gmra.mrb[164].mxu0 %v5882_v56  ;;  %v5841_v29 = vmax.f32 %v5777_v39, 0.0  ;;  %v16584_v56 = vld [vmem:[#allocation57_spill] sm:$0xff] }
 0x543   : > { %v5776_v8 = vadd.f32 %v11074_v41, %v13222_v22  ;;  %v5839_v61 = vmax.f32 %v5775_v57, 0.0  ;;  %v16586_v57 = vld [vmem:[#allocation59_spill] sm:$0xff] }
 0x544   : > { %v5842_v17 = vmax.f32 %v5778_v6, 0.0 }
 0x545   : > { %v5840_v18 = vmax.f32 %v5776_v8, 0.0  ;;  %v10771_v60 = vpop.f32.mrb[8].mxu1  ;;  %v16587_v8 = vld [vmem:[#allocation60_spill] sm:$0xff] }
 0x546   : > { %v11075_v20 = vadd.f32 %v10771_v60, %v16576_v49  ;;  %v5585_v9 = vpop.f32.mrb[9].mxu1  ;;  %v5884_v42 = vpack.c.bf16 %v5842_v17, %v5841_v29 }
 0x547   : > { %v11076_v14 = vadd.f32 %v5585_v9, %v16577_v62  ;;  %v10772_v31 = vpop.f32.mrb[10].mxu1  ;;  %v5883_v15 = vpack.c.bf16 %v5840_v18, %v5839_v61 }
 0x548   : > { %v5781_v5 = vadd.f32 %v11075_v20, %v13222_v22  ;;  %v11077_v1 = vadd.f32 %v10772_v31, %v16578_v11  ;;  %v5588_v27 = vpop.f32.mrb[11].mxu1 }
 0x549   : > { %v5779_v52 = vadd.f32 %v11076_v14, %v13222_v22  ;;  %v11078_v55 = vadd.f32 %v5588_v27, %v16579_v44  ;;  %10845 = vmatprep.mubr.bf16.mxu0 %v5883_v15  ;;  %v16589_v15 = vld [vmem:[#allocation62_spill] sm:$0xff] }
 0x54a   : > { %v5782_v58 = vadd.f32 %v11077_v1, %v13222_v22  ;;  %10846 = vmatmul.mubr.bf16.gmra.mrb[168].mxu0 %v5884_v42  ;;  %v5845_v4 = vmax.f32 %v5781_v5, 0.0  ;;  %v16588_v42 = vld [vmem:[#allocation61_spill] sm:$0xff] }
 0x54b   : > { %v5780_v10 = vadd.f32 %v11078_v55, %v13222_v22  ;;  %v5843_v24 = vmax.f32 %v5779_v52, 0.0  ;;  %v16590_v52 = vld [vmem:[#allocation63_spill] sm:$0xff] }
 0x54c   : > { %v5846_v48 = vmax.f32 %v5782_v58, 0.0 }
 0x54d   : > { %v5844_v35 = vmax.f32 %v5780_v10, 0.0  ;;  %v10775_v33 = vpop.f32.mrb[12].mxu1  ;;  %v16591_v10 = vld [vmem:[#allocation64_spill] sm:$0xff] }
 0x54e   : > { %v11079_v51 = vadd.f32 %v10775_v33, %v16580_v50  ;;  %v5601_v0 = vpop.f32.mrb[13].mxu1  ;;  %v5886_v43 = vpack.c.bf16 %v5846_v48, %v5845_v4 }
 0x54f   : > { %v11080_v38 = vadd.f32 %v5601_v0, %v16581_v19  ;;  %v10776_v7 = vpop.f32.mrb[14].mxu1  ;;  %v5885_v47 = vpack.c.bf16 %v5844_v35, %v5843_v24 }
 0x550   : > { %v5785_v34 = vadd.f32 %v11079_v51, %v13222_v22  ;;  %v11081_v54 = vadd.f32 %v10776_v7, %v16582_v21  ;;  %v5604_v13 = vpop.f32.mrb[15].mxu1 }
 0x551   : > { %v5783_v32 = vadd.f32 %v11080_v38, %v13222_v22  ;;  %v11082_v36 = vadd.f32 %v5604_v13, %v16583_v28  ;;  %10849 = vmatprep.mubr.bf16.mxu0 %v5885_v47  ;;  %v16593_v47 = vld [vmem:[#allocation66_spill] sm:$0xff] }
 0x552   : > { %v5786_v37 = vadd.f32 %v11081_v54, %v13222_v22  ;;  %10850 = vmatmul.mubr.bf16.gmra.mrb[172].mxu0 %v5886_v43  ;;  %v5849_v3 = vmax.f32 %v5785_v34, 0.0  ;;  %v16592_v43 = vld [vmem:[#allocation65_spill] sm:$0xff] }
 0x553   : > { %v5784_v59 = vadd.f32 %v11082_v36, %v13222_v22  ;;  %v5847_v63 = vmax.f32 %v5783_v32, 0.0  ;;  %v16594_v32 = vld [vmem:[#allocation67_spill] sm:$0xff] }
 0x554   : > { %v5850_v26 = vmax.f32 %v5786_v37, 0.0 }
 0x555   : > { %v5848_v30 = vmax.f32 %v5784_v59, 0.0  ;;  %v10779_v53 = vpop.f32.mrb[16].mxu1  ;;  %v16595_v59 = vld [vmem:[#allocation68_spill] sm:$0xff] }
 0x556   : > { %v11083_v46 = vadd.f32 %v10779_v53, %v16584_v56  ;;  %v5617_v40 = vpop.f32.mrb[17].mxu1  ;;  %v5888_v45 = vpack.c.bf16 %v5850_v26, %v5849_v3 }
 0x557   : > { %v11084_v39 = vadd.f32 %v5617_v40, %v16585_v25  ;;  %v10780_v23 = vpop.f32.mrb[18].mxu1  ;;  %v5887_v12 = vpack.c.bf16 %v5848_v30, %v5847_v63 }
 0x558   : > { %v5789_v2 = vadd.f32 %v11083_v46, %v13222_v22  ;;  %v11085_v16 = vadd.f32 %v10780_v23, %v16586_v57  ;;  %v5620_v41 = vpop.f32.mrb[19].mxu1 }
 0x559   : > { %v5787_v6 = vadd.f32 %v11084_v39, %v13222_v22  ;;  %v11086_v29 = vadd.f32 %v5620_v41, %v16587_v8  ;;  %10853 = vmatprep.mubr.bf16.mxu0 %v5887_v12  ;;  %v13355_v39 = vld [vmem:[%s16288_s6] ss:$0 sm:$0xff] }
 0x55a   : > { %v5790_v17 = vadd.f32 %v11085_v16, %v13222_v22  ;;  %10854 = vmatmul.mubr.bf16.gmra.mrb[176].mxu0 %v5888_v45  ;;  %v5853_v18 = vmax.f32 %v5789_v2, 0.0 }
 0x55b   : > { %v5788_v61 = vadd.f32 %v11086_v29, %v13222_v22  ;;  %v5851_v49 = vmax.f32 %v5787_v6, 0.0 }
 0x55c   : > { %v5854_v60 = vmax.f32 %v5790_v17, 0.0 }
 0x55d   : > { %v5852_v20 = vmax.f32 %v5788_v61, 0.0  ;;  %v10783_v9 = vpop.f32.mrb[20].mxu1 }
 0x55e   : > { %v11087_v62 = vadd.f32 %v10783_v9, %v16588_v42  ;;  %v5633_v14 = vpop.f32.mrb[21].mxu1  ;;  %v5890_v31 = vpack.c.bf16 %v5854_v60, %v5853_v18 }
 0x55f   : > { %v11088_v5 = vadd.f32 %v5633_v14, %v16589_v15  ;;  %v10784_v11 = vpop.f32.mrb[22].mxu1  ;;  %v5889_v1 = vpack.c.bf16 %v5852_v20, %v5851_v49 }
 0x560   : > { %v5793_v27 = vadd.f32 %v11087_v62, %v13222_v22  ;;  %v11089_v44 = vadd.f32 %v10784_v11, %v16590_v52  ;;  %v5636_v55 = vpop.f32.mrb[23].mxu1 }
 0x561   : > { %v5791_v58 = vadd.f32 %v11088_v5, %v13222_v22  ;;  %v11090_v4 = vadd.f32 %v5636_v55, %v16591_v10  ;;  %10857 = vmatprep.mubr.bf16.mxu0 %v5889_v1 }
 0x562   : > { %v5794_v48 = vadd.f32 %v11089_v44, %v13222_v22  ;;  %10858 = vmatmul.mubr.bf16.gmra.mrb[180].mxu0 %v5890_v31  ;;  %v5857_v35 = vmax.f32 %v5793_v27, 0.0 }
 0x563   : > { %v5792_v24 = vadd.f32 %v11090_v4, %v13222_v22  ;;  %v5855_v50 = vmax.f32 %v5791_v58, 0.0 }
 0x564   : > { %v5858_v33 = vmax.f32 %v5794_v48, 0.0 }
 0x565   : > { %v5856_v51 = vmax.f32 %v5792_v24, 0.0  ;;  %v10787_v0 = vpop.f32.mrb[24].mxu1 }
 0x566   : > { %v11091_v19 = vadd.f32 %v10787_v0, %v16592_v43  ;;  %v5649_v38 = vpop.f32.mrb[25].mxu1  ;;  %v5892_v7 = vpack.c.bf16 %v5858_v33, %v5857_v35 }
 0x567   : > { %v11092_v34 = vadd.f32 %v5649_v38, %v16593_v47  ;;  %v10788_v21 = vpop.f32.mrb[26].mxu1  ;;  %v5891_v54 = vpack.c.bf16 %v5856_v51, %v5855_v50 }
 0x568   : > { %v5797_v13 = vadd.f32 %v11091_v19, %v13222_v22  ;;  %v11093_v28 = vadd.f32 %v10788_v21, %v16594_v32  ;;  %v5652_v36 = vpop.f32.mrb[27].mxu1 }
 0x569   : > { %v5795_v37 = vadd.f32 %v11092_v34, %v13222_v22  ;;  %v11094_v3 = vadd.f32 %v5652_v36, %v16595_v59  ;;  %10861 = vmatprep.mubr.bf16.mxu0 %v5891_v54 }
 0x56a   : > { %v5798_v26 = vadd.f32 %v11093_v28, %v13222_v22  ;;  %10862 = vmatmul.mubr.bf16.gmra.mrb[184].mxu0 %v5892_v7  ;;  %v5861_v30 = vmax.f32 %v5797_v13, 0.0 }
 0x56b   : > { %v5796_v63 = vadd.f32 %v11094_v3, %v13222_v22  ;;  %v5859_v56 = vmax.f32 %v5795_v37, 0.0 }
 0x56c   : > { %v5862_v53 = vmax.f32 %v5798_v26, 0.0 }
 0x56d   : > { %v5860_v46 = vmax.f32 %v5796_v63, 0.0 }
 0x56e   : > { %v5894_v40 = vpack.c.bf16 %v5862_v53, %v5861_v30 }
 0x56f   : > { %v5893_v45 = vpack.c.bf16 %v5860_v46, %v5859_v56 }
 0x571   : > { %10865 = vmatprep.mubr.bf16.mxu0 %v5893_v45 }
 0x572   : > { %10866 = vmatmul.mubr.bf16.gmra.mrb[188].mxu0 %v5894_v40 }
 0x5cd   : > { %v10807_v25 = vpop.f32.mrb[128].mxu0 }
 0x5ce   : > { %v6000_v23 = vpop.f32.mrb[129].mxu0  ;;  %v13364_v16 = vadd.f32 %v10807_v25, %v13355_v39 }
 0x5cf   : > { %v10808_v12 = vpop.f32.mrb[130].mxu0  ;;  %v13358_v57 = vadd.f32 %v13355_v39, %v6000_v23 }
 0x5d0   : > { %v6003_v2 = vpop.f32.mrb[131].mxu0  ;;  %v13369_v6 = vadd.f32 %v10808_v12, %v13355_v39 }
 0x5d1   : > { %v13361_v22 = vadd.f32 %v13355_v39, %v6003_v2 }
 0x5d3   : > { %v6255_v41 = vadd.f32 %v13361_v22, %v13358_v57 }
 0x5d5   : > { %v6256_v8 = vadd.f32 %v6255_v41, %v13364_v16  ;;  %v10811_v29 = vpop.f32.mrb[132].mxu0 }
 0x5d6   : > { %v6016_v17 = vpop.f32.mrb[133].mxu0  ;;  %v13381_v42 = vadd.f32 %v10811_v29, %v13355_v39 }
 0x5d7   : > { %v13373_v61 = vadd.f32 %v13355_v39, %v6016_v17  ;;  %v6257_v18 = vadd.f32 %v6256_v8, %v13369_v6  ;;  %v10812_v60 = vpop.f32.mrb[134].mxu0 }
 0x5d8   : > { %v6019_v49 = vpop.f32.mrb[135].mxu0  ;;  %v13385_v14 = vadd.f32 %v10812_v60, %v13355_v39 }
 0x5d9   : > { %v6258_v20 = vadd.f32 %v6257_v18, %v13373_v61  ;;  %v13378_v9 = vadd.f32 %v13355_v39, %v6019_v49 }
 0x5db   : > { %v6259_v62 = vadd.f32 %v6258_v20, %v13378_v9 }
 0x5dd   : > { %v6260_v31 = vadd.f32 %v6259_v62, %v13381_v42  ;;  %v10815_v15 = vpop.f32.mrb[136].mxu0 }
 0x5de   : > { %v6032_v5 = vpop.f32.mrb[137].mxu0  ;;  %v13398_v4 = vadd.f32 %v10815_v15, %v13355_v39 }
 0x5df   : > { %v13389_v11 = vadd.f32 %v13355_v39, %v6032_v5  ;;  %v6261_v1 = vadd.f32 %v6260_v31, %v13385_v14  ;;  %v10816_v27 = vpop.f32.mrb[138].mxu0 }
 0x5e0   : > { %v6035_v52 = vpop.f32.mrb[139].mxu0  ;;  %v13402_v50 = vadd.f32 %v10816_v27, %v13355_v39 }
 0x5e1   : > { %v6262_v44 = vadd.f32 %v6261_v1, %v13389_v11  ;;  %v13394_v55 = vadd.f32 %v13355_v39, %v6035_v52 }
 0x5e3   : > { %v6263_v58 = vadd.f32 %v6262_v44, %v13394_v55  ;;  %v6333_v44 = vmax.f32 %v13361_v22, %v13369_v6 }
 0x5e5   : > { %v10819_v10 = vpop.f32.mrb[140].mxu0  ;;  %v6264_v35 = vadd.f32 %v6263_v58, %v13398_v4 }
 0x5e6   : > { %v6048_v48 = vpop.f32.mrb[141].mxu0  ;;  %v13414_v13 = vadd.f32 %v10819_v10, %v13355_v39 }
 0x5e7   : > { %v10820_v24 = vpop.f32.mrb[142].mxu0  ;;  %v13405_v51 = vadd.f32 %v13355_v39, %v6048_v48  ;;  %v6265_v0 = vadd.f32 %v6264_v35, %v13402_v50  ;;  %v6332_v35 = vmax.f32 %v13358_v57, %v13364_v16 }
 0x5e8   : > { %v6051_v33 = vpop.f32.mrb[143].mxu0  ;;  %v13418_v59 = vadd.f32 %v10820_v24, %v13355_v39 }
 0x5e9   : > { %v6266_v7 = vadd.f32 %v6265_v0, %v13405_v51  ;;  %v13410_v47 = vadd.f32 %v13355_v39, %v6051_v33  ;;  %v6335_v33 = vmax.f32 %v6333_v44, %v13378_v9 }
 0x5eb   : > { %v6267_v21 = vadd.f32 %v6266_v7, %v13410_v47 }
 0x5ed   : > { %v10823_v43 = vpop.f32.mrb[144].mxu0  ;;  %v6268_v36 = vadd.f32 %v6267_v21, %v13414_v13 }
 0x5ee   : > { %v6064_v19 = vpop.f32.mrb[145].mxu0  ;;  %v13436_v23 = vadd.f32 %v10823_v43, %v13355_v39 }
 0x5ef   : > { %v10824_v38 = vpop.f32.mrb[146].mxu0  ;;  %v13421_v3 = vadd.f32 %v13355_v39, %v6064_v19  ;;  %v6269_v26 = vadd.f32 %v6268_v36, %v13418_v59 }
 0x5f0   : > { %v6067_v34 = vpop.f32.mrb[147].mxu0  ;;  %v13446_v29 = vadd.f32 %v10824_v38, %v13355_v39 }
 0x5f1   : > { %v6270_v56 = vadd.f32 %v6269_v26, %v13421_v3  ;;  %v13430_v46 = vadd.f32 %v13355_v39, %v6067_v34  ;;  %v6334_v34 = vmax.f32 %v6332_v35, %v13373_v61 }
 0x5f3   : > { %v6271_v45 = vadd.f32 %v6270_v56, %v13430_v46 }
 0x5f5   : > { %v10827_v54 = vpop.f32.mrb[148].mxu0  ;;  %v6272_v41 = vadd.f32 %v6271_v45, %v13436_v23 }
 0x5f6   : > { %v6080_v32 = vpop.f32.mrb[149].mxu0  ;;  %v13478_v0 = vadd.f32 %v10827_v54, %v13355_v39  ;;  %v6337_v54 = vmax.f32 %v6335_v33, %v13385_v14 }
 0x5f7   : > { %v10828_v28 = vpop.f32.mrb[150].mxu0  ;;  %v13449_v17 = vadd.f32 %v13355_v39, %v6080_v32  ;;  %v6273_v18 = vadd.f32 %v6272_v41, %v13446_v29  ;;  %v6336_v41 = vmax.f32 %v6334_v34, %v13381_v42 }
 0x5f8   : > { %v6083_v37 = vpop.f32.mrb[151].mxu0  ;;  %v13492_v26 = vadd.f32 %v10828_v28, %v13355_v39 }
 0x5f9   : > { %v6274_v62 = vadd.f32 %v6273_v18, %v13449_v17  ;;  %v13454_v31 = vadd.f32 %v13355_v39, %v6083_v37  ;;  %v6339_v18 = vmax.f32 %v6337_v54, %v13394_v55 }
 0x5fb   : > { %v6275_v58 = vadd.f32 %v6274_v62, %v13454_v31 }
 0x5fd   : > { %v13424_v63 = vpop.f32.mrb[152].mxu0  ;;  %v6276_v21 = vadd.f32 %v6275_v58, %v13478_v0 }
 0x5fe   : > { %v6096_v30 = vpop.f32.mrb[153].mxu0 }
 0x5ff   : > { %v13426_v53 = vpop.f32.mrb[154].mxu0 }
 0x600   : > { %v6099_v40 = vpop.f32.mrb[155].mxu0 }
 0x601   : > { %v13516_v35 = vadd.f32 %v13355_v39, %v6099_v40 }
 0x605   : > { %v13433_v25 = vpop.f32.mrb[156].mxu0 }
 0x606   : > { %v13438_v12 = vpop.f32.mrb[157].mxu0 }
 0x607   : > { %v13440_v2 = vpop.f32.mrb[158].mxu0 }
 0x608   : > { %v13443_v8 = vpop.f32.mrb[159].mxu0 }
 0x60d   : > { %v10839_v60 = vpop.f32.mrb[160].mxu0 }
 0x60e   : > { %v6128_v49 = vpop.f32.mrb[161].mxu0  ;;  %v13463_v27 = vadd.f32 %v10839_v60, %v13355_v39  ;;  %v13501_v60 = vadd.f32 %v13355_v39, %v6096_v30  ;;  %v6341_v30 = vmax.f32 %v6339_v18, %v13402_v50 }
 0x60f   : > { %v10840_v20 = vpop.f32.mrb[162].mxu0  ;;  %v13457_v5 = vadd.f32 %v13355_v39, %v6128_v49  ;;  %v6277_v49 = vadd.f32 %v6276_v21, %v13492_v26 }
 0x610   : > { %v6131_v15 = vpop.f32.mrb[163].mxu0  ;;  %v13471_v10 = vadd.f32 %v10840_v20, %v13355_v39  ;;  %v6343_v34 = vmax.f32 %v6341_v30, %v13410_v47 }
 0x611   : > { %v13460_v1 = vadd.f32 %v13355_v39, %v6131_v15  ;;  %v6338_v15 = vmax.f32 %v6336_v41, %v13389_v11  ;;  %v6369_v21 = vmax.f32 %v13457_v5, %v13463_v27 }
 0x613   : > { %v6292_v52 = vadd.f32 %v13460_v1, %v13457_v5 }
 0x615   : > { %v6293_v48 = vadd.f32 %v6292_v52, %v13463_v27  ;;  %v10843_v24 = vpop.f32.mrb[164].mxu0 }
 0x616   : > { %v6144_v43 = vpop.f32.mrb[165].mxu0  ;;  %v13495_v56 = vadd.f32 %v10843_v24, %v13355_v39  ;;  %v6278_v24 = vadd.f32 %v6277_v49, %v13501_v60 }
 0x617   : > { %v13481_v19 = vadd.f32 %v13355_v39, %v6144_v43  ;;  %v6294_v38 = vadd.f32 %v6293_v48, %v13471_v10  ;;  %v10844_v7 = vpop.f32.mrb[166].mxu0 }
 0x618   : > { %v6147_v32 = vpop.f32.mrb[167].mxu0  ;;  %16596 = vst [vmem:[#allocation69_spill] sm:$0xff] %v13495_v56  ;;  %v13505_v20 = vadd.f32 %v10844_v7, %v13355_v39  ;;  %v6340_v7 = vmax.f32 %v6338_v15, %v13398_v4  ;;  %v6279_v54 = vadd.f32 %v6278_v24, %v13516_v35  ;;  %v13542_v15 = vadd.f32 %v13424_v63, %v13355_v39 }
 0x619   : > { %v6295_v36 = vadd.f32 %v6294_v38, %v13481_v19  ;;  %v13488_v37 = vadd.f32 %v13355_v39, %v6147_v32  ;;  %v6371_v41 = vmax.f32 %v6369_v21, %v13481_v19 }
 0x61a   : > { %16597 = vst [vmem:[#allocation70_spill] sm:$0xff] %v13505_v20  ;;  %v6342_v40 = vmax.f32 %v6340_v7, %v13405_v51  ;;  %v6280_v7 = vadd.f32 %v6279_v54, %v13542_v15 }
 0x61b   : > { %v6296_v45 = vadd.f32 %v6295_v36, %v13488_v37  ;;  %v6373_v21 = vmax.f32 %v6371_v41, %v13495_v56 }
 0x61d   : > { %v6297_v28 = vadd.f32 %v6296_v45, %v13495_v56  ;;  %v10847_v62 = vpop.f32.mrb[168].mxu0  ;;  %v6370_v45 = vmax.f32 %v13460_v1, %v13471_v10 }
 0x61e   : > { %v6160_v52 = vpop.f32.mrb[169].mxu0  ;;  %v13527_v32 = vadd.f32 %v10847_v62, %v13355_v39  ;;  %v6345_v62 = vmax.f32 %v6343_v34, %v13418_v59 }
 0x61f   : > { %v13510_v44 = vadd.f32 %v13355_v39, %v6160_v52  ;;  %v6298_v58 = vadd.f32 %v6297_v28, %v13505_v20  ;;  %v10848_v48 = vpop.f32.mrb[170].mxu0 }
 0x620   : > { %v6163_v33 = vpop.f32.mrb[171].mxu0  ;;  %16600 = vst [vmem:[#allocation43_spill] sm:$0xff] %v13527_v32  ;;  %v13536_v18 = vadd.f32 %v10848_v48, %v13355_v39  ;;  %v6344_v48 = vmax.f32 %v6342_v40, %v13414_v13 }
 0x621   : > { %16598 = vst [vmem:[#allocation41_spill] sm:$0xff] %v13510_v44  ;;  %v6299_v43 = vadd.f32 %v6298_v58, %v13510_v44  ;;  %v13520_v38 = vadd.f32 %v13355_v39, %v6163_v33  ;;  %v6372_v58 = vmax.f32 %v6370_v45, %v13488_v37  ;;  %v6375_v40 = vmax.f32 %v6373_v21, %v13510_v44 }
 0x622   : > { %16601 = vst [vmem:[#allocation44_spill] sm:$0xff] %v13536_v18  ;;  %v6346_v45 = vmax.f32 %v6344_v48, %v13421_v3 }
 0x623   : > { %16599 = vst [vmem:[#allocation42_spill] sm:$0xff] %v13520_v38  ;;  %v6300_v36 = vadd.f32 %v6299_v43, %v13520_v38  ;;  %v6347_v43 = vmax.f32 %v6345_v62, %v13430_v46  ;;  %v6374_v62 = vmax.f32 %v6372_v58, %v13505_v20 }
 0x625   : > { %v6301_v49 = vadd.f32 %v6300_v36, %v13527_v32  ;;  %v10851_v28 = vpop.f32.mrb[172].mxu0 }
 0x626   : > { %v6176_v52 = vpop.f32.mrb[173].mxu0  ;;  %v13565_v54 = vadd.f32 %v10851_v28, %v13355_v39  ;;  %v6348_v28 = vmax.f32 %v6346_v45, %v13436_v23 }
 0x627   : > { %v13546_v30 = vadd.f32 %v13355_v39, %v6176_v52  ;;  %v6302_v24 = vadd.f32 %v6301_v49, %v13536_v18  ;;  %v10852_v33 = vpop.f32.mrb[174].mxu0  ;;  %v13560_v49 = vadd.f32 %v13426_v53, %v13355_v39  ;;  %v6349_v52 = vmax.f32 %v6347_v43, %v13446_v29 }
 0x628   : > { %v6179_v34 = vpop.f32.mrb[175].mxu0  ;;  %16604 = vst [vmem:[#allocation47_spill] sm:$0xff] %v13565_v54  ;;  %v6376_v53 = vmax.f32 %v6374_v62, %v13520_v38  ;;  %v6377_v43 = vmax.f32 %v6375_v40, %v13527_v32  ;;  %v6350_v62 = vmax.f32 %v6348_v28, %v13449_v17 }
 0x629   : > { %16602 = vst [vmem:[#allocation45_spill] sm:$0xff] %v13546_v30  ;;  %v6303_v63 = vadd.f32 %v6302_v24, %v13546_v30  ;;  %v13555_v36 = vadd.f32 %v13355_v39, %v6179_v34  ;;  %v13571_v24 = vadd.f32 %v13355_v39, %v13438_v12  ;;  %v6281_v48 = vadd.f32 %v6280_v7, %v13560_v49 }
 0x62a   : > { %v13576_v34 = vadd.f32 %v10852_v33, %v13355_v39  ;;  %v6378_v38 = vmax.f32 %v6376_v53, %v13536_v18  ;;  %v6352_v32 = vmax.f32 %v6350_v62, %v13478_v0 }
 0x62b   : > { %16603 = vst [vmem:[#allocation46_spill] sm:$0xff] %v13555_v36  ;;  %v6304_v41 = vadd.f32 %v6303_v63, %v13555_v36  ;;  %v6351_v63 = vmax.f32 %v6349_v52, %v13454_v31  ;;  %v6282_v33 = vadd.f32 %v6281_v48, %v13571_v24  ;;  %v6379_v52 = vmax.f32 %v6377_v43, %v13546_v30 }
 0x62c   : > { %16605 = vst [vmem:[#allocation48_spill] sm:$0xff] %v13576_v34  ;;  %v6380_v28 = vmax.f32 %v6378_v38, %v13555_v36  ;;  %v6354_v38 = vmax.f32 %v6352_v32, %v13501_v60 }
 0x62d   : > { %v6305_v58 = vadd.f32 %v6304_v41, %v13565_v54  ;;  %v10855_v21 = vpop.f32.mrb[176].mxu0  ;;  %v13590_v41 = vadd.f32 %v13355_v39, %v13443_v8 }
 0x62e   : > { %v6192_v44 = vpop.f32.mrb[177].mxu0  ;;  %v13601_v48 = vadd.f32 %v10855_v21, %v13355_v39  ;;  %v13615_v21 = vadd.f32 %v13433_v25, %v13355_v39 }
 0x62f   : > { %v13583_v12 = vadd.f32 %v13355_v39, %v6192_v44  ;;  %v6306_v7 = vadd.f32 %v6305_v58, %v13576_v34  ;;  %v10856_v20 = vpop.f32.mrb[178].mxu0  ;;  %v6353_v58 = vmax.f32 %v6351_v63, %v13492_v26  ;;  %v6283_v53 = vadd.f32 %v6282_v33, %v13590_v41 }
 0x630   : > { %v6195_v45 = vpop.f32.mrb[179].mxu0  ;;  %16608 = vst [vmem:[#allocation51_spill] sm:$0xff] %v13601_v48 }
 0x631   : > { %16606 = vst [vmem:[#allocation49_spill] sm:$0xff] %v13583_v12  ;;  %v6307_v40 = vadd.f32 %v6306_v7, %v13583_v12  ;;  %v13596_v44 = vadd.f32 %v13355_v39, %v6195_v45  ;;  %v6355_v43 = vmax.f32 %v6353_v58, %v13516_v35  ;;  %v6381_v7 = vmax.f32 %v6379_v52, %v13565_v54 }
 0x632   : > { %v13609_v45 = vadd.f32 %v10856_v20, %v13355_v39  ;;  %v6382_v58 = vmax.f32 %v6380_v28, %v13576_v34  ;;  %v6356_v28 = vmax.f32 %v6354_v38, %v13542_v15 }
 0x633   : > { %16607 = vst [vmem:[#allocation50_spill] sm:$0xff] %v13596_v44  ;;  %v6308_v8 = vadd.f32 %v6307_v40, %v13596_v44  ;;  %v6383_v62 = vmax.f32 %v6381_v7, %v13583_v12  ;;  %v6357_v54 = vmax.f32 %v6355_v43, %v13560_v49  ;;  %v13633_v7 = vadd.f32 %v13440_v2, %v13355_v39 }
 0x634   : > { %16609 = vst [vmem:[#allocation52_spill] sm:$0xff] %v13609_v45  ;;  %v6384_v36 = vmax.f32 %v6382_v58, %v13596_v44  ;;  %v6358_v58 = vmax.f32 %v6356_v28, %v13571_v24 }
 0x635   : > { %v6309_v63 = vadd.f32 %v6308_v8, %v13601_v48  ;;  %v10859_v30 = vpop.f32.mrb[180].mxu0  ;;  %v6284_v8 = vadd.f32 %v6283_v53, %v13615_v21  ;;  %v6385_v43 = vmax.f32 %v6383_v62, %v13601_v48 }
 0x636   : > { %v6208_v40 = vpop.f32.mrb[181].mxu0  ;;  %v13637_v53 = vadd.f32 %v10859_v30, %v13355_v39 }
 0x637   : > { %v13620_v33 = vadd.f32 %v13355_v39, %v6208_v40  ;;  %v6310_v20 = vadd.f32 %v6309_v63, %v13609_v45  ;;  %v10860_v52 = vpop.f32.mrb[182].mxu0  ;;  %v6359_v63 = vmax.f32 %v6357_v54, %v13590_v41  ;;  %v6386_v54 = vmax.f32 %v6384_v36, %v13609_v45 }
 0x638   : > { %v6211_v32 = vpop.f32.mrb[183].mxu0  ;;  %16612 = vst [vmem:[#allocation55_spill] sm:$0xff] %v13637_v53  ;;  %v13645_v38 = vadd.f32 %v10860_v52, %v13355_v39 }
 0x639   : > { %16610 = vst [vmem:[#allocation53_spill] sm:$0xff] %v13620_v33  ;;  %v6311_v25 = vadd.f32 %v6310_v20, %v13620_v33  ;;  %v13628_v18 = vadd.f32 %v13355_v39, %v6211_v32  ;;  %v6285_v20 = vadd.f32 %v6284_v8, %v13633_v7  ;;  %v6387_v32 = vmax.f32 %v6385_v43, %v13620_v33 }
 0x63a   : > { %16613 = vst [vmem:[#allocation56_spill] sm:$0xff] %v13645_v38  ;;  %v6361_v30 = vmax.f32 %v6359_v63, %v13633_v7  ;;  %v6360_v43 = vmax.f32 %v6358_v58, %v13615_v21 }
 0x63b   : > { %16611 = vst [vmem:[#allocation54_spill] sm:$0xff] %v13628_v18  ;;  %v6312_v40 = vadd.f32 %v6311_v25, %v13628_v18  ;;  %v6388_v62 = vmax.f32 %v6386_v54, %v13628_v18  ;;  %v6286_v52 = vrot.slane %v6285_v20, 4  ;;  %v6389_v36 = vmax.f32 %v6387_v32, %v13637_v53 }
 0x63c   : > { %v6362_v63 = vmax.f32 %v6360_v43, %v6361_v30 }
 0x63d   : > { %v6313_v2 = vadd.f32 %v6312_v40, %v13637_v53  ;;  %v10863_v44 = vpop.f32.mrb[184].mxu0  ;;  %v6390_v18 = vmax.f32 %v6388_v62, %v13645_v38  ;;  %v6287_v58 = vadd.f32 %v6286_v52, %v6285_v20 }
 0x63e   : > { %v6224_v12 = vpop.f32.mrb[185].mxu0  ;;  %v13662_v54 = vadd.f32 %v10863_v44, %v13355_v39  ;;  %v6363_v53 = vrot.slane %v6362_v63, 4 }
 0x63f   : > { %v13652_v25 = vadd.f32 %v13355_v39, %v6224_v12  ;;  %v6314_v8 = vadd.f32 %v6313_v2, %v13645_v38  ;;  %v10864_v28 = vpop.f32.mrb[186].mxu0  ;;  %v6288_v62 = vrot.slane %v6287_v58, 2 }
 0x640   : > { %v6227_v33 = vpop.f32.mrb[187].mxu0  ;;  %16616 = vst [vmem:[#allocation59_spill] sm:$0xff] %v13662_v54  ;;  %v13668_v48 = vadd.f32 %v10864_v28, %v13355_v39 }
 0x641   : > { %16614 = vst [vmem:[#allocation57_spill] sm:$0xff] %v13652_v25  ;;  %v6315_v40 = vadd.f32 %v6314_v8, %v13652_v25  ;;  %v13659_v45 = vadd.f32 %v13355_v39, %v6227_v33  ;;  %v6391_v12 = vmax.f32 %v6389_v36, %v13652_v25 }
 0x642   : > { %16617 = vst [vmem:[#allocation60_spill] sm:$0xff] %v13668_v48 }
 0x643   : > { %16615 = vst [vmem:[#allocation58_spill] sm:$0xff] %v13659_v45  ;;  %v6316_v2 = vadd.f32 %v6315_v40, %v13659_v45  ;;  %v6392_v32 = vmax.f32 %v6390_v18, %v13659_v45  ;;  %v6393_v40 = vmax.f32 %v6391_v12, %v13662_v54  ;;  %v6364_v45 = vmax.f32 %v6362_v63, %v6363_v53 }
 0x645   : > { %v6317_v8 = vadd.f32 %v6316_v2, %v13662_v54  ;;  %v10867_v33 = vpop.f32.mrb[188].mxu0  ;;  %v6394_v18 = vmax.f32 %v6392_v32, %v13668_v48  ;;  %v6365_v25 = vrot.slane %v6364_v45, 2 }
 0x646   : > { %v6240_v30 = vpop.f32.mrb[189].mxu0 }
 0x647   : > { %v13673_v44 = vadd.f32 %v13355_v39, %v6240_v30  ;;  %v6318_v43 = vadd.f32 %v6317_v8, %v13668_v48  ;;  %v10868_v36 = vpop.f32.mrb[190].mxu0  ;;  %v13684_v30 = vadd.f32 %v10867_v33, %v13355_v39  ;;  %v6366_v38 = vmax.f32 %v6364_v45, %v6365_v25 }
 0x648   : > { %v6243_v20 = vpop.f32.mrb[191].mxu0  ;;  %v13687_v8 = vadd.f32 %v10868_v36, %v13355_v39 }
 0x649   : > { %16618 = vst [vmem:[#allocation61_spill] sm:$0xff] %v13673_v44  ;;  %v6319_v28 = vadd.f32 %v6318_v43, %v13673_v44  ;;  %v6395_v52 = vmax.f32 %v6393_v40, %v13673_v44  ;;  %v13680_v2 = vadd.f32 %v13355_v39, %v6243_v20  ;;  %16620 = vst [vmem:[#allocation63_spill] sm:$0xff] %v13684_v30 }
 0x64a   : > { %16621 = vst [vmem:[#allocation64_spill] sm:$0xff] %v13687_v8  ;;  %v6289_v44 = vadd.f32 %v6288_v62, %v6287_v58 }
 0x64b   : > { %16619 = vst [vmem:[#allocation62_spill] sm:$0xff] %v13680_v2  ;;  %v6320_v12 = vadd.f32 %v6319_v28, %v13680_v2  ;;  %v6396_v54 = vmax.f32 %v6394_v18, %v13680_v2  ;;  %v6397_v43 = vmax.f32 %v6395_v52, %v13684_v30  ;;  %v6367_v2 = vrot.slane %v6366_v38, 1 }
 0x64c   : > { %v6290_v48 = vrot.slane %v6289_v44, 1 }
 0x64d   : > { %v6321_v40 = vadd.f32 %v6320_v12, %v13684_v30  ;;  %v6398_v20 = vmax.f32 %v6396_v54, %v13687_v8  ;;  %v6368_v56 = vmax.f32 %v6366_v38, %v6367_v2  ;;  %v11684_v38 = vld [vmem:[%s16291_s9 + $0x10] sm:$0xff]   ;;  %v11686_v2 = vld [vmem:[%s16291_s9 + $0x20] sm:$0xff]  }
 0x64e   : > { %v6291_v18 = vadd.f32 %v6290_v48, %v6289_v44  ;;  %v11685_v44 = vld [vmem:[%s16291_s9 + $0x18] sm:$0xff]  }
 0x64f   : > { %v6322_v53 = vadd.f32 %v6321_v40, %v13687_v8  ;;  %v6399_v63 = vmax.f32 %v6397_v43, %v6398_v20  ;;  %v6431_v8 = vstv %s9373_s22  ;;  %s9387_s22 = sld [smem:[#allocation3 + $0x5]] }
 0x650   : > { %v6330_v54 = vmul.f32 0.00390625, %v6291_v18 }
 0x651   : > { %v6323_v32 = vrot.slane %v6322_v53, 4  ;;  %v6400_v33 = vrot.slane %v6399_v63, 4 }
 0x652   : > { %v6406_v20 = vadd.f32 %v6368_v56, %v6330_v54  ;;  %v11683_v56 = vld [vmem:[%s16291_s9 + $0x8] sm:$0xff]  }
 0x653   : > { %v6324_v39 = vadd.f32 %v6323_v32, %v6322_v53  ;;  %v6401_v36 = vmax.f32 %v6399_v63, %v6400_v33  ;;  %v11689_v32 = vld [vmem:[%s16291_s9 + $0x38] sm:$0xff]  }
 0x654   : > { %v6432_v45 = vmul.f32 %v6431_v8, %v6406_v20 }
 0x655   : > { %v6325_v28 = vrot.slane %v6324_v39, 2  ;;  %v6402_v34 = vrot.slane %v6401_v36, 2 }
 0x657   : > { %v6326_v52 = vadd.f32 %v6325_v28, %v6324_v39  ;;  %v6403_v12 = vmax.f32 %v6401_v36, %v6402_v34  ;;  %v11682_v34 = vld [vmem:[%s16291_s9] sm:$0xff]  }
 0x658   : > { %10869 = vmatprep.subr.bf16.mxu0 %v11682_v34 }
 0x659   : > { %v6327_v30 = vrot.slane %v6326_v52, 1  ;;  %v6404_v58 = vrot.slane %v6403_v12, 1  ;;  %10870 = vmatpush3.bf16.msra.mxu0 %v11682_v34 }
 0x65a   : > { %10871 = vmatprep.subr.bf16.mxu0 %v11683_v56 }
 0x65b   : > { %v6328_v62 = vadd.f32 %v6327_v30, %v6326_v52  ;;  %v6405_v43 = vmax.f32 %v6403_v12, %v6404_v58  ;;  %v11687_v30 = vld [vmem:[%s16291_s9 + $0x28] sm:$0xff]  }
 0x65d   : > { %v6331_v40 = vmul.f32 0.00390625, %v6328_v62  ;;  %10872 = vmatpush3.bf16.msra.mxu0 %v11683_v56 }
 0x65e   : > { %10873 = vmatprep.subr.bf16.mxu0 %v11684_v38 }
 0x65f   : > { %v6407_v53 = vadd.f32 %v6405_v43, %v6331_v40  ;;  %v6445_v40 = vstv %s9374_s15  ;;  %s9388_s15 = sld [smem:[#allocation3 + $0x6]] }
 0x661   : > { %v6411_v63 = vsel %vm6410_vm1, %v6407_v53, %v6406_v20  ;;  %v6433_v25 = vmul.f32 %v6431_v8, %v6407_v53  ;;  %10874 = vmatpush3.bf16.msra.mxu0 %v11684_v38  ;;  %v11688_v8 = vld [vmem:[%s16291_s9 + $0x30] sm:$0xff]   ;;  %v6454_v53 = vstv %s9375_s16  ;;  %s9389_s16 = sld [smem:[#allocation3 + $0x7]] }
 0x662   : > { %6439 = vrot.lane.b32.xlu1 %v6411_v63, %s12171_s20  ;;  %6412 = vrot.lane.b32.xlu0 %v6411_v63, %s12172_s23 }
 0x663   : > { %v6436_v48 = vsel %vm6410_vm1, %v6433_v25, %v6432_v45  ;;  %10875 = vmatprep.subr.bf16.mxu0 %v11685_v44 }
 0x665   : > { %10876 = vmatpush3.bf16.msra.mxu0 %v11685_v44 }
 0x666   : > { %6448 = vrot.lane.b32.xlu1 %v6411_v63, %s12173_s24  ;;  %6421 = vrot.lane.b32.xlu0 %v6411_v63, %s12174_s30  ;;  %s6417_s24 = sld [smem:[#allocation3]]  ;;  %s9372_s30 = sld [smem:[#allocation3 + $0x1]] }
 0x667   : > { %10877 = vmatprep.subr.bf16.mxu0 %v11686_v2 }
 0x669   : > { %10878 = vmatpush3.bf16.msra.mxu0 %v11686_v2 }
 0x66a   : > { %10879 = vmatprep.subr.bf16.mxu0 %v11687_v30 }
 0x66c   : > { %v6418_v36 = vstv %s6417_s24  ;;  %v6427_v18 = vstv %s9372_s30  ;;  %s12176_s30 = smov [#allocation6]  }
 0x66d   : > { %10880 = vmatpush3.bf16.msra.mxu0 %v11687_v30  ;;  %s12104_s12 = sshll.u32 %s12176_s30, 4  ;;  %s12105_s12 = int_to_ptr.vmem [resolvable:$false] %s12104_s12 }
 0x66e   : > { %10881 = vmatprep.subr.bf16.mxu0 %v11688_v8 }
 0x671   : > { %10882 = vmatpush3.bf16.msra.mxu0 %v11688_v8  ;;  %v12175_v8 = vmov 1966171168  }
 0x672   : > { %10883 = vmatprep.subr.bf16.mxu0 %v11689_v32 }
 0x675   : > { %10884 = vmatpush3.bf16.msra.mxu0 %v11689_v32  ;;  %v6465_v32 = vunpack.c.l.s4 %v12175_v8 }
 0x6d4   : > { %v6440_v33 = vpop.permute.xlu1 %6439  ;;  %v6413_v39 = vpop.permute.xlu0 %6412 }
 0x6d5   : > { %v6416_v28 = vsel %vm6415_vm2, 0.0, %v6413_v39  ;;  %v6443_v43 = vsel %vm6442_vm4, %v6440_v33, 0.0  ;;  %v6467_v39 = vlaneseq }
 0x6d6   : > { %v6419_v54 = vmul.f32 %v6418_v36, %v6416_v28  ;;  %v6446_v45 = vmul.f32 %v6445_v40, %v6443_v43  ;;  %v6466_v36 = vunpack.c.0.s8 %v6465_v32 }
 0x6d7   : > { %v13719_v28 = vshrl.u32 %v6467_v39, 7 }
 0x6d8   : > { %v6422_v52 = vpop.permute.xlu0 %6421  ;;  %v6449_v58 = vpop.permute.xlu1 %6448 }
 0x6d9   : > { %v6425_v12 = vsel %vm6424_vm3, 0.0, %v6422_v52  ;;  %v6452_v63 = vsel %vm6451_vm5, %v6449_v58, 0.0  ;;  %v13722_v33 = vsub.s32 %v6466_v36, %v13719_v28  ;;  %v6488_v52 = vsub.s32 0, %v13719_v28 }
 0x6da   : > { %v6428_v62 = vmul.f32 %v6427_v18, %v6425_v12  ;;  %v6455_v34 = vmul.f32 %v6454_v53, %v6452_v63 }
 0x6dc   : > { %v6429_v20 = vadd.f32 %v6428_v62, %v6419_v54 }
 0x6de   : > { %v6438_v25 = vadd.f32 %v6436_v48, %v6429_v20  ;;  %v13753_v20 = vld [vmem:[%s16293_s11] ss:$0 sm:$0xff] }
 0x6e0   : > { %v6447_v56 = vadd.f32 %v6446_v45, %v6438_v25 }
 0x6e2   : > { %v6456_v38 = vadd.f32 %v6455_v34, %v6447_v56 }
 0x6e4   : > { %v9376_v44 = vmul.f32 -1.442695, %v6456_v38 }
 0x6e6   : > { %11691 = vpow2.f32 %v9376_v44 }
 0x6f0   : > { %v11692_v2 = vpop.eup %11691 }
 0x6f1   : > { %v6460_v30 = vadd.f32 1.0, %v11692_v2 }
 0x6f3   : > { %11693 = vrcp.f32 %v6460_v30 }
 0x6fd   : > { %v11694_v18 = vpop.eup %11693 }
 0x6fe   : > { %v13725_v48 = vrot.slane %v11694_v18, %v13722_v33 }
 0x700   : > { %v6478_v12 = vrot.slane %v13725_v48, %v13722_v33 }
 0x702   : > { %v13732_v54 = vrot.slane %v6478_v12, %v6488_v52 }
 0x704   : > { %v13736_v58 = vmul.f32 %v13732_v54, %v13358_v57  ;;  %v13740_v62 = vmul.f32 %v13732_v54, %v13361_v22  ;;  %v13744_v40 = vmul.f32 %v13732_v54, %v13364_v16  ;;  %v13748_v43 = vmul.f32 %v13732_v54, %v13369_v6 }
 0x705   : > { %v13757_v57 = vmul.f32 %v13732_v54, %v13373_v61  ;;  %v13761_v22 = vmul.f32 %v13732_v54, %v13378_v9  ;;  %v13775_v9 = vmul.f32 %v13732_v54, %v13381_v42  ;;  %v13783_v34 = vmul.f32 %v13732_v54, %v13385_v14 }
 0x706   : > { %16622 = vst [vmem:[#allocation65_spill] sm:$0xff] %v13736_v58  ;;  %16623 = vst [vmem:[#allocation66_spill] sm:$0xff] %v13740_v62  ;;  %v6960_v16 = vmul.f32 %v13753_v20, %v13740_v62  ;;  %v6959_v6 = vmul.f32 %v13753_v20, %v13736_v58  ;;  %v6560_v53 = vpack.c.bf16 %v13740_v62, %v13736_v58 }
 0x707   : > { %16624 = vst [vmem:[#allocation67_spill] sm:$0xff] %v13744_v40  ;;  %16625 = vst [vmem:[#allocation68_spill] sm:$0xff] %v13748_v43  ;;  %v6561_v63 = vpack.c.bf16 %v13748_v43, %v13744_v40  ;;  %v6562_v61 = vpack.c.bf16 %v13761_v22, %v13757_v57  ;;  %v6963_v45 = vmul.f32 %v13753_v20, %v13757_v57 }
 0x708   : > { %16626 = vst [vmem:[#allocation71_spill] sm:$0xff] %v13757_v57  ;;  %16627 = vst [vmem:[#allocation72_spill] sm:$0xff] %v13761_v22  ;;  %7025 = vadd.xlane.f32.xlu1 %v6960_v16  ;;  %7023 = vadd.xlane.f32.xlu0 %v6959_v6  ;;  %v6961_v25 = vmul.f32 %v13753_v20, %v13744_v40  ;;  %v13787_v56 = vmul.f32 %v13732_v54, %v13389_v11 }
 0x709   : > { %10885 = vmatprep.mubr.bf16.mxu0 %v6560_v53  ;;  %16628 = vst [vmem:[#allocation73_spill] sm:$0xff] %v13775_v9  ;;  %16629 = vst [vmem:[#allocation74_spill] sm:$0xff] %v13783_v34  ;;  %v13791_v42 = vmul.f32 %v13732_v54, %v13394_v55  ;;  %v6965_v38 = vmul.f32 %v13753_v20, %v13775_v9  ;;  %v6962_v44 = vmul.f32 %v13753_v20, %v13748_v43 }
 0x70a   : > { %10886 = vmatmul.mubr.bf16.vlgmr.msra.gmra.mrb[192].mxu0 %v6561_v63  ;;  %16630 = vst [vmem:[#allocation75_spill] sm:$0xff] %v13787_v56  ;;  %v6563_v14 = vpack.c.bf16 %v13783_v34, %v13775_v9  ;;  %v13803_v11 = vmul.f32 %v13732_v54, %v13398_v4  ;;  %v6967_v55 = vmul.f32 %v13753_v20, %v13787_v56 }
 0x70b   : > { %10889 = vmatprep.mubr.bf16.mxu0 %v6562_v61  ;;  %16631 = vst [vmem:[#allocation76_spill] sm:$0xff] %v13791_v42  ;;  %v6564_v2 = vpack.c.bf16 %v13791_v42, %v13787_v56  ;;  %v6964_v30 = vmul.f32 %v13753_v20, %v13761_v22  ;;  %v13811_v8 = vmul.f32 %v13732_v54, %v13402_v50 }
 0x70c   : > { %7031 = vadd.xlane.f32.xlu1 %v6963_v45  ;;  %7027 = vadd.xlane.f32.xlu0 %v6961_v25  ;;  %16632 = vst [vmem:[#allocation77_spill] sm:$0xff] %v13803_v11  ;;  %v13815_v32 = vmul.f32 %v13732_v54, %v13405_v51  ;;  %v13819_v4 = vmul.f32 %v13732_v54, %v13410_v47 }
 0x70d   : > { %16633 = vst [vmem:[#allocation78_spill] sm:$0xff] %v13811_v8  ;;  %v6969_v39 = vmul.f32 %v13753_v20, %v13803_v11  ;;  %v6966_v36 = vmul.f32 %v13753_v20, %v13783_v34  ;;  %v6565_v50 = vpack.c.bf16 %v13811_v8, %v13803_v11  ;;  %v13831_v51 = vmul.f32 %v13732_v54, %v13414_v13 }
 0x70e   : > { %16634 = vst [vmem:[#allocation79_spill] sm:$0xff] %v13815_v32  ;;  %16635 = vst [vmem:[#allocation80_spill] sm:$0xff] %v13819_v4  ;;  %v6566_v18 = vpack.c.bf16 %v13819_v4, %v13815_v32  ;;  %v6971_v47 = vmul.f32 %v13753_v20, %v13815_v32  ;;  %v6968_v12 = vmul.f32 %v13753_v20, %v13791_v42 }
 0x70f   : > { %16636 = vst [vmem:[#allocation81_spill] sm:$0xff] %v13831_v51  ;;  %v13839_v16 = vmul.f32 %v13732_v54, %v13418_v59  ;;  %v13843_v6 = vmul.f32 %v13732_v54, %v13421_v3  ;;  %v13847_v13 = vmul.f32 %v13732_v54, %v13430_v46  ;;  %v6973_v53 = vmul.f32 %v13753_v20, %v13831_v51 }
 0x710   : > { %7035 = vadd.xlane.f32.xlu1 %v6965_v38  ;;  %7029 = vadd.xlane.f32.xlu0 %v6962_v44  ;;  %v6970_v63 = vmul.f32 %v13753_v20, %v13811_v8  ;;  %v13859_v3 = vmul.f32 %v13732_v54, %v13436_v23  ;;  %v6972_v45 = vmul.f32 %v13753_v20, %v13819_v4 }
 0x711   : > { %16637 = vst [vmem:[#allocation82_spill] sm:$0xff] %v13839_v16  ;;  %16638 = vst [vmem:[#allocation83_spill] sm:$0xff] %v13843_v6  ;;  %v6567_v59 = vpack.c.bf16 %v13839_v16, %v13831_v51  ;;  %v6568_v61 = vpack.c.bf16 %v13847_v13, %v13843_v6  ;;  %v6975_v46 = vmul.f32 %v13753_v20, %v13843_v6 }
 0x712   : > { %10890 = vmatmul.mubr.bf16.gmra.mrb[196].mxu0 %v6563_v14  ;;  %16639 = vst [vmem:[#allocation84_spill] sm:$0xff] %v13847_v13  ;;  %16640 = vst [vmem:[#allocation85_spill] sm:$0xff] %v13859_v3  ;;  %v13867_v25 = vmul.f32 %v13732_v54, %v13446_v29  ;;  %v13871_v38 = vmul.f32 %v13732_v54, %v13449_v17  ;;  %v13875_v23 = vmul.f32 %v13732_v54, %v13454_v31 }
 0x713   : > { %10893 = vmatprep.mubr.bf16.mxu0 %v6564_v2  ;;  %v6977_v44 = vmul.f32 %v13753_v20, %v13859_v3  ;;  %v6974_v14 = vmul.f32 %v13753_v20, %v13839_v16  ;;  %v13887_v17 = vmul.f32 %v13732_v54, %v13478_v0  ;;  %v13903_v0 = vmul.f32 %v13732_v54, %v13516_v35 }
 0x714   : > { %7039 = vadd.xlane.f32.xlu1 %v6967_v55  ;;  %7033 = vadd.xlane.f32.xlu0 %v6964_v30  ;;  %16641 = vst [vmem:[#allocation86_spill] sm:$0xff] %v13867_v25  ;;  %16642 = vst [vmem:[#allocation87_spill] sm:$0xff] %v13871_v38  ;;  %v6569_v29 = vpack.c.bf16 %v13867_v25, %v13859_v3  ;;  %v6570_v2 = vpack.c.bf16 %v13875_v23, %v13871_v38 }
 0x715   : > { %16643 = vst [vmem:[#allocation88_spill] sm:$0xff] %v13875_v23  ;;  %16644 = vst [vmem:[#allocation89_spill] sm:$0xff] %v13887_v17  ;;  %v6979_v31 = vmul.f32 %v13753_v20, %v13871_v38  ;;  %v6976_v55 = vmul.f32 %v13753_v20, %v13847_v13  ;;  %v13895_v30 = vmul.f32 %v13732_v54, %v13492_v26 }
 0x716   : > { %16647 = vst [vmem:[#allocation92_spill] sm:$0xff] %v13903_v0  ;;  %v13917_v35 = vmul.f32 %v13732_v54, %v13542_v15  ;;  %v13930_v15 = vmul.f32 %v13732_v54, %v13571_v24  ;;  %v13958_v28 = vmul.f32 %v13732_v54, %v13633_v7 }
 0x717   : > { %16645 = vst [vmem:[#allocation90_spill] sm:$0xff] %v13895_v30  ;;  %v6571_v26 = vpack.c.bf16 %v13895_v30, %v13887_v17 }
 0x718   : > { %7043 = vadd.xlane.f32.xlu1 %v6969_v39  ;;  %7037 = vadd.xlane.f32.xlu0 %v6966_v36  ;;  %v13899_v39 = vmul.f32 %v13732_v54, %v13501_v60  ;;  %v6981_v36 = vmul.f32 %v13753_v20, %v13887_v17  ;;  %16648 = vst [vmem:[#allocation93_spill] sm:$0xff] %v13917_v35  ;;  %16650 = vst [vmem:[#allocation95_spill] sm:$0xff] %v13930_v15 }
 0x719   : > { %16653 = vst [vmem:[#allocation98_spill] sm:$0xff] %v13958_v28 }
 0x71a   : > { %10894 = vmatmul.mubr.bf16.gmra.mrb[200].mxu0 %v6565_v50  ;;  %16646 = vst [vmem:[#allocation91_spill] sm:$0xff] %v13899_v39  ;;  %v6978_v50 = vmul.f32 %v13753_v20, %v13867_v25  ;;  %v6572_v60 = vpack.c.bf16 %v13903_v0, %v13899_v39 }
 0x71b   : > { %10897 = vmatprep.mubr.bf16.mxu0 %v6566_v18  ;;  %v6471_v18 = vcombine.high %v13725_v48, %v13725_v48 }
 0x71c   : > { %7047 = vadd.xlane.f32.xlu1 %v6971_v47  ;;  %7041 = vadd.xlane.f32.xlu0 %v6968_v12  ;;  %v6983_v47 = vmul.f32 %v13753_v20, %v13899_v39  ;;  %v6980_v12 = vmul.f32 %v13753_v20, %v13875_v23 }
 0x71d   : > { %v6485_v48 = vrot.slane %v6471_v18, %v13722_v33 }
 0x71f   : > { %v13944_v33 = vrot.slane %v6485_v48, %v6488_v52 }
 0x720   : > { %7051 = vadd.xlane.f32.xlu1 %v6973_v53  ;;  %7045 = vadd.xlane.f32.xlu0 %v6970_v63  ;;  %v13925_v53 = vmul.f32 %v13732_v54, %v13560_v49  ;;  %v13934_v63 = vmul.f32 %v13732_v54, %v13590_v41  ;;  %v13950_v41 = vmul.f32 %v13732_v54, %v13615_v21 }
 0x721   : > { %v13962_v52 = vmul.f32 %v13944_v33, %v13457_v5  ;;  %v13966_v21 = vmul.f32 %v13944_v33, %v13460_v1  ;;  %v13978_v5 = vmul.f32 %v13944_v33, %v13463_v27  ;;  %v13994_v27 = vmul.f32 %v13944_v33, %v13488_v37 }
 0x722   : > { %10898 = vmatmul.mubr.bf16.gmra.mrb[204].mxu0 %v6567_v59  ;;  %16649 = vst [vmem:[#allocation94_spill] sm:$0xff] %v13925_v53  ;;  %16651 = vst [vmem:[#allocation96_spill] sm:$0xff] %v13934_v63  ;;  %v6985_v59 = vmul.f32 %v13753_v20, %v13917_v35  ;;  %v6573_v49 = vpack.c.bf16 %v13925_v53, %v13917_v35  ;;  %v6574_v24 = vpack.c.bf16 %v13934_v63, %v13930_v15 }
 0x723   : > { %10901 = vmatprep.mubr.bf16.mxu0 %v6568_v61  ;;  %v6982_v61 = vmul.f32 %v13753_v20, %v13895_v30  ;;  %16652 = vst [vmem:[#allocation97_spill] sm:$0xff] %v13950_v41  ;;  %16654 = vst [vmem:[#allocation99_spill] sm:$0xff] %v13962_v52  ;;  %v6575_v7 = vpack.c.bf16 %v13958_v28, %v13950_v41  ;;  %v6576_v54 = vpack.c.bf16 %v13966_v21, %v13962_v52 }
 0x724   : > { %7055 = vadd.xlane.f32.xlu1 %v6975_v46  ;;  %7049 = vadd.xlane.f32.xlu0 %v6972_v45  ;;  %v6987_v46 = vmul.f32 %v13753_v20, %v13930_v15  ;;  %v6984_v45 = vmul.f32 %v13753_v20, %v13903_v0  ;;  %16655 = vst [vmem:[#allocation100_spill] sm:$0xff] %v13966_v21  ;;  %16656 = vst [vmem:[#allocation101_spill] sm:$0xff] %v13978_v5 }
 0x725   : > { %v6988_v1 = vmul.f32 %v13753_v20, %v13934_v63  ;;  %16659 = vst [vmem:[#allocation104_spill] sm:$0xff] %v13994_v27  ;;  %v6992_v37 = vmul.f32 %v13753_v20, %v13966_v21 }
 0x728   : > { %7059 = vadd.xlane.f32.xlu1 %v6977_v44  ;;  %7053 = vadd.xlane.f32.xlu0 %v6974_v14  ;;  %v6989_v44 = vmul.f32 %v13753_v20, %v13950_v41  ;;  %v6986_v14 = vmul.f32 %v13753_v20, %v13925_v53 }
 0x72a   : > { %10902 = vmatmul.mubr.bf16.gmra.mrb[208].mxu0 %v6569_v29  ;;  %v6991_v29 = vmul.f32 %v13753_v20, %v13962_v52 }
 0x72b   : > { %10905 = vmatprep.mubr.bf16.mxu0 %v6570_v2  ;;  %v13986_v2 = vmul.f32 %v13944_v33, %v13471_v10 }
 0x72c   : > { %7063 = vadd.xlane.f32.xlu1 %v6979_v31  ;;  %7057 = vadd.xlane.f32.xlu0 %v6976_v55  ;;  %v13990_v31 = vmul.f32 %v13944_v33, %v13481_v19  ;;  %v6990_v55 = vmul.f32 %v13753_v20, %v13958_v28  ;;  %v16660_v19 = vld [vmem:[#allocation69_spill] sm:$0xff] }
 0x72d   : > { %16657 = vst [vmem:[#allocation102_spill] sm:$0xff] %v13986_v2  ;;  %v6577_v10 = vpack.c.bf16 %v13986_v2, %v13978_v5 }
 0x72e   : > { %16658 = vst [vmem:[#allocation103_spill] sm:$0xff] %v13990_v31  ;;  %v6995_v18 = vmul.f32 %v13753_v20, %v13990_v31 }
 0x730   : > { %7067 = vadd.xlane.f32.xlu1 %v6981_v36  ;;  %7061 = vadd.xlane.f32.xlu0 %v6978_v50  ;;  %v6993_v36 = vmul.f32 %v13753_v20, %v13978_v5  ;;  %v6578_v50 = vpack.c.bf16 %v13994_v27, %v13990_v31 }
 0x732   : > { %10906 = vmatmul.mubr.bf16.gmra.mrb[212].mxu0 %v6571_v26  ;;  %v14006_v26 = vmul.f32 %v13944_v33, %v16660_v19 }
 0x733   : > { %10909 = vmatprep.mubr.bf16.mxu0 %v6572_v60  ;;  %v16662_v60 = vld [vmem:[#allocation70_spill] sm:$0xff] }
 0x734   : > { %7071 = vadd.xlane.f32.xlu1 %v6983_v47  ;;  %7065 = vadd.xlane.f32.xlu0 %v6980_v12  ;;  %16661 = vst [vmem:[#allocation69_spill] sm:$0xff] %v14006_v26  ;;  %v14014_v47 = vmul.f32 %v13944_v33, %v16662_v60  ;;  %v16664_v12 = vld [vmem:[#allocation41_spill] sm:$0xff] }
 0x735   : > { %v14018_v48 = vmul.f32 %v13944_v33, %v16664_v12  ;;  %v16676_v12 = vld [vmem:[#allocation47_spill] sm:$0xff] }
 0x736   : > { %16663 = vst [vmem:[#allocation70_spill] sm:$0xff] %v14014_v47  ;;  %v6998_v19 = vmul.f32 %v13753_v20, %v14014_v47 }
 0x737   : > { %16665 = vst [vmem:[#allocation41_spill] sm:$0xff] %v14018_v48 }
 0x738   : > { %7075 = vadd.xlane.f32.xlu1 %v6985_v59  ;;  %7069 = vadd.xlane.f32.xlu0 %v6982_v61  ;;  %v16666_v59 = vld [vmem:[#allocation42_spill] sm:$0xff] }
 0x739   : > { %v14022_v61 = vmul.f32 %v13944_v33, %v16666_v59  ;;  %v14062_v59 = vmul.f32 %v13944_v33, %v16676_v12 }
 0x73a   : > { %10910 = vmatmul.mubr.bf16.gmra.mrb[216].mxu0 %v6573_v49  ;;  %v6994_v49 = vmul.f32 %v13753_v20, %v13986_v2 }
 0x73b   : > { %10913 = vmatprep.mubr.bf16.mxu0 %v6574_v24  ;;  %16667 = vst [vmem:[#allocation42_spill] sm:$0xff] %v14022_v61  ;;  %v6997_v24 = vmul.f32 %v13753_v20, %v14006_v26  ;;  %16677 = vst [vmem:[#allocation47_spill] sm:$0xff] %v14062_v59 }
 0x73c   : > { %7079 = vadd.xlane.f32.xlu1 %v6987_v46  ;;  %7073 = vadd.xlane.f32.xlu0 %v6984_v45  ;;  %v6579_v46 = vpack.c.bf16 %v14014_v47, %v14006_v26  ;;  %v6580_v45 = vpack.c.bf16 %v14022_v61, %v14018_v48 }
 0x740   : > { %7083 = vadd.xlane.f32.xlu1 %v6989_v44  ;;  %7077 = vadd.xlane.f32.xlu0 %v6986_v14  ;;  %v16668_v44 = vld [vmem:[#allocation43_spill] sm:$0xff] }
 0x741   : > { %v14034_v14 = vmul.f32 %v13944_v33, %v16668_v44  ;;  %v16680_v44 = vld [vmem:[#allocation49_spill] sm:$0xff] }
 0x742   : > { %10914 = vmatmul.mubr.bf16.gmra.mrb[220].mxu0 %v6575_v7  ;;  %v6996_v7 = vmul.f32 %v13753_v20, %v13994_v27 }
 0x743   : > { %10917 = vmatprep.mubr.bf16.mxu0 %v6576_v54  ;;  %16669 = vst [vmem:[#allocation43_spill] sm:$0xff] %v14034_v14  ;;  %v6999_v54 = vmul.f32 %v13753_v20, %v14018_v48 }
 0x744   : > { %7081 = vadd.xlane.f32.xlu0 %v6988_v1  ;;  %7087 = vadd.xlane.f32.xlu1 %v6991_v29  ;;  %v16670_v1 = vld [vmem:[#allocation44_spill] sm:$0xff] }
 0x745   : > { %v14042_v29 = vmul.f32 %v13944_v33, %v16670_v1 }
 0x747   : > { %16671 = vst [vmem:[#allocation44_spill] sm:$0xff] %v14042_v29 }
 0x748   : > { %7085 = vadd.xlane.f32.xlu0 %v6990_v55  ;;  %7091 = vadd.xlane.f32.xlu1 %v6993_v36  ;;  %v16672_v55 = vld [vmem:[#allocation45_spill] sm:$0xff] }
 0x749   : > { %v14046_v36 = vmul.f32 %v13944_v33, %v16672_v55  ;;  %v7002_v55 = vmul.f32 %v13753_v20, %v14042_v29 }
 0x74a   : > { %10918 = vmatmul.mubr.bf16.gmra.mrb[224].mxu0 %v6577_v10  ;;  %v16674_v10 = vld [vmem:[#allocation46_spill] sm:$0xff] }
 0x74b   : > { %10921 = vmatprep.mubr.bf16.mxu0 %v6578_v50  ;;  %16673 = vst [vmem:[#allocation45_spill] sm:$0xff] %v14046_v36  ;;  %v14050_v50 = vmul.f32 %v13944_v33, %v16674_v10  ;;  %v7005_v10 = vmul.f32 %v13753_v20, %v14062_v59 }
 0x74c   : > { %7089 = vadd.xlane.f32.xlu0 %v6992_v37  ;;  %7095 = vadd.xlane.f32.xlu1 %v6995_v18  ;;  %v7001_v37 = vmul.f32 %v13753_v20, %v14034_v14  ;;  %v6581_v18 = vpack.c.bf16 %v14042_v29, %v14034_v14 }
 0x74d   : > { %16675 = vst [vmem:[#allocation46_spill] sm:$0xff] %v14050_v50  ;;  %v6582_v60 = vpack.c.bf16 %v14050_v50, %v14046_v36  ;;  %v7004_v12 = vmul.f32 %v13753_v20, %v14050_v50 }
 0x750   : > { %7093 = vadd.xlane.f32.xlu0 %v6994_v49  ;;  %7099 = vadd.xlane.f32.xlu1 %v6997_v24  ;;  %v7000_v49 = vmul.f32 %v13753_v20, %v14022_v61  ;;  %v7003_v24 = vmul.f32 %v13753_v20, %v14046_v36  ;;  %v14196_v36 = vstv %s9387_s22  ;;  %s448_s22 = sand.u32 1, %s12158_s26  }
 0x751   : > { %s15845_s20 = sshll.u32 %s448_s22, 9 }
 0x752   : > { %10922 = vmatmul.mubr.bf16.gmra.mrb[228].mxu0 %v6579_v46  ;;  %v16678_v46 = vld [vmem:[#allocation48_spill] sm:$0xff]  ;;  %s15878_s23 = scalar_lea.vmem [#allocation6], %s15845_s20 }
 0x753   : > { %10925 = vmatprep.mubr.bf16.mxu0 %v6580_v45  ;;  %v14070_v45 = vmul.f32 %v13944_v33, %v16678_v46 }
 0x754   : > { %7097 = vadd.xlane.f32.xlu0 %v6996_v7  ;;  %7103 = vadd.xlane.f32.xlu1 %v6999_v54  ;;  %v14074_v7 = vmul.f32 %v13944_v33, %v16680_v44  ;;  %v16682_v54 = vld [vmem:[#allocation50_spill] sm:$0xff]  ;;  %v16688_v44 = vld [vmem:[#allocation53_spill] sm:$0xff] }
 0x755   : > { %16679 = vst [vmem:[#allocation48_spill] sm:$0xff] %v14070_v45  ;;  %v14078_v1 = vmul.f32 %v13944_v33, %v16682_v54  ;;  %v14102_v54 = vmul.f32 %v13944_v33, %v16688_v44 }
 0x756   : > { %16681 = vst [vmem:[#allocation49_spill] sm:$0xff] %v14074_v7 }
 0x757   : > { %16683 = vst [vmem:[#allocation50_spill] sm:$0xff] %v14078_v1  ;;  %16689 = vst [vmem:[#allocation53_spill] sm:$0xff] %v14102_v54  ;;  %v7008_v44 = vmul.f32 %v13753_v20, %v14078_v1 }
 0x758   : > { %7101 = vadd.xlane.f32.xlu0 %v6998_v19  ;;  %7107 = vadd.xlane.f32.xlu1 %v7001_v37  ;;  %v6583_v19 = vpack.c.bf16 %v14070_v45, %v14062_v59  ;;  %v6584_v37 = vpack.c.bf16 %v14078_v1, %v14074_v7 }
 0x75a   : > { %10926 = vmatmul.mubr.bf16.gmra.mrb[232].mxu0 %v6581_v18  ;;  %v16684_v18 = vld [vmem:[#allocation51_spill] sm:$0xff] }
 0x75b   : > { %10929 = vmatprep.mubr.bf16.mxu0 %v6582_v60  ;;  %v14090_v60 = vmul.f32 %v13944_v33, %v16684_v18 }
 0x75c   : > { %7105 = vadd.xlane.f32.xlu0 %v7000_v49  ;;  %7111 = vadd.xlane.f32.xlu1 %v7003_v24  ;;  %v7007_v49 = vmul.f32 %v13753_v20, %v14074_v7  ;;  %v16686_v24 = vld [vmem:[#allocation52_spill] sm:$0xff] }
 0x75d   : > { %16685 = vst [vmem:[#allocation51_spill] sm:$0xff] %v14090_v60  ;;  %v14098_v46 = vmul.f32 %v13944_v33, %v16686_v24 }
 0x75f   : > { %16687 = vst [vmem:[#allocation52_spill] sm:$0xff] %v14098_v46  ;;  %v6585_v18 = vpack.c.bf16 %v14098_v46, %v14090_v60  ;;  %v7010_v1 = vmul.f32 %v13753_v20, %v14098_v46 }
 0x760   : > { %7109 = vadd.xlane.f32.xlu0 %v7002_v55  ;;  %7115 = vadd.xlane.f32.xlu1 %v7005_v10  ;;  %v16690_v55 = vld [vmem:[#allocation54_spill] sm:$0xff] }
 0x761   : > { %v14106_v10 = vmul.f32 %v13944_v33, %v16690_v55  ;;  %v7011_v55 = vmul.f32 %v13753_v20, %v14102_v54 }
 0x762   : > { %10930 = vmatmul.mubr.bf16.gmra.mrb[236].mxu0 %v6583_v19  ;;  %v7006_v19 = vmul.f32 %v13753_v20, %v14070_v45 }
 0x763   : > { %10933 = vmatprep.mubr.bf16.mxu0 %v6584_v37  ;;  %16691 = vst [vmem:[#allocation54_spill] sm:$0xff] %v14106_v10  ;;  %v7009_v37 = vmul.f32 %v13753_v20, %v14090_v60  ;;  %v16696_v60 = vld [vmem:[#allocation57_spill] sm:$0xff] }
 0x764   : > { %7113 = vadd.xlane.f32.xlu0 %v7004_v12  ;;  %7119 = vadd.xlane.f32.xlu1 %v7007_v49  ;;  %v6586_v12 = vpack.c.bf16 %v14106_v10, %v14102_v54  ;;  %v16692_v49 = vld [vmem:[#allocation55_spill] sm:$0xff]  ;;  %v14130_v7 = vmul.f32 %v13944_v33, %v16696_v60 }
 0x765   : > { %v14118_v24 = vmul.f32 %v13944_v33, %v16692_v49  ;;  %v16698_v49 = vld [vmem:[#allocation58_spill] sm:$0xff]  ;;  %v16700_v60 = vld [vmem:[#allocation59_spill] sm:$0xff] }
 0x766   : > { %16697 = vst [vmem:[#allocation57_spill] sm:$0xff] %v14130_v7  ;;  %v7015_v54 = vmul.f32 %v13753_v20, %v14130_v7 }
 0x767   : > { %16693 = vst [vmem:[#allocation55_spill] sm:$0xff] %v14118_v24 }
 0x768   : > { %7117 = vadd.xlane.f32.xlu0 %v7006_v19  ;;  %7123 = vadd.xlane.f32.xlu1 %v7009_v37  ;;  %v16694_v19 = vld [vmem:[#allocation56_spill] sm:$0xff] }
 0x769   : > { %v14126_v37 = vmul.f32 %v13944_v33, %v16694_v19  ;;  %v14146_v19 = vmul.f32 %v13944_v33, %v16700_v60  ;;  %v16706_v60 = vld [vmem:[#allocation62_spill] sm:$0xff] }
 0x76a   : > { %10934 = vmatmul.mubr.bf16.gmra.mrb[240].mxu0 %v6585_v18  ;;  %v14134_v18 = vmul.f32 %v13944_v33, %v16698_v49  ;;  %v7012_v49 = vmul.f32 %v13753_v20, %v14106_v10 }
 0x76b   : > { %10937 = vmatprep.mubr.bf16.mxu0 %v6586_v12  ;;  %16695 = vst [vmem:[#allocation56_spill] sm:$0xff] %v14126_v37  ;;  %v7013_v12 = vmul.f32 %v13753_v20, %v14118_v24  ;;  %16701 = vst [vmem:[#allocation59_spill] sm:$0xff] %v14146_v19  ;;  %v7014_v10 = vmul.f32 %v13753_v20, %v14126_v37 }
 0x76c   : > { %7121 = vadd.xlane.f32.xlu0 %v7008_v44  ;;  %7127 = vadd.xlane.f32.xlu1 %v7011_v55  ;;  %16699 = vst [vmem:[#allocation58_spill] sm:$0xff] %v14134_v18  ;;  %v6587_v44 = vpack.c.bf16 %v14126_v37, %v14118_v24  ;;  %v6588_v55 = vpack.c.bf16 %v14134_v18, %v14130_v7  ;;  %v16704_v24 = vld [vmem:[#allocation61_spill] sm:$0xff] }
 0x76d   : > { %v14158_v46 = vmul.f32 %v13944_v33, %v16704_v24  ;;  %v16708_v24 = vld [vmem:[#allocation63_spill] sm:$0xff] }
 0x76f   : > { %16705 = vst [vmem:[#allocation61_spill] sm:$0xff] %v14158_v46  ;;  %v7019_v7 = vmul.f32 %v13753_v20, %v14158_v46 }
 0x770   : > { %7125 = vadd.xlane.f32.xlu0 %v7010_v1  ;;  %7131 = vadd.xlane.f32.xlu1 %v7013_v12  ;;  %v16702_v1 = vld [vmem:[#allocation60_spill] sm:$0xff] }
 0x771   : > { %v14154_v12 = vmul.f32 %v13944_v33, %v16702_v1  ;;  %v14174_v1 = vmul.f32 %v13944_v33, %v16708_v24 }
 0x772   : > { %10938 = vmatmul.mubr.bf16.gmra.mrb[244].mxu0 %v6587_v44  ;;  %v14162_v44 = vmul.f32 %v13944_v33, %v16706_v60  ;;  %v7016_v60 = vmul.f32 %v13753_v20, %v14134_v18 }
 0x773   : > { %10941 = vmatprep.mubr.bf16.mxu0 %v6588_v55  ;;  %16703 = vst [vmem:[#allocation60_spill] sm:$0xff] %v14154_v12  ;;  %v7017_v55 = vmul.f32 %v13753_v20, %v14146_v19  ;;  %16709 = vst [vmem:[#allocation63_spill] sm:$0xff] %v14174_v1  ;;  %v7021_v24 = vmul.f32 %v13753_v20, %v14174_v1 }
 0x774   : > { %7129 = vadd.xlane.f32.xlu0 %v7012_v49  ;;  %7135 = vadd.xlane.f32.xlu1 %v7015_v54  ;;  %16707 = vst [vmem:[#allocation62_spill] sm:$0xff] %v14162_v44  ;;  %v6589_v49 = vpack.c.bf16 %v14154_v12, %v14146_v19  ;;  %v6590_v54 = vpack.c.bf16 %v14162_v44, %v14158_v46  ;;  %v16712_v46 = vld [vmem:[#allocation9_spill] sm:$0xff] }
 0x775   : > { %v7018_v19 = vmul.f32 %v13753_v20, %v14154_v12 }
 0x778   : > { %7133 = vadd.xlane.f32.xlu0 %v7014_v10  ;;  %7139 = vadd.xlane.f32.xlu1 %v7017_v55  ;;  %v16710_v10 = vld [vmem:[#allocation64_spill] sm:$0xff] }
 0x779   : > { %v14182_v55 = vmul.f32 %v13944_v33, %v16710_v10 }
 0x77a   : > { %10942 = vmatmul.mubr.bf16.gmra.mrb[248].mxu0 %v6589_v49 }
 0x77b   : > { %10945 = vmatprep.mubr.bf16.mxu0 %v6590_v54  ;;  %16711 = vst [vmem:[#allocation64_spill] sm:$0xff] %v14182_v55  ;;  %v6591_v49 = vpack.c.bf16 %v14182_v55, %v14174_v1  ;;  %v7020_v54 = vmul.f32 %v13753_v20, %v14162_v44  ;;  %v7022_v33 = vmul.f32 %v13753_v20, %v14182_v55 }
 0x77c   : > { %7137 = vadd.xlane.f32.xlu0 %v7016_v60  ;;  %7143 = vadd.xlane.f32.xlu1 %v7019_v7 }
 0x780   : > { %7141 = vadd.xlane.f32.xlu0 %v7018_v19  ;;  %7147 = vadd.xlane.f32.xlu1 %v7021_v24 }
 0x782   : > { %10946 = vmatmul.mubr.bf16.gmra.mrb[252].mxu0 %v6591_v49 }
 0x783   : > { %10951 = vmatprep.mubr.msk.bf16.mxu0 %vm571_vm0, %v16712_v46 }
 0x784   : > { %7145 = vadd.xlane.f32.xlu0 %v7020_v54 }
 0x788   : > { %7149 = vadd.xlane.f32.xlu0 %v7022_v33 }
 0x795   : > { %v7026_v7 = vpop.xlane.xlu1 %7025  ;;  %v7024_v60 = vpop.xlane.xlu0 %7023 }
 0x796   : > { %v14202_v29 = vadd.f32 %v14196_v36, %v7024_v60  ;;  %v14210_v26 = vadd.f32 %v14196_v36, %v7026_v7 }
 0x799   : > { %v7032_v10 = vpop.xlane.xlu1 %7031  ;;  %v7028_v19 = vpop.xlane.xlu0 %7027 }
 0x79a   : > { %v14199_v20 = vadd.f32 %v14196_v36, %v7028_v19  ;;  %v14213_v27 = vadd.f32 %v14196_v36, %v7032_v10 }
 0x79c   : > { %v7217_v14 = vmax.f32 %v14202_v29, %v14199_v20 }
 0x79d   : > { %v7036_v24 = vpop.xlane.xlu1 %7035  ;;  %v7030_v12 = vpop.xlane.xlu0 %7029 }
 0x79e   : > { %v14207_v61 = vadd.f32 %v14196_v36, %v7030_v12  ;;  %v14219_v60 = vadd.f32 %v14196_v36, %v7036_v24  ;;  %v7219_v31 = vmax.f32 %v7217_v14, %v14213_v27 }
 0x7a0   : > { %v7218_v12 = vmax.f32 %v14210_v26, %v14207_v61  ;;  %v7221_v24 = vmax.f32 %v7219_v31, %v14219_v60 }
 0x7a1   : > { %v7040_v18 = vpop.xlane.xlu1 %7039  ;;  %v7034_v1 = vpop.xlane.xlu0 %7033 }
 0x7a2   : > { %v14216_v19 = vadd.f32 %v14196_v36, %v7034_v1  ;;  %v14228_v21 = vadd.f32 %v14196_v36, %v7040_v18 }
 0x7a4   : > { %v7220_v10 = vmax.f32 %v7218_v12, %v14216_v19  ;;  %v7223_v18 = vmax.f32 %v7221_v24, %v14228_v21 }
 0x7a5   : > { %v7044_v49 = vpop.xlane.xlu1 %7043  ;;  %v7038_v37 = vpop.xlane.xlu0 %7037 }
 0x7a6   : > { %v14225_v2 = vadd.f32 %v14196_v36, %v7038_v37  ;;  %v14236_v14 = vadd.f32 %v14196_v36, %v7044_v49 }
 0x7a8   : > { %v7222_v52 = vmax.f32 %v7220_v10, %v14225_v2  ;;  %v7225_v31 = vmax.f32 %v7223_v18, %v14236_v14 }
 0x7a9   : > { %v7048_v45 = vpop.xlane.xlu1 %7047  ;;  %v7042_v44 = vpop.xlane.xlu0 %7041 }
 0x7aa   : > { %v14232_v1 = vadd.f32 %v14196_v36, %v7042_v44  ;;  %v14244_v63 = vadd.f32 %v14196_v36, %v7048_v45 }
 0x7ac   : > { %v7224_v44 = vmax.f32 %v7222_v52, %v14232_v1  ;;  %v7227_v45 = vmax.f32 %v7225_v31, %v14244_v63 }
 0x7ad   : > { %v7052_v59 = vpop.xlane.xlu1 %7051  ;;  %v7046_v46 = vpop.xlane.xlu0 %7045 }
 0x7ae   : > { %v14240_v37 = vadd.f32 %v14196_v36, %v7046_v46  ;;  %v14252_v49 = vadd.f32 %v14196_v36, %v7052_v59 }
 0x7b0   : > { %v7226_v46 = vmax.f32 %v7224_v44, %v14240_v37  ;;  %v7229_v59 = vmax.f32 %v7227_v45, %v14252_v49 }
 0x7b1   : > { %v7056_v54 = vpop.xlane.xlu1 %7055  ;;  %v7050_v50 = vpop.xlane.xlu0 %7049 }
 0x7b2   : > { %v14248_v12 = vadd.f32 %v14196_v36, %v7050_v50  ;;  %v14260_v53 = vadd.f32 %v14196_v36, %v7056_v54 }
 0x7b4   : > { %v7228_v52 = vmax.f32 %v7226_v46, %v14248_v12  ;;  %v7231_v54 = vmax.f32 %v7229_v59, %v14260_v53 }
 0x7b5   : > { %v7060_v33 = vpop.xlane.xlu1 %7059  ;;  %v7054_v55 = vpop.xlane.xlu0 %7053 }
 0x7b6   : > { %v14256_v10 = vadd.f32 %v14196_v36, %v7054_v55  ;;  %v14268_v18 = vadd.f32 %v14196_v36, %v7060_v33 }
 0x7b8   : > { %v7230_v55 = vmax.f32 %v7228_v52, %v14256_v10  ;;  %v7233_v33 = vmax.f32 %v7231_v54, %v14268_v18 }
 0x7b9   : > { %v7064_v48 = vpop.xlane.xlu1 %7063  ;;  %v7058_v47 = vpop.xlane.xlu0 %7057 }
 0x7ba   : > { %v14264_v50 = vadd.f32 %v14196_v36, %v7058_v47  ;;  %v14276_v0 = vadd.f32 %v14196_v36, %v7064_v48 }
 0x7bc   : > { %v7232_v47 = vmax.f32 %v7230_v55, %v14264_v50  ;;  %v7235_v48 = vmax.f32 %v7233_v33, %v14276_v0 }
 0x7bd   : > { %v7068_v5 = vpop.xlane.xlu1 %7067  ;;  %v7062_v7 = vpop.xlane.xlu0 %7061 }
 0x7be   : > { %v14272_v44 = vadd.f32 %v14196_v36, %v7062_v7  ;;  %v14284_v45 = vadd.f32 %v14196_v36, %v7068_v5 }
 0x7c0   : > { %v7234_v7 = vmax.f32 %v7232_v47, %v14272_v44  ;;  %v7237_v5 = vmax.f32 %v7235_v48, %v14284_v45 }
 0x7c1   : > { %v7072_v28 = vpop.xlane.xlu1 %7071  ;;  %v7066_v41 = vpop.xlane.xlu0 %7065 }
 0x7c2   : > { %v14280_v46 = vadd.f32 %v14196_v36, %v7066_v41  ;;  %v14292_v30 = vadd.f32 %v14196_v36, %v7072_v28 }
 0x7c4   : > { %v7236_v41 = vmax.f32 %v7234_v7, %v14280_v46  ;;  %v7239_v28 = vmax.f32 %v7237_v5, %v14292_v30 }
 0x7c5   : > { %v7076_v15 = vpop.xlane.xlu1 %7075  ;;  %v7070_v24 = vpop.xlane.xlu0 %7069 }
 0x7c6   : > { %v14288_v52 = vadd.f32 %v14196_v36, %v7070_v24  ;;  %v14300_v54 = vadd.f32 %v14196_v36, %v7076_v15 }
 0x7c8   : > { %v7238_v24 = vmax.f32 %v7236_v41, %v14288_v52  ;;  %v7241_v15 = vmax.f32 %v7239_v28, %v14300_v54 }
 0x7c9   : > { %v7080_v35 = vpop.xlane.xlu1 %7079  ;;  %v7074_v31 = vpop.xlane.xlu0 %7073 }
 0x7ca   : > { %v14296_v55 = vadd.f32 %v14196_v36, %v7074_v31  ;;  %v14310_v7 = vadd.f32 %v14196_v36, %v7080_v35 }
 0x7cc   : > { %v7240_v31 = vmax.f32 %v7238_v24, %v14296_v55  ;;  %v7243_v25 = vmax.f32 %v7241_v15, %v14310_v7 }
 0x7cd   : > { %v7084_v39 = vpop.xlane.xlu1 %7083  ;;  %v7078_v59 = vpop.xlane.xlu0 %7077 }
 0x7ce   : > { %v14304_v47 = vadd.f32 %v14196_v36, %v7078_v59  ;;  %v14318_v41 = vadd.f32 %v14196_v36, %v7084_v39 }
 0x7d0   : > { %v7242_v59 = vmax.f32 %v7240_v31, %v14304_v47  ;;  %v7245_v24 = vmax.f32 %v7243_v25, %v14318_v41 }
 0x7d1   : > { %v7082_v17 = vpop.xlane.xlu0 %7081  ;;  %v14306_v33 = vpop.xlane.xlu1 %7087 }
 0x7d2   : > { %v14314_v48 = vadd.f32 %v14196_v36, %v7082_v17 }
 0x7d4   : > { %v7244_v5 = vmax.f32 %v7242_v59, %v14314_v48 }
 0x7d5   : > { %v7086_v23 = vpop.xlane.xlu0 %7085  ;;  %v7092_v38 = vpop.xlane.xlu1 %7091 }
 0x7d6   : > { %v14324_v35 = vadd.f32 %v14196_v36, %v7086_v23 }
 0x7d8   : > { %v7246_v17 = vmax.f32 %v7244_v5, %v14324_v35 }
 0x7d9   : > { %v7090_v3 = vpop.xlane.xlu0 %7089  ;;  %v7096_v28 = vpop.xlane.xlu1 %7095 }
 0x7da   : > { %v7247_v13 = vmax.f32 %v7245_v24, %v7246_v17 }
 0x7dc   : > { %v7248_v39 = vrot.slane %v7247_v13, 4 }
 0x7dd   : > { %v14328_v6 = vpop.f32.mrb[192].mxu0  ;;  %v7094_v31 = vpop.xlane.xlu0 %7093 }
 0x7de   : > { %16713 = vst [vmem:[#allocation9_spill] sm:$0xff] %v14328_v6  ;;  %v7249_v16 = vmax.f32 %v7247_v13, %v7248_v39  ;;  %v14330_v51 = vpop.f32.mrb[193].mxu0  ;;  %v7100_v15 = vpop.xlane.xlu1 %7099 }
 0x7df   : > { %16714 = vst [vmem:[#allocation105_spill] sm:$0xff] %v14330_v51  ;;  %v14332_v4 = vpop.f32.mrb[194].mxu0 }
 0x7e0   : > { %16715 = vst [vmem:[#allocation106_spill] sm:$0xff] %v14332_v4  ;;  %v7250_v59 = vrot.slane %v7249_v16, 2  ;;  %v14334_v23 = vpop.f32.mrb[195].mxu0 }
 0x7e1   : > { %16716 = vst [vmem:[#allocation107_spill] sm:$0xff] %v14334_v23  ;;  %v7098_v32 = vpop.xlane.xlu0 %7097 }
 0x7e2   : > { %v7251_v25 = vmax.f32 %v7249_v16, %v7250_v59  ;;  %v7104_v8 = vpop.xlane.xlu1 %7103 }
 0x7e4   : > { %v7252_v5 = vrot.slane %v7251_v25, 1 }
 0x7e5   : > { %v14336_v11 = vpop.f32.mrb[196].mxu0  ;;  %v7102_v24 = vpop.xlane.xlu0 %7101 }
 0x7e6   : > { %16717 = vst [vmem:[#allocation108_spill] sm:$0xff] %v14336_v11  ;;  %v14338_v17 = vpop.f32.mrb[197].mxu0  ;;  %v14340_v6 = vpop.xlane.xlu1 %7107  ;;  %v14344_v39 = vmax.f32 %v7251_v25, %v7252_v5 }
 0x7e7   : > { %16718 = vst [vmem:[#allocation109_spill] sm:$0xff] %v14338_v17  ;;  %v14342_v13 = vpop.f32.mrb[198].mxu0 }
 0x7e8   : > { %16719 = vst [vmem:[#allocation110_spill] sm:$0xff] %v14342_v13  ;;  %v14346_v51 = vpop.f32.mrb[199].mxu0  ;;  %v7291_v16 = vsub.f32 %v14202_v29, %v14344_v39  ;;  %v7292_v59 = vsub.f32 %v14210_v26, %v14344_v39  ;;  %v7293_v17 = vsub.f32 %v14199_v20, %v14344_v39  ;;  %v7295_v26 = vsub.f32 %v14213_v27, %v14344_v39 }
 0x7e9   : > { %16720 = vst [vmem:[#allocation111_spill] sm:$0xff] %v14346_v51  ;;  %v7106_v4 = vpop.xlane.xlu0 %7105  ;;  %v7294_v51 = vsub.f32 %v14207_v61, %v14344_v39  ;;  %v7297_v61 = vsub.f32 %v14219_v60, %v14344_v39  ;;  %v14381_v27 = vadd.f32 %v14196_v36, %v7092_v38  ;;  %v7299_v38 = vsub.f32 %v14228_v21, %v14344_v39 }
 0x7ea   : > { %v14348_v42 = vpop.xlane.xlu1 %7111  ;;  %v7355_v29 = vmul.f32 1.442695, %v7291_v16  ;;  %v7357_v56 = vmul.f32 1.442695, %v7292_v59  ;;  %v7359_v34 = vmul.f32 1.442695, %v7293_v17  ;;  %v7300_v21 = vsub.f32 %v14232_v1, %v14344_v39 }
 0x7eb   : > { %v7361_v9 = vmul.f32 1.442695, %v7294_v51  ;;  %v7363_v16 = vmul.f32 1.442695, %v7295_v26  ;;  %v14392_v51 = vadd.f32 %v14196_v36, %v7096_v28  ;;  %v14410_v28 = vadd.f32 %v14196_v36, %v7098_v32 }
 0x7ec   : > { %11695 = vpow2.f32 %v7355_v29  ;;  %v7298_v29 = vsub.f32 %v14225_v2, %v14344_v39  ;;  %v14404_v2 = vadd.f32 %v14196_v36, %v7090_v3  ;;  %v14426_v32 = vadd.f32 %v14196_v36, %v7104_v8 }
 0x7ed   : > { %v14356_v11 = vpop.f32.mrb[200].mxu0  ;;  %v14358_v23 = vpop.xlane.xlu0 %7109  ;;  %11697 = vpow2.f32 %v7357_v56  ;;  %v14389_v56 = vadd.f32 %v14196_v36, %v14306_v33  ;;  %v14407_v33 = vadd.f32 %v14196_v36, %v7100_v15  ;;  %v14444_v43 = vadd.f32 %v14196_v36, %v7106_v4 }
 0x7ee   : > { %16721 = vst [vmem:[#allocation112_spill] sm:$0xff] %v14356_v11  ;;  %v14360_v25 = vpop.f32.mrb[201].mxu0  ;;  %v14362_v5 = vpop.xlane.xlu1 %7115  ;;  %11699 = vpow2.f32 %v7359_v34  ;;  %v14395_v34 = vadd.f32 %v14196_v36, %v7094_v31  ;;  %v7369_v26 = vmul.f32 1.442695, %v7298_v29  ;;  %v7371_v29 = vmul.f32 1.442695, %v7299_v38 }
 0x7ef   : > { %16722 = vst [vmem:[#allocation113_spill] sm:$0xff] %v14360_v25  ;;  %v14366_v13 = vpop.f32.mrb[202].mxu0  ;;  %v7296_v25 = vsub.f32 %v14216_v19, %v14344_v39  ;;  %11701 = vpow2.f32 %v7361_v9  ;;  %v7367_v19 = vmul.f32 1.442695, %v7297_v61  ;;  %v7254_v9 = vmax.f32 %v14389_v56, %v14381_v27 }
 0x7f0   : > { %16723 = vst [vmem:[#allocation114_spill] sm:$0xff] %v14366_v13  ;;  %11703 = vpow2.f32 %v7363_v16  ;;  %v14412_v31 = vpop.f32.mrb[203].mxu0  ;;  %v7255_v15 = vmax.f32 %v14404_v2, %v14395_v34  ;;  %v7302_v38 = vsub.f32 %v14240_v37, %v14344_v39  ;;  %v14465_v62 = vadd.f32 %v14196_v36, %v14358_v23 }
 0x7f1   : > { %v14370_v20 = vpop.xlane.xlu0 %7113  ;;  %v7365_v13 = vmul.f32 1.442695, %v7296_v25  ;;  %16724 = vst [vmem:[#allocation115_spill] sm:$0xff] %v14412_v31  ;;  %v7256_v3 = vmax.f32 %v7254_v9, %v14392_v51  ;;  %v14429_v31 = vadd.f32 %v14196_v36, %v7102_v24  ;;  %v7304_v23 = vsub.f32 %v14248_v12, %v14344_v39 }
 0x7f2   : > { %v14372_v11 = vpop.xlane.xlu1 %7119  ;;  %v7257_v24 = vmax.f32 %v7255_v15, %v14410_v28  ;;  %v14494_v12 = vadd.f32 %v14196_v36, %v14362_v5 }
 0x7f3   : > { %11705 = vpow2.f32 %v7365_v13  ;;  %v7301_v13 = vsub.f32 %v14236_v14, %v14344_v39  ;;  %v7258_v8 = vmax.f32 %v7256_v3, %v14407_v33  ;;  %v14509_v5 = vadd.f32 %v14196_v36, %v14372_v11 }
 0x7f4   : > { %11707 = vpow2.f32 %v7367_v19  ;;  %v7373_v19 = vmul.f32 1.442695, %v7300_v21  ;;  %v7381_v11 = vmul.f32 1.442695, %v7304_v23 }
 0x7f5   : > { %v14378_v59 = vpop.xlane.xlu0 %7117  ;;  %v14418_v61 = vpop.f32.mrb[204].mxu0  ;;  %11709 = vpow2.f32 %v7369_v26  ;;  %v7260_v15 = vmax.f32 %v7258_v8, %v14426_v32  ;;  %v7375_v21 = vmul.f32 1.442695, %v7301_v13 }
 0x7f6   : > { %v14383_v17 = vpop.xlane.xlu1 %7123  ;;  %16725 = vst [vmem:[#allocation116_spill] sm:$0xff] %v14418_v61  ;;  %v14420_v16 = vpop.eup %11695  ;;  %11711 = vpow2.f32 %v7371_v29 }
 0x7f7   : > { %v14431_v22 = vpop.f32.mrb[205].mxu0  ;;  %v14433_v1 = vpop.eup %11697  ;;  %11713 = vpow2.f32 %v7373_v19 }
 0x7f8   : > { %16726 = vst [vmem:[#allocation117_spill] sm:$0xff] %v14431_v22  ;;  %v14437_v61 = vpop.f32.mrb[206].mxu0  ;;  %v7483_v57 = vadd.f32 %v14433_v1, %v14420_v16  ;;  %v14450_v14 = vpop.eup %11699  ;;  %11715 = vpow2.f32 %v7375_v21 }
 0x7f9   : > { %v14399_v60 = vpop.xlane.xlu0 %7121  ;;  %16727 = vst [vmem:[#allocation118_spill] sm:$0xff] %v14437_v61  ;;  %v14446_v22 = vpop.f32.mrb[207].mxu0  ;;  %16729 = vst [vmem:[#allocation120_spill] sm:$0xff] %v14450_v14  ;;  %v14456_v61 = vadd.f32 %v14196_v36, %v14340_v6  ;;  %v7303_v6 = vsub.f32 %v14244_v63, %v14344_v39 }
 0x7fa   : > { %v14414_v25 = vpop.xlane.xlu1 %7127  ;;  %16728 = vst [vmem:[#allocation119_spill] sm:$0xff] %v14446_v22  ;;  %v7484_v4 = vadd.f32 %v14450_v14, %v7483_v57  ;;  %v7259_v22 = vmax.f32 %v7257_v24, %v14429_v31  ;;  %v14469_v37 = vpop.eup %11701  ;;  %v14475_v57 = vadd.f32 %v14196_v36, %v14348_v42  ;;  %v7377_v42 = vmul.f32 1.442695, %v7302_v38 }
 0x7fb   : > { %16732 = vst [vmem:[#allocation123_spill] sm:$0xff] %v14469_v37  ;;  %v14489_v29 = vpop.eup %11703  ;;  %v7379_v38 = vmul.f32 1.442695, %v7303_v6  ;;  %v14519_v21 = vadd.f32 %v14196_v36, %v14399_v60 }
 0x7fc   : > { %v7485_v24 = vadd.f32 %v14469_v37, %v7484_v4  ;;  %16735 = vst [vmem:[#allocation126_spill] sm:$0xff] %v14489_v29  ;;  %11717 = vpow2.f32 %v7377_v42 }
 0x7fd   : > { %v7126_v9 = vpop.xlane.xlu0 %7125  ;;  %v14458_v3 = vpop.f32.mrb[208].mxu0  ;;  %11719 = vpow2.f32 %v7379_v38 }
 0x7fe   : > { %v14448_v40 = vpop.xlane.xlu1 %7131  ;;  %16730 = vst [vmem:[#allocation121_spill] sm:$0xff] %v14458_v3  ;;  %v14467_v58 = vpop.f32.mrb[209].mxu0  ;;  %v14485_v3 = vadd.f32 %v14196_v36, %v14370_v20  ;;  %v7486_v4 = vadd.f32 %v14489_v29, %v7485_v24  ;;  %11721 = vpow2.f32 %v7381_v11 }
 0x7ff   : > { %16731 = vst [vmem:[#allocation122_spill] sm:$0xff] %v14467_v58  ;;  %v14477_v26 = vpop.f32.mrb[210].mxu0  ;;  %v7261_v58 = vmax.f32 %v7259_v22, %v14444_v43  ;;  %v7305_v22 = vsub.f32 %v14252_v49, %v14344_v39  ;;  %v14504_v37 = vpop.eup %11705 }
 0x800   : > { %16733 = vst [vmem:[#allocation124_spill] sm:$0xff] %v14477_v26  ;;  %v14487_v63 = vpop.f32.mrb[211].mxu0  ;;  %v7262_v26 = vmax.f32 %v7260_v15, %v14456_v61  ;;  %16736 = vst [vmem:[#allocation127_spill] sm:$0xff] %v14504_v37  ;;  %v7487_v24 = vadd.f32 %v14504_v37, %v7486_v4  ;;  %v14523_v29 = vpop.eup %11707  ;;  %v14537_v37 = vadd.f32 %v14196_v36, %v7126_v9 }
 0x801   : > { %v7130_v8 = vpop.xlane.xlu0 %7129  ;;  %16734 = vst [vmem:[#allocation125_spill] sm:$0xff] %v14487_v63  ;;  %v7263_v20 = vmax.f32 %v7261_v58, %v14465_v62  ;;  %v14502_v63 = vadd.f32 %v14196_v36, %v14378_v59  ;;  %v7306_v58 = vsub.f32 %v14256_v10, %v14344_v39  ;;  %16739 = vst [vmem:[#allocation130_spill] sm:$0xff] %v14523_v29  ;;  %v14541_v23 = vpop.eup %11709 }
 0x802   : > { %v7136_v13 = vpop.xlane.xlu1 %7135  ;;  %v7264_v19 = vmax.f32 %v7262_v26, %v14475_v57  ;;  %v14528_v10 = vadd.f32 %v14196_v36, %v14383_v17  ;;  %v7488_v60 = vadd.f32 %v14523_v29, %v7487_v24  ;;  %16742 = vst [vmem:[#allocation133_spill] sm:$0xff] %v14541_v23  ;;  %v7308_v24 = vsub.f32 %v14264_v50, %v14344_v39  ;;  %v14555_v29 = vpop.eup %11711 }
 0x803   : > { %v7265_v59 = vmax.f32 %v7263_v20, %v14485_v3  ;;  %v7307_v20 = vsub.f32 %v14260_v53, %v14344_v39  ;;  %16743 = vst [vmem:[#allocation134_spill] sm:$0xff] %v14555_v29  ;;  %v7309_v50 = vsub.f32 %v14268_v18, %v14344_v39 }
 0x805   : > { %v14511_v15 = vpop.f32.mrb[212].mxu0  ;;  %v7134_v49 = vpop.xlane.xlu0 %7133 }
 0x806   : > { %16737 = vst [vmem:[#allocation128_spill] sm:$0xff] %v14511_v15  ;;  %v14521_v6 = vpop.f32.mrb[213].mxu0  ;;  %v7140_v26 = vpop.xlane.xlu1 %7139  ;;  %v7266_v15 = vmax.f32 %v7264_v19, %v14494_v12  ;;  %v7383_v19 = vmul.f32 1.442695, %v7305_v22  ;;  %v7385_v22 = vmul.f32 1.442695, %v7306_v58 }
 0x807   : > { %16738 = vst [vmem:[#allocation129_spill] sm:$0xff] %v14521_v6  ;;  %v14530_v4 = vpop.f32.mrb[214].mxu0  ;;  %v7267_v6 = vmax.f32 %v7265_v59, %v14502_v63  ;;  %v7489_v59 = vadd.f32 %v14541_v23, %v7488_v60  ;;  %v14569_v23 = vpop.eup %11713  ;;  %v7387_v58 = vmul.f32 1.442695, %v7307_v20  ;;  %v7310_v20 = vsub.f32 %v14272_v44, %v14344_v39 }
 0x808   : > { %16740 = vst [vmem:[#allocation131_spill] sm:$0xff] %v14530_v4  ;;  %v14539_v42 = vpop.f32.mrb[215].mxu0  ;;  %v7268_v17 = vmax.f32 %v7266_v15, %v14509_v5  ;;  %v14546_v4 = vadd.f32 %v14196_v36, %v14414_v25  ;;  %v14560_v25 = vadd.f32 %v14196_v36, %v14448_v40  ;;  %16744 = vst [vmem:[#allocation135_spill] sm:$0xff] %v14569_v23  ;;  %11723 = vpow2.f32 %v7383_v19 }
 0x809   : > { %16741 = vst [vmem:[#allocation132_spill] sm:$0xff] %v14539_v42  ;;  %v7138_v53 = vpop.xlane.xlu0 %7137  ;;  %v7269_v9 = vmax.f32 %v7267_v6, %v14519_v21  ;;  %v14553_v42 = vadd.f32 %v14196_v36, %v7130_v8  ;;  %v7490_v60 = vadd.f32 %v14555_v29, %v7489_v59  ;;  %v14567_v8 = vadd.f32 %v14196_v36, %v7134_v49  ;;  %v14584_v29 = vpop.eup %11715 }
 0x80a   : > { %v7270_v38 = vmax.f32 %v7268_v17, %v14528_v10  ;;  %v7144_v15 = vpop.xlane.xlu1 %7143  ;;  %v14573_v40 = vadd.f32 %v14196_v36, %v7136_v13  ;;  %16747 = vst [vmem:[#allocation138_spill] sm:$0xff] %v14584_v29  ;;  %11725 = vpow2.f32 %v7385_v22  ;;  %v7389_v13 = vmul.f32 1.442695, %v7308_v24 }
 0x80b   : > { %v7271_v6 = vmax.f32 %v7269_v9, %v14537_v37  ;;  %v7491_v18 = vadd.f32 %v14569_v23, %v7490_v60  ;;  %v14580_v9 = vadd.f32 %v14196_v36, %v7138_v53  ;;  %v14594_v53 = vadd.f32 %v14196_v36, %v7140_v26  ;;  %v14601_v23 = vpop.eup %11717 }
 0x80c   : > { %v7272_v11 = vmax.f32 %v7270_v38, %v14546_v4  ;;  %16750 = vst [vmem:[#allocation141_spill] sm:$0xff] %v14601_v23  ;;  %v7311_v44 = vsub.f32 %v14276_v0, %v14344_v39  ;;  %11727 = vpow2.f32 %v7387_v58  ;;  %v7391_v24 = vmul.f32 1.442695, %v7309_v50 }
 0x80d   : > { %v14575_v17 = vpop.f32.mrb[216].mxu0  ;;  %v7142_v14 = vpop.xlane.xlu0 %7141  ;;  %v7273_v59 = vmax.f32 %v7271_v6, %v14553_v42  ;;  %v7492_v60 = vadd.f32 %v14584_v29, %v7491_v18  ;;  %v7312_v0 = vsub.f32 %v14280_v46, %v14344_v39  ;;  %11729 = vpow2.f32 %v7389_v13 }
 0x80e   : > { %16745 = vst [vmem:[#allocation136_spill] sm:$0xff] %v14575_v17  ;;  %v14582_v49 = vpop.f32.mrb[217].mxu0  ;;  %v7274_v19 = vmax.f32 %v7272_v11, %v14560_v25  ;;  %v7148_v11 = vpop.xlane.xlu1 %7147  ;;  %v7393_v50 = vmul.f32 1.442695, %v7310_v20  ;;  %11731 = vpow2.f32 %v7391_v24 }
 0x80f   : > { %16746 = vst [vmem:[#allocation137_spill] sm:$0xff] %v14582_v49  ;;  %v14589_v38 = vpop.f32.mrb[218].mxu0  ;;  %v7275_v6 = vmax.f32 %v7273_v59, %v14567_v8  ;;  %v14597_v49 = vadd.f32 %v14196_v36, %v7142_v14  ;;  %v7493_v59 = vadd.f32 %v14601_v23, %v7492_v60  ;;  %v14609_v14 = vadd.f32 %v14196_v36, %v7144_v15 }
 0x810   : > { %16748 = vst [vmem:[#allocation139_spill] sm:$0xff] %v14589_v38  ;;  %v14599_v17 = vpop.f32.mrb[219].mxu0  ;;  %v7276_v22 = vmax.f32 %v7274_v19, %v14573_v40  ;;  %v14614_v38 = vpop.eup %11719  ;;  %v7395_v23 = vmul.f32 1.442695, %v7311_v44  ;;  %11733 = vpow2.f32 %v7393_v50  ;;  %v7397_v44 = vmul.f32 1.442695, %v7312_v0 }
 0x811   : > { %16749 = vst [vmem:[#allocation140_spill] sm:$0xff] %v14599_v17  ;;  %v7146_v18 = vpop.xlane.xlu0 %7145  ;;  %v7277_v26 = vmax.f32 %v7275_v6, %v14580_v9  ;;  %v7494_v58 = vadd.f32 %v14614_v38, %v7493_v59  ;;  %v14622_v6 = vadd.f32 %v14196_v36, %v7148_v11  ;;  %v14624_v15 = vpop.eup %11721 }
 0x812   : > { %v14612_v17 = vadd.f32 %v14196_v36, %v7146_v18  ;;  %v7278_v19 = vmax.f32 %v7276_v22, %v14594_v53  ;;  %v7313_v18 = vsub.f32 %v14284_v45, %v14344_v39  ;;  %v7314_v45 = vsub.f32 %v14288_v52, %v14344_v39 }
 0x813   : > { %v7279_v60 = vmax.f32 %v7277_v26, %v14597_v49  ;;  %v7495_v20 = vadd.f32 %v14624_v15, %v7494_v58  ;;  %v14638_v26 = vpop.eup %11723  ;;  %11735 = vpow2.f32 %v7395_v23  ;;  %v7317_v23 = vsub.f32 %v14300_v54, %v14344_v39 }
 0x814   : > { %v7280_v13 = vmax.f32 %v7278_v19, %v14609_v14  ;;  %11737 = vpow2.f32 %v7397_v44 }
 0x815   : > { %v14628_v29 = vpop.f32.mrb[220].mxu0  ;;  %v7150_v46 = vpop.xlane.xlu0 %7149  ;;  %v7281_v22 = vmax.f32 %v7279_v60, %v14612_v17  ;;  %v7496_v58 = vadd.f32 %v14638_v26, %v7495_v20  ;;  %v7316_v20 = vsub.f32 %v14296_v55, %v14344_v39 }
 0x816   : > { %16751 = vst [vmem:[#allocation142_spill] sm:$0xff] %v14628_v29  ;;  %v14633_v59 = vpop.f32.mrb[221].mxu0  ;;  %v14636_v11 = vadd.f32 %v14196_v36, %v7150_v46  ;;  %v7282_v19 = vmax.f32 %v7280_v13, %v14622_v6  ;;  %v7315_v36 = vsub.f32 %v14292_v30, %v14344_v39  ;;  %v7399_v46 = vmul.f32 1.442695, %v7313_v18 }
 0x817   : > { %16752 = vst [vmem:[#allocation143_spill] sm:$0xff] %v14633_v59  ;;  %v14642_v24 = vpop.f32.mrb[222].mxu0  ;;  %v14649_v59 = vpop.eup %11725  ;;  %v7401_v13 = vmul.f32 1.442695, %v7314_v45 }
 0x818   : > { %16753 = vst [vmem:[#allocation144_spill] sm:$0xff] %v14636_v11  ;;  %16754 = vst [vmem:[#allocation145_spill] sm:$0xff] %v14642_v24  ;;  %v7283_v60 = vmax.f32 %v7281_v22, %v14636_v11  ;;  %v14647_v29 = vpop.f32.mrb[223].mxu0  ;;  %v7497_v52 = vadd.f32 %v14649_v59, %v7496_v58  ;;  %v14654_v50 = vpop.eup %11727  ;;  %11739 = vpow2.f32 %v7399_v46  ;;  %v7403_v18 = vmul.f32 1.442695, %v7315_v36 }
 0x819   : > { %16755 = vst [vmem:[#allocation146_spill] sm:$0xff] %v14647_v29  ;;  %v11690_v29 = vld [vmem:[%s16289_s7] sm:$0xff]   ;;  %v14662_v30 = vpop.eup %11729  ;;  %11741 = vpow2.f32 %v7401_v13  ;;  %v16760_v13 = vld [vmem:[#allocation10_spill] sm:$0xff] }
 0x81a   : > { %v7284_v0 = vmax.f32 %v7282_v19, %v7283_v60  ;;  %v7498_v22 = vadd.f32 %v14654_v50, %v7497_v52  ;;  %10949 = vmatprep.subr.bf16.mxu0 %v11690_v29  ;;  %v14671_v19 = vpop.eup %11731  ;;  %v7318_v60 = vsub.f32 %v14304_v47, %v14344_v39  ;;  %v7405_v52 = vmul.f32 1.442695, %v7316_v20 }
 0x81b   : > { %10950 = vmatpush3.bf16.msra.mxu0 %v11690_v29  ;;  %11743 = vpow2.f32 %v7403_v18  ;;  %v7320_v20 = vsub.f32 %v14314_v48, %v14344_v39 }
 0x81c   : > { %v7285_v24 = vrot.slane %v7284_v0, 4  ;;  %v7499_v55 = vadd.f32 %v14662_v30, %v7498_v22  ;;  %v14680_v22 = vpop.eup %11733  ;;  %11745 = vpow2.f32 %v7405_v52  ;;  %v7322_v52 = vsub.f32 %v14324_v35, %v14344_v39 }
 0x81d   : > { %v14666_v58 = vpop.f32.mrb[224].mxu0  ;;  %v14687_v29 = vpop.eup %11735 }
 0x81e   : > { %16756 = vst [vmem:[#allocation147_spill] sm:$0xff] %v14666_v58  ;;  %v7286_v45 = vmax.f32 %v7284_v0, %v7285_v24  ;;  %v14669_v44 = vpop.f32.mrb[225].mxu0  ;;  %v7500_v54 = vadd.f32 %v14671_v19, %v7499_v55  ;;  %v7319_v24 = vsub.f32 %v14310_v7, %v14344_v39  ;;  %v7407_v0 = vmul.f32 1.442695, %v7317_v23  ;;  %10952 = vmatmul.mubr.msk.bf16.vlgmr.msra.gmra.mrb[0].mxu0 %vm571_vm0, %v16760_v13  ;;  %v14694_v18 = vpop.eup %11737 }
 0x81f   : > { %16757 = vst [vmem:[#allocation148_spill] sm:$0xff] %v14669_v44  ;;  %v14675_v11 = vpop.f32.mrb[226].mxu0  ;;  %v7409_v55 = vmul.f32 1.442695, %v7318_v60  ;;  %v7321_v23 = vsub.f32 %v14318_v41, %v14344_v39  ;;  %v7417_v39 = vmul.f32 1.442695, %v7322_v52 }
 0x820   : > { %16758 = vst [vmem:[#allocation149_spill] sm:$0xff] %v14675_v11  ;;  %v7287_v36 = vrot.slane %v7286_v45, 2  ;;  %v14678_v46 = vpop.f32.mrb[227].mxu0  ;;  %v7501_v44 = vadd.f32 %v14680_v22, %v7500_v54  ;;  %11747 = vpow2.f32 %v7407_v0  ;;  %v16766_v11 = vld [vmem:[#allocation12_spill] sm:$0xff] }
 0x821   : > { %16759 = vst [vmem:[#allocation150_spill] sm:$0xff] %v14678_v46  ;;  %v16761_v46 = vld [vmem:[#allocation11_spill] sm:$0xff]  ;;  %11749 = vpow2.f32 %v7409_v55 }
 0x822   : > { %v7288_v47 = vmax.f32 %v7286_v45, %v7287_v36  ;;  %10955 = vmatprep.mubr.msk.bf16.mxu0 %vm571_vm0, %v16761_v46  ;;  %v7502_v7 = vadd.f32 %v14687_v29, %v7501_v44  ;;  %v7411_v45 = vmul.f32 1.442695, %v7319_v24  ;;  %v14703_v60 = vpop.eup %11739  ;;  %v7413_v44 = vmul.f32 1.442695, %v7320_v20  ;;  %v16767_v20 = vld [vmem:[#allocation13_spill] sm:$0xff] }
 0x823   : > { %v14712_v24 = vpop.eup %11741 }
 0x824   : > { %v7289_v54 = vrot.slane %v7288_v47, 1  ;;  %v7503_v13 = vadd.f32 %v14694_v18, %v7502_v7  ;;  %11751 = vpow2.f32 %v7411_v45 }
 0x825   : > { %v14698_v36 = vpop.f32.mrb[228].mxu0  ;;  %v14719_v35 = vpop.eup %11743  ;;  %11753 = vpow2.f32 %v7413_v44 }
 0x826   : > { %16762 = vst [vmem:[#allocation10_spill] sm:$0xff] %v14698_v36  ;;  %v14701_v48 = vpop.f32.mrb[229].mxu0  ;;  %v7504_v41 = vadd.f32 %v14703_v60, %v7503_v13  ;;  %v7415_v36 = vmul.f32 1.442695, %v7321_v23  ;;  %v14714_v7 = vmax.f32 %v7288_v47, %v7289_v54  ;;  %10956 = vmatmul.mubr.msk.bf16.gmra.mrb[4].mxu0 %vm571_vm0, %v16766_v11  ;;  %v14724_v13 = vpop.eup %11745 }
 0x827   : > { %16763 = vst [vmem:[#allocation11_spill] sm:$0xff] %v14701_v48  ;;  %v14707_v46 = vpop.f32.mrb[230].mxu0  ;;  %10959 = vmatprep.mubr.msk.bf16.mxu0 %vm571_vm0, %v16767_v20 }
 0x828   : > { %16764 = vst [vmem:[#allocation151_spill] sm:$0xff] %v14707_v46  ;;  %v14710_v0 = vpop.f32.mrb[231].mxu0  ;;  %v7505_v48 = vadd.f32 %v14712_v24, %v7504_v41  ;;  %11755 = vpow2.f32 %v7415_v36  ;;  %v7323_v47 = vsub.f32 %v14389_v56, %v14714_v7  ;;  %v7324_v23 = vsub.f32 %v14404_v2, %v14714_v7 }
 0x829   : > { %16765 = vst [vmem:[#allocation152_spill] sm:$0xff] %v14710_v0  ;;  %v7325_v54 = vsub.f32 %v14381_v27, %v14714_v7  ;;  %11757 = vpow2.f32 %v7417_v39  ;;  %v7326_v56 = vsub.f32 %v14395_v34, %v14714_v7 }
 0x82a   : > { %v7506_v55 = vadd.f32 %v14719_v35, %v7505_v48  ;;  %v14737_v44 = vpop.eup %11747  ;;  %v7419_v20 = vmul.f32 1.442695, %v7323_v47 }
 0x82b   : > { %v14746_v41 = vpop.eup %11749  ;;  %v7425_v47 = vmul.f32 1.442695, %v7326_v56 }
 0x82c   : > { %v7507_v11 = vadd.f32 %v14724_v13, %v7506_v55  ;;  %v7421_v55 = vmul.f32 1.442695, %v7324_v23  ;;  %11759 = vpow2.f32 %v7419_v20 }
 0x82d   : > { %v14730_v45 = vpop.f32.mrb[232].mxu0 }
 0x82e   : > { %16768 = vst [vmem:[#allocation12_spill] sm:$0xff] %v14730_v45  ;;  %v14735_v52 = vpop.f32.mrb[233].mxu0  ;;  %v7508_v36 = vadd.f32 %v14737_v44, %v7507_v11  ;;  %v7423_v45 = vmul.f32 1.442695, %v7325_v54  ;;  %v14751_v39 = vpop.eup %11751  ;;  %v7327_v11 = vsub.f32 %v14392_v51, %v14714_v7  ;;  %11761 = vpow2.f32 %v7421_v55 }
 0x82f   : > { %16769 = vst [vmem:[#allocation13_spill] sm:$0xff] %v14735_v52  ;;  %v14739_v48 = vpop.f32.mrb[234].mxu0  ;;  %v16772_v52 = vld [vmem:[#allocation14_spill] sm:$0xff]  ;;  %v14758_v23 = vpop.eup %11753  ;;  %v7328_v51 = vsub.f32 %v14410_v28, %v14714_v7 }
 0x830   : > { %16770 = vst [vmem:[#allocation153_spill] sm:$0xff] %v14739_v48  ;;  %v14744_v2 = vpop.f32.mrb[235].mxu0  ;;  %v7509_v27 = vadd.f32 %v14746_v41, %v7508_v36  ;;  %10960 = vmatmul.mubr.msk.bf16.gmra.mrb[8].mxu0 %vm571_vm0, %v16772_v52  ;;  %v16773_v48 = vld [vmem:[#allocation15_spill] sm:$0xff]  ;;  %11763 = vpow2.f32 %v7423_v45  ;;  %v7427_v20 = vmul.f32 1.442695, %v7327_v11  ;;  %v16777_v45 = vld [vmem:[#allocation16_spill] sm:$0xff] }
 0x831   : > { %16771 = vst [vmem:[#allocation154_spill] sm:$0xff] %v14744_v2  ;;  %10963 = vmatprep.mubr.msk.bf16.mxu0 %vm571_vm0, %v16773_v48  ;;  %11765 = vpow2.f32 %v7425_v47  ;;  %v7429_v28 = vmul.f32 1.442695, %v7328_v51  ;;  %v16778_v11 = vld [vmem:[#allocation17_spill] sm:$0xff] }
 0x832   : > { %v7510_v34 = vadd.f32 %v14751_v39, %v7509_v27  ;;  %v14763_v52 = vpop.eup %11755  ;;  %11767 = vpow2.f32 %v7427_v20 }
 0x833   : > { %v14770_v55 = vpop.eup %11757  ;;  %11769 = vpow2.f32 %v7429_v28 }
 0x834   : > { %v7511_v54 = vadd.f32 %v14758_v23, %v7510_v34  ;;  %v7329_v34 = vsub.f32 %v14407_v33, %v14714_v7  ;;  %v7330_v33 = vsub.f32 %v14429_v31, %v14714_v7  ;;  %v7331_v31 = vsub.f32 %v14426_v32, %v14714_v7 }
 0x835   : > { %v14761_v36 = vpop.f32.mrb[236].mxu0 }
 0x836   : > { %16774 = vst [vmem:[#allocation14_spill] sm:$0xff] %v14761_v36  ;;  %v7512_v2 = vadd.f32 %v14763_v52, %v7511_v54  ;;  %v14768_v48 = vpop.f32.mrb[237].mxu0  ;;  %v7431_v51 = vmul.f32 1.442695, %v7329_v34  ;;  %v7433_v34 = vmul.f32 1.442695, %v7330_v33 }
 0x837   : > { %16775 = vst [vmem:[#allocation15_spill] sm:$0xff] %v14768_v48  ;;  %v14773_v27 = vpop.f32.mrb[238].mxu0  ;;  %v14783_v48 = vpop.eup %11759 }
 0x838   : > { %v7513_v56 = vadd.f32 %v14770_v55, %v7512_v2  ;;  %16776 = vst [vmem:[#allocation155_spill] sm:$0xff] %v14773_v27  ;;  %10964 = vmatmul.mubr.msk.bf16.gmra.mrb[12].mxu0 %vm571_vm0, %v16777_v45  ;;  %v14781_v54 = vpop.f32.mrb[239].mxu0  ;;  %v14787_v2 = vpop.eup %11761  ;;  %11771 = vpow2.f32 %v7431_v51 }
 0x839   : > { %10967 = vmatprep.mubr.msk.bf16.mxu0 %vm571_vm0, %v16778_v11  ;;  %16779 = vst [vmem:[#allocation16_spill] sm:$0xff] %v14781_v54  ;;  %v7520_v20 = vadd.f32 %v14787_v2, %v14783_v48  ;;  %11773 = vpow2.f32 %v7433_v34 }
 0x83a   : > { %v7514_v47 = vrot.slane %v7513_v56, 4  ;;  %v14797_v11 = vpop.eup %11763 }
 0x83b   : > { %16783 = vst [vmem:[#allocation158_spill] sm:$0xff] %v14797_v11 }
 0x83c   : > { %v7515_v27 = vadd.f32 %v7514_v47, %v7513_v56  ;;  %v14802_v56 = vpop.eup %11765 }
 0x83d   : > { %v14785_v36 = vpop.f32.mrb[240].mxu0 }
 0x83e   : > { %16780 = vst [vmem:[#allocation17_spill] sm:$0xff] %v14785_v36  ;;  %v14789_v0 = vpop.f32.mrb[241].mxu0  ;;  %v7516_v54 = vrot.slane %v7515_v27, 2  ;;  %v7521_v36 = vadd.f32 %v14797_v11, %v7520_v20 }
 0x83f   : > { %16781 = vst [vmem:[#allocation156_spill] sm:$0xff] %v14789_v0  ;;  %v14795_v45 = vpop.f32.mrb[242].mxu0  ;;  %v16785_v0 = vld [vmem:[#allocation18_spill] sm:$0xff] }
 0x840   : > { %16782 = vst [vmem:[#allocation157_spill] sm:$0xff] %v14795_v45  ;;  %v14799_v46 = vpop.f32.mrb[243].mxu0  ;;  %v7517_v47 = vadd.f32 %v7516_v54, %v7515_v27  ;;  %10968 = vmatmul.mubr.msk.bf16.gmra.mrb[16].mxu0 %vm571_vm0, %v16785_v0  ;;  %v7522_v28 = vadd.f32 %v14802_v56, %v7521_v36  ;;  %v16786_v45 = vld [vmem:[#allocation19_spill] sm:$0xff]  ;;  %v7435_v0 = vmul.f32 1.442695, %v7331_v31  ;;  %v7332_v36 = vsub.f32 %v14444_v43, %v14714_v7 }
 0x841   : > { %16784 = vst [vmem:[#allocation159_spill] sm:$0xff] %v14799_v46  ;;  %10971 = vmatprep.mubr.msk.bf16.mxu0 %vm571_vm0, %v16786_v45  ;;  %v14811_v46 = vpop.eup %11767  ;;  %v7334_v43 = vsub.f32 %v14465_v62, %v14714_v7 }
 0x842   : > { %v7518_v58 = vrot.slane %v7517_v47, 1  ;;  %v7523_v27 = vadd.f32 %v14811_v46, %v7522_v28  ;;  %v14824_v51 = vpop.eup %11769  ;;  %v7437_v31 = vmul.f32 1.442695, %v7332_v36  ;;  %v7336_v36 = vsub.f32 %v14485_v3, %v14714_v7 }
 0x843   : > { %v14835_v34 = vpop.eup %11771 }
 0x844   : > { %v7519_v11 = vadd.f32 %v7518_v58, %v7517_v47  ;;  %v7524_v45 = vadd.f32 %v14824_v51, %v7523_v27  ;;  %v7333_v58 = vsub.f32 %v14456_v61, %v14714_v7  ;;  %v16792_v47 = vld [vmem:[#allocation21_spill] sm:$0xff]  ;;  %v14848_v62 = vpop.eup %11773 }
 0x845   : > { %v14813_v20 = vpop.f32.mrb[244].mxu0 }
 0x846   : > { %16787 = vst [vmem:[#allocation18_spill] sm:$0xff] %v14813_v20  ;;  %v14816_v54 = vpop.f32.mrb[245].mxu0  ;;  %11775 = vrcp.f32 %v7519_v11  ;;  %v16791_v20 = vld [vmem:[#allocation20_spill] sm:$0xff]  ;;  %v7335_v11 = vsub.f32 %v14475_v57, %v14714_v7  ;;  %v7439_v61 = vmul.f32 1.442695, %v7333_v58  ;;  %v7337_v57 = vsub.f32 %v14494_v12, %v14714_v7 }
 0x847   : > { %16788 = vst [vmem:[#allocation19_spill] sm:$0xff] %v14816_v54  ;;  %v14818_v32 = vpop.f32.mrb[246].mxu0  ;;  %11777 = vpow2.f32 %v7435_v0  ;;  %v7339_v12 = vsub.f32 %v14509_v5, %v14714_v7  ;;  %v16810_v54 = vld [vmem:[#allocation66_spill] sm:$0xff] }
 0x848   : > { %16789 = vst [vmem:[#allocation160_spill] sm:$0xff] %v14818_v32  ;;  %v14822_v33 = vpop.f32.mrb[247].mxu0  ;;  %10972 = vmatmul.mubr.msk.bf16.gmra.mrb[20].mxu0 %vm571_vm0, %v16791_v20  ;;  %v7525_v20 = vadd.f32 %v14835_v34, %v7524_v45  ;;  %11779 = vpow2.f32 %v7437_v31  ;;  %v16797_v32 = vld [vmem:[#allocation22_spill] sm:$0xff]  ;;  %v7338_v31 = vsub.f32 %v14502_v63, %v14714_v7 }
 0x849   : > { %16790 = vst [vmem:[#allocation161_spill] sm:$0xff] %v14822_v33  ;;  %10975 = vmatprep.mubr.msk.bf16.mxu0 %vm571_vm0, %v16792_v47  ;;  %v7441_v47 = vmul.f32 1.442695, %v7334_v43  ;;  %11781 = vpow2.f32 %v7439_v61  ;;  %v16798_v43 = vld [vmem:[#allocation23_spill] sm:$0xff] }
 0x84a   : > { %v7526_v45 = vadd.f32 %v14848_v62, %v7525_v20  ;;  %v7447_v20 = vmul.f32 1.442695, %v7337_v57 }
 0x84b   : > { %11783 = vpow2.f32 %v7441_v47 }
 0x84d   : > { %v14839_v28 = vpop.f32.mrb[248].mxu0 }
 0x84e   : > { %16793 = vst [vmem:[#allocation20_spill] sm:$0xff] %v14839_v28  ;;  %v14842_v27 = vpop.f32.mrb[249].mxu0  ;;  %v7443_v28 = vmul.f32 1.442695, %v7335_v11  ;;  %v7445_v11 = vmul.f32 1.442695, %v7336_v36 }
 0x84f   : > { %16794 = vst [vmem:[#allocation21_spill] sm:$0xff] %v14842_v27  ;;  %v14844_v0 = vpop.f32.mrb[250].mxu0 }
 0x850   : > { %16795 = vst [vmem:[#allocation162_spill] sm:$0xff] %v14844_v0  ;;  %v14846_v33 = vpop.f32.mrb[251].mxu0  ;;  %10976 = vmatmul.mubr.msk.bf16.gmra.mrb[24].mxu0 %vm571_vm0, %v16797_v32  ;;  %v14857_v58 = vpop.eup %11775  ;;  %11785 = vpow2.f32 %v7443_v28 }
 0x851   : > { %16796 = vst [vmem:[#allocation163_spill] sm:$0xff] %v14846_v33  ;;  %10979 = vmatprep.mubr.msk.bf16.mxu0 %vm571_vm0, %v16798_v43  ;;  %v14863_v3 = vpop.eup %11777  ;;  %v14871_v32 = vmul.f32 %v14857_v58, %v14624_v15  ;;  %v14875_v61 = vmul.f32 %v14857_v58, %v14638_v26  ;;  %v14879_v63 = vmul.f32 %v14857_v58, %v14649_v59  ;;  %11787 = vpow2.f32 %v7445_v11 }
 0x852   : > { %16799 = vst [vmem:[#allocation22_spill] sm:$0xff] %v14863_v3  ;;  %v7527_v47 = vadd.f32 %v14863_v3, %v7526_v45  ;;  %v14886_v28 = vmul.f32 %v14857_v58, %v14654_v50  ;;  %v14890_v15 = vmul.f32 %v14857_v58, %v14662_v30  ;;  %v14894_v26 = vmul.f32 %v14857_v58, %v14671_v19  ;;  %v16811_v3 = vld [vmem:[#allocation123_spill] sm:$0xff] }
 0x853   : > { %v14898_v59 = vmul.f32 %v14857_v58, %v14680_v22  ;;  %v14904_v57 = vmul.f32 %v14857_v58, %v14687_v29  ;;  %v14908_v50 = vmul.f32 %v14857_v58, %v14694_v18  ;;  %v14912_v30 = vmul.f32 %v14857_v58, %v14703_v60 }
 0x854   : > { %v14916_v19 = vmul.f32 %v14857_v58, %v14712_v24  ;;  %v14922_v45 = vmul.f32 %v14857_v58, %v14719_v35  ;;  %v14926_v29 = vmul.f32 %v14857_v58, %v14724_v13  ;;  %v14930_v18 = vmul.f32 %v14857_v58, %v14737_v44  ;;  %v14936_v24 = vpop.eup %11779 }
 0x855   : > { %v14867_v33 = vpop.f32.mrb[252].mxu0  ;;  %v14934_v60 = vmul.f32 %v14857_v58, %v14746_v41  ;;  %16804 = vst [vmem:[#allocation167_spill] sm:$0xff] %v14936_v24  ;;  %v14940_v43 = vmul.f32 %v14857_v58, %v14751_v39  ;;  %v14944_v35 = vmul.f32 %v14857_v58, %v14758_v23  ;;  %v14948_v13 = vmul.f32 %v14857_v58, %v14763_v52  ;;  %v16805_v41 = vld [vmem:[#allocation24_spill] sm:$0xff] }
 0x856   : > { %16800 = vst [vmem:[#allocation23_spill] sm:$0xff] %v14867_v33  ;;  %v14882_v5 = vpop.f32.mrb[253].mxu0  ;;  %v14952_v44 = vmul.f32 %v14857_v58, %v14770_v55  ;;  %v7559_v39 = vmul.f32 %v14857_v58, %v14433_v1  ;;  %v7528_v23 = vadd.f32 %v14936_v24, %v7527_v47  ;;  %v7340_v52 = vsub.f32 %v14519_v21, %v14714_v7  ;;  %v16808_v47 = vld [vmem:[#allocation120_spill] sm:$0xff] }
 0x857   : > { %16801 = vst [vmem:[#allocation164_spill] sm:$0xff] %v14882_v5  ;;  %v14900_v36 = vpop.f32.mrb[254].mxu0  ;;  %v7449_v55 = vmul.f32 1.442695, %v7338_v31  ;;  %v14965_v5 = vpop.eup %11781  ;;  %11789 = vpow2.f32 %v7447_v20  ;;  %v7560_v0 = vmul.f32 %v14857_v58, %v16808_v47  ;;  %v7342_v11 = vsub.f32 %v14537_v37, %v14714_v7  ;;  %v16812_v47 = vld [vmem:[#allocation26_spill] sm:$0xff] }
 0x858   : > { %16802 = vst [vmem:[#allocation165_spill] sm:$0xff] %v14900_v36  ;;  %v14918_v22 = vpop.f32.mrb[255].mxu0  ;;  %10980 = vmatmul.mubr.msk.bf16.gmra.mrb[28].mxu0 %vm571_vm0, %v16805_v41  ;;  %v16806_v36 = vld [vmem:[#allocation25_spill] sm:$0xff]  ;;  %16807 = vst [vmem:[#allocation24_spill] sm:$0xff] %v14965_v5  ;;  %v14967_v33 = vpop.eup %11783  ;;  %v7451_v41 = vmul.f32 1.442695, %v7339_v12  ;;  %v7624_v21 = vmul.f32 %v7559_v39, %v16810_v54  ;;  %v7529_v31 = vadd.f32 %v14965_v5, %v7528_v23 }
 0x859   : > { %16803 = vst [vmem:[#allocation166_spill] sm:$0xff] %v14918_v22  ;;  %v7558_v22 = vmul.f32 %v14857_v58, %v14420_v16  ;;  %10983 = vmatprep.mubr.msk.bf16.mxu0 %vm571_vm0, %v16806_v36  ;;  %v7341_v16 = vsub.f32 %v14528_v10, %v14714_v7  ;;  %v16809_v36 = vld [vmem:[#allocation65_spill] sm:$0xff]  ;;  %11791 = vpow2.f32 %v7449_v55  ;;  %v7453_v24 = vmul.f32 1.442695, %v7340_v52  ;;  %v16814_v23 = vld [vmem:[#allocation67_spill] sm:$0xff] }
 0x85a   : > { %v14971_v1 = vpop.eup %11785  ;;  %v7561_v10 = vmul.f32 %v14857_v58, %v16811_v3  ;;  %v7343_v12 = vsub.f32 %v14546_v4, %v14714_v7  ;;  %11793 = vpow2.f32 %v7451_v41  ;;  %v7530_v37 = vadd.f32 %v14967_v33, %v7529_v31  ;;  %v16815_v52 = vld [vmem:[#allocation27_spill] sm:$0xff]  ;;  %v16817_v41 = vld [vmem:[#allocation68_spill] sm:$0xff]  ;;  %v16818_v31 = vld [vmem:[#allocation130_spill] sm:$0xff] }
 0x85b   : > { %v7623_v27 = vmul.f32 %v7558_v22, %v16809_v36  ;;  %v7455_v20 = vmul.f32 1.442695, %v7341_v16  ;;  %v16813_v22 = vld [vmem:[#allocation126_spill] sm:$0xff]  ;;  %v7625_v36 = vmul.f32 %v7560_v0, %v16814_v23  ;;  %v7344_v3 = vsub.f32 %v14553_v42, %v14714_v7  ;;  %v16816_v55 = vld [vmem:[#allocation127_spill] sm:$0xff]  ;;  %v14998_v0 = vpop.eup %11787 }
 0x85c   : > { %v7562_v39 = vmul.f32 %v14857_v58, %v16813_v22  ;;  %11795 = vpow2.f32 %v7453_v24  ;;  %v7457_v4 = vmul.f32 1.442695, %v7342_v11  ;;  %v7563_v16 = vmul.f32 %v14857_v58, %v16816_v55  ;;  %v16819_v24 = vld [vmem:[#allocation71_spill] sm:$0xff] }
 0x85d   : > { %v7687_v54 = vadd.f32 %v7624_v21, %v7623_v27  ;;  %v7531_v22 = vadd.f32 %v14971_v1, %v7530_v37  ;;  %v7345_v27 = vsub.f32 %v14560_v25, %v14714_v7  ;;  %11797 = vpow2.f32 %v7455_v20  ;;  %v16821_v20 = vld [vmem:[#allocation72_spill] sm:$0xff] }
 0x85e   : > { %v7459_v21 = vmul.f32 1.442695, %v7343_v12  ;;  %v7564_v42 = vmul.f32 %v14857_v58, %v16818_v31  ;;  %v7627_v11 = vmul.f32 %v7562_v39, %v16819_v24  ;;  %11799 = vpow2.f32 %v7457_v4  ;;  %v16824_v4 = vld [vmem:[#allocation73_spill] sm:$0xff] }
 0x85f   : > { %v7688_v5 = vadd.f32 %v7687_v54, %v7625_v36  ;;  %v7532_v55 = vadd.f32 %v14998_v0, %v7531_v22  ;;  %v7346_v54 = vsub.f32 %v14567_v8, %v14714_v7  ;;  %v7461_v36 = vmul.f32 1.442695, %v7344_v3  ;;  %v16823_v8 = vld [vmem:[#allocation134_spill] sm:$0xff] }
 0x860   : > { %10984 = vmatmul.mubr.msk.bf16.gmra.mrb[32].mxu0 %vm571_vm0, %v16812_v47  ;;  %v7626_v47 = vmul.f32 %v7561_v10, %v16817_v41  ;;  %v16820_v10 = vld [vmem:[#allocation133_spill] sm:$0xff]  ;;  %v7628_v12 = vmul.f32 %v7563_v16, %v16821_v20  ;;  %11801 = vpow2.f32 %v7459_v21  ;;  %v7463_v39 = vmul.f32 1.442695, %v7345_v27  ;;  %v16826_v21 = vld [vmem:[#allocation135_spill] sm:$0xff] }
 0x861   : > { %10987 = vmatprep.mubr.msk.bf16.mxu0 %vm571_vm0, %v16815_v52  ;;  %v15006_v23 = vpop.eup %11789  ;;  %v7565_v25 = vmul.f32 %v14857_v58, %v16820_v10  ;;  %v7566_v3 = vmul.f32 %v14857_v58, %v16823_v8  ;;  %v7629_v22 = vmul.f32 %v7564_v42, %v16824_v4  ;;  %11803 = vpow2.f32 %v7461_v36  ;;  %v16829_v36 = vld [vmem:[#allocation75_spill] sm:$0xff] }
 0x862   : > { %v7689_v52 = vadd.f32 %v7688_v5, %v7626_v47  ;;  %v7533_v31 = vadd.f32 %v15006_v23, %v7532_v55  ;;  %v7347_v5 = vsub.f32 %v14573_v40, %v14714_v7  ;;  %v16822_v47 = vld [vmem:[#allocation28_spill] sm:$0xff]  ;;  %v7348_v40 = vsub.f32 %v14580_v9, %v14714_v7 }
 0x863   : > { %v15014_v41 = vpop.eup %11791  ;;  %v7465_v27 = vmul.f32 1.442695, %v7346_v54  ;;  %v7567_v55 = vmul.f32 %v14857_v58, %v16826_v21  ;;  %11805 = vpow2.f32 %v7463_v39  ;;  %v7631_v54 = vmul.f32 %v7566_v3, %v16829_v36  ;;  %v16831_v39 = vld [vmem:[#allocation76_spill] sm:$0xff] }
 0x864   : > { %v7690_v37 = vadd.f32 %v7689_v52, %v7627_v11  ;;  %v7534_v16 = vadd.f32 %v15014_v41, %v7533_v31  ;;  %v16825_v11 = vld [vmem:[#allocation29_spill] sm:$0xff]  ;;  %v15026_v52 = vpop.eup %11793  ;;  %v7467_v31 = vmul.f32 1.442695, %v7347_v5  ;;  %v16905_v36 = vld [vmem:[#allocation132_spill] sm:$0xff] }
 0x865   : > { %11807 = vpow2.f32 %v7465_v27  ;;  %v7632_v5 = vmul.f32 %v7567_v55, %v16831_v39  ;;  %v16834_v55 = vld [vmem:[#allocation31_spill] sm:$0xff] }
 0x866   : > { %v7691_v10 = vadd.f32 %v7690_v37, %v7628_v12  ;;  %v7535_v42 = vadd.f32 %v15026_v52, %v7534_v16  ;;  %v15034_v12 = vpop.eup %11795  ;;  %v7349_v37 = vsub.f32 %v14594_v53, %v14714_v7  ;;  %11809 = vpow2.f32 %v7467_v31  ;;  %v16835_v31 = vld [vmem:[#allocation78_spill] sm:$0xff] }
 0x867   : > { %v15042_v24 = vpop.eup %11797 }
 0x868   : > { %10988 = vmatmul.mubr.msk.bf16.gmra.mrb[36].mxu0 %vm571_vm0, %v16822_v47  ;;  %v16827_v47 = vld [vmem:[#allocation74_spill] sm:$0xff]  ;;  %v7692_v20 = vadd.f32 %v7691_v10, %v7629_v22  ;;  %v7536_v21 = vadd.f32 %v15034_v12, %v7535_v42  ;;  %v7469_v22 = vmul.f32 1.442695, %v7348_v40  ;;  %v16830_v10 = vld [vmem:[#allocation141_spill] sm:$0xff]  ;;  %v7471_v3 = vmul.f32 1.442695, %v7349_v37 }
 0x869   : > { %10991 = vmatprep.mubr.msk.bf16.mxu0 %vm571_vm0, %v16825_v11  ;;  %v7630_v8 = vmul.f32 %v7565_v25, %v16827_v47  ;;  %v16828_v11 = vld [vmem:[#allocation138_spill] sm:$0xff]  ;;  %v7350_v25 = vsub.f32 %v14597_v49, %v14714_v7  ;;  %v7569_v53 = vmul.f32 %v14857_v58, %v16830_v10  ;;  %v15050_v47 = vpop.eup %11799  ;;  %v7570_v49 = vmul.f32 %v14857_v58, %v14614_v38  ;;  %v16833_v40 = vld [vmem:[#allocation77_spill] sm:$0xff] }
 0x86a   : > { %v7568_v9 = vmul.f32 %v14857_v58, %v16828_v11  ;;  %v7537_v11 = vadd.f32 %v15042_v24, %v7536_v21  ;;  %11811 = vpow2.f32 %v7469_v22 }
 0x86b   : > { %v7693_v4 = vadd.f32 %v7692_v20, %v7630_v8  ;;  %v7351_v20 = vsub.f32 %v14609_v14, %v14714_v7  ;;  %v16832_v8 = vld [vmem:[#allocation30_spill] sm:$0xff]  ;;  %v7352_v14 = vsub.f32 %v14612_v17, %v14714_v7  ;;  %v7473_v37 = vmul.f32 1.442695, %v7350_v25  ;;  %v16837_v25 = vld [vmem:[#allocation144_spill] sm:$0xff] }
 0x86c   : > { %v7633_v27 = vmul.f32 %v7568_v9, %v16833_v40  ;;  %v7634_v21 = vmul.f32 %v7569_v53, %v16835_v31  ;;  %v7353_v9 = vsub.f32 %v14622_v6, %v14714_v7  ;;  %11813 = vpow2.f32 %v7471_v3  ;;  %v16904_v40 = vld [vmem:[#allocation131_spill] sm:$0xff] }
 0x86d   : > { %v7694_v16 = vadd.f32 %v7693_v4, %v7631_v54  ;;  %v7538_v4 = vadd.f32 %v15050_v47, %v7537_v11  ;;  %v15062_v54 = vpop.eup %11801  ;;  %v7354_v22 = vsub.f32 %v16837_v25, %v14714_v7  ;;  %11815 = vpow2.f32 %v7473_v37 }
 0x86e   : > { %v15068_v58 = vpop.eup %11803  ;;  %v7477_v53 = vmul.f32 1.442695, %v7352_v14  ;;  %v16841_v14 = vld [vmem:[#allocation33_spill] sm:$0xff] }
 0x86f   : > { %v7695_v42 = vadd.f32 %v7694_v16, %v7632_v5  ;;  %v7539_v38 = vadd.f32 %v15062_v54, %v7538_v4  ;;  %v7475_v5 = vmul.f32 1.442695, %v7351_v20  ;;  %v16836_v16 = vld [vmem:[#allocation79_spill] sm:$0xff]  ;;  %v15074_v17 = vpop.eup %11805  ;;  %v7479_v20 = vmul.f32 1.442695, %v7353_v9 }
 0x870   : > { %10992 = vmatmul.mubr.msk.bf16.gmra.mrb[40].mxu0 %vm571_vm0, %v16832_v8  ;;  %v7635_v11 = vmul.f32 %v7570_v49, %v16836_v16  ;;  %v15081_v3 = vpop.eup %11807  ;;  %v16839_v49 = vld [vmem:[#allocation32_spill] sm:$0xff]  ;;  %v7481_v37 = vmul.f32 1.442695, %v7354_v22  ;;  %v16903_v16 = vld [vmem:[#allocation129_spill] sm:$0xff] }
 0x871   : > { %10995 = vmatprep.mubr.msk.bf16.mxu0 %vm571_vm0, %v16834_v55  ;;  %v7696_v10 = vadd.f32 %v7695_v42, %v7633_v27  ;;  %v7540_v55 = vadd.f32 %v15068_v58, %v7539_v38  ;;  %v16838_v27 = vld [vmem:[#allocation80_spill] sm:$0xff]  ;;  %11817 = vpow2.f32 %v7475_v5 }
 0x872   : > { %v7636_v42 = vmul.f32 %v14871_v32, %v16838_v27  ;;  %v15090_v32 = vpop.eup %11809  ;;  %11819 = vpow2.f32 %v7477_v53  ;;  %v16844_v53 = vld [vmem:[#allocation84_spill] sm:$0xff] }
 0x873   : > { %v7697_v8 = vadd.f32 %v7696_v10, %v7634_v21  ;;  %v7541_v6 = vadd.f32 %v15074_v17, %v7540_v55  ;;  %v16840_v21 = vld [vmem:[#allocation81_spill] sm:$0xff]  ;;  %11821 = vpow2.f32 %v7479_v20  ;;  %v7640_v22 = vmul.f32 %v14890_v15, %v16844_v53  ;;  %v16848_v15 = vld [vmem:[#allocation86_spill] sm:$0xff] }
 0x874   : > { %v7637_v10 = vmul.f32 %v14875_v61, %v16840_v21  ;;  %v15095_v55 = vpop.eup %11811  ;;  %v16843_v61 = vld [vmem:[#allocation83_spill] sm:$0xff]  ;;  %11823 = vpow2.f32 %v7481_v37  ;;  %v16846_v20 = vld [vmem:[#allocation85_spill] sm:$0xff] }
 0x875   : > { %v7698_v4 = vadd.f32 %v7697_v8, %v7635_v11  ;;  %v7542_v7 = vadd.f32 %v15081_v3, %v7541_v6  ;;  %v16842_v11 = vld [vmem:[#allocation82_spill] sm:$0xff]  ;;  %v7639_v25 = vmul.f32 %v14886_v28, %v16843_v61  ;;  %v7641_v28 = vmul.f32 %v14894_v26, %v16846_v20 }
 0x876   : > { %v7638_v5 = vmul.f32 %v14879_v63, %v16842_v11  ;;  %v15100_v6 = vpop.eup %11813 }
 0x877   : > { %v7699_v38 = vadd.f32 %v7698_v4, %v7636_v42  ;;  %v7543_v8 = vadd.f32 %v15090_v32, %v7542_v7 }
 0x878   : > { %10996 = vmatmul.mubr.msk.bf16.gmra.mrb[44].mxu0 %vm571_vm0, %v16839_v49 }
 0x879   : > { %10999 = vmatprep.mubr.msk.bf16.mxu0 %vm571_vm0, %v16841_v14  ;;  %v7700_v9 = vadd.f32 %v7699_v38, %v7637_v10  ;;  %v7544_v4 = vadd.f32 %v15095_v55, %v7543_v8  ;;  %v15105_v10 = vpop.eup %11815  ;;  %v16845_v38 = vld [vmem:[#allocation34_spill] sm:$0xff] }
 0x87b   : > { %v7701_v42 = vadd.f32 %v7700_v9, %v7638_v5  ;;  %v7545_v63 = vadd.f32 %v15100_v6, %v7544_v4  ;;  %v16847_v5 = vld [vmem:[#allocation35_spill] sm:$0xff]  ;;  %v15114_v37 = vpop.eup %11817  ;;  %v7642_v9 = vmul.f32 %v14898_v59, %v16848_v15 }
 0x87c   : > { %v16849_v4 = vld [vmem:[#allocation87_spill] sm:$0xff] }
 0x87d   : > { %v7702_v49 = vadd.f32 %v7701_v42, %v7639_v25  ;;  %v7546_v14 = vadd.f32 %v15105_v10, %v7545_v63  ;;  %v15119_v42 = vpop.eup %11819  ;;  %v16850_v63 = vld [vmem:[#allocation88_spill] sm:$0xff] }
 0x87f   : > { %v7703_v7 = vadd.f32 %v7702_v49, %v7640_v22  ;;  %v7547_v25 = vadd.f32 %v15114_v37, %v7546_v14  ;;  %v15124_v49 = vpop.eup %11821 }
 0x880   : > { %11000 = vmatmul.mubr.msk.bf16.gmra.mrb[48].mxu0 %vm571_vm0, %v16845_v38  ;;  %v7643_v38 = vmul.f32 %v14904_v57, %v16849_v4  ;;  %v15129_v59 = vpop.eup %11823 }
 0x881   : > { %11003 = vmatprep.mubr.msk.bf16.mxu0 %vm571_vm0, %v16847_v5  ;;  %v7704_v8 = vadd.f32 %v7703_v7, %v7641_v28  ;;  %v7548_v22 = vadd.f32 %v15119_v42, %v7547_v25  ;;  %v7644_v5 = vmul.f32 %v14908_v50, %v16850_v63  ;;  %v16851_v28 = vld [vmem:[#allocation36_spill] sm:$0xff]  ;;  %v16852_v7 = vld [vmem:[#allocation89_spill] sm:$0xff]  ;;  %v16854_v25 = vld [vmem:[#allocation90_spill] sm:$0xff] }
 0x882   : > { %v7645_v14 = vmul.f32 %v14912_v30, %v16852_v7  ;;  %v7646_v50 = vmul.f32 %v14916_v19, %v16854_v25 }
 0x883   : > { %v7705_v26 = vadd.f32 %v7704_v8, %v7642_v9  ;;  %v7549_v53 = vadd.f32 %v15124_v49, %v7548_v22  ;;  %v16853_v8 = vld [vmem:[#allocation37_spill] sm:$0xff]  ;;  %v16855_v22 = vld [vmem:[#allocation91_spill] sm:$0xff] }
 0x884   : > { %v7647_v4 = vmul.f32 %v14922_v45, %v16855_v22 }
 0x885   : > { %v7706_v20 = vadd.f32 %v7705_v26, %v7643_v38  ;;  %v7550_v9 = vadd.f32 %v15129_v59, %v7549_v53  ;;  %v16858_v53 = vld [vmem:[#allocation93_spill] sm:$0xff] }
 0x887   : > { %v7707_v57 = vadd.f32 %v7706_v20, %v7644_v5  ;;  %v7551_v26 = vrot.slane %v7550_v9, 4  ;;  %v16857_v5 = vld [vmem:[#allocation38_spill] sm:$0xff] }
 0x888   : > { %11004 = vmatmul.mubr.msk.bf16.gmra.mrb[52].mxu0 %vm571_vm0, %v16851_v28  ;;  %v16856_v28 = vld [vmem:[#allocation92_spill] sm:$0xff] }
 0x889   : > { %11007 = vmatprep.mubr.msk.bf16.mxu0 %vm571_vm0, %v16853_v8  ;;  %v7708_v38 = vadd.f32 %v7707_v57, %v7645_v14  ;;  %v7552_v15 = vadd.f32 %v7551_v26, %v7550_v9  ;;  %v7648_v61 = vmul.f32 %v14926_v29, %v16856_v28  ;;  %v7649_v8 = vmul.f32 %v14930_v18, %v16858_v53  ;;  %v16859_v14 = vld [vmem:[#allocation39_spill] sm:$0xff]  ;;  %v16860_v57 = vld [vmem:[#allocation94_spill] sm:$0xff]  ;;  %v16862_v26 = vld [vmem:[#allocation96_spill] sm:$0xff] }
 0x88a   : > { %v7650_v45 = vmul.f32 %v14934_v60, %v16860_v57  ;;  %v16863_v18 = vld [vmem:[#allocation40_spill] sm:$0xff]  ;;  %v16865_v60 = vld [vmem:[#allocation98_spill] sm:$0xff]  ;;  %v16881_v57 = vld [vmem:[#allocation119_spill] sm:$0xff] }
 0x88b   : > { %v7709_v63 = vadd.f32 %v7708_v38, %v7646_v50  ;;  %v7553_v20 = vrot.slane %v7552_v15, 2  ;;  %v16861_v38 = vld [vmem:[#allocation95_spill] sm:$0xff]  ;;  %v16882_v53 = vld [vmem:[#allocation121_spill] sm:$0xff] }
 0x88c   : > { %v7651_v29 = vmul.f32 %v14940_v43, %v16861_v38  ;;  %v15165_v43 = vld [vmem:[%s16292_s10] ss:$0 sm:$0xff] }
 0x88d   : > { %v7710_v30 = vadd.f32 %v7709_v63, %v7647_v4  ;;  %v7554_v19 = vadd.f32 %v7553_v20, %v7552_v15  ;;  %v16879_v38 = vld [vmem:[#allocation117_spill] sm:$0xff]  ;;  %v6789_v31 = vadd.f32 %v16904_v40, %v15165_v43 }
 0x88f   : > { %v7711_v7 = vadd.f32 %v7710_v30, %v7648_v61  ;;  %v7555_v50 = vrot.slane %v7554_v19, 1  ;;  %v16864_v61 = vld [vmem:[#allocation97_spill] sm:$0xff] }
 0x890   : > { %11008 = vmatmul.mubr.msk.bf16.gmra.mrb[56].mxu0 %vm571_vm0, %v16857_v5  ;;  %v7652_v5 = vmul.f32 %v14944_v35, %v16862_v26  ;;  %v7653_v15 = vmul.f32 %v14948_v13, %v16864_v61  ;;  %v16877_v61 = vld [vmem:[#allocation115_spill] sm:$0xff]  ;;  %v16880_v26 = vld [vmem:[#allocation118_spill] sm:$0xff] }
 0x891   : > { %11011 = vmatprep.mubr.msk.bf16.mxu0 %vm571_vm0, %v16859_v14  ;;  %v7712_v9 = vadd.f32 %v7711_v7, %v7649_v8  ;;  %v7556_v63 = vadd.f32 %v7555_v50, %v7554_v19  ;;  %v7654_v7 = vmul.f32 %v14952_v44, %v16865_v60  ;;  %v16866_v14 = vld [vmem:[#allocation9_spill] sm:$0xff]  ;;  %v16878_v60 = vld [vmem:[#allocation116_spill] sm:$0xff] }
 0x893   : > { %v7713_v4 = vadd.f32 %v7712_v9, %v7650_v45  ;;  %11825 = vrcp.f32 %v7556_v63  ;;  %v15169_v45 = vadd.f32 %v16866_v14, %v15165_v43  ;;  %v16867_v9 = vld [vmem:[#allocation105_spill] sm:$0xff]  ;;  %v16870_v63 = vld [vmem:[#allocation108_spill] sm:$0xff] }
 0x894   : > { %v15173_v13 = vadd.f32 %v15165_v43, %v16867_v9  ;;  %v16874_v14 = vld [vmem:[#allocation112_spill] sm:$0xff] }
 0x895   : > { %v7714_v28 = vadd.f32 %v7713_v4, %v7651_v29  ;;  %v16869_v29 = vld [vmem:[#allocation107_spill] sm:$0xff]  ;;  %v15203_v9 = vadd.f32 %v16874_v14, %v15165_v43  ;;  %v15223_v14 = vadd.f32 %v15165_v43, %v16879_v38 }
 0x896   : > { %v15183_v4 = vadd.f32 %v15165_v43, %v16869_v29 }
 0x897   : > { %v7715_v30 = vadd.f32 %v7714_v28, %v7652_v5  ;;  %v16868_v28 = vld [vmem:[#allocation106_spill] sm:$0xff]  ;;  %v15187_v5 = vadd.f32 %v16870_v63, %v15165_v43 }
 0x898   : > { %11012 = vmatmul.mubr.msk.bf16.gmra.mrb[60].mxu0 %vm571_vm0, %v16863_v18  ;;  %v15177_v44 = vadd.f32 %v16868_v28, %v15165_v43  ;;  %v16871_v18 = vld [vmem:[#allocation109_spill] sm:$0xff]  ;;  %v16876_v63 = vld [vmem:[#allocation114_spill] sm:$0xff] }
 0x899   : > { %v7716_v20 = vadd.f32 %v7715_v30, %v7653_v15  ;;  %v15191_v15 = vadd.f32 %v15165_v43, %v16871_v18  ;;  %v16872_v30 = vld [vmem:[#allocation110_spill] sm:$0xff]  ;;  %v16875_v28 = vld [vmem:[#allocation113_spill] sm:$0xff]  ;;  %v15211_v18 = vadd.f32 %v16876_v63, %v15165_v43  ;;  %v15231_v63 = vadd.f32 %v15165_v43, %v16881_v57 }
 0x89a   : > { %v15207_v29 = vadd.f32 %v15165_v43, %v16875_v28  ;;  %v15227_v28 = vadd.f32 %v16880_v26, %v15165_v43 }
 0x89b   : > { %v7717_v8 = vadd.f32 %v7716_v20, %v7654_v7  ;;  %v15195_v7 = vadd.f32 %v16872_v30, %v15165_v43  ;;  %v15215_v30 = vadd.f32 %v15165_v43, %v16877_v61  ;;  %v15235_v61 = vadd.f32 %v16882_v53, %v15165_v43 }
 0x89d   : > { %v7718_v35 = vrot.slane %v7717_v8, 4  ;;  %v15179_v50 = vpop.eup %11825 }
 0x89e   : > { %v15243_v38 = vmul.f32 %v15179_v50, %v15006_v23  ;;  %v15247_v26 = vmul.f32 %v15179_v50, %v15014_v41  ;;  %v15251_v57 = vmul.f32 %v15179_v50, %v15026_v52  ;;  %v15255_v53 = vmul.f32 %v15179_v50, %v15034_v12 }
 0x89f   : > { %v7719_v19 = vadd.f32 %v7718_v35, %v7717_v8  ;;  %v16873_v8 = vld [vmem:[#allocation111_spill] sm:$0xff]  ;;  %v15263_v23 = vmul.f32 %v15179_v50, %v15050_v47  ;;  %v15267_v41 = vmul.f32 %v15179_v50, %v15062_v54  ;;  %v15271_v52 = vmul.f32 %v15179_v50, %v15068_v58 }
 0x8a0   : > { %v15199_v35 = vadd.f32 %v15165_v43, %v16873_v8  ;;  %v15219_v8 = vadd.f32 %v16878_v60, %v15165_v43  ;;  %v15239_v60 = vmul.f32 %v15179_v50, %v14998_v0  ;;  %16883 = vst [vmem:[#allocation25_spill] sm:$0xff] %v15251_v57  ;;  %16884 = vst [vmem:[#allocation120_spill] sm:$0xff] %v15255_v53 }
 0x8a1   : > { %v7720_v20 = vrot.slane %v7719_v19, 2  ;;  %v15259_v0 = vmul.f32 %v15179_v50, %v15042_v24  ;;  %16886 = vst [vmem:[#allocation26_spill] sm:$0xff] %v15263_v23  ;;  %16887 = vst [vmem:[#allocation126_spill] sm:$0xff] %v15267_v41  ;;  %v15275_v12 = vmul.f32 %v15179_v50, %v15074_v17  ;;  %v15279_v24 = vmul.f32 %v15179_v50, %v15081_v3  ;;  %v16921_v23 = vld [vmem:[#allocation104_spill] sm:$0xff] }
 0x8a2   : > { %16888 = vst [vmem:[#allocation27_spill] sm:$0xff] %v15271_v52  ;;  %v15283_v47 = vmul.f32 %v15179_v50, %v15090_v32  ;;  %v15291_v58 = vmul.f32 %v15179_v50, %v15095_v55  ;;  %v15295_v17 = vmul.f32 %v15179_v50, %v15100_v6  ;;  %v15299_v3 = vmul.f32 %v15179_v50, %v15105_v10  ;;  %v16900_v10 = vld [vmem:[#allocation124_spill] sm:$0xff] }
 0x8a3   : > { %v7721_v22 = vadd.f32 %v7720_v20, %v7719_v19  ;;  %16885 = vst [vmem:[#allocation123_spill] sm:$0xff] %v15259_v0  ;;  %16889 = vst [vmem:[#allocation127_spill] sm:$0xff] %v15275_v12  ;;  %v16892_v19 = vld [vmem:[#allocation122_spill] sm:$0xff]  ;;  %v15303_v32 = vmul.f32 %v15179_v50, %v15114_v37  ;;  %v15307_v20 = vmul.f32 %v15179_v50, %v15119_v42  ;;  %v16901_v42 = vld [vmem:[#allocation125_spill] sm:$0xff] }
 0x8a4   : > { %16890 = vst [vmem:[#allocation130_spill] sm:$0xff] %v15279_v24  ;;  %16891 = vst [vmem:[#allocation133_spill] sm:$0xff] %v15283_v47  ;;  %v15287_v54 = vadd.f32 %v15165_v43, %v16892_v19  ;;  %v15311_v55 = vmul.f32 %v15179_v50, %v15124_v49  ;;  %v15315_v6 = vmul.f32 %v15179_v50, %v15129_v59  ;;  %v16902_v49 = vld [vmem:[#allocation128_spill] sm:$0xff]  ;;  %v16913_v47 = vld [vmem:[#allocation142_spill] sm:$0xff] }
 0x8a5   : > { %16893 = vst [vmem:[#allocation28_spill] sm:$0xff] %v15291_v58  ;;  %16894 = vst [vmem:[#allocation134_spill] sm:$0xff] %v15295_v17  ;;  %v7722_v19 = vrot.slane %v7721_v22, 1  ;;  %v6773_v25 = vadd.f32 %v16900_v10, %v15165_v43  ;;  %v7591_v37 = vmul.f32 %v15179_v50, %v14783_v48  ;;  %v7592_v21 = vmul.f32 %v15179_v50, %v14787_v2  ;;  %v16906_v48 = vld [vmem:[#allocation136_spill] sm:$0xff]  ;;  %v16914_v24 = vld [vmem:[#allocation143_spill] sm:$0xff] }
 0x8a6   : > { %16895 = vst [vmem:[#allocation29_spill] sm:$0xff] %v15299_v3  ;;  %16896 = vst [vmem:[#allocation135_spill] sm:$0xff] %v15303_v32  ;;  %v6765_v11 = vadd.f32 %v15165_v43, %v16901_v42  ;;  %v6786_v27 = vadd.f32 %v16902_v49, %v15165_v43  ;;  %v6778_v59 = vadd.f32 %v15165_v43, %v16903_v16  ;;  %v16911_v17 = vld [vmem:[#allocation100_spill] sm:$0xff]  ;;  %v16915_v12 = vld [vmem:[#allocation145_spill] sm:$0xff] }
 0x8a7   : > { %16897 = vst [vmem:[#allocation138_spill] sm:$0xff] %v15307_v20  ;;  %16898 = vst [vmem:[#allocation141_spill] sm:$0xff] %v15311_v55  ;;  %v6781_v10 = vadd.f32 %v15165_v43, %v16905_v36  ;;  %v6802_v39 = vadd.f32 %v16906_v48, %v15165_v43  ;;  %v16908_v55 = vld [vmem:[#allocation158_spill] sm:$0xff]  ;;  %v7594_v49 = vmul.f32 %v15179_v50, %v14802_v56  ;;  %v16909_v48 = vld [vmem:[#allocation139_spill] sm:$0xff] }
 0x8a8   : > { %16899 = vst [vmem:[#allocation30_spill] sm:$0xff] %v15315_v6  ;;  %v16907_v6 = vld [vmem:[#allocation137_spill] sm:$0xff]  ;;  %v7593_v42 = vmul.f32 %v15179_v50, %v16908_v55  ;;  %v7595_v16 = vmul.f32 %v15179_v50, %v14811_v46  ;;  %v7596_v40 = vmul.f32 %v15179_v50, %v14824_v51  ;;  %v7597_v36 = vmul.f32 %v15179_v50, %v14835_v34  ;;  %v16912_v58 = vld [vmem:[#allocation140_spill] sm:$0xff] }
 0x8a9   : > { %v6794_v2 = vadd.f32 %v15165_v43, %v16907_v6  ;;  %v7723_v20 = vadd.f32 %v7722_v19, %v7721_v22  ;;  %v6805_v32 = vadd.f32 %v16909_v48, %v15165_v43  ;;  %v16910_v6 = vld [vmem:[#allocation99_spill] sm:$0xff]  ;;  %v7656_v55 = vmul.f32 %v7592_v21, %v16911_v17  ;;  %v16916_v19 = vld [vmem:[#allocation22_spill] sm:$0xff]  ;;  %v16917_v48 = vld [vmem:[#allocation101_spill] sm:$0xff] }
 0x8aa   : > { %v7655_v3 = vmul.f32 %v7591_v37, %v16910_v6  ;;  %v6797_v56 = vadd.f32 %v15165_v43, %v16912_v58  ;;  %v6818_v46 = vadd.f32 %v16913_v47, %v15165_v43  ;;  %v6810_v51 = vadd.f32 %v15165_v43, %v16914_v24  ;;  %v16918_v6 = vld [vmem:[#allocation146_spill] sm:$0xff]  ;;  %v16920_v47 = vld [vmem:[#allocation103_spill] sm:$0xff]  ;;  %v16922_v0 = vld [vmem:[#allocation69_spill] sm:$0xff] }
 0x8ab   : > { %v6821_v34 = vadd.f32 %v16915_v12, %v15165_v43  ;;  %v7598_v22 = vmul.f32 %v15179_v50, %v14848_v62  ;;  %v7599_v37 = vmul.f32 %v15179_v50, %v16916_v19  ;;  %v7657_v21 = vmul.f32 %v7593_v42, %v16917_v48  ;;  %v16919_v17 = vld [vmem:[#allocation102_spill] sm:$0xff] }
 0x8ac   : > { %v6813_v58 = vadd.f32 %v15165_v43, %v16918_v6  ;;  %v7658_v52 = vmul.f32 %v7594_v49, %v16919_v17  ;;  %v7659_v41 = vmul.f32 %v7595_v16, %v16920_v47  ;;  %v7660_v24 = vmul.f32 %v7596_v40, %v16921_v23 }
 0x8ad   : > { %v7661_v53 = vmul.f32 %v7597_v36, %v16922_v0  ;;  %v7724_v12 = vadd.f32 %v7656_v55, %v7655_v3  ;;  %v15370_v57 = vmul.f32 %v7723_v20, %v6821_v34  ;;  %v7762_v19 = vmul.f32 %v7723_v20, %v15183_v4 }
 0x8ae   : > { %v15372_v62 = vmul.f32 %v7723_v20, %v6813_v58  ;;  %v7761_v42 = vmul.f32 %v7723_v20, %v15173_v13  ;;  %v7764_v48 = vmul.f32 %v7723_v20, %v15177_v44  ;;  %v7763_v6 = vmul.f32 %v7723_v20, %v15169_v45 }
 0x8af   : > { %v7766_v49 = vmul.f32 %v7723_v20, %v15199_v35  ;;  %v7725_v16 = vadd.f32 %v7724_v12, %v7657_v21  ;;  %7827 = vadd.xlane.f32.xlu0 %v7762_v19  ;;  %v7765_v40 = vmul.f32 %v7723_v20, %v15191_v15  ;;  %v7768_v3 = vmul.f32 %v7723_v20, %v15195_v7 }
 0x8b0   : > { %v7767_v36 = vmul.f32 %v7723_v20, %v15187_v5  ;;  %7825 = vadd.xlane.f32.xlu1 %v7761_v42  ;;  %v7770_v55 = vmul.f32 %v7723_v20, %v15215_v30  ;;  %v7769_v4 = vmul.f32 %v7723_v20, %v15207_v29  ;;  %v7772_v13 = vmul.f32 %v7723_v20, %v15211_v18  ;;  %v16929_v42 = vld [vmem:[#allocation44_spill] sm:$0xff] }
 0x8b1   : > { %v7771_v44 = vmul.f32 %v7723_v20, %v15203_v9  ;;  %v7726_v45 = vadd.f32 %v7725_v16, %v7658_v52  ;;  %v7774_v35 = vmul.f32 %v7723_v20, %v15231_v63  ;;  %v7773_v34 = vmul.f32 %v7723_v20, %v15223_v14 }
 0x8b2   : > { %v7776_v15 = vmul.f32 %v7723_v20, %v15227_v28  ;;  %v7775_v7 = vmul.f32 %v7723_v20, %v15219_v8  ;;  %v7778_v21 = vmul.f32 %v7723_v20, %v6765_v11  ;;  %v7777_v5 = vmul.f32 %v7723_v20, %v15287_v54  ;;  %v16923_v54 = vld [vmem:[#allocation167_spill] sm:$0xff] }
 0x8b3   : > { %v15391_v58 = vmul.f32 %v7723_v20, %v6773_v25  ;;  %v7727_v30 = vadd.f32 %v7726_v45, %v7659_v41  ;;  %7831 = vadd.xlane.f32.xlu0 %v7764_v48  ;;  %v7779_v29 = vmul.f32 %v7723_v20, %v15235_v61  ;;  %v15394_v18 = vmul.f32 %v7723_v20, %v6781_v10  ;;  %v16926_v48 = vld [vmem:[#allocation41_spill] sm:$0xff] }
 0x8b4   : > { %v15396_v9 = vmul.f32 %v7723_v20, %v6778_v59  ;;  %7829 = vadd.xlane.f32.xlu1 %v7763_v6  ;;  %v15398_v63 = vmul.f32 %v7723_v20, %v6789_v31  ;;  %v15400_v14 = vmul.f32 %v7723_v20, %v6786_v27  ;;  %v15402_v28 = vmul.f32 %v7723_v20, %v6797_v56  ;;  %v16924_v31 = vld [vmem:[#allocation70_spill] sm:$0xff]  ;;  %v16925_v56 = vld [vmem:[#allocation24_spill] sm:$0xff] }
 0x8b5   : > { %v15404_v11 = vmul.f32 %v7723_v20, %v6794_v2  ;;  %v7728_v8 = vadd.f32 %v7727_v30, %v7660_v24  ;;  %v15406_v25 = vmul.f32 %v7723_v20, %v6805_v32  ;;  %v15408_v41 = vmul.f32 %v7723_v20, %v6802_v39 }
 0x8b6   : > { %v15410_v52 = vmul.f32 %v7723_v20, %v6810_v51  ;;  %v15412_v61 = vmul.f32 %v7723_v20, %v6818_v46  ;;  %v7600_v59 = vmul.f32 %v15179_v50, %v16923_v54  ;;  %v7662_v10 = vmul.f32 %v7598_v22, %v16924_v31  ;;  %v16927_v51 = vld [vmem:[#allocation42_spill] sm:$0xff] }
 0x8b7   : > { %v7729_v27 = vadd.f32 %v7728_v8, %v7661_v53  ;;  %7835 = vadd.xlane.f32.xlu0 %v7766_v49  ;;  %v7601_v2 = vmul.f32 %v15179_v50, %v16925_v56  ;;  %v7663_v32 = vmul.f32 %v7599_v37, %v16926_v48  ;;  %v7602_v39 = vmul.f32 %v15179_v50, %v14967_v33  ;;  %v16928_v53 = vld [vmem:[#allocation43_spill] sm:$0xff]  ;;  %v16930_v37 = vld [vmem:[#allocation45_spill] sm:$0xff]  ;;  %v16931_v33 = vld [vmem:[#allocation46_spill] sm:$0xff] }
 0x8b8   : > { %7833 = vadd.xlane.f32.xlu1 %v7765_v40  ;;  %v7664_v20 = vmul.f32 %v7600_v59, %v16927_v51  ;;  %v7603_v22 = vmul.f32 %v15179_v50, %v14971_v1  ;;  %v7668_v45 = vmul.f32 %v15239_v60, %v16931_v33  ;;  %v16937_v56 = vld [vmem:[#allocation120_spill] sm:$0xff] }
 0x8b9   : > { %v7730_v24 = vadd.f32 %v7729_v27, %v7662_v10  ;;  %v7665_v12 = vmul.f32 %v7601_v2, %v16928_v53  ;;  %v7666_v6 = vmul.f32 %v7602_v39, %v16929_v42  ;;  %v16936_v27 = vld [vmem:[#allocation50_spill] sm:$0xff] }
 0x8ba   : > { %v7667_v16 = vmul.f32 %v7603_v22, %v16930_v37  ;;  %v7672_v60 = vmul.f32 %v16937_v56, %v16936_v27  ;;  %v16941_v39 = vld [vmem:[#allocation26_spill] sm:$0xff] }
 0x8bb   : > { %v7731_v46 = vadd.f32 %v7730_v24, %v7663_v32  ;;  %7839 = vadd.xlane.f32.xlu0 %v7768_v3  ;;  %v16932_v3 = vld [vmem:[#allocation47_spill] sm:$0xff]  ;;  %v16940_v24 = vld [vmem:[#allocation52_spill] sm:$0xff]  ;;  %v16955_v56 = vld [vmem:[#allocation134_spill] sm:$0xff] }
 0x8bc   : > { %7837 = vadd.xlane.f32.xlu1 %v7767_v36  ;;  %v7669_v1 = vmul.f32 %v15243_v38, %v16932_v3  ;;  %v16933_v36 = vld [vmem:[#allocation48_spill] sm:$0xff] }
 0x8bd   : > { %v7732_v19 = vadd.f32 %v7731_v46, %v7664_v20  ;;  %v7670_v8 = vmul.f32 %v15247_v26, %v16933_v36  ;;  %v7674_v26 = vmul.f32 %v16941_v39, %v16940_v24  ;;  %v16959_v39 = vld [vmem:[#allocation135_spill] sm:$0xff] }
 0x8bf   : > { %v7733_v49 = vadd.f32 %v7732_v19, %v7665_v12  ;;  %7843 = vadd.xlane.f32.xlu0 %v7770_v55  ;;  %v16934_v55 = vld [vmem:[#allocation49_spill] sm:$0xff]  ;;  %v16944_v12 = vld [vmem:[#allocation54_spill] sm:$0xff]  ;;  %v16945_v19 = vld [vmem:[#allocation27_spill] sm:$0xff] }
 0x8c0   : > { %7841 = vadd.xlane.f32.xlu1 %v7769_v4  ;;  %v16935_v4 = vld [vmem:[#allocation25_spill] sm:$0xff] }
 0x8c1   : > { %v7734_v40 = vadd.f32 %v7733_v49, %v7666_v6  ;;  %v7671_v59 = vmul.f32 %v16935_v4, %v16934_v55  ;;  %v7676_v6 = vmul.f32 %v16945_v19, %v16944_v12  ;;  %v16952_v4 = vld [vmem:[#allocation58_spill] sm:$0xff]  ;;  %v16963_v19 = vld [vmem:[#allocation141_spill] sm:$0xff] }
 0x8c3   : > { %v7735_v30 = vadd.f32 %v7734_v40, %v7667_v16  ;;  %7847 = vadd.xlane.f32.xlu0 %v7772_v13  ;;  %v16938_v13 = vld [vmem:[#allocation51_spill] sm:$0xff] }
 0x8c4   : > { %7845 = vadd.xlane.f32.xlu1 %v7771_v44  ;;  %v16939_v44 = vld [vmem:[#allocation123_spill] sm:$0xff] }
 0x8c5   : > { %v7736_v50 = vadd.f32 %v7735_v30, %v7668_v45  ;;  %v7673_v38 = vmul.f32 %v16939_v44, %v16938_v13  ;;  %v16948_v45 = vld [vmem:[#allocation56_spill] sm:$0xff]  ;;  %v16949_v30 = vld [vmem:[#allocation130_spill] sm:$0xff] }
 0x8c6   : > { %v16956_v44 = vld [vmem:[#allocation60_spill] sm:$0xff] }
 0x8c7   : > { %v7737_v54 = vadd.f32 %v7736_v50, %v7669_v1  ;;  %7851 = vadd.xlane.f32.xlu0 %v7774_v35  ;;  %v16942_v35 = vld [vmem:[#allocation53_spill] sm:$0xff]  ;;  %v7678_v1 = vmul.f32 %v16949_v30, %v16948_v45  ;;  %v16995_v45 = vld [vmem:[#allocation164_spill] sm:$0xff] }
 0x8c8   : > { %7849 = vadd.xlane.f32.xlu1 %v7773_v34  ;;  %v16943_v34 = vld [vmem:[#allocation126_spill] sm:$0xff]  ;;  %v16951_v50 = vld [vmem:[#allocation133_spill] sm:$0xff] }
 0x8c9   : > { %v7738_v10 = vadd.f32 %v7737_v54, %v7670_v8  ;;  %v7675_v46 = vmul.f32 %v16943_v34, %v16942_v35  ;;  %v16960_v34 = vld [vmem:[#allocation62_spill] sm:$0xff] }
 0x8cb   : > { %v7739_v2 = vadd.f32 %v7738_v10, %v7671_v59  ;;  %7855 = vadd.xlane.f32.xlu0 %v7776_v15  ;;  %v16946_v15 = vld [vmem:[#allocation55_spill] sm:$0xff]  ;;  %v16953_v59 = vld [vmem:[#allocation28_spill] sm:$0xff] }
 0x8cc   : > { %7853 = vadd.xlane.f32.xlu1 %v7775_v7  ;;  %v16947_v7 = vld [vmem:[#allocation127_spill] sm:$0xff] }
 0x8cd   : > { %v7740_v32 = vadd.f32 %v7739_v2, %v7672_v60  ;;  %v7677_v16 = vmul.f32 %v16947_v7, %v16946_v15  ;;  %v16954_v10 = vld [vmem:[#allocation59_spill] sm:$0xff]  ;;  %v16964_v7 = vld [vmem:[#allocation64_spill] sm:$0xff] }
 0x8ce   : > { %v7681_v60 = vmul.f32 %v16955_v56, %v16954_v10 }
 0x8cf   : > { %v7741_v20 = vadd.f32 %v7740_v32, %v7673_v38  ;;  %7859 = vadd.xlane.f32.xlu0 %v7778_v21  ;;  %v16958_v32 = vld [vmem:[#allocation61_spill] sm:$0xff] }
 0x8d0   : > { %7857 = vadd.xlane.f32.xlu1 %v7777_v5  ;;  %v16950_v5 = vld [vmem:[#allocation57_spill] sm:$0xff] }
 0x8d1   : > { %v7742_v22 = vadd.f32 %v7741_v20, %v7674_v26  ;;  %v7679_v8 = vmul.f32 %v16951_v50, %v16950_v5  ;;  %v7683_v26 = vmul.f32 %v16959_v39, %v16958_v32  ;;  %v16967_v50 = vld [vmem:[#allocation148_spill] sm:$0xff] }
 0x8d2   : > { %v16974_v39 = vld [vmem:[#allocation12_spill] sm:$0xff] }
 0x8d3   : > { %v7743_v49 = vadd.f32 %v7742_v22, %v7675_v46  ;;  %7863 = vadd.xlane.f32.xlu0 %v15391_v58  ;;  %v7680_v58 = vmul.f32 %v16953_v59, %v16952_v4  ;;  %v16962_v22 = vld [vmem:[#allocation63_spill] sm:$0xff]  ;;  %v16969_v59 = vld [vmem:[#allocation150_spill] sm:$0xff] }
 0x8d4   : > { %7861 = vadd.xlane.f32.xlu1 %v7779_v29 }
 0x8d5   : > { %v7744_v40 = vadd.f32 %v7743_v49, %v7676_v6  ;;  %v7685_v6 = vmul.f32 %v16963_v19, %v16962_v22 }
 0x8d7   : > { %v7745_v21 = vadd.f32 %v7744_v40, %v7677_v16  ;;  %7867 = vadd.xlane.f32.xlu0 %v15394_v18  ;;  %v16957_v18 = vld [vmem:[#allocation29_spill] sm:$0xff] }
 0x8d8   : > { %7865 = vadd.xlane.f32.xlu1 %v15396_v9  ;;  %v7682_v38 = vmul.f32 %v16957_v18, %v16956_v44 }
 0x8d9   : > { %v7746_v54 = vadd.f32 %v7745_v21, %v7678_v1  ;;  %v16966_v1 = vld [vmem:[#allocation147_spill] sm:$0xff] }
 0x8da   : > { %v6834_v21 = vadd.f32 %v16966_v1, %v15165_v43 }
 0x8db   : > { %v7747_v29 = vadd.f32 %v7746_v54, %v7679_v8  ;;  %7871 = vadd.xlane.f32.xlu0 %v15398_v63  ;;  %v16961_v63 = vld [vmem:[#allocation138_spill] sm:$0xff]  ;;  %v6826_v8 = vadd.f32 %v15165_v43, %v16967_v50  ;;  %v16968_v54 = vld [vmem:[#allocation149_spill] sm:$0xff]  ;;  %v16980_v50 = vld [vmem:[#allocation155_spill] sm:$0xff] }
 0x8dc   : > { %7869 = vadd.xlane.f32.xlu1 %v15400_v14  ;;  %v7684_v46 = vmul.f32 %v16961_v63, %v16960_v34 }
 0x8dd   : > { %v7748_v2 = vadd.f32 %v7747_v29, %v7680_v58 }
 0x8df   : > { %v7749_v9 = vadd.f32 %v7748_v2, %v7681_v60  ;;  %7875 = vadd.xlane.f32.xlu0 %v15402_v28  ;;  %v16965_v28 = vld [vmem:[#allocation30_spill] sm:$0xff]  ;;  %v16972_v60 = vld [vmem:[#allocation151_spill] sm:$0xff] }
 0x8e0   : > { %7873 = vadd.xlane.f32.xlu1 %v15404_v11  ;;  %v7686_v16 = vmul.f32 %v16965_v28, %v16964_v7  ;;  %v6853_v2 = vadd.f32 %v16972_v60, %v15165_v43 }
 0x8e1   : > { %v7750_v20 = vadd.f32 %v7749_v9, %v7682_v38  ;;  %v16973_v38 = vld [vmem:[#allocation152_spill] sm:$0xff] }
 0x8e2   : > { %v6845_v9 = vadd.f32 %v15165_v43, %v16973_v38 }
 0x8e3   : > { %v7751_v14 = vadd.f32 %v7750_v20, %v7683_v26  ;;  %7879 = vadd.xlane.f32.xlu0 %v15406_v25  ;;  %v6866_v26 = vadd.f32 %v16974_v39, %v15165_v43  ;;  %v16975_v20 = vld [vmem:[#allocation13_spill] sm:$0xff] }
 0x8e4   : > { %7877 = vadd.xlane.f32.xlu1 %v15408_v41  ;;  %v6858_v63 = vadd.f32 %v15165_v43, %v16975_v20  ;;  %v16984_v39 = vld [vmem:[#allocation157_spill] sm:$0xff] }
 0x8e5   : > { %v7752_v49 = vadd.f32 %v7751_v14, %v7684_v46  ;;  %v16976_v46 = vld [vmem:[#allocation153_spill] sm:$0xff]  ;;  %v6901_v20 = vadd.f32 %v16984_v39, %v15165_v43 }
 0x8e6   : > { %v6869_v14 = vadd.f32 %v16976_v46, %v15165_v43  ;;  %v16985_v46 = vld [vmem:[#allocation159_spill] sm:$0xff]  ;;  %v16991_v39 = vld [vmem:[#allocation21_spill] sm:$0xff] }
 0x8e7   : > { %v7753_v11 = vadd.f32 %v7752_v49, %v7685_v6  ;;  %7883 = vadd.xlane.f32.xlu0 %v15372_v62  ;;  %v6837_v62 = vadd.f32 %v16968_v54, %v15165_v43  ;;  %v16977_v49 = vld [vmem:[#allocation154_spill] sm:$0xff]  ;;  %v6885_v54 = vadd.f32 %v16980_v50, %v15165_v43  ;;  %v16987_v50 = vld [vmem:[#allocation19_spill] sm:$0xff]  ;;  %v6922_v44 = vadd.f32 %v15165_v43, %v16991_v39 }
 0x8e8   : > { %7881 = vadd.xlane.f32.xlu1 %v15410_v52  ;;  %v6829_v52 = vadd.f32 %v15165_v43, %v16969_v59  ;;  %v6861_v28 = vadd.f32 %v15165_v43, %v16977_v49  ;;  %v16981_v59 = vld [vmem:[#allocation16_spill] sm:$0xff]  ;;  %v6893_v49 = vadd.f32 %v15165_v43, %v16985_v46  ;;  %v6906_v22 = vadd.f32 %v15165_v43, %v16987_v50  ;;  %v16992_v46 = vld [vmem:[#allocation162_spill] sm:$0xff] }
 0x8e9   : > { %v7754_v40 = vadd.f32 %v7753_v11, %v7686_v16  ;;  %v16978_v16 = vld [vmem:[#allocation14_spill] sm:$0xff]  ;;  %v6933_v5 = vadd.f32 %v16992_v46, %v15165_v43 }
 0x8ea   : > { %v6882_v11 = vadd.f32 %v16978_v16, %v15165_v43  ;;  %v16986_v16 = vld [vmem:[#allocation18_spill] sm:$0xff] }
 0x8eb   : > { %v7755_v30 = vrot.slane %v7754_v40, 4  ;;  %7887 = vadd.xlane.f32.xlu0 %v15370_v57  ;;  %v16970_v57 = vld [vmem:[#allocation10_spill] sm:$0xff] }
 0x8ec   : > { %7885 = vadd.xlane.f32.xlu1 %v15412_v61  ;;  %v6850_v29 = vadd.f32 %v16970_v57, %v15165_v43  ;;  %v16971_v61 = vld [vmem:[#allocation11_spill] sm:$0xff]  ;;  %v6877_v57 = vadd.f32 %v15165_v43, %v16981_v59  ;;  %v16988_v59 = vld [vmem:[#allocation160_spill] sm:$0xff] }
 0x8ed   : > { %v7756_v25 = vadd.f32 %v7755_v30, %v7754_v40  ;;  %v6842_v56 = vadd.f32 %v15165_v43, %v16971_v61  ;;  %v16979_v40 = vld [vmem:[#allocation15_spill] sm:$0xff]  ;;  %v16982_v61 = vld [vmem:[#allocation17_spill] sm:$0xff]  ;;  %v6917_v7 = vadd.f32 %v16988_v59, %v15165_v43 }
 0x8ee   : > { %v6874_v30 = vadd.f32 %v15165_v43, %v16979_v40  ;;  %v6914_v40 = vadd.f32 %v16986_v16, %v15165_v43  ;;  %v16993_v16 = vld [vmem:[#allocation163_spill] sm:$0xff] }
 0x8ef   : > { %v7757_v58 = vrot.slane %v7756_v25, 2  ;;  %v6925_v4 = vadd.f32 %v15165_v43, %v16993_v16  ;;  %v16994_v59 = vld [vmem:[#allocation23_spill] sm:$0xff] }
 0x8f0   : > { %v6946_v15 = vadd.f32 %v16994_v59, %v15165_v43 }
 0x8f1   : > { %v15479_v41 = vpop.f32.mrb[0].mxu0  ;;  %v7758_v6 = vadd.f32 %v7757_v58, %v7756_v25  ;;  %v6898_v25 = vadd.f32 %v16982_v61, %v15165_v43  ;;  %v16983_v58 = vld [vmem:[#allocation156_spill] sm:$0xff]  ;;  %v16989_v61 = vld [vmem:[#allocation161_spill] sm:$0xff] }
 0x8f2   : > { %v15495_v18 = vpop.f32.mrb[1].mxu0  ;;  %v6890_v60 = vadd.f32 %v15165_v43, %v16983_v58  ;;  %v6909_v32 = vadd.f32 %v15165_v43, %v16989_v61  ;;  %v16990_v58 = vld [vmem:[#allocation20_spill] sm:$0xff]  ;;  %v6938_v61 = vadd.f32 %v15165_v43, %v16995_v45 }
 0x8f3   : > { %v15505_v19 = vpop.f32.mrb[2].mxu0  ;;  %v7759_v38 = vrot.slane %v7758_v6, 1  ;;  %v6930_v34 = vadd.f32 %v16990_v58, %v15165_v43  ;;  %v16996_v58 = vld [vmem:[#allocation165_spill] sm:$0xff] }
 0x8f4   : > { %v15513_v1 = vpop.f32.mrb[3].mxu0 }
 0x8f5   : > { %v7760_v10 = vadd.f32 %v7759_v38, %v7758_v6  ;;  %v6949_v6 = vadd.f32 %v16996_v58, %v15165_v43  ;;  %v16997_v38 = vld [vmem:[#allocation166_spill] sm:$0xff] }
 0x8f6   : > { %v6941_v39 = vadd.f32 %v15165_v43, %v16997_v38 }
 0x8f7   : > { %v7795_v35 = vmul.f32 %v7760_v10, %v6834_v21  ;;  %v7793_v12 = vmul.f32 %v7760_v10, %v6826_v8  ;;  %v7796_v46 = vmul.f32 %v7760_v10, %v6837_v62  ;;  %v7794_v13 = vmul.f32 %v7760_v10, %v6829_v52 }
 0x8f8   : > { %v7799_v24 = vmul.f32 %v7760_v10, %v6850_v29  ;;  %v7797_v16 = vmul.f32 %v7760_v10, %v6842_v56  ;;  %v7800_v27 = vmul.f32 %v7760_v10, %v6853_v2  ;;  %v7798_v55 = vmul.f32 %v7760_v10, %v6845_v9 }
 0x8f9   : > { %v15543_v50 = vpop.f32.mrb[4].mxu0  ;;  %v7803_v59 = vmul.f32 %v7760_v10, %v6866_v26  ;;  %v7801_v36 = vmul.f32 %v7760_v10, %v6858_v63  ;;  %v7804_v33 = vmul.f32 %v7760_v10, %v6869_v14  ;;  %v7802_v45 = vmul.f32 %v7760_v10, %v6861_v28  ;;  %7891 = vadd.xlane.f32.xlu0 %v7794_v13 }
 0x8fa   : > { %v15553_v3 = vpop.f32.mrb[5].mxu0  ;;  %v7807_v58 = vmul.f32 %v7760_v10, %v6882_v11  ;;  %v7805_v53 = vmul.f32 %v7760_v10, %v6874_v30  ;;  %v7808_v43 = vmul.f32 %v7760_v10, %v6885_v54  ;;  %v7806_v21 = vmul.f32 %v7760_v10, %v6877_v57  ;;  %7889 = vadd.xlane.f32.xlu1 %v7793_v12 }
 0x8fb   : > { %v15555_v37 = vpop.f32.mrb[6].mxu0  ;;  %v7811_v62 = vmul.f32 %v7760_v10, %v6898_v25  ;;  %v7809_v52 = vmul.f32 %v7760_v10, %v6890_v60  ;;  %v7812_v29 = vmul.f32 %v7760_v10, %v6901_v20  ;;  %v7810_v56 = vmul.f32 %v7760_v10, %v6893_v49 }
 0x8fc   : > { %v15557_v8 = vpop.f32.mrb[7].mxu0  ;;  %v7815_v2 = vmul.f32 %v7760_v10, %v6914_v40  ;;  %v7813_v9 = vmul.f32 %v7760_v10, %v6906_v22  ;;  %v7816_v26 = vmul.f32 %v7760_v10, %v6917_v7  ;;  %v7814_v63 = vmul.f32 %v7760_v10, %v6909_v32 }
 0x8fd   : > { %v7819_v14 = vmul.f32 %v7760_v10, %v6930_v34  ;;  %v7817_v28 = vmul.f32 %v7760_v10, %v6922_v44  ;;  %v7820_v13 = vmul.f32 %v7760_v10, %v6933_v5  ;;  %v7818_v38 = vmul.f32 %v7760_v10, %v6925_v4  ;;  %7895 = vadd.xlane.f32.xlu0 %v7796_v46 }
 0x8fe   : > { %v7823_v11 = vmul.f32 %v7760_v10, %v6946_v15  ;;  %v7821_v30 = vmul.f32 %v7760_v10, %v6938_v61  ;;  %v7824_v54 = vmul.f32 %v7760_v10, %v6949_v6  ;;  %v7822_v57 = vmul.f32 %v7760_v10, %v6941_v39  ;;  %7893 = vadd.xlane.f32.xlu1 %v7795_v35 }
 0x901   : > { %7899 = vadd.xlane.f32.xlu0 %v7798_v55 }
 0x902   : > { %7897 = vadd.xlane.f32.xlu1 %v7797_v16 }
 0x903   : > { %v15559_v12 = vpop.f32.mrb[8].mxu0 }
 0x904   : > { %v15561_v25 = vpop.f32.mrb[9].mxu0 }
 0x905   : > { %v15563_v60 = vpop.f32.mrb[10].mxu0  ;;  %7903 = vadd.xlane.f32.xlu0 %v7800_v27 }
 0x906   : > { %v15565_v22 = vpop.f32.mrb[11].mxu0  ;;  %7901 = vadd.xlane.f32.xlu1 %v7799_v24 }
 0x909   : > { %7907 = vadd.xlane.f32.xlu0 %v7802_v45  ;;  %v15615_v45 = vstv %s9388_s15  ;;  %s9496_s15 = sshll.u32 %s12270_s29, 13  ;;  %s16241_s29 = scalar_lea.sflag [#allocation4], %s448_s22 }
 0x90a   : > { %7905 = vadd.xlane.f32.xlu1 %v7801_v36  ;;  %s16233_s20 = scalar_lea.hbm %s16295_s13, %s9496_s15  ;;  %s12106_s15 = scalar_lea.vmem %s12105_s12, 16384 }
 0x90b   : > { %v15567_v5 = vpop.f32.mrb[12].mxu0 }
 0x90c   : > { %v15569_v15 = vpop.f32.mrb[13].mxu0 }
 0x90d   : > { %v15571_v4 = vpop.f32.mrb[14].mxu0  ;;  %7911 = vadd.xlane.f32.xlu0 %v7804_v33 }
 0x90e   : > { %v15573_v35 = vpop.f32.mrb[15].mxu0  ;;  %7909 = vadd.xlane.f32.xlu1 %v7803_v59 }
 0x911   : > { %7915 = vadd.xlane.f32.xlu0 %v7806_v21 }
 0x912   : > { %7913 = vadd.xlane.f32.xlu1 %v7805_v53 }
 0x913   : > { %v15575_v55 = vpop.f32.mrb[16].mxu0 }
 0x914   : > { %v15577_v10 = vpop.f32.mrb[17].mxu0 }
 0x915   : > { %7919 = vadd.xlane.f32.xlu0 %v7808_v43  ;;  %v15579_v27 = vpop.f32.mrb[18].mxu0  ;;  %v15619_v43 = vstv %s9389_s16  ;;  %s9044_s16 = sshll.u32 %s15878_s23, 4  ;;  %s16235_s16 = int_to_ptr.vmem [resolvable:$true] %s9044_s16 }
 0x916   : > { %7917 = vadd.xlane.f32.xlu1 %v7807_v58  ;;  %v15581_v24 = vpop.f32.mrb[19].mxu0  ;;  %s12100_s24 = scalar_lea.vmem %s16235_s16, 8192  ;;  %p12107_p13 = scmp.lt.s32.totalorder %s16235_s16, %s12105_s12 }
 0x917   : > { %p12101_p9 = scmp.ne.s32.totalorder %s16235_s16, %s12100_s24  ;;  %p12108_p0 = scmp.lt.s32.totalorder %s12106_s15, %s12100_s24 }
 0x919   : > { %7923 = vadd.xlane.f32.xlu0 %v7810_v56  ;;  %p12102_p10 = pnand %p12101_p9, %p12287_p5  ;;  %p12109_p1 = por %p12108_p0, %p12107_p13 }
 0x91a   : > { %7921 = vadd.xlane.f32.xlu1 %v7809_v52 }
 0x91b   : > { %v15583_v36 = vpop.f32.mrb[20].mxu0  ;;  %p12103_p12 = pneg %p12102_p10 }
 0x91c   : > { %v15585_v44 = vpop.f32.mrb[21].mxu0 }
 0x91d   : > { %7927 = vadd.xlane.f32.xlu0 %v7812_v29  ;;  %v15587_v33 = vpop.f32.mrb[22].mxu0  ;;  %p12110_p2 = pnand %p12109_p1, %p12103_p12 }
 0x91e   : > { %7925 = vadd.xlane.f32.xlu1 %v7811_v62  ;;  %v15589_v32 = vpop.f32.mrb[23].mxu0 }
 0x921   : > { %7931 = vadd.xlane.f32.xlu0 %v7814_v63 }
 0x922   : > { %7929 = vadd.xlane.f32.xlu1 %v7813_v9  ;;  %v15630_v9 = vld [vmem:[%s16290_s8] ss:$0 sm:$0xff] }
 0x923   : > { %v15591_v53 = vpop.f32.mrb[24].mxu0  ;;  %v15690_v42 = vadd.f32 %v15563_v60, %v15630_v9  ;;  %v15728_v51 = vadd.f32 %v15579_v27, %v15630_v9 }
 0x924   : > { %v15593_v34 = vpop.f32.mrb[25].mxu0 }
 0x925   : > { %7935 = vadd.xlane.f32.xlu0 %v7816_v26  ;;  %v15595_v7 = vpop.f32.mrb[26].mxu0 }
 0x926   : > { %7933 = vadd.xlane.f32.xlu1 %v7815_v2  ;;  %v15597_v20 = vpop.f32.mrb[27].mxu0 }
 0x929   : > { %7939 = vadd.xlane.f32.xlu0 %v7818_v38 }
 0x92a   : > { %7937 = vadd.xlane.f32.xlu1 %v7817_v28 }
 0x92b   : > { %v15599_v49 = vpop.f32.mrb[28].mxu0 }
 0x92c   : > { %v15601_v40 = vpop.f32.mrb[29].mxu0 }
 0x92d   : > { %7943 = vadd.xlane.f32.xlu0 %v7820_v13  ;;  %v15603_v61 = vpop.f32.mrb[30].mxu0 }
 0x92e   : > { %7941 = vadd.xlane.f32.xlu1 %v7819_v14  ;;  %v15605_v6 = vpop.f32.mrb[31].mxu0 }
 0x931   : > { %7947 = vadd.xlane.f32.xlu0 %v7822_v57 }
 0x932   : > { %7945 = vadd.xlane.f32.xlu1 %v7821_v30  ;;  %v15639_v30 = vadd.f32 %v15479_v41, %v15630_v9  ;;  %v15657_v41 = vadd.f32 %v15543_v50, %v15630_v9 }
 0x933   : > { %v15607_v39 = vpop.f32.mrb[32].mxu0 }
 0x934   : > { %v15609_v46 = vpop.f32.mrb[33].mxu0 }
 0x935   : > { %7951 = vadd.xlane.f32.xlu0 %v7824_v54  ;;  %v15611_v16 = vpop.f32.mrb[34].mxu0  ;;  %v15643_v54 = vadd.f32 %v15630_v9, %v15495_v18  ;;  %v15661_v18 = vadd.f32 %v15630_v9, %v15553_v3 }
 0x936   : > { %7949 = vadd.xlane.f32.xlu1 %v7823_v11  ;;  %v15613_v59 = vpop.f32.mrb[35].mxu0 }
 0x93b   : > { %v15617_v58 = vpop.f32.mrb[36].mxu0 }
 0x93c   : > { %v7828_v21 = vpop.xlane.xlu0 %7827  ;;  %v15621_v62 = vpop.f32.mrb[37].mxu0 }
 0x93d   : > { %v7956_v52 = vmul.f32 %v15615_v45, %v7828_v21  ;;  %v7826_v29 = vpop.xlane.xlu1 %7825  ;;  %v15624_v56 = vpop.f32.mrb[38].mxu0 }
 0x93e   : > { %v7955_v2 = vmul.f32 %v15615_v45, %v7826_v29  ;;  %v15632_v26 = vpop.f32.mrb[39].mxu0  ;;  %v15652_v29 = vadd.f32 %v15630_v9, %v15513_v1  ;;  %v15668_v1 = vadd.f32 %v15555_v37, %v15630_v9 }
 0x93f   : > { %v8022_v63 = vadd.f32 %v15619_v43, %v7956_v52  ;;  %v15648_v52 = vadd.f32 %v15505_v19, %v15630_v9 }
 0x940   : > { %v8021_v14 = vadd.f32 %v15619_v43, %v7955_v2  ;;  %v7832_v28 = vpop.xlane.xlu0 %7831 }
 0x941   : > { %v9391_v13 = vmul.f32 -1.442695, %v8022_v63  ;;  %v7958_v38 = vmul.f32 %v15615_v45, %v7832_v28  ;;  %v7830_v11 = vpop.xlane.xlu1 %7829  ;;  %v15672_v28 = vadd.f32 %v15630_v9, %v15557_v8 }
 0x942   : > { %v9390_v57 = vmul.f32 -1.442695, %v8021_v14  ;;  %v7957_v21 = vmul.f32 %v15615_v45, %v7830_v11  ;;  %v15679_v11 = vadd.f32 %v15559_v12, %v15630_v9 }
 0x943   : > { %11827 = vpow2.f32 %v9391_v13  ;;  %v8024_v2 = vadd.f32 %v15619_v43, %v7958_v38  ;;  %v15663_v63 = vpop.f32.mrb[40].mxu0 }
 0x944   : > { %11829 = vpow2.f32 %v9390_v57  ;;  %v8023_v19 = vadd.f32 %v15619_v43, %v7957_v21  ;;  %v7836_v14 = vpop.xlane.xlu0 %7835  ;;  %v15674_v50 = vpop.f32.mrb[41].mxu0  ;;  %v15683_v57 = vadd.f32 %v15630_v9, %v15561_v25  ;;  %v15701_v25 = vadd.f32 %v15567_v5, %v15630_v9 }
 0x945   : > { %v9393_v13 = vmul.f32 -1.442695, %v8024_v2  ;;  %v7960_v3 = vmul.f32 %v15615_v45, %v7836_v14  ;;  %v7834_v38 = vpop.xlane.xlu1 %7833  ;;  %v15685_v37 = vpop.f32.mrb[42].mxu0  ;;  %v15694_v2 = vadd.f32 %v15630_v9, %v15565_v22  ;;  %v15710_v22 = vadd.f32 %v15571_v4, %v15630_v9 }
 0x946   : > { %v9392_v21 = vmul.f32 -1.442695, %v8023_v19  ;;  %v7959_v8 = vmul.f32 %v15615_v45, %v7834_v38  ;;  %v15696_v14 = vpop.f32.mrb[43].mxu0  ;;  %v15705_v19 = vadd.f32 %v15630_v9, %v15569_v15  ;;  %v15719_v15 = vadd.f32 %v15575_v55, %v15630_v9 }
 0x947   : > { %11831 = vpow2.f32 %v9393_v13  ;;  %v8026_v12 = vadd.f32 %v15619_v43, %v7960_v3  ;;  %v15714_v13 = vadd.f32 %v15630_v9, %v15573_v35  ;;  %v15732_v35 = vadd.f32 %v15630_v9, %v15581_v24 }
 0x948   : > { %11833 = vpow2.f32 %v9392_v21  ;;  %v8025_v60 = vadd.f32 %v15619_v43, %v7959_v8  ;;  %v7840_v38 = vpop.xlane.xlu0 %7839  ;;  %v15723_v21 = vadd.f32 %v15630_v9, %v15577_v10  ;;  %v15737_v55 = vadd.f32 %v15583_v36, %v15630_v9 }
 0x949   : > { %v9395_v3 = vmul.f32 -1.442695, %v8026_v12  ;;  %v7962_v5 = vmul.f32 %v15615_v45, %v7840_v38  ;;  %v7838_v48 = vpop.xlane.xlu1 %7837  ;;  %v15741_v10 = vadd.f32 %v15630_v9, %v15585_v44  ;;  %v15748_v24 = vadd.f32 %v15587_v33, %v15630_v9 }
 0x94a   : > { %v9394_v8 = vmul.f32 -1.442695, %v8025_v60  ;;  %v7961_v4 = vmul.f32 %v15615_v45, %v7838_v48  ;;  %v15752_v38 = vadd.f32 %v15630_v9, %v15589_v32 }
 0x94b   : > { %11835 = vpow2.f32 %v9395_v3  ;;  %v8028_v12 = vadd.f32 %v15619_v43, %v7962_v5  ;;  %v15743_v48 = vpop.f32.mrb[44].mxu0 }
 0x94c   : > { %11837 = vpow2.f32 %v9394_v8  ;;  %v8027_v27 = vadd.f32 %v15619_v43, %v7961_v4  ;;  %v7844_v60 = vpop.xlane.xlu0 %7843  ;;  %v15754_v36 = vpop.f32.mrb[45].mxu0  ;;  %v15759_v8 = vadd.f32 %v15591_v53, %v15630_v9  ;;  %v15763_v4 = vadd.f32 %v15630_v9, %v15593_v34 }
 0x94d   : > { %v11828_v3 = vpop.eup %11827  ;;  %v9397_v5 = vmul.f32 -1.442695, %v8028_v12  ;;  %v7964_v44 = vmul.f32 %v15615_v45, %v7844_v60  ;;  %v7842_v0 = vpop.xlane.xlu1 %7841  ;;  %v15770_v12 = vadd.f32 %v15630_v9, %v15597_v20  ;;  %v15777_v34 = vadd.f32 %v15595_v7, %v15630_v9 }
 0x94e   : > { %v15765_v33 = vpop.f32.mrb[46].mxu0  ;;  %v11830_v31 = vpop.eup %11829  ;;  %v8278_v32 = vadd.f32 1.0, %v11828_v3  ;;  %v9396_v23 = vmul.f32 -1.442695, %v8027_v27  ;;  %v7963_v47 = vmul.f32 %v15615_v45, %v7842_v0  ;;  %v15782_v0 = vadd.f32 %v15599_v49, %v15630_v9 }
 0x94f   : > { %16998 = vst [vmem:[#allocation31_spill] sm:$0xff] %v15770_v12  ;;  %v15772_v60 = vpop.f32.mrb[47].mxu0  ;;  %v8277_v17 = vadd.f32 1.0, %v11830_v31  ;;  %11839 = vpow2.f32 %v9397_v5  ;;  %v8030_v53 = vadd.f32 %v15619_v43, %v7964_v44  ;;  %16999 = vst [vmem:[#allocation144_spill] sm:$0xff] %v15777_v34  ;;  %v15786_v20 = vadd.f32 %v15630_v9, %v15601_v40 }
 0x950   : > { %11841 = vrcp.f32 %v8278_v32  ;;  %v8029_v3 = vadd.f32 %v15619_v43, %v7963_v47  ;;  %v7848_v27 = vpop.xlane.xlu0 %7847  ;;  %17000 = vst [vmem:[#allocation32_spill] sm:$0xff] %v15782_v0  ;;  %v15791_v7 = vadd.f32 %v15630_v9, %v15605_v6 }
 0x951   : > { %v11832_v31 = vpop.eup %11831  ;;  %11843 = vrcp.f32 %v8277_v17  ;;  %v9399_v5 = vmul.f32 -1.442695, %v8030_v53  ;;  %v7966_v44 = vmul.f32 %v15615_v45, %v7848_v27  ;;  %v7846_v12 = vpop.xlane.xlu1 %7845  ;;  %v15797_v17 = vadd.f32 %v15603_v61, %v15630_v9 }
 0x952   : > { %v11834_v47 = vpop.eup %11833  ;;  %v8280_v32 = vadd.f32 1.0, %v11832_v31  ;;  %11845 = vpow2.f32 %v9396_v23  ;;  %v9398_v34 = vmul.f32 -1.442695, %v8029_v3  ;;  %v7965_v49 = vmul.f32 %v15615_v45, %v7846_v12 }
 0x953   : > { %v8279_v0 = vadd.f32 1.0, %v11834_v47  ;;  %11847 = vpow2.f32 %v9399_v5  ;;  %v8032_v40 = vadd.f32 %v15619_v43, %v7966_v44  ;;  %v15799_v53 = vpop.f32.mrb[48].mxu0  ;;  %v15804_v23 = vadd.f32 %v15607_v39, %v15630_v9 }
 0x954   : > { %11849 = vrcp.f32 %v8280_v32  ;;  %v8031_v6 = vadd.f32 %v15619_v43, %v7965_v49  ;;  %v7852_v27 = vpop.xlane.xlu0 %7851  ;;  %v15808_v12 = vadd.f32 %v15630_v9, %v15609_v46  ;;  %v15810_v3 = vpop.f32.mrb[49].mxu0  ;;  %v15815_v47 = vadd.f32 %v15630_v9, %v15613_v59 }
 0x955   : > { %17001 = vst [vmem:[#allocation33_spill] sm:$0xff] %v15804_v23  ;;  %v11836_v31 = vpop.eup %11835  ;;  %11851 = vrcp.f32 %v8279_v0  ;;  %v9401_v61 = vmul.f32 -1.442695, %v8032_v40  ;;  %v7968_v5 = vmul.f32 %v15615_v45, %v7852_v27  ;;  %v7850_v44 = vpop.xlane.xlu1 %7849  ;;  %v15825_v27 = vadd.f32 %v15611_v16, %v15630_v9 }
 0x956   : > { %17002 = vst [vmem:[#allocation34_spill] sm:$0xff] %v15808_v12  ;;  %v15817_v32 = vpop.f32.mrb[50].mxu0  ;;  %v11838_v39 = vpop.eup %11837  ;;  %v8282_v49 = vadd.f32 1.0, %v11836_v31  ;;  %11853 = vpow2.f32 %v9398_v34  ;;  %v9400_v46 = vmul.f32 -1.442695, %v8031_v6  ;;  %v7967_v23 = vmul.f32 %v15615_v45, %v7850_v44 }
 0x957   : > { %17003 = vst [vmem:[#allocation35_spill] sm:$0xff] %v15817_v32  ;;  %v15820_v12 = vpop.f32.mrb[51].mxu0  ;;  %v8281_v0 = vadd.f32 1.0, %v11838_v39  ;;  %11855 = vpow2.f32 %v9401_v61  ;;  %v8034_v40 = vadd.f32 %v15619_v43, %v7968_v5  ;;  %17004 = vst [vmem:[#allocation36_spill] sm:$0xff] %v15825_v27  ;;  %v15831_v34 = vadd.f32 %v15617_v58, %v15630_v9 }
 0x958   : > { %11857 = vrcp.f32 %v8282_v49  ;;  %v8033_v59 = vadd.f32 %v15619_v43, %v7967_v23  ;;  %v7856_v32 = vpop.xlane.xlu0 %7855  ;;  %v15835_v6 = vadd.f32 %v15630_v9, %v15621_v62  ;;  %v15840_v23 = vadd.f32 %v15630_v9, %v15632_v26 }
 0x959   : > { %17005 = vst [vmem:[#allocation37_spill] sm:$0xff] %v15831_v34  ;;  %v11840_v31 = vpop.eup %11839  ;;  %11859 = vrcp.f32 %v8281_v0  ;;  %v9403_v61 = vmul.f32 -1.442695, %v8034_v40  ;;  %v7970_v16 = vmul.f32 %v15615_v45, %v7856_v32  ;;  %v7854_v5 = vpop.xlane.xlu1 %7853  ;;  %v17008_v0 = vld [vmem:[#allocation66_spill] sm:$0xff]  ;;  %v15851_v40 = vadd.f32 %v15624_v56, %v15630_v9 }
 0x95a   : > { %17006 = vst [vmem:[#allocation38_spill] sm:$0xff] %v15835_v6  ;;  %17007 = vst [vmem:[#allocation39_spill] sm:$0xff] %v15840_v23  ;;  %v11842_v44 = vpop.eup %11841  ;;  %v8284_v39 = vadd.f32 1.0, %v11840_v31  ;;  %11861 = vpow2.f32 %v9400_v46  ;;  %v9402_v49 = vmul.f32 -1.442695, %v8033_v59  ;;  %v7969_v58 = vmul.f32 %v15615_v45, %v7854_v5  ;;  %v17011_v59 = vld [vmem:[#allocation65_spill] sm:$0xff] }
 0x95b   : > { %v11844_v34 = vpop.eup %11843  ;;  %11863 = vpow2.f32 %v9403_v61  ;;  %v8036_v62 = vadd.f32 %v15619_v43, %v7970_v16  ;;  %v8470_v32 = vmul.f32 %v11842_v44, %v17008_v0  ;;  %17009 = vst [vmem:[#allocation40_spill] sm:$0xff] %v15851_v40  ;;  %v15853_v26 = vpop.f32.mrb[52].mxu0  ;;  %v15859_v23 = vadd.f32 %v15630_v9, %v15674_v50 }
 0x95c   : > { %17010 = vst [vmem:[#allocation9_spill] sm:$0xff] %v15853_v26  ;;  %v11846_v31 = vpop.eup %11845  ;;  %11865 = vrcp.f32 %v8284_v39  ;;  %v8035_v46 = vadd.f32 %v15619_v43, %v7969_v58  ;;  %v8469_v5 = vmul.f32 %v11844_v34, %v17011_v59  ;;  %v7860_v61 = vpop.xlane.xlu0 %7859 }
 0x95d   : > { %17012 = vst [vmem:[#allocation105_spill] sm:$0xff] %v15859_v23  ;;  %v15861_v16 = vpop.f32.mrb[53].mxu0  ;;  %v11848_v44 = vpop.eup %11847  ;;  %v8283_v0 = vadd.f32 1.0, %v11846_v31  ;;  %11867 = vpow2.f32 %v9402_v49  ;;  %v9405_v56 = vmul.f32 -1.442695, %v8036_v62  ;;  %v8838_v40 = vadd.f32 %v15652_v29, %v8470_v32  ;;  %v17016_v31 = vld [vmem:[#allocation68_spill] sm:$0xff] }
 0x95e   : > { %17013 = vst [vmem:[#allocation106_spill] sm:$0xff] %v15861_v16  ;;  %v7858_v26 = vpop.xlane.xlu1 %7857  ;;  %v15864_v6 = vpop.f32.mrb[54].mxu0  ;;  %v8286_v58 = vadd.f32 1.0, %v11848_v44  ;;  %v9404_v27 = vmul.f32 -1.442695, %v8035_v46  ;;  %v8837_v34 = vadd.f32 %v15643_v54, %v8469_v5  ;;  %v7972_v59 = vmul.f32 %v15615_v45, %v7860_v61  ;;  %v17018_v44 = vld [vmem:[#allocation67_spill] sm:$0xff] }
 0x95f   : > { %17014 = vst [vmem:[#allocation107_spill] sm:$0xff] %v15864_v6  ;;  %v11850_v39 = vpop.eup %11849  ;;  %v15868_v50 = vpop.f32.mrb[55].mxu0  ;;  %11869 = vrcp.f32 %v8283_v0  ;;  %v8902_v62 = vmax.f32 %v8838_v40, 0.0  ;;  %v7971_v29 = vmul.f32 %v15615_v45, %v7858_v26 }
 0x960   : > { %17015 = vst [vmem:[#allocation108_spill] sm:$0xff] %v15868_v50  ;;  %v11852_v23 = vpop.eup %11851  ;;  %v8472_v49 = vmul.f32 %v11850_v39, %v17016_v31  ;;  %11871 = vrcp.f32 %v8286_v58  ;;  %v8901_v16 = vmax.f32 %v8837_v34, 0.0  ;;  %v8038_v54 = vadd.f32 %v15619_v43, %v7972_v59  ;;  %v7864_v5 = vpop.xlane.xlu0 %7863 }
 0x961   : > { %v11854_v6 = vpop.eup %11853  ;;  %v8471_v46 = vmul.f32 %v11852_v23, %v17018_v44  ;;  %11873 = vpow2.f32 %v9405_v56  ;;  %8966 = vst [vmem:[%s15878_s23 + $0x8] sm:$0xff] %v8902_v62  ;;  %v8037_v40 = vadd.f32 %v15619_v43, %v7971_v29  ;;  %v7974_v59 = vmul.f32 %v15615_v45, %v7864_v5  ;;  %v17019_v29 = vld [vmem:[#allocation71_spill] sm:$0xff] }
 0x962   : > { %v11856_v61 = vpop.eup %11855  ;;  %v8285_v50 = vadd.f32 1.0, %v11854_v6  ;;  %v8840_v0 = vadd.f32 %v15648_v52, %v8472_v49  ;;  %v7862_v26 = vpop.xlane.xlu1 %7861  ;;  %11875 = vpow2.f32 %v9404_v27  ;;  %8965 = vst [vmem:[%s15878_s23] sm:$0xff] %v8901_v16  ;;  %v9407_v34 = vmul.f32 -1.442695, %v8038_v54 }
 0x963   : > { %v15872_v32 = vpop.f32.mrb[56].mxu0  ;;  %v11858_v39 = vpop.eup %11857  ;;  %v8288_v58 = vadd.f32 1.0, %v11856_v61  ;;  %v8839_v23 = vadd.f32 %v15639_v30, %v8471_v46  ;;  %v9406_v52 = vmul.f32 -1.442695, %v8037_v40  ;;  %v7973_v62 = vmul.f32 %v15615_v45, %v7862_v26  ;;  %v17020_v46 = vld [vmem:[#allocation72_spill] sm:$0xff] }
 0x964   : > { %17017 = vst [vmem:[#allocation109_spill] sm:$0xff] %v15872_v32  ;;  %v11860_v6 = vpop.eup %11859  ;;  %11877 = vrcp.f32 %v8285_v50  ;;  %v8904_v56 = vmax.f32 %v8840_v0, 0.0  ;;  %v7868_v61 = vpop.xlane.xlu0 %7867  ;;  %v8040_v50 = vadd.f32 %v15619_v43, %v7974_v59  ;;  %v8474_v54 = vmul.f32 %v11858_v39, %v17020_v46 }
 0x965   : > { %v11862_v31 = vpop.eup %11861  ;;  %11879 = vrcp.f32 %v8288_v58  ;;  %v8903_v49 = vmax.f32 %v8839_v23, 0.0  ;;  %v8473_v44 = vmul.f32 %v11860_v6, %v17019_v29  ;;  %v15887_v30 = vpop.f32.mrb[57].mxu0  ;;  %v8039_v26 = vadd.f32 %v15619_v43, %v7973_v62 }
 0x966   : > { %v11864_v27 = vpop.eup %11863  ;;  %v8287_v16 = vadd.f32 1.0, %v11862_v31  ;;  %8968 = vst [vmem:[%s15878_s23 + $0x18] sm:$0xff] %v8904_v56  ;;  %11881 = vpow2.f32 %v9407_v34  ;;  %v7866_v5 = vpop.xlane.xlu1 %7865  ;;  %v9409_v34 = vmul.f32 -1.442695, %v8040_v50  ;;  %v17021_v56 = vld [vmem:[#allocation74_spill] sm:$0xff]  ;;  %v8842_v39 = vadd.f32 %v15672_v28, %v8474_v54  ;;  %v17023_v28 = vld [vmem:[#allocation73_spill] sm:$0xff] }
 0x967   : > { %v15892_v0 = vpop.f32.mrb[58].mxu0  ;;  %v11866_v40 = vpop.eup %11865  ;;  %v8290_v58 = vadd.f32 1.0, %v11864_v27  ;;  %8967 = vst [vmem:[%s15878_s23 + $0x10] sm:$0xff] %v8903_v49  ;;  %11883 = vpow2.f32 %v9406_v52  ;;  %v8841_v23 = vadd.f32 %v15661_v18, %v8473_v44  ;;  %v9408_v46 = vmul.f32 -1.442695, %v8039_v26 }
 0x968   : > { %v15897_v6 = vpop.f32.mrb[59].mxu0  ;;  %v11868_v31 = vpop.eup %11867  ;;  %11885 = vrcp.f32 %v8287_v16  ;;  %v8476_v59 = vmul.f32 %v11866_v40, %v17021_v56  ;;  %v8906_v44 = vmax.f32 %v8842_v39, 0.0  ;;  %v7976_v16 = vmul.f32 %v15615_v45, %v7868_v61 }
 0x969   : > { %11887 = vrcp.f32 %v8290_v58  ;;  %v8289_v29 = vadd.f32 1.0, %v11868_v31  ;;  %v8905_v27 = vmax.f32 %v8841_v23, 0.0  ;;  %v7872_v49 = vpop.xlane.xlu0 %7871  ;;  %v11870_v62 = vpop.eup %11869  ;;  %v7975_v58 = vmul.f32 %v15615_v45, %v7866_v5 }
 0x96a   : > { %11889 = vpow2.f32 %v9409_v34  ;;  %v8844_v18 = vadd.f32 %v15668_v1, %v8476_v59  ;;  %v7870_v50 = vpop.xlane.xlu1 %7869  ;;  %v11872_v40 = vpop.eup %11871  ;;  %v8475_v54 = vmul.f32 %v11870_v62, %v17023_v28  ;;  %v7978_v26 = vmul.f32 %v15615_v45, %v7872_v49  ;;  %8970 = vst [vmem:[%s15878_s23 + $0x28] sm:$0xff] %v8906_v44  ;;  %v17025_v44 = vld [vmem:[#allocation76_spill] sm:$0xff] }
 0x96b   : > { %v15901_v52 = vpop.f32.mrb[60].mxu0  ;;  %11891 = vrcp.f32 %v8289_v29  ;;  %8969 = vst [vmem:[%s15878_s23 + $0x20] sm:$0xff] %v8905_v27  ;;  %v11874_v23 = vpop.eup %11873  ;;  %v8042_v1 = vadd.f32 %v15619_v43, %v7976_v16  ;;  %v7977_v34 = vmul.f32 %v15615_v45, %v7870_v50  ;;  %v8041_v39 = vadd.f32 %v15619_v43, %v7975_v58 }
 0x96c   : > { %17022 = vst [vmem:[#allocation110_spill] sm:$0xff] %v15901_v52  ;;  %11893 = vpow2.f32 %v9408_v46  ;;  %v8908_v31 = vmax.f32 %v8844_v18, 0.0  ;;  %v11876_v61 = vpop.eup %11875  ;;  %v8292_v56 = vadd.f32 1.0, %v11874_v23  ;;  %v8843_v59 = vadd.f32 %v15657_v41, %v8475_v54  ;;  %v15915_v27 = vpop.f32.mrb[61].mxu0 }
 0x96d   : > { %v8044_v29 = vadd.f32 %v15619_v43, %v7978_v26  ;;  %v7876_v5 = vpop.xlane.xlu0 %7875  ;;  %17024 = vst [vmem:[#allocation111_spill] sm:$0xff] %v15915_v27  ;;  %v8291_v62 = vadd.f32 1.0, %v11876_v61  ;;  %v9411_v46 = vmul.f32 -1.442695, %v8042_v1  ;;  %v8043_v18 = vadd.f32 %v15619_v43, %v7977_v34  ;;  %v15920_v28 = vpop.f32.mrb[62].mxu0  ;;  %v17028_v27 = vld [vmem:[#allocation78_spill] sm:$0xff] }
 0x96e   : > { %v11878_v49 = vpop.eup %11877  ;;  %8972 = vst [vmem:[%s15878_s23 + $0x38] sm:$0xff] %v8908_v31  ;;  %v8478_v16 = vmul.f32 %v11872_v40, %v17025_v44  ;;  %v7874_v50 = vpop.xlane.xlu1 %7873  ;;  %17026 = vst [vmem:[#allocation112_spill] sm:$0xff] %v15920_v28  ;;  %11895 = vrcp.f32 %v8292_v56  ;;  %v8907_v54 = vmax.f32 %v8843_v59, 0.0  ;;  %v9410_v58 = vmul.f32 -1.442695, %v8041_v39  ;;  %v17027_v31 = vld [vmem:[#allocation75_spill] sm:$0xff] }
 0x96f   : > { %v11880_v41 = vpop.eup %11879  ;;  %v9413_v26 = vmul.f32 -1.442695, %v8044_v29  ;;  %v15922_v23 = vpop.f32.mrb[63].mxu0  ;;  %11897 = vrcp.f32 %v8291_v62  ;;  %v9412_v61 = vmul.f32 -1.442695, %v8043_v18  ;;  %v8477_v1 = vmul.f32 %v11878_v49, %v17027_v31 }
 0x970   : > { %v11882_v52 = vpop.eup %11881  ;;  %v8480_v34 = vmul.f32 %v11880_v41, %v17028_v27  ;;  %8971 = vst [vmem:[%s15878_s23 + $0x30] sm:$0xff] %v8907_v54  ;;  %11899 = vpow2.f32 %v9411_v46  ;;  %v8846_v44 = vadd.f32 %v15694_v2, %v8478_v16  ;;  %v7980_v56 = vmul.f32 %v15615_v45, %v7876_v5  ;;  %v17029_v27 = vld [vmem:[#allocation77_spill] sm:$0xff] }
 0x971   : > { %v11884_v32 = vpop.eup %11883  ;;  %v8294_v40 = vadd.f32 1.0, %v11882_v52  ;;  %v7880_v59 = vpop.xlane.xlu0 %7879  ;;  %11901 = vpow2.f32 %v9410_v58  ;;  %v8845_v28 = vadd.f32 %v15683_v57, %v8477_v1  ;;  %v7979_v41 = vmul.f32 %v15615_v45, %v7874_v50 }
 0x972   : > { %v11886_v39 = vpop.eup %11885  ;;  %v8293_v29 = vadd.f32 1.0, %v11884_v32  ;;  %v8848_v62 = vadd.f32 %v15690_v42, %v8480_v34  ;;  %v7878_v49 = vpop.xlane.xlu1 %7877  ;;  %v8910_v46 = vmax.f32 %v8846_v44, 0.0  ;;  %v8046_v2 = vadd.f32 %v15619_v43, %v7980_v56 }
 0x973   : > { %v11888_v18 = vpop.eup %11887  ;;  %11903 = vrcp.f32 %v8294_v40  ;;  %v8479_v52 = vmul.f32 %v11886_v39, %v17029_v27  ;;  %v8909_v16 = vmax.f32 %v8845_v28, 0.0  ;;  %v8045_v1 = vadd.f32 %v15619_v43, %v7979_v41  ;;  %v17031_v27 = vld [vmem:[#allocation80_spill] sm:$0xff] }
 0x974   : > { %v11890_v5 = vpop.eup %11889  ;;  %11905 = vrcp.f32 %v8293_v29  ;;  %v8912_v32 = vmax.f32 %v8848_v62, 0.0  ;;  %8974 = vst [vmem:[%s15878_s23 + $0x48] sm:$0xff] %v8910_v46  ;;  %v9415_v58 = vmul.f32 -1.442695, %v8046_v2  ;;  %v7982_v34 = vmul.f32 %v15615_v45, %v7880_v59 }
 0x975   : > { %v11892_v57 = vpop.eup %11891  ;;  %v8296_v54 = vadd.f32 1.0, %v11890_v5  ;;  %v8847_v42 = vadd.f32 %v15679_v11, %v8479_v52  ;;  %11907 = vpow2.f32 %v9413_v26  ;;  %8973 = vst [vmem:[%s15878_s23 + $0x40] sm:$0xff] %v8909_v16  ;;  %v7981_v28 = vmul.f32 %v15615_v45, %v7878_v49  ;;  %v7884_v40 = vpop.xlane.xlu0 %7883  ;;  %v17030_v11 = vld [vmem:[#allocation79_spill] sm:$0xff]  ;;  %v17032_v16 = vld [vmem:[#allocation82_spill] sm:$0xff] }
 0x976   : > { %v11894_v31 = vpop.eup %11893  ;;  %11909 = vpow2.f32 %v9412_v61  ;;  %8976 = vst [vmem:[%s15878_s23 + $0x58] sm:$0xff] %v8912_v32  ;;  %v7882_v50 = vpop.xlane.xlu1 %7881  ;;  %v8481_v26 = vmul.f32 %v11892_v57, %v17030_v11  ;;  %v9414_v39 = vmul.f32 -1.442695, %v8045_v1  ;;  %v8048_v61 = vadd.f32 %v15619_v43, %v7982_v34  ;;  %v17033_v57 = vld [vmem:[#allocation81_spill] sm:$0xff] }
 0x977   : > { %11911 = vrcp.f32 %v8296_v54  ;;  %v8295_v44 = vadd.f32 1.0, %v11894_v31  ;;  %v8911_v56 = vmax.f32 %v8847_v42, 0.0  ;;  %v8047_v29 = vadd.f32 %v15619_v43, %v7981_v28 }
 0x978   : > { %11913 = vpow2.f32 %v9415_v58  ;;  %v11896_v62 = vpop.eup %11895  ;;  %v8849_v59 = vadd.f32 %v15705_v19, %v8481_v26  ;;  %v8482_v49 = vmul.f32 %v11888_v18, %v17031_v27  ;;  %v7984_v52 = vmul.f32 %v15615_v45, %v7884_v40 }
 0x979   : > { %11915 = vrcp.f32 %v8295_v44  ;;  %8975 = vst [vmem:[%s15878_s23 + $0x50] sm:$0xff] %v8911_v56  ;;  %v11898_v46 = vpop.eup %11897  ;;  %v9417_v2 = vmul.f32 -1.442695, %v8048_v61  ;;  %v9416_v5 = vmul.f32 -1.442695, %v8047_v29  ;;  %v8484_v32 = vmul.f32 %v11896_v62, %v17032_v16  ;;  %v7888_v28 = vpop.xlane.xlu0 %7887 }
 0x97a   : > { %11917 = vpow2.f32 %v9414_v39  ;;  %v11900_v41 = vpop.eup %11899  ;;  %v8483_v54 = vmul.f32 %v11898_v46, %v17033_v57  ;;  %v8913_v42 = vmax.f32 %v8849_v59, 0.0  ;;  %v8850_v58 = vadd.f32 %v15714_v13, %v8482_v49  ;;  %v7886_v40 = vpop.xlane.xlu1 %7885 }
 0x97b   : > { %v8050_v31 = vadd.f32 %v15619_v43, %v7984_v52  ;;  %v11902_v19 = vpop.eup %11901  ;;  %v8298_v1 = vadd.f32 1.0, %v11900_v41  ;;  %11919 = vpow2.f32 %v9417_v2  ;;  %v8852_v18 = vadd.f32 %v15710_v22, %v8484_v32  ;;  %v17034_v52 = vld [vmem:[#allocation83_spill] sm:$0xff]  ;;  %v17035_v41 = vld [vmem:[#allocation84_spill] sm:$0xff] }
 0x97c   : > { %v7983_v34 = vmul.f32 %v15615_v45, %v7882_v50  ;;  %v8297_v56 = vadd.f32 1.0, %v11902_v19  ;;  %v8851_v11 = vadd.f32 %v15701_v25, %v8483_v54  ;;  %11921 = vpow2.f32 %v9416_v5  ;;  %8977 = vst [vmem:[%s15878_s23 + $0x60] sm:$0xff] %v8913_v42 }
 0x97d   : > { %v11904_v44 = vpop.eup %11903  ;;  %v8914_v13 = vmax.f32 %v8850_v58, 0.0  ;;  %11923 = vrcp.f32 %v8298_v1  ;;  %v8916_v39 = vmax.f32 %v8852_v18, 0.0  ;;  %v9419_v61 = vmul.f32 -1.442695, %v8050_v31  ;;  %v17036_v58 = vld [vmem:[#allocation86_spill] sm:$0xff] }
 0x97e   : > { %v11906_v26 = vpop.eup %11905  ;;  %v8049_v22 = vadd.f32 %v15619_v43, %v7983_v34  ;;  %11925 = vrcp.f32 %v8297_v56  ;;  %v8915_v50 = vmax.f32 %v8851_v11, 0.0  ;;  %v7986_v62 = vmul.f32 %v15615_v45, %v7888_v28  ;;  %v17037_v56 = vld [vmem:[#allocation85_spill] sm:$0xff] }
 0x97f   : > { %v11908_v29 = vpop.eup %11907  ;;  %8978 = vst [vmem:[%s15878_s23 + $0x68] sm:$0xff] %v8914_v13  ;;  %v7985_v59 = vmul.f32 %v15615_v45, %v7886_v40  ;;  %8980 = vst [vmem:[%s15878_s23 + $0x78] sm:$0xff] %v8916_v39  ;;  %11927 = vpow2.f32 %v9419_v61  ;;  %v8485_v46 = vmul.f32 %v11906_v26, %v17034_v52  ;;  %v8486_v57 = vmul.f32 %v11904_v44, %v17035_v41 }
 0x980   : > { %v11910_v25 = vpop.eup %11909  ;;  %v8300_v27 = vadd.f32 1.0, %v11908_v29  ;;  %v9418_v49 = vmul.f32 -1.442695, %v8049_v22  ;;  %8979 = vst [vmem:[%s15878_s23 + $0x70] sm:$0xff] %v8915_v50  ;;  %v8052_v16 = vadd.f32 %v15619_v43, %v7986_v62  ;;  %v15970_v19 = vadd.f32 %v15630_v9, %v15696_v14 }
 0x981   : > { %v11912_v2 = vpop.eup %11911  ;;  %v8299_v5 = vadd.f32 1.0, %v11910_v25  ;;  %v8051_v32 = vadd.f32 %v15619_v43, %v7985_v59  ;;  %v8853_v42 = vadd.f32 %v15723_v21, %v8485_v46  ;;  %v8854_v26 = vadd.f32 %v15732_v35, %v8486_v57  ;;  %v17038_v46 = vld [vmem:[#allocation88_spill] sm:$0xff] }
 0x982   : > { %v11914_v54 = vpop.eup %11913  ;;  %11929 = vrcp.f32 %v8300_v27  ;;  %v8488_v31 = vmul.f32 %v11912_v2, %v17036_v58  ;;  %v9421_v34 = vmul.f32 -1.442695, %v8052_v16  ;;  %v15977_v14 = vadd.f32 %v15663_v63, %v15630_v9 }
 0x983   : > { %v11916_v1 = vpop.eup %11915  ;;  %11931 = vrcp.f32 %v8299_v5  ;;  %v8302_v18 = vadd.f32 1.0, %v11914_v54  ;;  %v9420_v28 = vmul.f32 -1.442695, %v8051_v32  ;;  %v8917_v11 = vmax.f32 %v8853_v42, 0.0  ;;  %v17039_v32 = vld [vmem:[#allocation87_spill] sm:$0xff] }
 0x984   : > { %v11918_v40 = vpop.eup %11917  ;;  %11933 = vpow2.f32 %v9418_v49  ;;  %v8487_v44 = vmul.f32 %v11916_v1, %v17037_v56  ;;  %v8856_v13 = vadd.f32 %v15728_v51, %v8488_v31  ;;  %v15983_v29 = vadd.f32 %v15685_v37, %v15630_v9 }
 0x985   : > { %11935 = vrcp.f32 %v8302_v18  ;;  %v8301_v21 = vadd.f32 1.0, %v11918_v40  ;;  %v11920_v39 = vpop.eup %11919  ;;  %8981 = vst [vmem:[%s15878_s23 + $0x80] sm:$0xff] %v8917_v11  ;;  %v8918_v35 = vmax.f32 %v8854_v26, 0.0  ;;  %v15987_v63 = vadd.f32 %v15630_v9, %v15754_v36  ;;  %v17040_v11 = vld [vmem:[#allocation90_spill] sm:$0xff] }
 0x986   : > { %v8855_v61 = vadd.f32 %v15719_v15, %v8487_v44  ;;  %11937 = vpow2.f32 %v9421_v34  ;;  %v8920_v22 = vmax.f32 %v8856_v13, 0.0  ;;  %v11922_v51 = vpop.eup %11921  ;;  %v8304_v50 = vadd.f32 1.0, %v11920_v39  ;;  %v7892_v62 = vpop.xlane.xlu0 %7891 }
 0x987   : > { %11939 = vrcp.f32 %v8301_v21  ;;  %v11924_v59 = vpop.eup %11923  ;;  %v8303_v15 = vadd.f32 1.0, %v11922_v51  ;;  %v7988_v27 = vmul.f32 %v15615_v45, %v7892_v62  ;;  %v7890_v37 = vpop.xlane.xlu1 %7889  ;;  %8982 = vst [vmem:[%s15878_s23 + $0x88] sm:$0xff] %v8918_v35  ;;  %v15996_v36 = vadd.f32 %v15743_v48, %v15630_v9 }
 0x988   : > { %v8919_v25 = vmax.f32 %v8855_v61, 0.0  ;;  %11941 = vpow2.f32 %v9420_v28  ;;  %8984 = vst [vmem:[%s15878_s23 + $0x98] sm:$0xff] %v8920_v22  ;;  %v11926_v49 = vpop.eup %11925  ;;  %v7987_v52 = vmul.f32 %v15615_v45, %v7890_v37  ;;  %v8490_v2 = vmul.f32 %v11924_v59, %v17038_v46 }
 0x989   : > { %11943 = vrcp.f32 %v8304_v50  ;;  %v11928_v5 = vpop.eup %11927  ;;  %v8054_v16 = vadd.f32 %v15619_v43, %v7988_v27  ;;  %v8489_v41 = vmul.f32 %v11926_v49, %v17039_v32  ;;  %v16003_v57 = vadd.f32 %v15765_v33, %v15630_v9  ;;  %v17042_v32 = vld [vmem:[#allocation91_spill] sm:$0xff] }
 0x98a   : > { %11945 = vrcp.f32 %v8303_v15  ;;  %8983 = vst [vmem:[%s15878_s23 + $0x90] sm:$0xff] %v8919_v25  ;;  %v8306_v54 = vadd.f32 1.0, %v11928_v5  ;;  %v8053_v42 = vadd.f32 %v15619_v43, %v7987_v52  ;;  %v7896_v58 = vpop.xlane.xlu0 %7895  ;;  %v16008_v31 = vadd.f32 %v15630_v9, %v15772_v60 }
 0x98b   : > { %v16012_v48 = vadd.f32 %v15630_v9, %v15810_v3  ;;  %v9423_v18 = vmul.f32 -1.442695, %v8054_v16  ;;  %v8857_v34 = vadd.f32 %v15741_v10, %v8489_v41  ;;  %v7990_v28 = vmul.f32 %v15615_v45, %v7896_v58  ;;  %v7894_v33 = vpop.xlane.xlu1 %7893  ;;  %v17041_v9 = vld [vmem:[#allocation89_spill] sm:$0xff] }
 0x98c   : > { %v11930_v1 = vpop.eup %11929  ;;  %v8858_v40 = vadd.f32 %v15752_v38, %v8490_v2  ;;  %11947 = vrcp.f32 %v8306_v54  ;;  %v9422_v44 = vmul.f32 -1.442695, %v8053_v42  ;;  %v7989_v60 = vmul.f32 %v15615_v45, %v7894_v33  ;;  %v17043_v42 = vld [vmem:[#allocation92_spill] sm:$0xff] }
 0x98d   : > { %v11932_v56 = vpop.eup %11931  ;;  %v8492_v13 = vmul.f32 %v11930_v1, %v17040_v11  ;;  %11949 = vpow2.f32 %v9423_v18  ;;  %v8921_v26 = vmax.f32 %v8857_v34, 0.0  ;;  %v8056_v10 = vadd.f32 %v15619_v43, %v7990_v28 }
 0x98e   : > { %v11934_v21 = vpop.eup %11933  ;;  %v8491_v3 = vmul.f32 %v11932_v56, %v17041_v9  ;;  %11951 = vpow2.f32 %v9422_v44  ;;  %v8055_v38 = vadd.f32 %v15619_v43, %v7989_v60  ;;  %v7900_v51 = vpop.xlane.xlu0 %7899  ;;  %v8922_v59 = vmax.f32 %v8858_v40, 0.0  ;;  %v17044_v40 = vld [vmem:[#allocation93_spill] sm:$0xff] }
 0x98f   : > { %v11936_v39 = vpop.eup %11935  ;;  %v8305_v61 = vadd.f32 1.0, %v11934_v21  ;;  %v8860_v22 = vadd.f32 %v15748_v24, %v8492_v13  ;;  %8985 = vst [vmem:[%s15878_s23 + $0xa0] sm:$0xff] %v8921_v26  ;;  %v9425_v62 = vmul.f32 -1.442695, %v8056_v10  ;;  %v7992_v15 = vmul.f32 %v15615_v45, %v7900_v51  ;;  %v7898_v25 = vpop.xlane.xlu1 %7897  ;;  %v17045_v21 = vld [vmem:[#allocation94_spill] sm:$0xff] }
 0x990   : > { %v11938_v50 = vpop.eup %11937  ;;  %v8859_v35 = vadd.f32 %v15737_v55, %v8491_v3  ;;  %v9424_v49 = vmul.f32 -1.442695, %v8055_v38  ;;  %8986 = vst [vmem:[%s15878_s23 + $0xa8] sm:$0xff] %v8922_v59  ;;  %v7991_v55 = vmul.f32 %v15615_v45, %v7898_v25  ;;  %v8494_v58 = vmul.f32 %v11936_v39, %v17043_v42 }
 0x991   : > { %v11940_v27 = vpop.eup %11939  ;;  %11953 = vrcp.f32 %v8305_v61  ;;  %v8308_v37 = vadd.f32 1.0, %v11938_v50  ;;  %v8924_v52 = vmax.f32 %v8860_v22, 0.0  ;;  %v8058_v2 = vadd.f32 %v15619_v43, %v7992_v15  ;;  %v17046_v61 = vld [vmem:[#allocation31_spill] sm:$0xff]  ;;  %v17047_v50 = vld [vmem:[#allocation144_spill] sm:$0xff] }
 0x992   : > { %v11942_v46 = vpop.eup %11941  ;;  %v8923_v24 = vmax.f32 %v8859_v35, 0.0  ;;  %11955 = vpow2.f32 %v9425_v62  ;;  %v8493_v41 = vmul.f32 %v11940_v27, %v17042_v32  ;;  %v7904_v54 = vpop.xlane.xlu0 %7903  ;;  %v8057_v34 = vadd.f32 %v15619_v43, %v7991_v55  ;;  %v16054_v32 = vld [vmem:[%s16290_s8] ss:$0 sm:$0xff] }
 0x993   : > { %v11944_v5 = vpop.eup %11943  ;;  %11957 = vrcp.f32 %v8308_v37  ;;  %v8307_v16 = vadd.f32 1.0, %v11942_v46  ;;  %8988 = vst [vmem:[%s15878_s23 + $0xb8] sm:$0xff] %v8924_v52  ;;  %v9427_v18 = vmul.f32 -1.442695, %v8058_v2  ;;  %v7994_v28 = vmul.f32 %v15615_v45, %v7904_v54  ;;  %v7902_v33 = vpop.xlane.xlu1 %7901 }
 0x994   : > { %v11946_v1 = vpop.eup %11945  ;;  %8987 = vst [vmem:[%s15878_s23 + $0xb0] sm:$0xff] %v8923_v24  ;;  %11959 = vpow2.f32 %v9424_v49  ;;  %v8861_v44 = vadd.f32 %v15763_v4, %v8493_v41  ;;  %v7993_v60 = vmul.f32 %v15615_v45, %v7902_v33  ;;  %v9426_v11 = vmul.f32 -1.442695, %v8057_v34 }
 0x995   : > { %11961 = vrcp.f32 %v8307_v16  ;;  %v8495_v56 = vmul.f32 %v11946_v1, %v17044_v40  ;;  %v8060_v13 = vadd.f32 %v15619_v43, %v7994_v28  ;;  %v8496_v9 = vmul.f32 %v11944_v5, %v17045_v21  ;;  %v17048_v5 = vld [vmem:[#allocation96_spill] sm:$0xff] }
 0x996   : > { %11963 = vpow2.f32 %v9427_v18  ;;  %v11948_v3 = vpop.eup %11947  ;;  %v8925_v10 = vmax.f32 %v8861_v44, 0.0  ;;  %v8059_v39 = vadd.f32 %v15619_v43, %v7993_v60  ;;  %v8862_v38 = vadd.f32 %v17046_v61, %v8494_v58  ;;  %v7908_v22 = vpop.xlane.xlu0 %7907  ;;  %v17049_v58 = vld [vmem:[#allocation95_spill] sm:$0xff]  ;;  %v17051_v61 = vld [vmem:[#allocation97_spill] sm:$0xff] }
 0x997   : > { %v8863_v26 = vadd.f32 %v15759_v8, %v8495_v56  ;;  %v11950_v51 = vpop.eup %11949  ;;  %11965 = vpow2.f32 %v9426_v11  ;;  %v9429_v4 = vmul.f32 -1.442695, %v8060_v13  ;;  %v8864_v35 = vadd.f32 %v17047_v50, %v8496_v9  ;;  %v7906_v59 = vpop.xlane.xlu1 %7905  ;;  %v17050_v11 = vld [vmem:[#allocation98_spill] sm:$0xff] }
 0x998   : > { %v7996_v62 = vmul.f32 %v15615_v45, %v7908_v22  ;;  %v11952_v15 = vpop.eup %11951  ;;  %v8310_v25 = vadd.f32 1.0, %v11950_v51  ;;  %8989 = vst [vmem:[%s15878_s23 + $0xc0] sm:$0xff] %v8925_v10  ;;  %v9428_v8 = vmul.f32 -1.442695, %v8059_v39  ;;  %v8926_v37 = vmax.f32 %v8862_v38, 0.0 }
 0x999   : > { %v8927_v27 = vmax.f32 %v8863_v26, 0.0  ;;  %v8309_v49 = vadd.f32 1.0, %v11952_v15  ;;  %11967 = vpow2.f32 %v9429_v4  ;;  %v8928_v52 = vmax.f32 %v8864_v35, 0.0  ;;  %v17052_v15 = vld [vmem:[#allocation32_spill] sm:$0xff] }
 0x99a   : > { %v8062_v46 = vadd.f32 %v15619_v43, %v7996_v62  ;;  %11969 = vrcp.f32 %v8310_v25  ;;  %8990 = vst [vmem:[%s15878_s23 + $0xc8] sm:$0xff] %v8926_v37  ;;  %v7995_v2 = vmul.f32 %v15615_v45, %v7906_v59  ;;  %v7912_v55 = vpop.xlane.xlu0 %7911  ;;  %v8498_v16 = vmul.f32 %v11948_v3, %v17048_v5 }
 0x99b   : > { %v11954_v24 = vpop.eup %11953  ;;  %8991 = vst [vmem:[%s15878_s23 + $0xd0] sm:$0xff] %v8927_v27  ;;  %v16058_v41 = vadd.f32 %v16054_v32, %v15799_v53  ;;  %11971 = vrcp.f32 %v8309_v49  ;;  %8992 = vst [vmem:[%s15878_s23 + $0xd8] sm:$0xff] %v8928_v52  ;;  %v7998_v18 = vmul.f32 %v15615_v45, %v7912_v55  ;;  %v7910_v34 = vpop.xlane.xlu1 %7909 }
 0x99c   : > { %v11956_v54 = vpop.eup %11955  ;;  %v9431_v42 = vmul.f32 -1.442695, %v8062_v46  ;;  %v8497_v1 = vmul.f32 %v11954_v24, %v17049_v58  ;;  %11973 = vpow2.f32 %v9428_v8  ;;  %v8061_v40 = vadd.f32 %v15619_v43, %v7995_v2 }
 0x99d   : > { %v11958_v28 = vpop.eup %11957  ;;  %v8312_v33 = vadd.f32 1.0, %v11956_v54  ;;  %v7997_v56 = vmul.f32 %v15615_v45, %v7910_v34  ;;  %v8064_v60 = vadd.f32 %v15619_v43, %v7998_v18  ;;  %v8866_v62 = vadd.f32 %v15791_v7, %v8498_v16  ;;  %v17053_v34 = vld [vmem:[#allocation100_spill] sm:$0xff] }
 0x99e   : > { %v11960_v44 = vpop.eup %11959  ;;  %11975 = vpow2.f32 %v9431_v42  ;;  %v8865_v53 = vadd.f32 %v15786_v20, %v8497_v1  ;;  %v8500_v13 = vmul.f32 %v11958_v28, %v17050_v11  ;;  %v9430_v3 = vmul.f32 -1.442695, %v8061_v40  ;;  %v7916_v10 = vpop.xlane.xlu0 %7915 }
 0x99f   : > { %v11962_v21 = vpop.eup %11961  ;;  %11977 = vrcp.f32 %v8312_v33  ;;  %v8311_v9 = vadd.f32 1.0, %v11960_v44  ;;  %v8063_v26 = vadd.f32 %v15619_v43, %v7997_v56  ;;  %v9433_v51 = vmul.f32 -1.442695, %v8064_v60  ;;  %v7914_v20 = vpop.xlane.xlu1 %7913  ;;  %v17054_v56 = vld [vmem:[#allocation99_spill] sm:$0xff] }
 0x9a0   : > { %v11964_v39 = vpop.eup %11963  ;;  %v8499_v38 = vmul.f32 %v11962_v21, %v17051_v61  ;;  %v8929_v22 = vmax.f32 %v8865_v53, 0.0  ;;  %v8868_v4 = vadd.f32 %v15797_v17, %v8500_v13  ;;  %v8000_v8 = vmul.f32 %v15615_v45, %v7916_v10 }
 0x9a1   : > { %11979 = vrcp.f32 %v8311_v9  ;;  %v8314_v50 = vadd.f32 1.0, %v11964_v39  ;;  %v9432_v35 = vmul.f32 -1.442695, %v8063_v26  ;;  %v11966_v59 = vpop.eup %11965  ;;  %v8930_v49 = vmax.f32 %v8866_v62, 0.0  ;;  %v17055_v39 = vld [vmem:[#allocation34_spill] sm:$0xff] }
 0x9a2   : > { %11981 = vpow2.f32 %v9430_v3  ;;  %v8867_v25 = vadd.f32 %v17052_v15, %v8499_v38  ;;  %8993 = vst [vmem:[%s15878_s23 + $0xe0] sm:$0xff] %v8929_v22  ;;  %v8932_v27 = vmax.f32 %v8868_v4, 0.0  ;;  %v8313_v37 = vadd.f32 1.0, %v11966_v59  ;;  %v7920_v52 = vpop.xlane.xlu0 %7919  ;;  %v17056_v22 = vld [vmem:[#allocation102_spill] sm:$0xff] }
 0x9a3   : > { %11983 = vrcp.f32 %v8314_v50  ;;  %v7999_v17 = vmul.f32 %v15615_v45, %v7914_v20  ;;  %v11968_v46 = vpop.eup %11967  ;;  %v8066_v7 = vadd.f32 %v15619_v43, %v8000_v8  ;;  %v8002_v2 = vmul.f32 %v15615_v45, %v7920_v52  ;;  %v7918_v55 = vpop.xlane.xlu1 %7917  ;;  %8994 = vst [vmem:[%s15878_s23 + $0xe8] sm:$0xff] %v8930_v49  ;;  %v17058_v8 = vld [vmem:[#allocation36_spill] sm:$0xff] }
 0x9a4   : > { %v8931_v24 = vmax.f32 %v8867_v25, 0.0  ;;  %11985 = vpow2.f32 %v9433_v51  ;;  %8996 = vst [vmem:[%s15878_s23 + $0xf8] sm:$0xff] %v8932_v27  ;;  %v11970_v5 = vpop.eup %11969  ;;  %v8316_v16 = vadd.f32 1.0, %v11968_v46  ;;  %v8001_v42 = vmul.f32 %v15615_v45, %v7918_v55  ;;  %v17057_v25 = vld [vmem:[#allocation101_spill] sm:$0xff] }
 0x9a5   : > { %11987 = vrcp.f32 %v8313_v37  ;;  %v8065_v54 = vadd.f32 %v15619_v43, %v7999_v17  ;;  %v11972_v58 = vpop.eup %11971  ;;  %v9435_v1 = vmul.f32 -1.442695, %v8066_v7  ;;  %v8068_v18 = vadd.f32 %v15619_v43, %v8002_v2  ;;  %v17059_v2 = vld [vmem:[#allocation33_spill] sm:$0xff] }
 0x9a6   : > { %8995 = vst [vmem:[%s15878_s23 + $0xf0] sm:$0xff] %v8931_v24  ;;  %11989 = vpow2.f32 %v9432_v35  ;;  %v8502_v28 = vmul.f32 %v11970_v5, %v17053_v34  ;;  %v11974_v33 = vpop.eup %11973  ;;  %v8501_v44 = vmul.f32 %v11972_v58, %v17054_v56  ;;  %v8067_v53 = vadd.f32 %v15619_v43, %v8001_v42  ;;  %v7924_v60 = vpop.xlane.xlu0 %7923 }
 0x9a7   : > { %11991 = vrcp.f32 %v8316_v16  ;;  %v9434_v40 = vmul.f32 -1.442695, %v8065_v54  ;;  %v8315_v13 = vadd.f32 1.0, %v11974_v33  ;;  %v9437_v21 = vmul.f32 -1.442695, %v8068_v18  ;;  %v7922_v3 = vpop.xlane.xlu1 %7921 }
 0x9a8   : > { %v11976_v11 = vpop.eup %11975  ;;  %11993 = vpow2.f32 %v9435_v1  ;;  %v8870_v9 = vadd.f32 %v15815_v47, %v8502_v28  ;;  %v8869_v61 = vadd.f32 %v17055_v39, %v8501_v44  ;;  %v9436_v38 = vmul.f32 -1.442695, %v8067_v53 }
 0x9a9   : > { %v11978_v26 = vpop.eup %11977  ;;  %v8318_v10 = vadd.f32 1.0, %v11976_v11  ;;  %11995 = vpow2.f32 %v9434_v40  ;;  %v8004_v20 = vmul.f32 %v15615_v45, %v7924_v60  ;;  %v8003_v47 = vmul.f32 %v15615_v45, %v7922_v3  ;;  %v17060_v40 = vld [vmem:[#allocation103_spill] sm:$0xff] }
 0x9aa   : > { %11997 = vrcp.f32 %v8315_v13  ;;  %v8504_v51 = vmul.f32 %v11978_v26, %v17056_v22  ;;  %v8934_v4 = vmax.f32 %v8870_v9, 0.0  ;;  %v8933_v35 = vmax.f32 %v8869_v61, 0.0  ;;  %v7928_v62 = vpop.xlane.xlu0 %7927  ;;  %v17062_v26 = vld [vmem:[#allocation38_spill] sm:$0xff] }
 0x9ab   : > { %v11980_v50 = vpop.eup %11979  ;;  %11999 = vrcp.f32 %v8318_v10  ;;  %v16094_v59 = vadd.f32 %v16054_v32, %v15820_v12  ;;  %v8070_v49 = vadd.f32 %v15619_v43, %v8004_v20  ;;  %v7926_v17 = vpop.xlane.xlu1 %7925  ;;  %v8069_v24 = vadd.f32 %v15619_v43, %v8003_v47  ;;  %v17063_v61 = vld [vmem:[#allocation70_spill] sm:$0xff] }
 0x9ac   : > { %v11982_v15 = vpop.eup %11981  ;;  %v8503_v27 = vmul.f32 %v11980_v50, %v17057_v25  ;;  %12001 = vpow2.f32 %v9437_v21  ;;  %v8872_v37 = vadd.f32 %v17058_v8, %v8504_v51  ;;  %8998 = vst [vmem:[%s15878_s23 + $0x108] sm:$0xff] %v8934_v4  ;;  %8997 = vst [vmem:[%s15878_s23 + $0x100] sm:$0xff] %v8933_v35  ;;  %v8006_v12 = vmul.f32 %v15615_v45, %v7928_v62  ;;  %v17061_v21 = vld [vmem:[#allocation104_spill] sm:$0xff]  ;;  %v17064_v4 = vld [vmem:[#allocation39_spill] sm:$0xff] }
 0x9ad   : > { %v11984_v52 = vpop.eup %11983  ;;  %v8317_v46 = vadd.f32 1.0, %v11982_v15  ;;  %12003 = vpow2.f32 %v9436_v38  ;;  %v9439_v16 = vmul.f32 -1.442695, %v8070_v49  ;;  %v8005_v54 = vmul.f32 %v15615_v45, %v7926_v17  ;;  %v17065_v25 = vld [vmem:[#allocation40_spill] sm:$0xff]  ;;  %v17066_v49 = vld [vmem:[#allocation69_spill] sm:$0xff] }
 0x9ae   : > { %v11986_v7 = vpop.eup %11985  ;;  %v8871_v55 = vadd.f32 %v17059_v2, %v8503_v27  ;;  %v8936_v5 = vmax.f32 %v8872_v37, 0.0  ;;  %v9438_v1 = vmul.f32 -1.442695, %v8069_v24  ;;  %v8072_v18 = vadd.f32 %v15619_v43, %v8006_v12  ;;  %v7932_v34 = vpop.xlane.xlu0 %7931 }
 0x9af   : > { %v11988_v42 = vpop.eup %11987  ;;  %12005 = vrcp.f32 %v8317_v46  ;;  %v8320_v58 = vadd.f32 1.0, %v11986_v7  ;;  %v8071_v44 = vadd.f32 %v15619_v43, %v8005_v54  ;;  %v7930_v53 = vpop.xlane.xlu1 %7929  ;;  %v8506_v9 = vmul.f32 %v11984_v52, %v17061_v21  ;;  %v17069_v21 = vld [vmem:[#allocation41_spill] sm:$0xff] }
 0x9b0   : > { %v11990_v28 = vpop.eup %11989  ;;  %v8935_v33 = vmax.f32 %v8871_v55, 0.0  ;;  %9000 = vst [vmem:[%s15878_s23 + $0x118] sm:$0xff] %v8936_v5  ;;  %12007 = vpow2.f32 %v9439_v16  ;;  %v8505_v56 = vmul.f32 %v11988_v42, %v17060_v40  ;;  %v9441_v13 = vmul.f32 -1.442695, %v8072_v18  ;;  %v17067_v16 = vld [vmem:[#allocation37_spill] sm:$0xff] }
 0x9b1   : > { %v11992_v60 = vpop.eup %11991  ;;  %12009 = vrcp.f32 %v8320_v58  ;;  %v8319_v11 = vadd.f32 1.0, %v11990_v28  ;;  %v9440_v39 = vmul.f32 -1.442695, %v8071_v44  ;;  %v8874_v20 = vadd.f32 %v17064_v4, %v8506_v9  ;;  %v17068_v44 = vld [vmem:[#allocation42_spill] sm:$0xff] }
 0x9b2   : > { %v11994_v3 = vpop.eup %11993  ;;  %8999 = vst [vmem:[%s15878_s23 + $0x110] sm:$0xff] %v8935_v33  ;;  %12011 = vpow2.f32 %v9438_v1  ;;  %v8873_v10 = vadd.f32 %v17062_v26, %v8505_v56  ;;  %v8508_v38 = vmul.f32 %v11992_v60, %v17063_v61  ;;  %v8008_v50 = vmul.f32 %v15615_v45, %v7932_v34  ;;  %v7936_v35 = vpop.xlane.xlu0 %7935 }
 0x9b3   : > { %v11996_v22 = vpop.eup %11995  ;;  %12013 = vrcp.f32 %v8319_v11  ;;  %v8322_v51 = vadd.f32 1.0, %v11994_v3  ;;  %v7934_v8 = vpop.xlane.xlu1 %7933  ;;  %v8938_v52 = vmax.f32 %v8874_v20, 0.0  ;;  %v8007_v7 = vmul.f32 %v15615_v45, %v7930_v53  ;;  %v17071_v20 = vld [vmem:[#allocation44_spill] sm:$0xff] }
 0x9b4   : > { %v11998_v47 = vpop.eup %11997  ;;  %v8321_v62 = vadd.f32 1.0, %v11996_v22  ;;  %v8937_v15 = vmax.f32 %v8873_v10, 0.0  ;;  %12015 = vpow2.f32 %v9441_v13  ;;  %v8876_v27 = vadd.f32 %v17065_v25, %v8508_v38 }
 0x9b5   : > { %v12000_v37 = vpop.eup %11999  ;;  %12017 = vrcp.f32 %v8322_v51  ;;  %v8507_v17 = vmul.f32 %v11998_v47, %v17066_v49  ;;  %v8074_v46 = vadd.f32 %v15619_v43, %v8008_v50  ;;  %v8010_v2 = vmul.f32 %v15615_v45, %v7936_v35  ;;  %9002 = vst [vmem:[%s15878_s23 + $0x128] sm:$0xff] %v8938_v52  ;;  %v17070_v51 = vld [vmem:[#allocation105_spill] sm:$0xff] }
 0x9b6   : > { %v12002_v24 = vpop.eup %12001  ;;  %12019 = vrcp.f32 %v8321_v62  ;;  %9001 = vst [vmem:[%s15878_s23 + $0x120] sm:$0xff] %v8937_v15  ;;  %v8940_v12 = vmax.f32 %v8876_v27, 0.0  ;;  %v7940_v58 = vpop.xlane.xlu0 %7939  ;;  %v8073_v18 = vadd.f32 %v15619_v43, %v8007_v7  ;;  %v8009_v28 = vmul.f32 %v15615_v45, %v7934_v8 }
 0x9b7   : > { %v12004_v55 = vpop.eup %12003  ;;  %v8324_v5 = vadd.f32 1.0, %v12002_v24  ;;  %v8875_v54 = vadd.f32 %v17067_v16, %v8507_v17  ;;  %12021 = vpow2.f32 %v9440_v39  ;;  %v9443_v42 = vmul.f32 -1.442695, %v8074_v46  ;;  %v7938_v33 = vpop.xlane.xlu1 %7937 }
 0x9b8   : > { %v8323_v1 = vadd.f32 1.0, %v12004_v55  ;;  %9004 = vst [vmem:[%s15878_s23 + $0x138] sm:$0xff] %v8940_v12  ;;  %v8076_v34 = vadd.f32 %v15619_v43, %v8010_v2  ;;  %v8510_v53 = vmul.f32 %v12000_v37, %v17068_v44  ;;  %v8012_v60 = vmul.f32 %v15615_v45, %v7940_v58  ;;  %v17072_v37 = vld [vmem:[#allocation43_spill] sm:$0xff] }
 0x9b9   : > { %v12006_v40 = vpop.eup %12005  ;;  %12023 = vrcp.f32 %v8324_v5  ;;  %v8939_v56 = vmax.f32 %v8875_v54, 0.0  ;;  %v9442_v13 = vmul.f32 -1.442695, %v8073_v18  ;;  %v8075_v39 = vadd.f32 %v15619_v43, %v8009_v28  ;;  %v17073_v54 = vld [vmem:[#allocation45_spill] sm:$0xff] }
 0x9ba   : > { %v12008_v11 = vpop.eup %12007  ;;  %12025 = vrcp.f32 %v8323_v1  ;;  %v8509_v9 = vmul.f32 %v12006_v40, %v17069_v21  ;;  %v9445_v3 = vmul.f32 -1.442695, %v8076_v34  ;;  %v8878_v61 = vadd.f32 %v15970_v19, %v8510_v53  ;;  %v7944_v38 = vpop.xlane.xlu0 %7943  ;;  %v17074_v53 = vld [vmem:[#allocation46_spill] sm:$0xff]  ;;  %v17075_v21 = vld [vmem:[#allocation48_spill] sm:$0xff] }
 0x9bb   : > { %v12010_v26 = vpop.eup %12009  ;;  %v8326_v10 = vadd.f32 1.0, %v12008_v11  ;;  %9003 = vst [vmem:[%s15878_s23 + $0x130] sm:$0xff] %v8939_v56  ;;  %12027 = vpow2.f32 %v9443_v42  ;;  %v8078_v35 = vadd.f32 %v15619_v43, %v8012_v60  ;;  %v7942_v47 = vpop.xlane.xlu1 %7941  ;;  %v9444_v25 = vmul.f32 -1.442695, %v8075_v39 }
 0x9bc   : > { %v12012_v22 = vpop.eup %12011  ;;  %12029 = vpow2.f32 %v9442_v13  ;;  %v8877_v4 = vadd.f32 %v17070_v51, %v8509_v9  ;;  %v8512_v50 = vmul.f32 %v12010_v26, %v17071_v20  ;;  %v8942_v27 = vmax.f32 %v8878_v61, 0.0 }
 0x9bd   : > { %v12014_v62 = vpop.eup %12013  ;;  %12031 = vrcp.f32 %v8326_v10  ;;  %v8325_v15 = vadd.f32 1.0, %v12012_v22  ;;  %v9447_v24 = vmul.f32 -1.442695, %v8078_v35  ;;  %v8011_v12 = vmul.f32 %v15615_v45, %v7938_v33  ;;  %v17076_v10 = vld [vmem:[#allocation47_spill] sm:$0xff] }
 0x9be   : > { %v12016_v8 = vpop.eup %12015  ;;  %v8511_v19 = vmul.f32 %v12014_v62, %v17072_v37  ;;  %v8941_v49 = vmax.f32 %v8877_v4, 0.0  ;;  %12033 = vpow2.f32 %v9445_v3  ;;  %v8880_v17 = vadd.f32 %v15983_v29, %v8512_v50  ;;  %9006 = vst [vmem:[%s15878_s23 + $0x148] sm:$0xff] %v8942_v27  ;;  %v7948_v1 = vpop.xlane.xlu0 %7947 }
 0x9bf   : > { %v12018_v52 = vpop.eup %12017  ;;  %12035 = vrcp.f32 %v8325_v15  ;;  %v8328_v46 = vadd.f32 1.0, %v12016_v8  ;;  %v8014_v5 = vmul.f32 %v15615_v45, %v7944_v38  ;;  %v8077_v29 = vadd.f32 %v15619_v43, %v8011_v12  ;;  %v7946_v18 = vpop.xlane.xlu1 %7945 }
 0x9c0   : > { %v12020_v7 = vpop.eup %12019  ;;  %v8879_v2 = vadd.f32 %v15977_v14, %v8511_v19  ;;  %9005 = vst [vmem:[%s15878_s23 + $0x140] sm:$0xff] %v8941_v49  ;;  %12037 = vpow2.f32 %v9444_v25  ;;  %v8944_v55 = vmax.f32 %v8880_v17, 0.0  ;;  %v8013_v58 = vmul.f32 %v15615_v45, %v7942_v47 }
 0x9c1   : > { %v12022_v16 = vpop.eup %12021  ;;  %12039 = vrcp.f32 %v8328_v46  ;;  %v8513_v42 = vmul.f32 %v12020_v7, %v17073_v54  ;;  %v8080_v14 = vadd.f32 %v15619_v43, %v8014_v5  ;;  %v9446_v40 = vmul.f32 -1.442695, %v8077_v29 }
 0x9c2   : > { %v8327_v34 = vadd.f32 1.0, %v12022_v16  ;;  %v8943_v28 = vmax.f32 %v8879_v2, 0.0  ;;  %9008 = vst [vmem:[%s15878_s23 + $0x158] sm:$0xff] %v8944_v55  ;;  %12041 = vpow2.f32 %v9447_v24  ;;  %v8079_v44 = vadd.f32 %v15619_v43, %v8013_v58  ;;  %v7952_v62 = vpop.xlane.xlu0 %7951  ;;  %v17078_v55 = vld [vmem:[#allocation35_spill] sm:$0xff]  ;;  %v17079_v16 = vld [vmem:[#allocation50_spill] sm:$0xff] }
 0x9c3   : > { %v12024_v33 = vpop.eup %12023  ;;  %v8881_v56 = vadd.f32 %v15987_v63, %v8513_v42  ;;  %v8514_v60 = vmul.f32 %v12018_v52, %v17074_v53  ;;  %v9449_v13 = vmul.f32 -1.442695, %v8080_v14  ;;  %v8016_v3 = vmul.f32 %v15615_v45, %v7948_v1  ;;  %v7950_v15 = vpop.xlane.xlu1 %7949  ;;  %v17077_v52 = vld [vmem:[#allocation49_spill] sm:$0xff]  ;;  %v17081_v53 = vld [vmem:[#allocation51_spill] sm:$0xff] }
 0x9c4   : > { %v12026_v11 = vpop.eup %12025  ;;  %12043 = vrcp.f32 %v8327_v34  ;;  %9007 = vst [vmem:[%s15878_s23 + $0x150] sm:$0xff] %v8943_v28  ;;  %v8516_v9 = vmul.f32 %v12024_v33, %v17075_v21  ;;  %v9448_v38 = vmul.f32 -1.442695, %v8079_v44  ;;  %v8018_v24 = vmul.f32 %v15615_v45, %v7952_v62  ;;  %v17080_v34 = vld [vmem:[#allocation52_spill] sm:$0xff] }
 0x9c5   : > { %v12028_v26 = vpop.eup %12027  ;;  %12045 = vpow2.f32 %v9446_v40  ;;  %v8515_v39 = vmul.f32 %v12026_v11, %v17076_v10  ;;  %v8945_v61 = vmax.f32 %v8881_v56, 0.0  ;;  %v8882_v4 = vadd.f32 %v16008_v31, %v8514_v60 }
 0x9c6   : > { %v12030_v63 = vpop.eup %12029  ;;  %v8330_v22 = vadd.f32 1.0, %v12028_v26  ;;  %12047 = vpow2.f32 %v9449_v13  ;;  %v8884_v51 = vadd.f32 %v16003_v57, %v8516_v9  ;;  %v8082_v47 = vadd.f32 %v15619_v43, %v8016_v3  ;;  %v17082_v9 = vld [vmem:[#allocation108_spill] sm:$0xff] }
 0x9c7   : > { %v12032_v20 = vpop.eup %12031  ;;  %v8329_v50 = vadd.f32 1.0, %v12030_v63  ;;  %v8883_v35 = vadd.f32 %v15996_v36, %v8515_v39  ;;  %9009 = vst [vmem:[%s15878_s23 + $0x160] sm:$0xff] %v8945_v61  ;;  %12049 = vpow2.f32 %v9448_v38  ;;  %v8946_v8 = vmax.f32 %v8882_v4, 0.0  ;;  %v17083_v63 = vld [vmem:[#allocation106_spill] sm:$0xff] }
 0x9c8   : > { %v12034_v25 = vpop.eup %12033  ;;  %12051 = vrcp.f32 %v8330_v22  ;;  %v8948_v27 = vmax.f32 %v8884_v51, 0.0  ;;  %v8015_v57 = vmul.f32 %v15615_v45, %v7946_v18  ;;  %v9451_v36 = vmul.f32 -1.442695, %v8082_v47 }
 0x9c9   : > { %v12036_v31 = vpop.eup %12035  ;;  %12053 = vrcp.f32 %v8329_v50  ;;  %v8332_v37 = vadd.f32 1.0, %v12034_v25  ;;  %v8947_v19 = vmax.f32 %v8883_v35, 0.0  ;;  %9010 = vst [vmem:[%s15878_s23 + $0x168] sm:$0xff] %v8946_v8  ;;  %v8017_v12 = vmul.f32 %v15615_v45, %v7950_v15  ;;  %v17085_v35 = vld [vmem:[#allocation53_spill] sm:$0xff] }
 0x9ca   : > { %v12038_v49 = vpop.eup %12037  ;;  %9012 = vst [vmem:[%s15878_s23 + $0x178] sm:$0xff] %v8948_v27  ;;  %v8081_v17 = vadd.f32 %v15619_v43, %v8015_v57  ;;  %v8517_v46 = vmul.f32 %v12036_v31, %v17077_v52  ;;  %v8786_v5 = vadd.f32 %v16054_v32, %v17078_v55  ;;  %v8518_v29 = vmul.f32 %v12032_v20, %v17079_v16  ;;  %v17084_v20 = vld [vmem:[#allocation54_spill] sm:$0xff]  ;;  %v17086_v27 = vld [vmem:[#allocation56_spill] sm:$0xff]  ;;  %v17087_v57 = vld [vmem:[#allocation107_spill] sm:$0xff] }
 0x9cb   : > { %v12040_v7 = vpop.eup %12039  ;;  %12055 = vrcp.f32 %v8332_v37  ;;  %v8331_v2 = vadd.f32 1.0, %v12038_v49  ;;  %9011 = vst [vmem:[%s15878_s23 + $0x170] sm:$0xff] %v8947_v19  ;;  %v8084_v1 = vadd.f32 %v15619_v43, %v8018_v24  ;;  %v8083_v45 = vadd.f32 %v15619_v43, %v8017_v12 }
 0x9cc   : > { %v12042_v54 = vpop.eup %12041  ;;  %12057 = vpow2.f32 %v9451_v36  ;;  %v9450_v42 = vmul.f32 -1.442695, %v8081_v17  ;;  %v8885_v58 = vadd.f32 %v16012_v48, %v8517_v46  ;;  %v8520_v28 = vmul.f32 %v12040_v7, %v17080_v34  ;;  %v17088_v36 = vld [vmem:[#allocation9_spill] sm:$0xff]  ;;  %v17089_v46 = vld [vmem:[#allocation55_spill] sm:$0xff] }
 0x9cd   : > { %12059 = vrcp.f32 %v8331_v2  ;;  %v8334_v18 = vadd.f32 1.0, %v12042_v54  ;;  %v9453_v40 = vmul.f32 -1.442695, %v8084_v1  ;;  %v8886_v56 = vadd.f32 %v16094_v59, %v8518_v29 }
 0x9ce   : > { %v12044_v14 = vpop.eup %12043  ;;  %12061 = vpow2.f32 %v9450_v42  ;;  %v8949_v33 = vmax.f32 %v8885_v58, 0.0  ;;  %v9452_v48 = vmul.f32 -1.442695, %v8083_v45  ;;  %v8888_v11 = vadd.f32 %v8786_v5, %v8520_v28  ;;  %v17090_v42 = vld [vmem:[#allocation58_spill] sm:$0xff] }
 0x9cf   : > { %v12046_v44 = vpop.eup %12045  ;;  %12063 = vrcp.f32 %v8334_v18  ;;  %v8519_v60 = vmul.f32 %v12044_v14, %v17081_v53  ;;  %v8950_v43 = vmax.f32 %v8886_v56, 0.0  ;;  %v8794_v3 = vadd.f32 %v16054_v32, %v17082_v9  ;;  %v17092_v53 = vld [vmem:[#allocation60_spill] sm:$0xff] }
 0x9d0   : > { %v12048_v13 = vpop.eup %12047  ;;  %v8333_v21 = vadd.f32 1.0, %v12046_v44  ;;  %9013 = vst [vmem:[%s15878_s23 + $0x180] sm:$0xff] %v8949_v33  ;;  %12065 = vpow2.f32 %v9453_v40  ;;  %v8952_v39 = vmax.f32 %v8888_v11, 0.0  ;;  %v8791_v22 = vadd.f32 %v16054_v32, %v17083_v63  ;;  %v17091_v40 = vld [vmem:[#allocation57_spill] sm:$0xff]  ;;  %v17093_v11 = vld [vmem:[#allocation59_spill] sm:$0xff] }
 0x9d1   : > { %v12050_v26 = vpop.eup %12049  ;;  %v8336_v10 = vadd.f32 1.0, %v12048_v13  ;;  %v8887_v59 = vadd.f32 %v16058_v41, %v8519_v60  ;;  %12067 = vpow2.f32 %v9452_v48  ;;  %9014 = vst [vmem:[%s15878_s23 + $0x188] sm:$0xff] %v8950_v43  ;;  %v8802_v31 = vadd.f32 %v16054_v32, %v17087_v57  ;;  %v17100_v57 = vld [vmem:[#allocation63_spill] sm:$0xff] }
 0x9d2   : > { %v12052_v61 = vpop.eup %12051  ;;  %12069 = vrcp.f32 %v8333_v21  ;;  %v8335_v38 = vadd.f32 1.0, %v12050_v26  ;;  %9016 = vst [vmem:[%s15878_s23 + $0x198] sm:$0xff] %v8952_v39  ;;  %v8799_v49 = vadd.f32 %v16054_v32, %v17088_v36  ;;  %v8810_v2 = vadd.f32 %v16054_v32, %v15897_v6  ;;  %v17094_v21 = vld [vmem:[#allocation109_spill] sm:$0xff] }
 0x9d3   : > { %v12054_v51 = vpop.eup %12053  ;;  %12071 = vrcp.f32 %v8336_v10  ;;  %v8951_v4 = vmax.f32 %v8887_v59, 0.0  ;;  %v8522_v50 = vmul.f32 %v12052_v61, %v17084_v20  ;;  %v8807_v45 = vadd.f32 %v16054_v32, %v15887_v30  ;;  %v17097_v20 = vld [vmem:[#allocation61_spill] sm:$0xff] }
 0x9d4   : > { %12073 = vrcp.f32 %v8335_v38  ;;  %v8521_v47 = vmul.f32 %v12054_v51, %v17085_v35  ;;  %v8818_v30 = vadd.f32 %v16054_v32, %v15892_v0  ;;  %v8815_v43 = vadd.f32 %v16054_v32, %v17094_v21  ;;  %v17095_v0 = vld [vmem:[#allocation111_spill] sm:$0xff] }
 0x9d5   : > { %v12056_v41 = vpop.eup %12055  ;;  %9015 = vst [vmem:[%s15878_s23 + $0x190] sm:$0xff] %v8951_v4  ;;  %v8890_v62 = vadd.f32 %v8794_v3, %v8522_v50  ;;  %v8826_v39 = vadd.f32 %v16054_v32, %v15922_v23  ;;  %v8823_v63 = vadd.f32 %v16054_v32, %v17095_v0 }
 0x9d6   : > { %v12058_v15 = vpop.eup %12057  ;;  %v8889_v25 = vadd.f32 %v8791_v22, %v8521_v47  ;;  %v8524_v8 = vmul.f32 %v12056_v41, %v17086_v27  ;;  %v17096_v22 = vld [vmem:[#allocation62_spill] sm:$0xff] }
 0x9d7   : > { %v12060_v37 = vpop.eup %12059  ;;  %v8338_v19 = vadd.f32 1.0, %v12058_v15  ;;  %v8954_v17 = vmax.f32 %v8890_v62, 0.0  ;;  %v17098_v62 = vld [vmem:[#allocation64_spill] sm:$0xff] }
 0x9d8   : > { %v12062_v52 = vpop.eup %12061  ;;  %v8523_v24 = vmul.f32 %v12060_v37, %v17089_v46  ;;  %v8953_v12 = vmax.f32 %v8889_v25, 0.0  ;;  %v8892_v7 = vadd.f32 %v8802_v31, %v8524_v8  ;;  %v17099_v25 = vld [vmem:[#allocation112_spill] sm:$0xff]  ;;  %v17101_v37 = vld [vmem:[#allocation110_spill] sm:$0xff] }
 0x9d9   : > { %v12064_v55 = vpop.eup %12063  ;;  %12075 = vrcp.f32 %v8338_v19  ;;  %v8337_v5 = vadd.f32 1.0, %v12062_v52  ;;  %9018 = vst [vmem:[%s15878_s23 + $0x1a8] sm:$0xff] %v8954_v17  ;;  %v8834_v27 = vadd.f32 %v16054_v32, %v17099_v25  ;;  %v8831_v19 = vadd.f32 %v16054_v32, %v17101_v37 }
 0x9da   : > { %v12066_v16 = vpop.eup %12065  ;;  %v8891_v29 = vadd.f32 %v8799_v49, %v8523_v24  ;;  %9017 = vst [vmem:[%s15878_s23 + $0x1a0] sm:$0xff] %v8953_v12  ;;  %v8956_v54 = vmax.f32 %v8892_v7, 0.0  ;;  %v8526_v58 = vmul.f32 %v12064_v55, %v17090_v42 }
 0x9db   : > { %v12068_v1 = vpop.eup %12067  ;;  %12077 = vrcp.f32 %v8337_v5  ;;  %v8340_v18 = vadd.f32 1.0, %v12066_v16 }
 0x9dc   : > { %v12070_v34 = vpop.eup %12069  ;;  %v8339_v6 = vadd.f32 1.0, %v12068_v1  ;;  %v8955_v28 = vmax.f32 %v8891_v29, 0.0  ;;  %9020 = vst [vmem:[%s15878_s23 + $0x1b8] sm:$0xff] %v8956_v54  ;;  %v8894_v14 = vadd.f32 %v8810_v2, %v8526_v58 }
 0x9dd   : > { %v12072_v33 = vpop.eup %12071  ;;  %12079 = vrcp.f32 %v8340_v18  ;;  %v8525_v56 = vmul.f32 %v12070_v34, %v17091_v40 }
 0x9de   : > { %v12074_v44 = vpop.eup %12073  ;;  %12081 = vrcp.f32 %v8339_v6  ;;  %9019 = vst [vmem:[%s15878_s23 + $0x1b0] sm:$0xff] %v8955_v28  ;;  %v8528_v60 = vmul.f32 %v12072_v33, %v17092_v53  ;;  %v8958_v48 = vmax.f32 %v8894_v14, 0.0 }
 0x9df   : > { %v8527_v13 = vmul.f32 %v12074_v44, %v17093_v11  ;;  %v8893_v9 = vadd.f32 %v8807_v45, %v8525_v56 }
 0x9e0   : > { %v8896_v3 = vadd.f32 %v8818_v30, %v8528_v60  ;;  %9022 = vst [vmem:[%s15878_s23 + $0x1c8] sm:$0xff] %v8958_v48 }
 0x9e1   : > { %v8895_v26 = vadd.f32 %v8815_v43, %v8527_v13  ;;  %v8957_v10 = vmax.f32 %v8893_v9, 0.0 }
 0x9e2   : > { %v8960_v59 = vmax.f32 %v8896_v3, 0.0 }
 0x9e3   : > { %v12076_v61 = vpop.eup %12075  ;;  %v8959_v38 = vmax.f32 %v8895_v26, 0.0  ;;  %9021 = vst [vmem:[%s15878_s23 + $0x1c0] sm:$0xff] %v8957_v10 }
 0x9e4   : > { %9024 = vst [vmem:[%s15878_s23 + $0x1d8] sm:$0xff] %v8960_v59  ;;  %v8530_v51 = vmul.f32 %v12076_v61, %v17096_v22 }
 0x9e5   : > { %v12078_v4 = vpop.eup %12077  ;;  %9023 = vst [vmem:[%s15878_s23 + $0x1d0] sm:$0xff] %v8959_v38 }
 0x9e6   : > { %v8529_v50 = vmul.f32 %v12078_v4, %v17097_v20  ;;  %v8898_v35 = vadd.f32 %v8826_v39, %v8530_v51 }
 0x9e7   : > { %v12080_v47 = vpop.eup %12079 }
 0x9e8   : > { %v12082_v23 = vpop.eup %12081  ;;  %v8897_v41 = vadd.f32 %v8823_v63, %v8529_v50  ;;  %v8532_v15 = vmul.f32 %v12080_v47, %v17098_v62  ;;  %v8962_v8 = vmax.f32 %v8898_v35, 0.0 }
 0x9e9   : > { %v8531_v31 = vmul.f32 %v12082_v23, %v17100_v57 }
 0x9ea   : > { %v8961_v36 = vmax.f32 %v8897_v41, 0.0  ;;  %v8900_v49 = vadd.f32 %v8834_v27, %v8532_v15  ;;  %9026 = vst [vmem:[%s15878_s23 + $0x1e8] sm:$0xff] %v8962_v8 }
 0x9eb   : > { %v8899_v17 = vadd.f32 %v8831_v19, %v8531_v31 }
 0x9ec   : > { %9025 = vst [vmem:[%s15878_s23 + $0x1e0] sm:$0xff] %v8961_v36  ;;  %v8964_v52 = vmax.f32 %v8900_v49, 0.0 }
 0x9ed   : > { %v8963_v32 = vmax.f32 %v8899_v17, 0.0 }
 0x9ee   : > { %9028 = vst [vmem:[%s15878_s23 + $0x1f8] sm:$0xff] %v8964_v52 }
 0x9ef   : > { %9027 = vst [vmem:[%s15878_s23 + $0x1f0] sm:$0xff] %v8963_v32 }
 0x9f0   : > { %12113 = shalt.err (!%p12110_p2)
}
 0x9f1   : > { %s12114_s22 = scalar_lea.hbm %s16233_s20, 8192  ;;  %s12118_s30 = scalar_lea.hbm %s16295_s13, 16384 }
 0x9f2   : > { %p12115_p3 = scmp.ne.s32.totalorder %s16233_s20, %s12114_s22  ;;  %p12119_p8 = scmp.lt.u32.totalorder %s16233_s20, %s16295_s13 }
 0x9f3   : > { %p12120_p11 = scmp.lt.u32.totalorder %s12118_s30, %s12114_s22  ;;  %p12122_p10 = scmp.lt.u32.totalorder %s12114_s22, %s16233_s20 }
 0x9f4   : > { %p12116_p4 = pnand %p12115_p3, %p12287_p5 }
 0x9f5   : > { %p12121_p9 = por %p12120_p11, %p12119_p8 }
 0x9f6   : > { %p12117_p7 = pneg %p12116_p4 }
 0x9f7   : > { %p12123_p12 = por %p12122_p10, %p12121_p9 }
 0x9f9   : > { %p12124_p13 = pnand %p12123_p12, %p12117_p7 }
 0x9fb   : > { %12127 = shalt.err (!%p12124_p13)
}
 0x9fc   : > { %s12177_s24 = smov 128   ;;  %s12178_s15 = smov 8  }
 0x9fd   : > { %11547 = dma.vmem_to_hbm [thread:$0]  (%p12287_p5), %s16235_s16, 8192, %s16233_s20, %s16241_s29, %s12177_s24, %s12177_s24, %s12178_s15  }
 0x9fe PF: > { %p11559_p0 = scmp.ge.s32.totalorder %s12166_s28, 2  ;;  %s9059_s0 = sand.u32 1, %s12154_s25  }
 0x9ff   : > { %s9060_s22 = scalar_lea.sflag [#allocation4], %s9059_s0 }
 0xa00   : > { %p11554_p1 = pnand %p11559_p0, %p12291_p6 }
 0xa02   : > { %12149 = dma.done.wait (!%p11554_p1), %s9060_s22, 8192  }
 0xa03   : > { %12151 = vsyncadd (!%p11554_p1), %s9060_s22, 4294959104  ;;  %p24_p2 = scmp.ge.s32.totalorder %s12274_s14, 4   ;;  %s17102_s25 = smov %s12158_s26 }
 0xa04   : > { %s17103_s26 = smov %s12162_s27  ;;  %s17104_s27 = smov %s12285_s17 }
 0xa05   : > { %s17105_s28 = smov %s12274_s14  ;;  %26 = sbr.rel (!%p24_p2) target bundleno = 7 (0x7), region = 122 }
 0xa0c   :  { %9065 = vsyncpa [#allocation4], 1 }
 0xa0d   :  { %9067 = vsyncpa [#allocation4 + $0x1], 1 }
 0xa0e   :  { %9068 = vsyncpa [#allocation5], 1 }
 0xa0f   :  { %9070 = vsyncpa [#allocation5 + $0x1], 1 }

</bundles_post_ra>
